<compile_context>
chip_gen: v7x
topology: tpu7x:2x2x1
jax: 0.10.0
libtpu: 0.0.40
codegen_flags: <defaults>
</compile_context>

<pallas_src>
import functools

import jax
import jax.numpy as jnp
from jax.experimental import pallas as pl
from jax.experimental.pallas import tpu as pltpu

OUT_PAD = 128  # stroke head padded to 128 lanes for lane-dense stores


# ----------------------------------------------------------------------------
# Fused encoder + decoder kernel.
#   conv3x3(same)+ReLU+maxpool2x2 -> conv3x3(same)+ReLU+global-avg-pool -> feat
#   h0/c0 = tanh(feat @ [Wih|Wic]);  fproj = feat @ Wf + bg      (one matmul)
#   gates_t = xproj_t + fproj + h_{t-1} @ Wh ;  LSTM update (h,c in vregs)
#   out = H_all @ Wo + bo   (single matmul after the loop)
# ----------------------------------------------------------------------------
def p2s_kernel(p1_ref, w1_ref, b1_ref, w2_ref, b2_ref,
               strokes_ref, wfeat_ref, bfeat_ref,
               wx_ref, wh_ref, wo_ref, bo_ref,
               o_ref, xproj_s, hall_s, *,
               B, H, W, C1, C2, T, HID):
    Hp, Wp = H // 2, W // 2

    # ---------------- encoder ----------------
    # conv1: one im2col matmul (patches built lane-dense in the wrapper).
    y = jnp.dot(p1_ref[...], w1_ref[...], preferred_element_type=jnp.float32)
    y = jnp.maximum(y + b1_ref[...], 0.0).reshape(B, H, W, C1)

    # 2x2 max pool (stride 2), value level.
    y = jnp.max(y.reshape(B, H, Wp, 2, C1), axis=3)        # pool along W
    y = jnp.max(y.reshape(B, Hp, 2, Wp, C1), axis=2)       # pool along H

    # "same" zero padding in registers (no scratch round trip).
    zw = jnp.zeros((B, Hp, 1, C1), jnp.float32)
    y = jnp.concatenate([zw, y, zw], axis=2)               # (B, Hp, Wp+2, C1)
    zh = jnp.zeros((B, 1, Wp + 2, C1), jnp.float32)
    x2 = jnp.concatenate([zh, y, zh], axis=1)              # (B, Hp+2, Wp+2, C1)

    # conv2 as one im2col matmul: (B*Hp*Wp, 9*C1) @ (9*C1, C2)
    cols2 = [x2[:, dy:dy + Hp, dx:dx + Wp, :]
             for dy in range(3) for dx in range(3)]
    p2 = jnp.concatenate(cols2, axis=-1).reshape(B * Hp * Wp, 9 * C1)
    y2 = jnp.dot(p2.astype(jnp.bfloat16), w2_ref[...],
                 preferred_element_type=jnp.float32)
    y2 = jnp.maximum(y2 + b2_ref[...], 0.0).reshape(B, Hp * Wp, C2)

    feat = jnp.sum(y2, axis=1) * (1.0 / float(Hp * Wp))    # (B, C2), stays in VMEM

    # ---------------- decoder prologue (loop-invariant) ----------------
    # One fused feature matmul: [Wih | Wic | Wf] -> (B, 2*HID + 4*HID)
    fp = (jnp.dot(feat.astype(jnp.bfloat16), wfeat_ref[...],
                  preferred_element_type=jnp.float32) + bfeat_ref[...])
    h0 = jnp.tanh(fp[:, 0:HID])
    c0 = jnp.tanh(fp[:, HID:2 * HID])
    fproj = fp[:, 2 * HID:]                                 # (B, 4*HID)

    # All T input projections in one matmul: (T*B, D) @ (D, 4*HID)
    T_, B_, D = strokes_ref.shape
    xs = strokes_ref[...].reshape(T * B, D)
    xproj_s[...] = jnp.dot(xs.astype(jnp.bfloat16), wx_ref[...],
                           preferred_element_type=jnp.float32
                           ).reshape(T, B, 4 * HID)

    wh = wh_ref[...]

    # ---------------- recurrence: h/c live in vregs, only h_t is stored -----
    def step(t, carry):
        h, c = carry
        gates = (xproj_s[t] + fproj
                 + jnp.dot(h.astype(jnp.bfloat16), wh,
                           preferred_element_type=jnp.float32))   # (B, 4*HID)
        # Full-width transcendentals (EUP slot is free), then lane slices.
        sg = jax.nn.sigmoid(gates)
        tg = jnp.tanh(gates)
        i_g = sg[:, 0 * HID:1 * HID]
        f_g = sg[:, 1 * HID:2 * HID]
        g_g = tg[:, 2 * HID:3 * HID]
        o_g = sg[:, 3 * HID:4 * HID]
        c_new = f_g * c + i_g * g_g
        h_new = o_g * jnp.tanh(c_new)
        hall_s[t] = h_new
        return (h_new, c_new)

    # TODO(synk): cap unroll (e.g. unroll=8) for production sequence lengths
    # to avoid vreg spills; with deferred outputs live state is just h/c.
    jax.lax.fori_loop(0, T, step, (h0, c0), unroll=True)

    # ---------------- output head, hoisted out of the recurrence ------------
    hs = hall_s[...].reshape(T * B, HID)
    out = (jnp.dot(hs.astype(jnp.bfloat16), wo_ref[...],
                   preferred_element_type=jnp.float32) + bo_ref[...])
    o_ref[...] = out.reshape(T, B, OUT_PAD).astype(o_ref.dtype)


# ----------------------------------------------------------------------------
# Parameters (deterministic, synthetic).  LSTM gate weights are stored
# concatenated along the output dim in [i|f|g|o] order (4*hid = 128 lanes).
# ----------------------------------------------------------------------------
def init_params(c_in=3, c1=16, c2=32, hid=32, stroke_dim=5):
    keys = jax.random.split(jax.random.PRNGKey(0), 14)
    n = lambda k, s: (0.1 * jax.random.normal(k, s)).astype(jnp.float32)
    return {
        "w1": n(keys[0], (3, 3, c_in, c1)), "b1": n(keys[1], (1, c1)),
        "w2": n(keys[2], (3, 3, c1, c2)),   "b2": n(keys[3], (1, c2)),
        "wih": n(keys[4], (c2, hid)), "bih": n(keys[5], (1, hid)),
        "wic": n(keys[6], (c2, hid)), "bic": n(keys[7], (1, hid)),
        "wx": n(keys[8], (stroke_dim, 4 * hid)),
        "wf": n(keys[9], (c2, 4 * hid)),
        "wh": n(keys[10], (hid, 4 * hid)),
        "bg": n(keys[11], (1, 4 * hid)),
        "wo": n(keys[12], (hid, stroke_dim)),
        "bo": n(keys[13], (1, stroke_dim)),
    }


# ----------------------------------------------------------------------------
# Photo2Sketch.forward  (single fused pallas_call)
# ----------------------------------------------------------------------------
def photo2sketch_forward(params, image_nchw, vector_sketch,
                         batch_num_strokes, batch_stroke_len):
    p = params
    x = jnp.transpose(image_nchw, (0, 2, 3, 1)).astype(jnp.float32)  # NCHW->NHWC
    B, H, W, Cin = x.shape
    C1, C2 = p["w1"].shape[-1], p["w2"].shape[-1]
    HID = p["wh"].shape[0]
    _, T, D = vector_sketch.shape
    SD = p["wo"].shape[1]
    Hp, Wp = H // 2, W // 2

    # Wrapper-side im2col for conv1 (layout plumbing; avoids 3/128-lane
    # relayouts inside the kernel).  Ordering matches w1.reshape(9*Cin, C1).
    xp = jnp.pad(x, ((0, 0), (1, 1), (1, 1), (0, 0)))
    cols = [xp[:, dy:dy + H, dx:dx + W, :] for dy in range(3) for dx in range(3)]
    patches1 = jnp.concatenate(cols, axis=-1).reshape(B * H * W, 9 * Cin)
    patches1 = patches1.astype(jnp.bfloat16)

    # Weights: matmul operands pre-cast to bf16 (f32 accumulation in-kernel).
    w1 = p["w1"].reshape(9 * Cin, C1).astype(jnp.bfloat16)
    w2 = p["w2"].reshape(9 * C1, C2).astype(jnp.bfloat16)
    wfeat = jnp.concatenate([p["wih"], p["wic"], p["wf"]], axis=1).astype(jnp.bfloat16)
    bfeat = jnp.concatenate([p["bih"], p["bic"], p["bg"]], axis=1)      # f32
    wx = p["wx"].astype(jnp.bfloat16)
    wh = p["wh"].astype(jnp.bfloat16)
    wo_pad = (jnp.zeros((HID, OUT_PAD), jnp.float32)
              .at[:, :SD].set(p["wo"]).astype(jnp.bfloat16))
    bo_pad = jnp.zeros((1, OUT_PAD), jnp.float32).at[:, :SD].set(p["bo"])

    strokes = jnp.transpose(vector_sketch.astype(jnp.float32), (1, 0, 2))  # (T,B,D)

    kern = functools.partial(p2s_kernel, B=B, H=H, W=W, C1=C1, C2=C2,
                             T=T, HID=HID)
    # TODO(synk): at production image/sequence sizes add a batch/H grid axis
    # marked "parallel" (v7x dual-TC) and set vmem_limit_bytes explicitly
    # (16 MiB scoped default on v5e, 32 MiB on v6e/v7x); at these toy shapes
    # everything fits in a single invocation.
    out_pad = pl.pallas_call(
        kern,
        out_shape=jax.ShapeDtypeStruct((T, B, OUT_PAD), jnp.float32),
        in_specs=[pl.BlockSpec(memory_space=pltpu.MemorySpace.VMEM)] * 12,
        out_specs=pl.BlockSpec(memory_space=pltpu.MemorySpace.VMEM),
        scratch_shapes=[pltpu.VMEM((T, B, 4 * HID), jnp.float32),   # xproj
                        pltpu.VMEM((T, B, HID), jnp.float32)],      # h history
    )(patches1, w1, p["b1"], w2, p["b2"], strokes,
      wfeat, bfeat, wx, wh, wo_pad, bo_pad)

    out_coords = jnp.transpose(out_pad[:, :, :SD], (1, 0, 2))        # (B, T, SD)
    # TODO(synk): batch_num_strokes / batch_stroke_len are passed through
    # untouched (as in the PyTorch forward); Adam/MSE/CE belong to train_batch.
    return out_coords, batch_num_strokes, batch_stroke_len


if __name__ == "__main__":
    params = init_params()

    key = jax.random.PRNGKey(0)
    k_img, k_skt = jax.random.split(key)
    image = jax.random.normal(k_img, (2, 3, 16, 16), jnp.float32)
    vector_sketch = jax.random.normal(k_skt, (2, 8, 5), jnp.float32)
    batch_num_strokes = jnp.array([3, 5], jnp.int32)
    batch_stroke_len = jnp.array([[4, 3, 2, 0, 0, 0, 0, 0],
                                  [2, 2, 2, 2, 1, 0, 0, 0]], jnp.int32)

    fwd = jax.jit(photo2sketch_forward)
    out_coords, ns, sl = fwd(params, image, vector_sketch,
                             batch_num_strokes, batch_stroke_len)
    jax.block_until_ready(out_coords)

    assert out_coords.shape == (2, 8, 5)
    assert out_coords.dtype == jnp.float32
    assert ns.shape == (2,) and sl.shape == (2, 8)
    assert bool(jnp.all(jnp.isfinite(out_coords)))
    print("KERNEL_OK")
</pallas_src>

<mosaic_0001>
module attributes {stable_mosaic.version = 11 : i64} {
  func.func @p2s_kernel(%arg0: memref<512x27xbf16, #tpu.memory_space<vmem>>, %arg1: memref<27x16xbf16, #tpu.memory_space<vmem>>, %arg2: memref<1x16xf32, #tpu.memory_space<vmem>>, %arg3: memref<144x32xbf16, #tpu.memory_space<vmem>>, %arg4: memref<1x32xf32, #tpu.memory_space<vmem>>, %arg5: memref<8x2x5xf32, #tpu.memory_space<vmem>>, %arg6: memref<32x192xbf16, #tpu.memory_space<vmem>>, %arg7: memref<1x192xf32, #tpu.memory_space<vmem>>, %arg8: memref<5x128xbf16, #tpu.memory_space<vmem>>, %arg9: memref<32x128xbf16, #tpu.memory_space<vmem>>, %arg10: memref<32x128xbf16, #tpu.memory_space<vmem>>, %arg11: memref<1x128xf32, #tpu.memory_space<vmem>>, %arg12: memref<8x2x128xf32, #tpu.memory_space<vmem>>, %arg13: memref<8x2x128xf32, #tpu.memory_space<vmem>>, %arg14: memref<8x2x32xf32, #tpu.memory_space<vmem>>) attributes {dimension_semantics = [], scalar_prefetch = 0 : i64, scratch_operands = 2 : i64, tpu.core_type = #tpu.core_type<tc>} {
    %c0 = arith.constant 0 : index
    %c0_0 = arith.constant 0 : index
    %0 = vector.load %arg0[%c0, %c0_0] : memref<512x27xbf16, #tpu.memory_space<vmem>>, vector<512x27xbf16>
    %c0_1 = arith.constant 0 : index
    %c0_2 = arith.constant 0 : index
    %1 = vector.load %arg1[%c0_1, %c0_2] : memref<27x16xbf16, #tpu.memory_space<vmem>>, vector<27x16xbf16>
    %cst = arith.constant dense<0.000000e+00> : vector<512x16xf32>
    %2 = tpu.matmul %0, %1, %cst {dimension_numbers = #tpu.dot_dimension_numbers<[1], [0], [0], [1], [0, 0, 1, 1], [], []>} : vector<512x27xbf16>, vector<27x16xbf16>, vector<512x16xf32> -> vector<512x16xf32>
    %c0_3 = arith.constant 0 : index
    %c0_4 = arith.constant 0 : index
    %3 = vector.load %arg2[%c0_3, %c0_4] : memref<1x16xf32, #tpu.memory_space<vmem>>, vector<1x16xf32>
    %4 = vector.broadcast %3 : vector<1x16xf32> to vector<512x16xf32>
    %5 = arith.addf %2, %4 : vector<512x16xf32>
    %cst_5 = arith.constant 0.000000e+00 : f32
    %6 = vector.broadcast %cst_5 : f32 to vector<512x16xf32>
    %7 = arith.maximumf %5, %6 : vector<512x16xf32>
    %8 = vector.shape_cast %7 : vector<512x16xf32> to vector<2x16x16x16xf32>
    %9 = vector.shape_cast %8 : vector<2x16x16x16xf32> to vector<2x16x8x2x16xf32>
    %cst_6 = arith.constant dense<0xFF800000> : vector<2x16x8x16xf32>
    %10 = vector.multi_reduction <maximumf>, %9, %cst_6 [3] : vector<2x16x8x2x16xf32> to vector<2x16x8x16xf32>
    %11 = vector.shape_cast %10 : vector<2x16x8x16xf32> to vector<2x8x2x8x16xf32>
    %cst_7 = arith.constant dense<0xFF800000> : vector<2x8x8x16xf32>
    %12 = vector.multi_reduction <maximumf>, %11, %cst_7 [2] : vector<2x8x2x8x16xf32> to vector<2x8x8x16xf32>
    %cst_8 = arith.constant 0.000000e+00 : f32
    %13 = vector.broadcast %cst_8 : f32 to vector<2x8x1x16xf32>
    %14 = tpu.concatenate %13, %12, %13 in 2 : vector<2x8x1x16xf32>, vector<2x8x8x16xf32>, vector<2x8x1x16xf32> -> vector<2x8x10x16xf32>
    %cst_9 = arith.constant 0.000000e+00 : f32
    %15 = vector.broadcast %cst_9 : f32 to vector<2x1x10x16xf32>
    %16 = tpu.concatenate %15, %14, %15 in 1 : vector<2x1x10x16xf32>, vector<2x8x10x16xf32>, vector<2x1x10x16xf32> -> vector<2x10x10x16xf32>
    %17 = vector.extract_strided_slice %16 {offsets = [0, 0, 0, 0], sizes = [2, 8, 8, 16], strides = [1, 1, 1, 1]} : vector<2x10x10x16xf32> to vector<2x8x8x16xf32>
    %18 = vector.extract_strided_slice %16 {offsets = [0, 0, 1, 0], sizes = [2, 8, 8, 16], strides = [1, 1, 1, 1]} : vector<2x10x10x16xf32> to vector<2x8x8x16xf32>
    %19 = vector.extract_strided_slice %16 {offsets = [0, 0, 2, 0], sizes = [2, 8, 8, 16], strides = [1, 1, 1, 1]} : vector<2x10x10x16xf32> to vector<2x8x8x16xf32>
    %20 = vector.extract_strided_slice %16 {offsets = [0, 1, 0, 0], sizes = [2, 8, 8, 16], strides = [1, 1, 1, 1]} : vector<2x10x10x16xf32> to vector<2x8x8x16xf32>
    %21 = vector.extract_strided_slice %16 {offsets = [0, 1, 1, 0], sizes = [2, 8, 8, 16], strides = [1, 1, 1, 1]} : vector<2x10x10x16xf32> to vector<2x8x8x16xf32>
    %22 = vector.extract_strided_slice %16 {offsets = [0, 1, 2, 0], sizes = [2, 8, 8, 16], strides = [1, 1, 1, 1]} : vector<2x10x10x16xf32> to vector<2x8x8x16xf32>
    %23 = vector.extract_strided_slice %16 {offsets = [0, 2, 0, 0], sizes = [2, 8, 8, 16], strides = [1, 1, 1, 1]} : vector<2x10x10x16xf32> to vector<2x8x8x16xf32>
    %24 = vector.extract_strided_slice %16 {offsets = [0, 2, 1, 0], sizes = [2, 8, 8, 16], strides = [1, 1, 1, 1]} : vector<2x10x10x16xf32> to vector<2x8x8x16xf32>
    %25 = vector.extract_strided_slice %16 {offsets = [0, 2, 2, 0], sizes = [2, 8, 8, 16], strides = [1, 1, 1, 1]} : vector<2x10x10x16xf32> to vector<2x8x8x16xf32>
    %26 = tpu.concatenate %17, %18, %19, %20, %21, %22, %23, %24, %25 in 3 : vector<2x8x8x16xf32>, vector<2x8x8x16xf32>, vector<2x8x8x16xf32>, vector<2x8x8x16xf32>, vector<2x8x8x16xf32>, vector<2x8x8x16xf32>, vector<2x8x8x16xf32>, vector<2x8x8x16xf32>, vector<2x8x8x16xf32> -> vector<2x8x8x144xf32>
    %27 = vector.shape_cast %26 : vector<2x8x8x144xf32> to vector<128x144xf32>
    %28 = arith.truncf %27 : vector<128x144xf32> to vector<128x144xbf16>
    %c0_10 = arith.constant 0 : index
    %c0_11 = arith.constant 0 : index
    %29 = vector.load %arg3[%c0_10, %c0_11] : memref<144x32xbf16, #tpu.memory_space<vmem>>, vector<144x32xbf16>
    %cst_12 = arith.constant dense<0.000000e+00> : vector<128x32xf32>
    %30 = tpu.matmul %28, %29, %cst_12 {dimension_numbers = #tpu.dot_dimension_numbers<[1], [0], [0], [1], [0, 0, 1, 1], [], []>} : vector<128x144xbf16>, vector<144x32xbf16>, vector<128x32xf32> -> vector<128x32xf32>
    %c0_13 = arith.constant 0 : index
    %c0_14 = arith.constant 0 : index
    %31 = vector.load %arg4[%c0_13, %c0_14] : memref<1x32xf32, #tpu.memory_space<vmem>>, vector<1x32xf32>
    %32 = vector.broadcast %31 : vector<1x32xf32> to vector<128x32xf32>
    %33 = arith.addf %30, %32 : vector<128x32xf32>
    %cst_15 = arith.constant 0.000000e+00 : f32
    %34 = vector.broadcast %cst_15 : f32 to vector<128x32xf32>
    %35 = arith.maximumf %33, %34 : vector<128x32xf32>
    %36 = vector.shape_cast %35 : vector<128x32xf32> to vector<2x64x32xf32>
    %cst_16 = arith.constant dense<0.000000e+00> : vector<2x32xf32>
    %37 = vector.multi_reduction <add>, %36, %cst_16 [1] : vector<2x64x32xf32> to vector<2x32xf32>
    %cst_17 = arith.constant 1.562500e-02 : f32
    %38 = vector.broadcast %cst_17 : f32 to vector<2x32xf32>
    %39 = arith.mulf %37, %38 : vector<2x32xf32>
    %40 = arith.truncf %39 : vector<2x32xf32> to vector<2x32xbf16>
    %c0_18 = arith.constant 0 : index
    %c0_19 = arith.constant 0 : index
    %41 = vector.load %arg6[%c0_18, %c0_19] : memref<32x192xbf16, #tpu.memory_space<vmem>>, vector<32x192xbf16>
    %cst_20 = arith.constant dense<0.000000e+00> : vector<2x192xf32>
    %42 = tpu.matmul %40, %41, %cst_20 {dimension_numbers = #tpu.dot_dimension_numbers<[1], [0], [0], [1], [0, 0, 1, 1], [], []>} : vector<2x32xbf16>, vector<32x192xbf16>, vector<2x192xf32> -> vector<2x192xf32>
    %c0_21 = arith.constant 0 : index
    %c0_22 = arith.constant 0 : index
    %43 = vector.load %arg7[%c0_21, %c0_22] : memref<1x192xf32, #tpu.memory_space<vmem>>, vector<1x192xf32>
    %44 = vector.broadcast %43 : vector<1x192xf32> to vector<2x192xf32>
    %45 = arith.addf %42, %44 : vector<2x192xf32>
    %46 = vector.extract_strided_slice %45 {offsets = [0, 0], sizes = [2, 32], strides = [1, 1]} : vector<2x192xf32> to vector<2x32xf32>
    %47 = math.tanh %46 : vector<2x32xf32>
    %48 = vector.extract_strided_slice %45 {offsets = [0, 32], sizes = [2, 32], strides = [1, 1]} : vector<2x192xf32> to vector<2x32xf32>
    %49 = math.tanh %48 : vector<2x32xf32>
    %50 = vector.extract_strided_slice %45 {offsets = [0, 64], sizes = [2, 128], strides = [1, 1]} : vector<2x192xf32> to vector<2x128xf32>
    %c0_23 = arith.constant 0 : index
    %c0_24 = arith.constant 0 : index
    %c0_25 = arith.constant 0 : index
    %51 = vector.load %arg5[%c0_23, %c0_24, %c0_25] : memref<8x2x5xf32, #tpu.memory_space<vmem>>, vector<8x2x5xf32>
    %52 = vector.shape_cast %51 : vector<8x2x5xf32> to vector<16x5xf32>
    %53 = arith.truncf %52 : vector<16x5xf32> to vector<16x5xbf16>
    %c0_26 = arith.constant 0 : index
    %c0_27 = arith.constant 0 : index
    %54 = vector.load %arg8[%c0_26, %c0_27] : memref<5x128xbf16, #tpu.memory_space<vmem>>, vector<5x128xbf16>
    %cst_28 = arith.constant dense<0.000000e+00> : vector<16x128xf32>
    %55 = tpu.matmul %53, %54, %cst_28 {dimension_numbers = #tpu.dot_dimension_numbers<[1], [0], [0], [1], [0, 0, 1, 1], [], []>} : vector<16x5xbf16>, vector<5x128xbf16>, vector<16x128xf32> -> vector<16x128xf32>
    %56 = vector.shape_cast %55 : vector<16x128xf32> to vector<8x2x128xf32>
    %c0_29 = arith.constant 0 : index
    %c0_30 = arith.constant 0 : index
    %c0_31 = arith.constant 0 : index
    %57 = vector.load %arg13[%c0_29, %c0_30, %c0_31] : memref<8x2x128xf32, #tpu.memory_space<vmem>>, vector<8x2x128xf32>
    tpu.vector_store %arg13[%c0_29, %c0_30, %c0_31], %56 {strides = array<i32>} : memref<8x2x128xf32, #tpu.memory_space<vmem>>, vector<8x2x128xf32>,
    %c0_32 = arith.constant 0 : index
    %c0_33 = arith.constant 0 : index
    %58 = vector.load %arg9[%c0_32, %c0_33] : memref<32x128xbf16, #tpu.memory_space<vmem>>, vector<32x128xbf16>
    %c0_i32 = arith.constant 0 : i32
    %59 = arith.index_cast %c0_i32 : i32 to index
    %c0_34 = arith.constant 0 : index
    %c0_35 = arith.constant 0 : index
    %60 = vector.load %arg13[%59, %c0_34, %c0_35] : memref<8x2x128xf32, #tpu.memory_space<vmem>>, vector<1x2x128xf32>
    %61 = vector.shape_cast %60 : vector<1x2x128xf32> to vector<2x128xf32>
    %62 = arith.addf %61, %50 : vector<2x128xf32>
    %63 = arith.truncf %47 : vector<2x32xf32> to vector<2x32xbf16>
    %cst_36 = arith.constant dense<0.000000e+00> : vector<2x128xf32>
    %64 = tpu.matmul %63, %58, %cst_36 {dimension_numbers = #tpu.dot_dimension_numbers<[1], [0], [0], [1], [0, 0, 1, 1], [], []>} : vector<2x32xbf16>, vector<32x128xbf16>, vector<2x128xf32> -> vector<2x128xf32>
    %65 = arith.addf %62, %64 : vector<2x128xf32>
    %66 = arith.negf %65 : vector<2x128xf32>
    %67 = math.exp %66 : vector<2x128xf32>
    %cst_37 = arith.constant 1.000000e+00 : f32
    %68 = vector.broadcast %cst_37 : f32 to vector<2x128xf32>
    %69 = arith.addf %68, %67 : vector<2x128xf32>
    %70 = arith.divf %68, %69 : vector<2x128xf32>
    %71 = math.tanh %65 : vector<2x128xf32>
    %72 = vector.extract_strided_slice %70 {offsets = [0, 0], sizes = [2, 32], strides = [1, 1]} : vector<2x128xf32> to vector<2x32xf32>
    %73 = vector.extract_strided_slice %70 {offsets = [0, 32], sizes = [2, 32], strides = [1, 1]} : vector<2x128xf32> to vector<2x32xf32>
    %74 = vector.extract_strided_slice %71 {offsets = [0, 64], sizes = [2, 32], strides = [1, 1]} : vector<2x128xf32> to vector<2x32xf32>
    %75 = vector.extract_strided_slice %70 {offsets = [0, 96], sizes = [2, 32], strides = [1, 1]} : vector<2x128xf32> to vector<2x32xf32>
    %76 = arith.mulf %73, %49 : vector<2x32xf32>
    %77 = arith.mulf %72, %74 : vector<2x32xf32>
    %78 = arith.addf %76, %77 : vector<2x32xf32>
    %79 = math.tanh %78 : vector<2x32xf32>
    %80 = arith.mulf %75, %79 : vector<2x32xf32>
    %81 = arith.index_cast %c0_i32 : i32 to index
    %c0_38 = arith.constant 0 : index
    %c0_39 = arith.constant 0 : index
    %82 = vector.load %arg14[%81, %c0_38, %c0_39] : memref<8x2x32xf32, #tpu.memory_space<vmem>>, vector<1x2x32xf32>
    %83 = vector.shape_cast %82 : vector<1x2x32xf32> to vector<2x32xf32>
    %84 = vector.shape_cast %80 : vector<2x32xf32> to vector<1x2x32xf32>
    tpu.vector_store %arg14[%81, %c0_38, %c0_39], %84 {strides = array<i32>} : memref<8x2x32xf32, #tpu.memory_space<vmem>>, vector<1x2x32xf32>,
    %c1_i32 = arith.constant 1 : i32
    %85 = arith.index_cast %c1_i32 : i32 to index
    %c0_40 = arith.constant 0 : index
    %c0_41 = arith.constant 0 : index
    %86 = vector.load %arg13[%85, %c0_40, %c0_41] : memref<8x2x128xf32, #tpu.memory_space<vmem>>, vector<1x2x128xf32>
    %87 = vector.shape_cast %86 : vector<1x2x128xf32> to vector<2x128xf32>
    %88 = arith.addf %87, %50 : vector<2x128xf32>
    %89 = arith.truncf %80 : vector<2x32xf32> to vector<2x32xbf16>
    %cst_42 = arith.constant dense<0.000000e+00> : vector<2x128xf32>
    %90 = tpu.matmul %89, %58, %cst_42 {dimension_numbers = #tpu.dot_dimension_numbers<[1], [0], [0], [1], [0, 0, 1, 1], [], []>} : vector<2x32xbf16>, vector<32x128xbf16>, vector<2x128xf32> -> vector<2x128xf32>
    %91 = arith.addf %88, %90 : vector<2x128xf32>
    %92 = arith.negf %91 : vector<2x128xf32>
    %93 = math.exp %92 : vector<2x128xf32>
    %cst_43 = arith.constant 1.000000e+00 : f32
    %94 = vector.broadcast %cst_43 : f32 to vector<2x128xf32>
    %95 = arith.addf %94, %93 : vector<2x128xf32>
    %96 = arith.divf %94, %95 : vector<2x128xf32>
    %97 = math.tanh %91 : vector<2x128xf32>
    %98 = vector.extract_strided_slice %96 {offsets = [0, 0], sizes = [2, 32], strides = [1, 1]} : vector<2x128xf32> to vector<2x32xf32>
    %99 = vector.extract_strided_slice %96 {offsets = [0, 32], sizes = [2, 32], strides = [1, 1]} : vector<2x128xf32> to vector<2x32xf32>
    %100 = vector.extract_strided_slice %97 {offsets = [0, 64], sizes = [2, 32], strides = [1, 1]} : vector<2x128xf32> to vector<2x32xf32>
    %101 = vector.extract_strided_slice %96 {offsets = [0, 96], sizes = [2, 32], strides = [1, 1]} : vector<2x128xf32> to vector<2x32xf32>
    %102 = arith.mulf %99, %78 : vector<2x32xf32>
    %103 = arith.mulf %98, %100 : vector<2x32xf32>
    %104 = arith.addf %102, %103 : vector<2x32xf32>
    %105 = math.tanh %104 : vector<2x32xf32>
    %106 = arith.mulf %101, %105 : vector<2x32xf32>
    %107 = arith.index_cast %c1_i32 : i32 to index
    %c0_44 = arith.constant 0 : index
    %c0_45 = arith.constant 0 : index
    %108 = vector.load %arg14[%107, %c0_44, %c0_45] : memref<8x2x32xf32, #tpu.memory_space<vmem>>, vector<1x2x32xf32>
    %109 = vector.shape_cast %108 : vector<1x2x32xf32> to vector<2x32xf32>
    %110 = vector.shape_cast %106 : vector<2x32xf32> to vector<1x2x32xf32>
    tpu.vector_store %arg14[%107, %c0_44, %c0_45], %110 {strides = array<i32>} : memref<8x2x32xf32, #tpu.memory_space<vmem>>, vector<1x2x32xf32>,
    %c2_i32 = arith.constant 2 : i32
    %111 = arith.index_cast %c2_i32 : i32 to index
    %c0_46 = arith.constant 0 : index
    %c0_47 = arith.constant 0 : index
    %112 = vector.load %arg13[%111, %c0_46, %c0_47] : memref<8x2x128xf32, #tpu.memory_space<vmem>>, vector<1x2x128xf32>
    %113 = vector.shape_cast %112 : vector<1x2x128xf32> to vector<2x128xf32>
    %114 = arith.addf %113, %50 : vector<2x128xf32>
    %115 = arith.truncf %106 : vector<2x32xf32> to vector<2x32xbf16>
    %cst_48 = arith.constant dense<0.000000e+00> : vector<2x128xf32>
    %116 = tpu.matmul %115, %58, %cst_48 {dimension_numbers = #tpu.dot_dimension_numbers<[1], [0], [0], [1], [0, 0, 1, 1], [], []>} : vector<2x32xbf16>, vector<32x128xbf16>, vector<2x128xf32> -> vector<2x128xf32>
    %117 = arith.addf %114, %116 : vector<2x128xf32>
    %118 = arith.negf %117 : vector<2x128xf32>
    %119 = math.exp %118 : vector<2x128xf32>
    %cst_49 = arith.constant 1.000000e+00 : f32
    %120 = vector.broadcast %cst_49 : f32 to vector<2x128xf32>
    %121 = arith.addf %120, %119 : vector<2x128xf32>
    %122 = arith.divf %120, %121 : vector<2x128xf32>
    %123 = math.tanh %117 : vector<2x128xf32>
    %124 = vector.extract_strided_slice %122 {offsets = [0, 0], sizes = [2, 32], strides = [1, 1]} : vector<2x128xf32> to vector<2x32xf32>
    %125 = vector.extract_strided_slice %122 {offsets = [0, 32], sizes = [2, 32], strides = [1, 1]} : vector<2x128xf32> to vector<2x32xf32>
    %126 = vector.extract_strided_slice %123 {offsets = [0, 64], sizes = [2, 32], strides = [1, 1]} : vector<2x128xf32> to vector<2x32xf32>
    %127 = vector.extract_strided_slice %122 {offsets = [0, 96], sizes = [2, 32], strides = [1, 1]} : vector<2x128xf32> to vector<2x32xf32>
    %128 = arith.mulf %125, %104 : vector<2x32xf32>
    %129 = arith.mulf %124, %126 : vector<2x32xf32>
    %130 = arith.addf %128, %129 : vector<2x32xf32>
    %131 = math.tanh %130 : vector<2x32xf32>
    %132 = arith.mulf %127, %131 : vector<2x32xf32>
    %133 = arith.index_cast %c2_i32 : i32 to index
    %c0_50 = arith.constant 0 : index
    %c0_51 = arith.constant 0 : index
    %134 = vector.load %arg14[%133, %c0_50, %c0_51] : memref<8x2x32xf32, #tpu.memory_space<vmem>>, vector<1x2x32xf32>
    %135 = vector.shape_cast %134 : vector<1x2x32xf32> to vector<2x32xf32>
    %136 = vector.shape_cast %132 : vector<2x32xf32> to vector<1x2x32xf32>
    tpu.vector_store %arg14[%133, %c0_50, %c0_51], %136 {strides = array<i32>} : memref<8x2x32xf32, #tpu.memory_space<vmem>>, vector<1x2x32xf32>,
    %c3_i32 = arith.constant 3 : i32
    %137 = arith.index_cast %c3_i32 : i32 to index
    %c0_52 = arith.constant 0 : index
    %c0_53 = arith.constant 0 : index
    %138 = vector.load %arg13[%137, %c0_52, %c0_53] : memref<8x2x128xf32, #tpu.memory_space<vmem>>, vector<1x2x128xf32>
    %139 = vector.shape_cast %138 : vector<1x2x128xf32> to vector<2x128xf32>
    %140 = arith.addf %139, %50 : vector<2x128xf32>
    %141 = arith.truncf %132 : vector<2x32xf32> to vector<2x32xbf16>
    %cst_54 = arith.constant dense<0.000000e+00> : vector<2x128xf32>
    %142 = tpu.matmul %141, %58, %cst_54 {dimension_numbers = #tpu.dot_dimension_numbers<[1], [0], [0], [1], [0, 0, 1, 1], [], []>} : vector<2x32xbf16>, vector<32x128xbf16>, vector<2x128xf32> -> vector<2x128xf32>
    %143 = arith.addf %140, %142 : vector<2x128xf32>
    %144 = arith.negf %143 : vector<2x128xf32>
    %145 = math.exp %144 : vector<2x128xf32>
    %cst_55 = arith.constant 1.000000e+00 : f32
    %146 = vector.broadcast %cst_55 : f32 to vector<2x128xf32>
    %147 = arith.addf %146, %145 : vector<2x128xf32>
    %148 = arith.divf %146, %147 : vector<2x128xf32>
    %149 = math.tanh %143 : vector<2x128xf32>
    %150 = vector.extract_strided_slice %148 {offsets = [0, 0], sizes = [2, 32], strides = [1, 1]} : vector<2x128xf32> to vector<2x32xf32>
    %151 = vector.extract_strided_slice %148 {offsets = [0, 32], sizes = [2, 32], strides = [1, 1]} : vector<2x128xf32> to vector<2x32xf32>
    %152 = vector.extract_strided_slice %149 {offsets = [0, 64], sizes = [2, 32], strides = [1, 1]} : vector<2x128xf32> to vector<2x32xf32>
    %153 = vector.extract_strided_slice %148 {offsets = [0, 96], sizes = [2, 32], strides = [1, 1]} : vector<2x128xf32> to vector<2x32xf32>
    %154 = arith.mulf %151, %130 : vector<2x32xf32>
    %155 = arith.mulf %150, %152 : vector<2x32xf32>
    %156 = arith.addf %154, %155 : vector<2x32xf32>
    %157 = math.tanh %156 : vector<2x32xf32>
    %158 = arith.mulf %153, %157 : vector<2x32xf32>
    %159 = arith.index_cast %c3_i32 : i32 to index
    %c0_56 = arith.constant 0 : index
    %c0_57 = arith.constant 0 : index
    %160 = vector.load %arg14[%159, %c0_56, %c0_57] : memref<8x2x32xf32, #tpu.memory_space<vmem>>, vector<1x2x32xf32>
    %161 = vector.shape_cast %160 : vector<1x2x32xf32> to vector<2x32xf32>
    %162 = vector.shape_cast %158 : vector<2x32xf32> to vector<1x2x32xf32>
    tpu.vector_store %arg14[%159, %c0_56, %c0_57], %162 {strides = array<i32>} : memref<8x2x32xf32, #tpu.memory_space<vmem>>, vector<1x2x32xf32>,
    %c4_i32 = arith.constant 4 : i32
    %163 = arith.index_cast %c4_i32 : i32 to index
    %c0_58 = arith.constant 0 : index
    %c0_59 = arith.constant 0 : index
    %164 = vector.load %arg13[%163, %c0_58, %c0_59] : memref<8x2x128xf32, #tpu.memory_space<vmem>>, vector<1x2x128xf32>
    %165 = vector.shape_cast %164 : vector<1x2x128xf32> to vector<2x128xf32>
    %166 = arith.addf %165, %50 : vector<2x128xf32>
    %167 = arith.truncf %158 : vector<2x32xf32> to vector<2x32xbf16>
    %cst_60 = arith.constant dense<0.000000e+00> : vector<2x128xf32>
    %168 = tpu.matmul %167, %58, %cst_60 {dimension_numbers = #tpu.dot_dimension_numbers<[1], [0], [0], [1], [0, 0, 1, 1], [], []>} : vector<2x32xbf16>, vector<32x128xbf16>, vector<2x128xf32> -> vector<2x128xf32>
    %169 = arith.addf %166, %168 : vector<2x128xf32>
    %170 = arith.negf %169 : vector<2x128xf32>
    %171 = math.exp %170 : vector<2x128xf32>
    %cst_61 = arith.constant 1.000000e+00 : f32
    %172 = vector.broadcast %cst_61 : f32 to vector<2x128xf32>
    %173 = arith.addf %172, %171 : vector<2x128xf32>
    %174 = arith.divf %172, %173 : vector<2x128xf32>
    %175 = math.tanh %169 : vector<2x128xf32>
    %176 = vector.extract_strided_slice %174 {offsets = [0, 0], sizes = [2, 32], strides = [1, 1]} : vector<2x128xf32> to vector<2x32xf32>
    %177 = vector.extract_strided_slice %174 {offsets = [0, 32], sizes = [2, 32], strides = [1, 1]} : vector<2x128xf32> to vector<2x32xf32>
    %178 = vector.extract_strided_slice %175 {offsets = [0, 64], sizes = [2, 32], strides = [1, 1]} : vector<2x128xf32> to vector<2x32xf32>
    %179 = vector.extract_strided_slice %174 {offsets = [0, 96], sizes = [2, 32], strides = [1, 1]} : vector<2x128xf32> to vector<2x32xf32>
    %180 = arith.mulf %177, %156 : vector<2x32xf32>
    %181 = arith.mulf %176, %178 : vector<2x32xf32>
    %182 = arith.addf %180, %181 : vector<2x32xf32>
    %183 = math.tanh %182 : vector<2x32xf32>
    %184 = arith.mulf %179, %183 : vector<2x32xf32>
    %185 = arith.index_cast %c4_i32 : i32 to index
    %c0_62 = arith.constant 0 : index
    %c0_63 = arith.constant 0 : index
    %186 = vector.load %arg14[%185, %c0_62, %c0_63] : memref<8x2x32xf32, #tpu.memory_space<vmem>>, vector<1x2x32xf32>
    %187 = vector.shape_cast %186 : vector<1x2x32xf32> to vector<2x32xf32>
    %188 = vector.shape_cast %184 : vector<2x32xf32> to vector<1x2x32xf32>
    tpu.vector_store %arg14[%185, %c0_62, %c0_63], %188 {strides = array<i32>} : memref<8x2x32xf32, #tpu.memory_space<vmem>>, vector<1x2x32xf32>,
    %c5_i32 = arith.constant 5 : i32
    %189 = arith.index_cast %c5_i32 : i32 to index
    %c0_64 = arith.constant 0 : index
    %c0_65 = arith.constant 0 : index
    %190 = vector.load %arg13[%189, %c0_64, %c0_65] : memref<8x2x128xf32, #tpu.memory_space<vmem>>, vector<1x2x128xf32>
    %191 = vector.shape_cast %190 : vector<1x2x128xf32> to vector<2x128xf32>
    %192 = arith.addf %191, %50 : vector<2x128xf32>
    %193 = arith.truncf %184 : vector<2x32xf32> to vector<2x32xbf16>
    %cst_66 = arith.constant dense<0.000000e+00> : vector<2x128xf32>
    %194 = tpu.matmul %193, %58, %cst_66 {dimension_numbers = #tpu.dot_dimension_numbers<[1], [0], [0], [1], [0, 0, 1, 1], [], []>} : vector<2x32xbf16>, vector<32x128xbf16>, vector<2x128xf32> -> vector<2x128xf32>
    %195 = arith.addf %192, %194 : vector<2x128xf32>
    %196 = arith.negf %195 : vector<2x128xf32>
    %197 = math.exp %196 : vector<2x128xf32>
    %cst_67 = arith.constant 1.000000e+00 : f32
    %198 = vector.broadcast %cst_67 : f32 to vector<2x128xf32>
    %199 = arith.addf %198, %197 : vector<2x128xf32>
    %200 = arith.divf %198, %199 : vector<2x128xf32>
    %201 = math.tanh %195 : vector<2x128xf32>
    %202 = vector.extract_strided_slice %200 {offsets = [0, 0], sizes = [2, 32], strides = [1, 1]} : vector<2x128xf32> to vector<2x32xf32>
    %203 = vector.extract_strided_slice %200 {offsets = [0, 32], sizes = [2, 32], strides = [1, 1]} : vector<2x128xf32> to vector<2x32xf32>
    %204 = vector.extract_strided_slice %201 {offsets = [0, 64], sizes = [2, 32], strides = [1, 1]} : vector<2x128xf32> to vector<2x32xf32>
    %205 = vector.extract_strided_slice %200 {offsets = [0, 96], sizes = [2, 32], strides = [1, 1]} : vector<2x128xf32> to vector<2x32xf32>
    %206 = arith.mulf %203, %182 : vector<2x32xf32>
    %207 = arith.mulf %202, %204 : vector<2x32xf32>
    %208 = arith.addf %206, %207 : vector<2x32xf32>
    %209 = math.tanh %208 : vector<2x32xf32>
    %210 = arith.mulf %205, %209 : vector<2x32xf32>
    %211 = arith.index_cast %c5_i32 : i32 to index
    %c0_68 = arith.constant 0 : index
    %c0_69 = arith.constant 0 : index
    %212 = vector.load %arg14[%211, %c0_68, %c0_69] : memref<8x2x32xf32, #tpu.memory_space<vmem>>, vector<1x2x32xf32>
    %213 = vector.shape_cast %212 : vector<1x2x32xf32> to vector<2x32xf32>
    %214 = vector.shape_cast %210 : vector<2x32xf32> to vector<1x2x32xf32>
    tpu.vector_store %arg14[%211, %c0_68, %c0_69], %214 {strides = array<i32>} : memref<8x2x32xf32, #tpu.memory_space<vmem>>, vector<1x2x32xf32>,
    %c6_i32 = arith.constant 6 : i32
    %215 = arith.index_cast %c6_i32 : i32 to index
    %c0_70 = arith.constant 0 : index
    %c0_71 = arith.constant 0 : index
    %216 = vector.load %arg13[%215, %c0_70, %c0_71] : memref<8x2x128xf32, #tpu.memory_space<vmem>>, vector<1x2x128xf32>
    %217 = vector.shape_cast %216 : vector<1x2x128xf32> to vector<2x128xf32>
    %218 = arith.addf %217, %50 : vector<2x128xf32>
    %219 = arith.truncf %210 : vector<2x32xf32> to vector<2x32xbf16>
    %cst_72 = arith.constant dense<0.000000e+00> : vector<2x128xf32>
    %220 = tpu.matmul %219, %58, %cst_72 {dimension_numbers = #tpu.dot_dimension_numbers<[1], [0], [0], [1], [0, 0, 1, 1], [], []>} : vector<2x32xbf16>, vector<32x128xbf16>, vector<2x128xf32> -> vector<2x128xf32>
    %221 = arith.addf %218, %220 : vector<2x128xf32>
    %222 = arith.negf %221 : vector<2x128xf32>
    %223 = math.exp %222 : vector<2x128xf32>
    %cst_73 = arith.constant 1.000000e+00 : f32
    %224 = vector.broadcast %cst_73 : f32 to vector<2x128xf32>
    %225 = arith.addf %224, %223 : vector<2x128xf32>
    %226 = arith.divf %224, %225 : vector<2x128xf32>
    %227 = math.tanh %221 : vector<2x128xf32>
    %228 = vector.extract_strided_slice %226 {offsets = [0, 0], sizes = [2, 32], strides = [1, 1]} : vector<2x128xf32> to vector<2x32xf32>
    %229 = vector.extract_strided_slice %226 {offsets = [0, 32], sizes = [2, 32], strides = [1, 1]} : vector<2x128xf32> to vector<2x32xf32>
    %230 = vector.extract_strided_slice %227 {offsets = [0, 64], sizes = [2, 32], strides = [1, 1]} : vector<2x128xf32> to vector<2x32xf32>
    %231 = vector.extract_strided_slice %226 {offsets = [0, 96], sizes = [2, 32], strides = [1, 1]} : vector<2x128xf32> to vector<2x32xf32>
    %232 = arith.mulf %229, %208 : vector<2x32xf32>
    %233 = arith.mulf %228, %230 : vector<2x32xf32>
    %234 = arith.addf %232, %233 : vector<2x32xf32>
    %235 = math.tanh %234 : vector<2x32xf32>
    %236 = arith.mulf %231, %235 : vector<2x32xf32>
    %237 = arith.index_cast %c6_i32 : i32 to index
    %c0_74 = arith.constant 0 : index
    %c0_75 = arith.constant 0 : index
    %238 = vector.load %arg14[%237, %c0_74, %c0_75] : memref<8x2x32xf32, #tpu.memory_space<vmem>>, vector<1x2x32xf32>
    %239 = vector.shape_cast %238 : vector<1x2x32xf32> to vector<2x32xf32>
    %240 = vector.shape_cast %236 : vector<2x32xf32> to vector<1x2x32xf32>
    tpu.vector_store %arg14[%237, %c0_74, %c0_75], %240 {strides = array<i32>} : memref<8x2x32xf32, #tpu.memory_space<vmem>>, vector<1x2x32xf32>,
    %c7_i32 = arith.constant 7 : i32
    %241 = arith.index_cast %c7_i32 : i32 to index
    %c0_76 = arith.constant 0 : index
    %c0_77 = arith.constant 0 : index
    %242 = vector.load %arg13[%241, %c0_76, %c0_77] : memref<8x2x128xf32, #tpu.memory_space<vmem>>, vector<1x2x128xf32>
    %243 = vector.shape_cast %242 : vector<1x2x128xf32> to vector<2x128xf32>
    %244 = arith.addf %243, %50 : vector<2x128xf32>
    %245 = arith.truncf %236 : vector<2x32xf32> to vector<2x32xbf16>
    %cst_78 = arith.constant dense<0.000000e+00> : vector<2x128xf32>
    %246 = tpu.matmul %245, %58, %cst_78 {dimension_numbers = #tpu.dot_dimension_numbers<[1], [0], [0], [1], [0, 0, 1, 1], [], []>} : vector<2x32xbf16>, vector<32x128xbf16>, vector<2x128xf32> -> vector<2x128xf32>
    %247 = arith.addf %244, %246 : vector<2x128xf32>
    %248 = arith.negf %247 : vector<2x128xf32>
    %249 = math.exp %248 : vector<2x128xf32>
    %cst_79 = arith.constant 1.000000e+00 : f32
    %250 = vector.broadcast %cst_79 : f32 to vector<2x128xf32>
    %251 = arith.addf %250, %249 : vector<2x128xf32>
    %252 = arith.divf %250, %251 : vector<2x128xf32>
    %253 = math.tanh %247 : vector<2x128xf32>
    %254 = vector.extract_strided_slice %252 {offsets = [0, 0], sizes = [2, 32], strides = [1, 1]} : vector<2x128xf32> to vector<2x32xf32>
    %255 = vector.extract_strided_slice %252 {offsets = [0, 32], sizes = [2, 32], strides = [1, 1]} : vector<2x128xf32> to vector<2x32xf32>
    %256 = vector.extract_strided_slice %253 {offsets = [0, 64], sizes = [2, 32], strides = [1, 1]} : vector<2x128xf32> to vector<2x32xf32>
    %257 = vector.extract_strided_slice %252 {offsets = [0, 96], sizes = [2, 32], strides = [1, 1]} : vector<2x128xf32> to vector<2x32xf32>
    %258 = arith.mulf %255, %234 : vector<2x32xf32>
    %259 = arith.mulf %254, %256 : vector<2x32xf32>
    %260 = arith.addf %258, %259 : vector<2x32xf32>
    %261 = math.tanh %260 : vector<2x32xf32>
    %262 = arith.mulf %257, %261 : vector<2x32xf32>
    %263 = arith.index_cast %c7_i32 : i32 to index
    %c0_80 = arith.constant 0 : index
    %c0_81 = arith.constant 0 : index
    %264 = vector.load %arg14[%263, %c0_80, %c0_81] : memref<8x2x32xf32, #tpu.memory_space<vmem>>, vector<1x2x32xf32>
    %265 = vector.shape_cast %264 : vector<1x2x32xf32> to vector<2x32xf32>
    %266 = vector.shape_cast %262 : vector<2x32xf32> to vector<1x2x32xf32>
    tpu.vector_store %arg14[%263, %c0_80, %c0_81], %266 {strides = array<i32>} : memref<8x2x32xf32, #tpu.memory_space<vmem>>, vector<1x2x32xf32>,
    %c8_i32 = arith.constant 8 : i32
    %c0_82 = arith.constant 0 : index
    %c0_83 = arith.constant 0 : index
    %c0_84 = arith.constant 0 : index
    %267 = vector.load %arg14[%c0_82, %c0_83, %c0_84] : memref<8x2x32xf32, #tpu.memory_space<vmem>>, vector<8x2x32xf32>
    %268 = vector.shape_cast %267 : vector<8x2x32xf32> to vector<16x32xf32>
    %269 = arith.truncf %268 : vector<16x32xf32> to vector<16x32xbf16>
    %c0_85 = arith.constant 0 : index
    %c0_86 = arith.constant 0 : index
    %270 = vector.load %arg10[%c0_85, %c0_86] : memref<32x128xbf16, #tpu.memory_space<vmem>>, vector<32x128xbf16>
    %cst_87 = arith.constant dense<0.000000e+00> : vector<16x128xf32>
    %271 = tpu.matmul %269, %270, %cst_87 {dimension_numbers = #tpu.dot_dimension_numbers<[1], [0], [0], [1], [0, 0, 1, 1], [], []>} : vector<16x32xbf16>, vector<32x128xbf16>, vector<16x128xf32> -> vector<16x128xf32>
    %c0_88 = arith.constant 0 : index
    %c0_89 = arith.constant 0 : index
    %272 = vector.load %arg11[%c0_88, %c0_89] : memref<1x128xf32, #tpu.memory_space<vmem>>, vector<1x128xf32>
    %273 = vector.broadcast %272 : vector<1x128xf32> to vector<16x128xf32>
    %274 = arith.addf %271, %273 : vector<16x128xf32>
    %275 = vector.shape_cast %274 : vector<16x128xf32> to vector<8x2x128xf32>
    %c0_90 = arith.constant 0 : index
    %c0_91 = arith.constant 0 : index
    %c0_92 = arith.constant 0 : index
    %276 = vector.load %arg12[%c0_90, %c0_91, %c0_92] : memref<8x2x128xf32, #tpu.memory_space<vmem>>, vector<8x2x128xf32>
    tpu.vector_store %arg12[%c0_90, %c0_91, %c0_92], %275 {strides = array<i32>} : memref<8x2x128xf32, #tpu.memory_space<vmem>>, vector<8x2x128xf32>,
    return
  }
}

</mosaic_0001>

<bundles_post_ra>
// kernel: photo2sketch_forward.1
= control target key start
LH: loop header
LB: loop body
LE: loop exit
PB: predicated region body
PF: predicated region fallthrough
CT: control target
= control target key end

     0   :  { %vm385_vm0 = vcmask 1044480   ;;  %vm386_vm1 = vcmask 1045504   ;;  %v10468_v1 = vmov 65535   ;;  %vm288_vm2 = vcmask 220160   ;;  %s7312_s16 = smov 16   ;;  %s7313_s17 = smov 32   ;;  %s10455_s1 = inlined_call_operand.vmem [shape: bf16[27,16], index: 1, kind: input, shape index: {}]   ;;  %s10456_s0 = inlined_call_operand.vmem [shape: bf16[512,27], index: 0, kind: input, shape index: {}]   ;;  %s10457_s2 = inlined_call_operand.vmem [shape: f32[1,16], index: 2, kind: input, shape index: {}]   ;;  %s10458_s3 = inlined_call_operand.vmem [shape: bf16[144,32], index: 3, kind: input, shape index: {}]   ;;  %s10459_s6 = inlined_call_operand.vmem [shape: bf16[32,192], index: 6, kind: input, shape index: {}]   ;;  %s10460_s4 = inlined_call_operand.vmem [shape: f32[1,32], index: 4, kind: input, shape index: {}]   ;;  %s10461_s5 = inlined_call_operand.vmem [shape: f32[8,2,5], index: 5, kind: input, shape index: {}]   ;;  %s10462_s8 = inlined_call_operand.vmem [shape: bf16[5,128], index: 8, kind: input, shape index: {}]   ;;  %s10463_s9 = inlined_call_operand.vmem [shape: bf16[32,128], index: 9, kind: input, shape index: {}]   ;;  %s10464_s7 = inlined_call_operand.vmem [shape: f32[1,192], index: 7, kind: input, shape index: {}]   ;;  %s10465_s10 = inlined_call_operand.vmem [shape: bf16[32,128], index: 10, kind: input, shape index: {}]   ;;  %s10466_s11 = inlined_call_operand.vmem [shape: f32[1,128], index: 11, kind: input, shape index: {}]   ;;  %s10467_s12 = inlined_call_operand.vmem [shape: f32[8,2,128], index: 12, kind: output, shape index: {}]  }
   0x1   :  { %v7185_v0 = vld [vmem:[%s10455_s1] sm:$0xff]   ;;  %v387_v2 = vsel %vm385_vm0, 4294967295, %v10468_v1  ;;  %v7186_v3 = vld [vmem:[%s10455_s1 + $0x8] sm:$0x3f]   ;;  %v7189_v8 = vld [vmem:[%s10456_s0 + $0x10] sm:$0xff]   ;;  %v813_v40 = vlaneseq  ;;  %vm2153_vm3 = vcmask 123904  }
   0x2   :  { %6767 = vmatprep.subr.bf16.mxu0 %v7185_v0  ;;  %v388_v4 = vsel %vm386_vm1, %v387_v2, 0  ;;  %v7187_v6 = vld [vmem:[%s10456_s0] sm:$0xff]   ;;  %v7188_v7 = vld [vmem:[%s10456_s0 + $0x8] sm:$0xff]   ;;  %v7190_v9 = vld [vmem:[%s10456_s0 + $0x18] sm:$0xff]   ;;  %v7310_v38 = vmov 1983009808  }
   0x3   :  { %6768 = vmatpush3.bf16.msra.mxu0 %v7185_v0  ;;  %v390_v5 = vand.u32 %v7186_v3, %v388_v4  ;;  %6771 = vmatprep.mubr.msk.bf16.mxu0 %vm288_vm2, %v7187_v6  ;;  %v7191_v10 = vld [vmem:[%s10456_s0 + $0x20] sm:$0xff]   ;;  %v7192_v11 = vld [vmem:[%s10456_s0 + $0x28] sm:$0xff]   ;;  %v7193_v12 = vld [vmem:[%s10456_s0 + $0x30] sm:$0xff]   ;;  %v811_v39 = vunpack.c.l.s4 %v7310_v38  ;;  %v7522_v42 = vshrl.u32 %v813_v40, 7  ;;  %vm3946_vm4 = vcmask 130048   ;;  %s7314_s18 = smov 48  }
   0x4   :  { %v7194_v13 = vld [vmem:[%s10456_s0 + $0x38] sm:$0xff]   ;;  %v7195_v14 = vld [vmem:[%s10456_s0 + $0x40] sm:$0xff]   ;;  %v7196_v15 = vld [vmem:[%s10456_s0 + $0x48] sm:$0xff]   ;;  %vm4459_vm5 = vcmask 1042434   ;;  %vm4461_vm6 = vcmask 1043459   ;;  %vm4463_vm7 = vcmask 1044484  }
   0x5   :  { %6769 = vmatprep.subr.bf16.mxu0 %v390_v5  ;;  %v7197_v16 = vld [vmem:[%s10456_s0 + $0x50] sm:$0xff]   ;;  %v7198_v17 = vld [vmem:[%s10456_s0 + $0x58] sm:$0xff]   ;;  %v7199_v18 = vld [vmem:[%s10456_s0 + $0x60] sm:$0xff]   ;;  %v812_v41 = vunpack.c.0.s8 %v811_v39  ;;  %10564 = vst [vmem:[#allocation4_spill] sm:$0xff] %v7522_v42  ;;  %vm4465_vm8 = vcmask 1045509   ;;  %vm4467_vm9 = vcmask 1046534  }
   0x6   :  { %v7200_v19 = vld [vmem:[%s10456_s0 + $0x68] sm:$0xff]   ;;  %v7201_v20 = vld [vmem:[%s10456_s0 + $0x70] sm:$0xff]   ;;  %v7202_v21 = vld [vmem:[%s10456_s0 + $0x78] sm:$0xff]   ;;  %vm4469_vm10 = vcmask 1047559   ;;  %vm4593_vm11 = vcmask 1040384   ;;  %vm4655_vm12 = vcmask 1046528  }
   0x7   :  { %6770 = vmatpush3.bf16.msra.mxu0 %v390_v5  ;;  %v7203_v22 = vld [vmem:[%s10456_s0 + $0x80] sm:$0xff]   ;;  %v7204_v23 = vld [vmem:[%s10456_s0 + $0x88] sm:$0xff]   ;;  %v7205_v24 = vld [vmem:[%s10456_s0 + $0x90] sm:$0xff]   ;;  %v7531_v46 = vsub.s32 %v812_v41, %v7522_v42  ;;  %s7315_s19 = smov 64   ;;  %s7316_s22 = smov 80   ;;  %vm5114_vm13 = vcmask 261120  }
   0x8   :  { %v7206_v25 = vld [vmem:[%s10456_s0 + $0x98] sm:$0xff]   ;;  %v7207_v26 = vld [vmem:[%s10456_s0 + $0xa0] sm:$0xff]   ;;  %v7208_v27 = vld [vmem:[%s10456_s0 + $0xa8] sm:$0xff]   ;;  %s7317_s23 = smov 96   ;;  %s7318_s24 = smov 112   ;;  %vm5130_vm14 = vcmask 392192  }
   0x9   :  { %v7209_v28 = vld [vmem:[%s10456_s0 + $0xb0] sm:$0xff]   ;;  %v7210_v29 = vld [vmem:[%s10456_s0 + $0xb8] sm:$0xff]   ;;  %v7211_v30 = vld [vmem:[%s10456_s0 + $0xc0] sm:$0xff]   ;;  %10565 = vst [vmem:[#allocation5_spill] sm:$0xff] %v7531_v46  ;;  %vm5147_vm15 = vcmask 523264   ;;  %vm5164_vm0 = vcmask 654336  }
   0xa   :  { %6772 = vmatmul.mubr.msk.bf16.vlgmr.msra.gmra.mrb[0].mxu0 %vm288_vm2, %v7188_v7  ;;  %v7212_v31 = vld [vmem:[%s10456_s0 + $0xc8] sm:$0xff]   ;;  %v7213_v32 = vld [vmem:[%s10456_s0 + $0xd0] sm:$0xff]   ;;  %v7214_v33 = vld [vmem:[%s10456_s0 + $0xd8] sm:$0xff]  }
   0xb   :  { %6775 = vmatprep.mubr.msk.bf16.mxu0 %vm288_vm2, %v7189_v8  ;;  %v7215_v34 = vld [vmem:[%s10456_s0 + $0xe0] sm:$0xff]   ;;  %v7216_v35 = vld [vmem:[%s10456_s0 + $0xe8] sm:$0xff]   ;;  %v7217_v36 = vld [vmem:[%s10456_s0 + $0xf0] sm:$0xff]  }
   0xc   :  { %v7218_v37 = vld [vmem:[%s10456_s0 + $0xf8] sm:$0xff]   ;;  %v7527_v43 = vld [vmem:[%s10457_s2] ss:$0 sm:$0xff] }
  0x12   :  { %6776 = vmatmul.mubr.msk.bf16.gmra.mrb[4].mxu0 %vm288_vm2, %v7190_v9 }
  0x13   :  { %6779 = vmatprep.mubr.msk.bf16.mxu0 %vm288_vm2, %v7191_v10 }
  0x1a   :  { %6780 = vmatmul.mubr.msk.bf16.gmra.mrb[8].mxu0 %vm288_vm2, %v7192_v11 }
  0x1b   :  { %6783 = vmatprep.mubr.msk.bf16.mxu0 %vm288_vm2, %v7193_v12 }
  0x22   :  { %6784 = vmatmul.mubr.msk.bf16.gmra.mrb[12].mxu0 %vm288_vm2, %v7194_v13 }
  0x23   :  { %6787 = vmatprep.mubr.msk.bf16.mxu0 %vm288_vm2, %v7195_v14 }
  0x2a   :  { %6788 = vmatmul.mubr.msk.bf16.gmra.mrb[16].mxu0 %vm288_vm2, %v7196_v15 }
  0x2b   :  { %6791 = vmatprep.mubr.msk.bf16.mxu0 %vm288_vm2, %v7197_v16 }
  0x32   :  { %6792 = vmatmul.mubr.msk.bf16.gmra.mrb[20].mxu0 %vm288_vm2, %v7198_v17 }
  0x33   :  { %6795 = vmatprep.mubr.msk.bf16.mxu0 %vm288_vm2, %v7199_v18 }
  0x3a   :  { %6796 = vmatmul.mubr.msk.bf16.gmra.mrb[24].mxu0 %vm288_vm2, %v7200_v19 }
  0x3b   :  { %6799 = vmatprep.mubr.msk.bf16.mxu0 %vm288_vm2, %v7201_v20 }
  0x42   :  { %6800 = vmatmul.mubr.msk.bf16.gmra.mrb[28].mxu0 %vm288_vm2, %v7202_v21 }
  0x43   :  { %6803 = vmatprep.mubr.msk.bf16.mxu0 %vm288_vm2, %v7203_v22 }
  0x4a   :  { %6804 = vmatmul.mubr.msk.bf16.gmra.mrb[32].mxu0 %vm288_vm2, %v7204_v23 }
  0x4b   :  { %6807 = vmatprep.mubr.msk.bf16.mxu0 %vm288_vm2, %v7205_v24 }
  0x52   :  { %6808 = vmatmul.mubr.msk.bf16.gmra.mrb[36].mxu0 %vm288_vm2, %v7206_v25 }
  0x53   :  { %6811 = vmatprep.mubr.msk.bf16.mxu0 %vm288_vm2, %v7207_v26 }
  0x5a   :  { %6812 = vmatmul.mubr.msk.bf16.gmra.mrb[40].mxu0 %vm288_vm2, %v7208_v27 }
  0x5b   :  { %6815 = vmatprep.mubr.msk.bf16.mxu0 %vm288_vm2, %v7209_v28 }
  0x62   :  { %6816 = vmatmul.mubr.msk.bf16.gmra.mrb[44].mxu0 %vm288_vm2, %v7210_v29 }
  0x63   :  { %6819 = vmatprep.mubr.msk.bf16.mxu0 %vm288_vm2, %v7211_v30 }
  0x6a   :  { %6820 = vmatmul.mubr.msk.bf16.gmra.mrb[48].mxu0 %vm288_vm2, %v7212_v31 }
  0x6b   :  { %6823 = vmatprep.mubr.msk.bf16.mxu0 %vm288_vm2, %v7213_v32 }
  0x72   :  { %6824 = vmatmul.mubr.msk.bf16.gmra.mrb[52].mxu0 %vm288_vm2, %v7214_v33 }
  0x73   :  { %6827 = vmatprep.mubr.msk.bf16.mxu0 %vm288_vm2, %v7215_v34 }
  0x7a   :  { %6828 = vmatmul.mubr.msk.bf16.gmra.mrb[56].mxu0 %vm288_vm2, %v7216_v35 }
  0x7b   :  { %6831 = vmatprep.mubr.msk.bf16.mxu0 %vm288_vm2, %v7217_v36 }
  0x82   :  { %6832 = vmatmul.mubr.msk.bf16.gmra.mrb[60].mxu0 %vm288_vm2, %v7218_v37  ;;  %vm5181_vm2 = vcmask 785408  }
  0xdd   :  { %v6773_v44 = vpop.f32.mrb[0].mxu0 }
  0xde   :  { %v435_v45 = vadd.f32 %v6773_v44, %v7527_v43  ;;  %v426_v47 = vpop.f32.mrb[1].mxu0 }
  0xdf   :  { %v427_v48 = vadd.f32 %v7527_v43, %v426_v47  ;;  %v6774_v49 = vpop.f32.mrb[2].mxu0 }
  0xe0   :  { %v683_v50 = vmax.f32 %v435_v45, 0.0  ;;  %v438_v51 = vadd.f32 %v6774_v49, %v7527_v43  ;;  %v429_v52 = vpop.f32.mrb[3].mxu0 }
  0xe1   :  { %v681_v53 = vmax.f32 %v427_v48, 0.0  ;;  %v430_v54 = vadd.f32 %v7527_v43, %v429_v52 }
  0xe2   :  { %v843_v55 = vcombine.high %v683_v50, %v683_v50  ;;  %v850_v56 = vrot.slane %v683_v50, %v7531_v46  ;;  %v7537_v57 = vmax.f32 %v438_v51, 0.0 }
  0xe3   :  { %v809_v58 = vcombine.high %v681_v53, %v681_v53  ;;  %v816_v59 = vrot.slane %v681_v53, %v7531_v46  ;;  %v7540_v60 = vmax.f32 %v430_v54, 0.0 }
  0xe4   :  { %v857_v61 = vrot.slane %v843_v55, %v7531_v46  ;;  %v858_v62 = vcombine.high %v850_v56, %v850_v56  ;;  %v2210_v63 = vsel %vm2153_vm3, %v850_v56, -inf  ;;  %v860_v0 = vcombine.high %v7537_v57, %v7537_v57 }
  0xe5   :  { %v2211_v2 = vrot.slane %v2210_v63, 4  ;;  %v823_v3 = vrot.slane %v809_v58, %v7531_v46  ;;  %v824_v4 = vcombine.high %v816_v59, %v816_v59  ;;  %v2154_v5 = vsel %vm2153_vm3, %v816_v59, -inf  ;;  %v7548_v6 = vpop.f32.mrb[4].mxu0 }
  0xe6   :  { %v859_v7 = vcombine.high %v857_v61, %v857_v61  ;;  %v2217_v8 = vsel %vm2153_vm3, %v858_v62, -inf  ;;  %v2224_v9 = vsel %vm2153_vm3, %v857_v61, -inf  ;;  %v2155_v10 = vrot.slane %v2154_v5, 4  ;;  %v7552_v11 = vpop.f32.mrb[5].mxu0 }
  0xe7   :  { %v2212_v12 = vmax.f32 %v2210_v63, %v2211_v2  ;;  %v2218_v13 = vrot.slane %v2217_v8, 4  ;;  %v2225_v14 = vrot.slane %v2224_v9, 4  ;;  %v825_v15 = vcombine.high %v823_v3, %v823_v3  ;;  %v7554_v16 = vpop.f32.mrb[6].mxu0 }
  0xe8   :  { %v2231_v17 = vsel %vm2153_vm3, %v859_v7, -inf  ;;  %v2156_v18 = vmax.f32 %v2154_v5, %v2155_v10  ;;  %v2161_v19 = vsel %vm2153_vm3, %v824_v4, -inf  ;;  %v2168_v20 = vsel %vm2153_vm3, %v823_v3, -inf  ;;  %v7559_v21 = vpop.f32.mrb[7].mxu0 }
  0xe9   :  { %v2213_v22 = vrot.slane %v2212_v12, 2  ;;  %v2219_v23 = vmax.f32 %v2217_v8, %v2218_v13  ;;  %v2226_v24 = vmax.f32 %v2224_v9, %v2225_v14  ;;  %v2232_v25 = vrot.slane %v2231_v17, 4 }
  0xea   :  { %v2157_v26 = vrot.slane %v2156_v18, 2  ;;  %v2162_v27 = vrot.slane %v2161_v19, 4  ;;  %v2169_v28 = vrot.slane %v2168_v20, 4  ;;  %v2175_v29 = vsel %vm2153_vm3, %v825_v15, -inf }
  0xeb   :  { %v2214_v30 = vmax.f32 %v2212_v12, %v2213_v22  ;;  %v2220_v31 = vrot.slane %v2219_v23, 2  ;;  %v2227_v32 = vrot.slane %v2226_v24, 2  ;;  %v2233_v33 = vmax.f32 %v2231_v17, %v2232_v25 }
  0xec   :  { %v2158_v34 = vmax.f32 %v2156_v18, %v2157_v26  ;;  %v2163_v35 = vmax.f32 %v2161_v19, %v2162_v27  ;;  %v2170_v36 = vmax.f32 %v2168_v20, %v2169_v28  ;;  %v2176_v37 = vrot.slane %v2175_v29, 4 }
  0xed   :  { %v2215_v38 = vrot.slane %v2214_v30, 1  ;;  %v2221_v39 = vmax.f32 %v2219_v23, %v2220_v31  ;;  %v2228_v40 = vmax.f32 %v2226_v24, %v2227_v32  ;;  %v2234_v41 = vrot.slane %v2233_v33, 2  ;;  %v7562_v44 = vpop.f32.mrb[8].mxu0 }
  0xee   :  { %v2159_v45 = vrot.slane %v2158_v34, 1  ;;  %v2164_v47 = vrot.slane %v2163_v35, 2  ;;  %v2171_v48 = vrot.slane %v2170_v36, 2  ;;  %v2177_v49 = vmax.f32 %v2175_v29, %v2176_v37  ;;  %v7564_v50 = vpop.f32.mrb[9].mxu0 }
  0xef   :  { %v2216_v51 = vmax.f32 %v2214_v30, %v2215_v38  ;;  %v2222_v52 = vrot.slane %v2221_v39, 1  ;;  %v2229_v53 = vrot.slane %v2228_v40, 1  ;;  %v2235_v54 = vmax.f32 %v2233_v33, %v2234_v41  ;;  %v7566_v55 = vpop.f32.mrb[10].mxu0 }
  0xf0   :  { %v2160_v56 = vmax.f32 %v2158_v34, %v2159_v45  ;;  %v2165_v58 = vmax.f32 %v2163_v35, %v2164_v47  ;;  %v2172_v59 = vmax.f32 %v2170_v36, %v2171_v48  ;;  %v2178_v61 = vrot.slane %v2177_v49, 2  ;;  %v7568_v62 = vpop.f32.mrb[11].mxu0 }
  0xf1   :  { %v2223_v63 = vmax.f32 %v2221_v39, %v2222_v52  ;;  %v2230_v2 = vmax.f32 %v2228_v40, %v2229_v53  ;;  %v2236_v3 = vrot.slane %v2235_v54, 1  ;;  %v3948_v4 = vsel %vm3946_vm4, %v2216_v51, -inf }
  0xf2   :  { %v2166_v5 = vrot.slane %v2165_v58, 1  ;;  %v2173_v7 = vrot.slane %v2172_v59, 1  ;;  %v2179_v8 = vmax.f32 %v2177_v49, %v2178_v61  ;;  %v3947_v9 = vsel %vm3946_vm4, %v2160_v56, -inf }
  0xf3   :  { %v2237_v10 = vmax.f32 %v2235_v54, %v2236_v3  ;;  %v3951_v12 = vsel %vm3946_vm4, %v2223_v63, -inf  ;;  %v3954_v13 = vsel %vm3946_vm4, %v2230_v2, -inf  ;;  %v3949_v14 = vmax.f32 %v3947_v9, %v3948_v4 }
  0xf4   :  { %v2167_v15 = vmax.f32 %v2165_v58, %v2166_v5  ;;  %v2174_v17 = vmax.f32 %v2172_v59, %v2173_v7  ;;  %v2180_v18 = vrot.slane %v2179_v8, 1  ;;  %v867_v19 = vrot.slane %v7537_v57, %v7531_v46 }
  0xf5   :  { %v7577_v20 = vsel %vm3946_vm4, %v2237_v10, -inf  ;;  %v874_v22 = vrot.slane %v860_v0, %v7531_v46  ;;  %v826_v23 = vcombine.high %v7540_v60, %v7540_v60  ;;  %v833_v24 = vrot.slane %v7540_v60, %v7531_v46  ;;  %v7587_v25 = vpop.f32.mrb[12].mxu0 }
  0xf6   :  { %v2181_v26 = vmax.f32 %v2179_v8, %v2180_v18  ;;  %v3950_v27 = vsel %vm3946_vm4, %v2167_v15, -inf  ;;  %v3953_v28 = vsel %vm3946_vm4, %v2174_v17, -inf  ;;  %v875_v29 = vcombine.high %v867_v19, %v867_v19  ;;  %v7591_v30 = vpop.f32.mrb[13].mxu0 }
  0xf7   :  { %v3952_v31 = vmax.f32 %v3950_v27, %v3951_v12  ;;  %v3955_v32 = vmax.f32 %v3953_v28, %v3954_v13  ;;  %v876_v57 = vcombine.high %v874_v22, %v874_v22  ;;  %v2238_v0 = vsel %vm2153_vm3, %v867_v19, -inf  ;;  %v7594_v33 = vpop.f32.mrb[14].mxu0 }
  0xf8   :  { %v7597_v34 = vsel %vm3946_vm4, %v2181_v26, -inf  ;;  %v2239_v60 = vrot.slane %v2238_v0, 4  ;;  %v2245_v35 = vsel %vm2153_vm3, %v875_v29, -inf  ;;  %v2252_v36 = vsel %vm2153_vm3, %v874_v22, -inf  ;;  %v7601_v37 = vpop.f32.mrb[15].mxu0 }
  0xf9   :  { %v4460_v39 = vsel %vm4459_vm5, %v3952_v31, %v3949_v14  ;;  %v2246_v40 = vrot.slane %v2245_v35, 4  ;;  %v2253_v41 = vrot.slane %v2252_v36, 4  ;;  %v2259_v48 = vsel %vm2153_vm3, %v876_v57, -inf }
  0xfa   :  { %v7607_v45 = vsel %vm4461_vm6, %v3955_v32, %v4460_v39  ;;  %v2240_v47 = vmax.f32 %v2238_v0, %v2239_v60  ;;  %v840_v49 = vrot.slane %v826_v23, %v7531_v46  ;;  %v2260_v53 = vrot.slane %v2259_v48, 4 }
  0xfb   :  { %v2247_v51 = vmax.f32 %v2245_v35, %v2246_v40  ;;  %v2254_v52 = vmax.f32 %v2252_v36, %v2253_v41  ;;  %v841_v54 = vcombine.high %v833_v24, %v833_v24  ;;  %v2182_v59 = vsel %vm2153_vm3, %v833_v24, -inf }
  0xfc   :  { %v2241_v56 = vrot.slane %v2240_v47, 2  ;;  %v842_v58 = vcombine.high %v840_v49, %v840_v49  ;;  %v2196_v61 = vsel %vm2153_vm3, %v840_v49, -inf  ;;  %v2261_v3 = vmax.f32 %v2259_v48, %v2260_v53 }
  0xfd   :  { %v2248_v63 = vrot.slane %v2247_v51, 2  ;;  %v2255_v2 = vrot.slane %v2254_v52, 2  ;;  %v2183_v4 = vrot.slane %v2182_v59, 4  ;;  %v7613_v5 = vpop.f32.mrb[16].mxu0  ;;  %v2189_v8 = vsel %vm2153_vm3, %v841_v54, -inf }
  0xfe   :  { %v2242_v7 = vmax.f32 %v2240_v47, %v2241_v56  ;;  %v2197_v9 = vrot.slane %v2196_v61, 4  ;;  %v2203_v10 = vsel %vm2153_vm3, %v842_v58, -inf  ;;  %v2262_v14 = vrot.slane %v2261_v3, 2  ;;  %v7617_v17 = vpop.f32.mrb[17].mxu0 }
  0xff   :  { %v2249_v12 = vmax.f32 %v2247_v51, %v2248_v63  ;;  %v2256_v13 = vmax.f32 %v2254_v52, %v2255_v2  ;;  %v2184_v15 = vmax.f32 %v2182_v59, %v2183_v4  ;;  %v2190_v19 = vrot.slane %v2189_v8, 4  ;;  %v7634_v56 = vpop.f32.mrb[18].mxu0 }
 0x100   :  { %v2243_v18 = vrot.slane %v2242_v7, 1  ;;  %v2198_v22 = vmax.f32 %v2196_v61, %v2197_v9  ;;  %v2204_v23 = vrot.slane %v2203_v10, 4  ;;  %v7619_v35 = vmax.f32 %v2261_v3, %v2262_v14 }
 0x101   :  { %v2250_v24 = vrot.slane %v2249_v12, 1  ;;  %v2257_v26 = vrot.slane %v2256_v13, 1  ;;  %v2185_v27 = vrot.slane %v2184_v15, 2  ;;  %v2191_v29 = vmax.f32 %v2189_v8, %v2190_v19 }
 0x102   :  { %v2244_v28 = vmax.f32 %v2242_v7, %v2243_v18  ;;  %v2199_v31 = vrot.slane %v2198_v22, 2  ;;  %v2205_v32 = vmax.f32 %v2203_v10, %v2204_v23  ;;  %v451_v49 = vadd.f32 %v7548_v6, %v7527_v43 }
 0x103   :  { %v2251_v57 = vmax.f32 %v2249_v12, %v2250_v24  ;;  %v2258_v0 = vmax.f32 %v2256_v13, %v2257_v26  ;;  %v2186_v60 = vmax.f32 %v2184_v15, %v2185_v27  ;;  %v2192_v36 = vrot.slane %v2191_v29, 2 }
 0x104   :  { %v2200_v39 = vmax.f32 %v2198_v22, %v2199_v31  ;;  %v2206_v40 = vrot.slane %v2205_v32, 2  ;;  %v7622_v41 = vsel %vm3946_vm4, %v2244_v28, -inf  ;;  %v443_v54 = vadd.f32 %v7527_v43, %v7552_v11 }
 0x105   :  { %v7625_v47 = vsel %vm3946_vm4, %v2251_v57, -inf  ;;  %v2187_v48 = vrot.slane %v2186_v60, 1  ;;  %v7630_v51 = vsel %vm3946_vm4, %v2258_v0, -inf  ;;  %v2193_v52 = vmax.f32 %v2191_v29, %v2192_v36 }
 0x106   :  { %v2201_v53 = vrot.slane %v2200_v39, 1  ;;  %v7636_v59 = vmax.f32 %v2205_v32, %v2206_v40  ;;  %v687_v61 = vmax.f32 %v451_v49, 0.0  ;;  %v454_v63 = vadd.f32 %v7554_v16, %v7527_v43 }
 0x107   :  { %v2188_v58 = vmax.f32 %v2186_v60, %v2187_v48  ;;  %v2194_v2 = vrot.slane %v2193_v52, 1  ;;  %v685_v6 = vmax.f32 %v443_v54, 0.0  ;;  %v7642_v4 = vadd.f32 %v7527_v43, %v7559_v21 }
 0x108   :  { %v2202_v3 = vmax.f32 %v2200_v39, %v2201_v53  ;;  %v911_v11 = vcombine.high %v687_v61, %v687_v61  ;;  %v918_v8 = vrot.slane %v687_v61, %v7531_v46  ;;  %v7648_v9 = vmax.f32 %v454_v63, 0.0 }
 0x109   :  { %v7645_v7 = vsel %vm3946_vm4, %v2188_v58, -inf  ;;  %v2195_v10 = vmax.f32 %v2193_v52, %v2194_v2  ;;  %v877_v13 = vcombine.high %v685_v6, %v685_v6  ;;  %v884_v23 = vrot.slane %v685_v6, %v7531_v46 }
 0x10a   :  { %v7653_v16 = vsel %vm3946_vm4, %v2202_v3, -inf  ;;  %v925_v14 = vrot.slane %v911_v11, %v7531_v46  ;;  %v926_v15 = vcombine.high %v918_v8, %v918_v8  ;;  %v2322_v18 = vsel %vm2153_vm3, %v918_v8, -inf  ;;  %v7673_v8 = vpop.f32.mrb[19].mxu0 }
 0x10b   :  { %v7660_v19 = vsel %vm3946_vm4, %v2195_v10, -inf  ;;  %v2323_v22 = vrot.slane %v2322_v18, 4  ;;  %v891_v24 = vrot.slane %v877_v13, %v7531_v46  ;;  %v892_v0 = vcombine.high %v884_v23, %v884_v23 }
 0x10c   :  { %v927_v27 = vcombine.high %v925_v14, %v925_v14  ;;  %v2329_v28 = vsel %vm2153_vm3, %v926_v15, -inf  ;;  %v2336_v29 = vsel %vm2153_vm3, %v925_v14, -inf  ;;  %v2266_v39 = vsel %vm2153_vm3, %v884_v23, -inf }
 0x10d   :  { %v2324_v31 = vmax.f32 %v2322_v18, %v2323_v22  ;;  %v2330_v32 = vrot.slane %v2329_v28, 4  ;;  %v2337_v57 = vrot.slane %v2336_v29, 4  ;;  %v893_v36 = vcombine.high %v891_v24, %v891_v24 }
 0x10e   :  { %v2343_v60 = vsel %vm2153_vm3, %v927_v27, -inf  ;;  %v2280_v40 = vsel %vm2153_vm3, %v891_v24, -inf  ;;  %v2267_v54 = vrot.slane %v2266_v39, 4  ;;  %v2273_v58 = vsel %vm2153_vm3, %v892_v0, -inf }
 0x10f   :  { %v2325_v48 = vrot.slane %v2324_v31, 2  ;;  %v2331_v49 = vmax.f32 %v2329_v28, %v2330_v32  ;;  %v2338_v52 = vmax.f32 %v2336_v29, %v2337_v57  ;;  %v2344_v53 = vrot.slane %v2343_v60, 4 }
 0x110   :  { %v2281_v61 = vrot.slane %v2280_v40, 4  ;;  %v2287_v63 = vsel %vm2153_vm3, %v893_v36, -inf  ;;  %v2268_v10 = vmax.f32 %v2266_v39, %v2267_v54  ;;  %v2274_v13 = vrot.slane %v2273_v58, 4 }
 0x111   :  { %v2326_v2 = vmax.f32 %v2324_v31, %v2325_v48  ;;  %v2332_v3 = vrot.slane %v2331_v49, 2  ;;  %v2339_v6 = vrot.slane %v2338_v52, 2  ;;  %v2345_v11 = vmax.f32 %v2343_v60, %v2344_v53 }
 0x112   :  { %v2282_v14 = vmax.f32 %v2280_v40, %v2281_v61  ;;  %v2288_v15 = vrot.slane %v2287_v63, 4  ;;  %v2269_v27 = vrot.slane %v2268_v10, 2  ;;  %v2275_v28 = vmax.f32 %v2273_v58, %v2274_v13 }
 0x113   :  { %v2327_v18 = vrot.slane %v2326_v2, 1  ;;  %v2333_v22 = vmax.f32 %v2331_v49, %v2332_v3  ;;  %v2340_v23 = vmax.f32 %v2338_v52, %v2339_v6  ;;  %v2346_v24 = vrot.slane %v2345_v11, 2 }
 0x114   :  { %v2283_v29 = vrot.slane %v2282_v14, 2  ;;  %v2289_v32 = vmax.f32 %v2287_v63, %v2288_v15  ;;  %v2270_v48 = vmax.f32 %v2268_v10, %v2269_v27  ;;  %v2276_v60 = vrot.slane %v2275_v28, 2 }
 0x115   :  { %v2328_v57 = vmax.f32 %v2326_v2, %v2327_v18  ;;  %v2334_v0 = vrot.slane %v2333_v22, 1  ;;  %v2341_v31 = vrot.slane %v2340_v23, 1  ;;  %v2347_v36 = vmax.f32 %v2345_v11, %v2346_v24 }
 0x116   :  { %v2284_v53 = vmax.f32 %v2282_v14, %v2283_v29  ;;  %v2290_v1 = vrot.slane %v2289_v32, 2  ;;  %v2271_v49 = vrot.slane %v2270_v48, 1  ;;  %v2277_v52 = vmax.f32 %v2275_v28, %v2276_v60 }
 0x117   :  { %v2335_v39 = vmax.f32 %v2333_v22, %v2334_v0  ;;  %v2342_v54 = vmax.f32 %v2340_v23, %v2341_v31  ;;  %v2348_v40 = vrot.slane %v2347_v36, 1  ;;  %v3972_v61 = vsel %vm3946_vm4, %v2328_v57, -inf }
 0x118   :  { %v2285_v3 = vrot.slane %v2284_v53, 1  ;;  %v2291_v6 = vmax.f32 %v2289_v32, %v2290_v1  ;;  %v928_v11 = vcombine.high %v7648_v9, %v7648_v9  ;;  %v2272_v10 = vmax.f32 %v2270_v48, %v2271_v49 }
 0x119   :  { %v2349_v58 = vmax.f32 %v2347_v36, %v2348_v40  ;;  %v3975_v63 = vsel %vm3946_vm4, %v2335_v39, -inf  ;;  %v3978_v2 = vsel %vm3946_vm4, %v2342_v54, -inf  ;;  %v2278_v13 = vrot.slane %v2277_v52, 1 }
 0x11a   :  { %v2286_v14 = vmax.f32 %v2284_v53, %v2285_v3  ;;  %v2292_v15 = vrot.slane %v2291_v6, 1  ;;  %v935_v22 = vrot.slane %v7648_v9, %v7531_v46  ;;  %v942_v1 = vrot.slane %v928_v11, %v7531_v46 }
 0x11b   :  { %v7681_v18 = vsel %vm3946_vm4, %v2349_v58, -inf  ;;  %v686_v23 = vmax.f32 %v7642_v4, 0.0  ;;  %v2279_v24 = vmax.f32 %v2277_v52, %v2278_v13  ;;  %v3971_v28 = vsel %vm3946_vm4, %v2272_v10, -inf }
 0x11c   :  { %v2293_v27 = vmax.f32 %v2291_v6, %v2292_v15  ;;  %v3977_v29 = vsel %vm3946_vm4, %v2286_v14, -inf  ;;  %v3973_v32 = vmax.f32 %v3971_v28, %v3972_v61  ;;  %v943_v0 = vcombine.high %v935_v22, %v935_v22 }
 0x11d   :  { %v3979_v57 = vmax.f32 %v3977_v29, %v3978_v2  ;;  %v944_v31 = vcombine.high %v942_v1, %v942_v1  ;;  %v3974_v36 = vsel %vm3946_vm4, %v2279_v24, -inf  ;;  %v2350_v9 = vsel %vm2153_vm3, %v935_v22, -inf }
 0x11e   :  { %v7691_v48 = vsel %vm3946_vm4, %v2293_v27, -inf  ;;  %v2364_v60 = vsel %vm2153_vm3, %v942_v1, -inf  ;;  %v3976_v4 = vmax.f32 %v3974_v36, %v3975_v63  ;;  %v2351_v39 = vrot.slane %v2350_v9, 4 }
 0x11f   :  { %v3982_v53 = vmax.f32 %v7691_v48, %v7681_v18  ;;  %v2357_v54 = vsel %vm2153_vm3, %v943_v0, -inf  ;;  %v2365_v61 = vrot.slane %v2364_v60, 4  ;;  %v2371_v49 = vsel %vm2153_vm3, %v944_v31, -inf }
 0x120   :  { %v2358_v40 = vrot.slane %v2357_v54, 4  ;;  %v894_v52 = vcombine.high %v686_v23, %v686_v23  ;;  %v4471_v3 = vsel %vm4459_vm5, %v3976_v4, %v3973_v32  ;;  %v2352_v6 = vmax.f32 %v2350_v9, %v2351_v39 }
 0x121   :  { %v2372_v58 = vrot.slane %v2371_v49, 4  ;;  %v901_v2 = vrot.slane %v686_v23, %v7531_v46  ;;  %v4472_v11 = vsel %vm4461_vm6, %v3979_v57, %v4471_v3  ;;  %v2366_v10 = vmax.f32 %v2364_v60, %v2365_v61 }
 0x122   :  { %v2359_v63 = vmax.f32 %v2357_v54, %v2358_v40  ;;  %v908_v13 = vrot.slane %v894_v52, %v7531_v46  ;;  %v2353_v14 = vrot.slane %v2352_v6, 2 }
 0x123   :  { %v2373_v15 = vmax.f32 %v2371_v49, %v2372_v58  ;;  %v909_v18 = vcombine.high %v901_v2, %v901_v2  ;;  %v2294_v22 = vsel %vm2153_vm3, %v901_v2, -inf  ;;  %v2367_v24 = vrot.slane %v2366_v10, 2 }
 0x124   :  { %v2360_v1 = vrot.slane %v2359_v63, 2  ;;  %v910_v27 = vcombine.high %v908_v13, %v908_v13  ;;  %v2295_v28 = vrot.slane %v2294_v22, 4  ;;  %v2354_v29 = vmax.f32 %v2352_v6, %v2353_v14 }
 0x125   :  { %v2374_v32 = vrot.slane %v2373_v15, 2  ;;  %v2301_v23 = vsel %vm2153_vm3, %v909_v18, -inf  ;;  %v2308_v57 = vsel %vm2153_vm3, %v908_v13, -inf  ;;  %v2368_v31 = vmax.f32 %v2366_v10, %v2367_v24 }
 0x126   :  { %v2361_v0 = vmax.f32 %v2359_v63, %v2360_v1  ;;  %v2296_v36 = vmax.f32 %v2294_v22, %v2295_v28  ;;  %v2302_v48 = vrot.slane %v2301_v23, 4  ;;  %v2355_v9 = vrot.slane %v2354_v29, 1 }
 0x127   :  { %v2375_v60 = vmax.f32 %v2373_v15, %v2374_v32  ;;  %v2309_v4 = vrot.slane %v2308_v57, 4  ;;  %v2315_v39 = vsel %vm2153_vm3, %v910_v27, -inf  ;;  %v2369_v40 = vrot.slane %v2368_v31, 1 }
 0x128   :  { %v2362_v54 = vrot.slane %v2361_v0, 1  ;;  %v2297_v61 = vrot.slane %v2296_v36, 2  ;;  %v2303_v49 = vmax.f32 %v2301_v23, %v2302_v48  ;;  %v2356_v52 = vmax.f32 %v2354_v29, %v2355_v9 }
 0x129   :  { %v2376_v3 = vrot.slane %v2375_v60, 1  ;;  %v2310_v6 = vmax.f32 %v2308_v57, %v2309_v4  ;;  %v2316_v58 = vrot.slane %v2315_v39, 4  ;;  %v2370_v15 = vmax.f32 %v2368_v31, %v2369_v40 }
 0x12a   :  { %v2363_v13 = vmax.f32 %v2361_v0, %v2362_v54  ;;  %v2298_v63 = vmax.f32 %v2296_v36, %v2297_v61  ;;  %v2304_v10 = vrot.slane %v2303_v49, 2  ;;  %v3984_v24 = vsel %vm3946_vm4, %v2356_v52, -inf }
 0x12b   :  { %v2311_v18 = vrot.slane %v2310_v6, 2  ;;  %v2317_v22 = vmax.f32 %v2315_v39, %v2316_v58  ;;  %v7709_v1 = vmax.f32 %v2375_v60, %v2376_v3  ;;  %v4473_v23 = vsel %vm4463_vm7, %v3982_v53, %v4472_v11 }
 0x12c   :  { %v2299_v27 = vrot.slane %v2298_v63, 1  ;;  %v2305_v28 = vmax.f32 %v2303_v49, %v2304_v10  ;;  %v467_v57 = vadd.f32 %v7562_v44, %v7527_v43  ;;  %v3987_v0 = vsel %vm3946_vm4, %v2363_v13, -inf }
 0x12d   :  { %v2312_v29 = vmax.f32 %v2310_v6, %v2311_v18  ;;  %v2318_v32 = vrot.slane %v2317_v22, 2  ;;  %v459_v48 = vadd.f32 %v7527_v43, %v7564_v50  ;;  %v7719_v9 = vsel %vm3946_vm4, %v2370_v15, -inf }
 0x12e   :  { %v2300_v36 = vmax.f32 %v2298_v63, %v2299_v27  ;;  %v2306_v31 = vrot.slane %v2305_v28, 1  ;;  %v691_v4 = vmax.f32 %v467_v57, 0.0  ;;  %v470_v39 = vadd.f32 %v7566_v55, %v7527_v43 }
 0x12f   :  { %v2313_v60 = vrot.slane %v2312_v29, 1  ;;  %v7723_v53 = vmax.f32 %v2317_v22, %v2318_v32  ;;  %v689_v11 = vmax.f32 %v459_v48, 0.0  ;;  %v7728_v50 = vadd.f32 %v7527_v43, %v7568_v62 }
 0x130   :  { %v2307_v54 = vmax.f32 %v2305_v28, %v2306_v31  ;;  %v3983_v44 = vsel %vm3946_vm4, %v2300_v36, -inf  ;;  %v979_v49 = vcombine.high %v691_v4, %v691_v4  ;;  %v986_v3 = vrot.slane %v691_v4, %v7531_v46  ;;  %v7750_v36 = vpop.f32.mrb[20].mxu0 }
 0x131   :  { %v2314_v40 = vmax.f32 %v2312_v29, %v2313_v60  ;;  %v3985_v61 = vmax.f32 %v3983_v44, %v3984_v24  ;;  %v945_v6 = vcombine.high %v689_v11, %v689_v11  ;;  %v952_v55 = vrot.slane %v689_v11, %v7531_v46 }
 0x132   :  { %v3986_v52 = vsel %vm3946_vm4, %v2307_v54, -inf  ;;  %v7737_v10 = vmax.f32 %v470_v39, 0.0  ;;  %v993_v62 = vrot.slane %v979_v49, %v7531_v46  ;;  %v994_v18 = vcombine.high %v986_v3, %v986_v3 }
 0x133   :  { %v3988_v58 = vmax.f32 %v3986_v52, %v3987_v0  ;;  %v7734_v13 = vsel %vm3946_vm4, %v2314_v40, -inf  ;;  %v4474_v63 = vsel %vm4465_vm8, %v3985_v61, %v4473_v23  ;;  %v2434_v22 = vsel %vm2153_vm3, %v986_v3, -inf  ;;  %v7755_v3 = vpop.f32.mrb[21].mxu0 }
 0x134   :  { %v2435_v27 = vrot.slane %v2434_v22, 4  ;;  %v959_v28 = vrot.slane %v945_v6, %v7531_v46  ;;  %v960_v29 = vcombine.high %v952_v55, %v952_v55  ;;  %v995_v32 = vcombine.high %v993_v62, %v993_v62 }
 0x135   :  { %v7744_v24 = vsel %vm4467_vm9, %v3988_v58, %v4474_v63  ;;  %v2441_v23 = vsel %vm2153_vm3, %v994_v18, -inf  ;;  %v2448_v57 = vsel %vm2153_vm3, %v993_v62, -inf  ;;  %v2378_v0 = vsel %vm2153_vm3, %v952_v55, -inf  ;;  %v7758_v62 = vpop.f32.mrb[22].mxu0 }
 0x136   :  { %v2436_v31 = vmax.f32 %v2434_v22, %v2435_v27  ;;  %v2442_v48 = vrot.slane %v2441_v23, 4  ;;  %v2449_v60 = vrot.slane %v2448_v57, 4  ;;  %v961_v4 = vcombine.high %v959_v28, %v959_v28 }
 0x137   :  { %v2455_v39 = vsel %vm2153_vm3, %v995_v32, -inf  ;;  %v2379_v54 = vrot.slane %v2378_v0, 4  ;;  %v2385_v44 = vsel %vm2153_vm3, %v960_v29, -inf  ;;  %v2392_v11 = vsel %vm2153_vm3, %v959_v28, -inf }
 0x138   :  { %v2437_v40 = vrot.slane %v2436_v31, 2  ;;  %v2443_v61 = vmax.f32 %v2441_v23, %v2442_v48  ;;  %v2450_v49 = vmax.f32 %v2448_v57, %v2449_v60  ;;  %v2456_v52 = vrot.slane %v2455_v39, 4 }
 0x139   :  { %v2380_v6 = vmax.f32 %v2378_v0, %v2379_v54  ;;  %v2386_v55 = vrot.slane %v2385_v44, 4  ;;  %v2393_v58 = vrot.slane %v2392_v11, 4  ;;  %v2399_v63 = vsel %vm2153_vm3, %v961_v4, -inf }
 0x13a   :  { %v2438_v18 = vmax.f32 %v2436_v31, %v2437_v40  ;;  %v2444_v22 = vrot.slane %v2443_v61, 2  ;;  %v2451_v27 = vrot.slane %v2450_v49, 2  ;;  %v2457_v32 = vmax.f32 %v2455_v39, %v2456_v52 }
 0x13b   :  { %v2381_v29 = vrot.slane %v2380_v6, 2  ;;  %v2387_v21 = vmax.f32 %v2385_v44, %v2386_v55  ;;  %v2394_v28 = vmax.f32 %v2392_v11, %v2393_v58  ;;  %v2400_v26 = vrot.slane %v2399_v63, 4 }
 0x13c   :  { %v2439_v23 = vrot.slane %v2438_v18, 1  ;;  %v2445_v57 = vmax.f32 %v2443_v61, %v2444_v22  ;;  %v2452_v48 = vmax.f32 %v2450_v49, %v2451_v27  ;;  %v2458_v60 = vrot.slane %v2457_v32, 2 }
 0x13d   :  { %v2382_v15 = vmax.f32 %v2380_v6, %v2381_v29  ;;  %v2388_v0 = vrot.slane %v2387_v21, 2  ;;  %v2395_v54 = vrot.slane %v2394_v28, 2  ;;  %v2401_v12 = vmax.f32 %v2399_v63, %v2400_v26 }
 0x13e   :  { %v2440_v38 = vmax.f32 %v2438_v18, %v2439_v23  ;;  %v2446_v4 = vrot.slane %v2445_v57, 1  ;;  %v2453_v2 = vrot.slane %v2452_v48, 1  ;;  %v2459_v14 = vmax.f32 %v2457_v32, %v2458_v60 }
 0x13f   :  { %v2383_v31 = vrot.slane %v2382_v15, 1  ;;  %v2389_v40 = vmax.f32 %v2387_v21, %v2388_v0  ;;  %v2396_v42 = vmax.f32 %v2394_v28, %v2395_v54  ;;  %v2402_v39 = vrot.slane %v2401_v12, 2 }
 0x140   :  { %v2447_v52 = vmax.f32 %v2445_v57, %v2446_v4  ;;  %v2454_v44 = vmax.f32 %v2452_v48, %v2453_v2  ;;  %v2460_v11 = vrot.slane %v2459_v14, 1  ;;  %v3996_v55 = vsel %vm3946_vm4, %v2440_v38, -inf }
 0x141   :  { %v2384_v61 = vmax.f32 %v2382_v15, %v2383_v31  ;;  %v2390_v49 = vrot.slane %v2389_v40, 1  ;;  %v2397_v58 = vrot.slane %v2396_v42, 1  ;;  %v2403_v6 = vmax.f32 %v2401_v12, %v2402_v39 }
 0x142   :  { %v2461_v22 = vmax.f32 %v2459_v14, %v2460_v11  ;;  %v3999_v26 = vsel %vm3946_vm4, %v2447_v52, -inf  ;;  %v4002_v63 = vsel %vm3946_vm4, %v2454_v44, -inf  ;;  %v996_v18 = vcombine.high %v7737_v10, %v7737_v10 }
 0x143   :  { %v2391_v21 = vmax.f32 %v2389_v40, %v2390_v49  ;;  %v2398_v27 = vmax.f32 %v2396_v42, %v2397_v58  ;;  %v2404_v32 = vrot.slane %v2403_v6, 1  ;;  %v3995_v2 = vsel %vm3946_vm4, %v2384_v61, -inf }
 0x144   :  { %v7767_v29 = vsel %vm3946_vm4, %v2461_v22, -inf  ;;  %v3997_v38 = vmax.f32 %v3995_v2, %v3996_v55  ;;  %v1003_v12 = vrot.slane %v7737_v10, %v7531_v46  ;;  %v1010_v14 = vrot.slane %v996_v18, %v7531_v46 }
 0x145   :  { %10566 = vst [vmem:[#allocation6_spill] sm:$0xff] %v7767_v29  ;;  %v2405_v15 = vmax.f32 %v2403_v6, %v2404_v32  ;;  %v3998_v28 = vsel %vm3946_vm4, %v2391_v21, -inf  ;;  %v4001_v23 = vsel %vm3946_vm4, %v2398_v27, -inf  ;;  %v690_v57 = vmax.f32 %v7728_v50, 0.0 }
 0x146   :  { %v4000_v42 = vmax.f32 %v3998_v28, %v3999_v26  ;;  %v4003_v48 = vmax.f32 %v4001_v23, %v4002_v63  ;;  %v1011_v60 = vcombine.high %v1003_v12, %v1003_v12  ;;  %v1012_v0 = vcombine.high %v1010_v14, %v1010_v14 }
 0x147   :  { %v7776_v54 = vsel %vm3946_vm4, %v2405_v15, -inf  ;;  %v2462_v4 = vsel %vm2153_vm3, %v1003_v12, -inf  ;;  %v2476_v10 = vsel %vm2153_vm3, %v1010_v14, -inf  ;;  %v962_v31 = vcombine.high %v690_v57, %v690_v57 }
 0x148   :  { %10567 = vst [vmem:[#allocation7_spill] sm:$0xff] %v7776_v54  ;;  %v4477_v39 = vsel %vm4459_vm5, %v4000_v42, %v3997_v38  ;;  %v2463_v52 = vrot.slane %v2462_v4, 4  ;;  %v2469_v50 = vsel %vm2153_vm3, %v1011_v60, -inf  ;;  %v2477_v55 = vrot.slane %v2476_v10, 4  ;;  %v7796_v60 = vpop.f32.mrb[23].mxu0 }
 0x149   :  { %v7785_v44 = vsel %vm4461_vm6, %v4003_v48, %v4477_v39  ;;  %v2470_v11 = vrot.slane %v2469_v50, 4  ;;  %v2483_v61 = vsel %vm2153_vm3, %v1012_v0, -inf  ;;  %v969_v6 = vrot.slane %v690_v57, %v7531_v46 }
 0x14a   :  { %10568 = vst [vmem:[#allocation8_spill] sm:$0xff] %v7785_v44  ;;  %v2464_v49 = vmax.f32 %v2462_v4, %v2463_v52  ;;  %v2484_v58 = vrot.slane %v2483_v61, 4  ;;  %v976_v22 = vrot.slane %v962_v31, %v7531_v46  ;;  %v2320_v26 = vrot.slane %v7723_v53, 1 }
 0x14b   :  { %v2471_v63 = vmax.f32 %v2469_v50, %v2470_v11  ;;  %v2478_v18 = vmax.f32 %v2476_v10, %v2477_v55  ;;  %v483_v21 = vadd.f32 %v7587_v25, %v7527_v43  ;;  %v977_v2 = vcombine.high %v969_v6, %v969_v6 }
 0x14c   :  { %v2465_v27 = vrot.slane %v2464_v49, 2  ;;  %v2485_v32 = vmax.f32 %v2483_v61, %v2484_v58  ;;  %v978_v38 = vcombine.high %v976_v22, %v976_v22  ;;  %v2406_v15 = vsel %vm2153_vm3, %v969_v6, -inf }
 0x14d   :  { %v2472_v12 = vrot.slane %v2471_v63, 2  ;;  %v2479_v14 = vrot.slane %v2478_v18, 2  ;;  %v2420_v28 = vsel %vm2153_vm3, %v976_v22, -inf  ;;  %v2407_v42 = vrot.slane %v2406_v15, 4 }
 0x14e   :  { %v2466_v23 = vmax.f32 %v2464_v49, %v2465_v27  ;;  %v2486_v57 = vrot.slane %v2485_v32, 2  ;;  %v2413_v48 = vsel %vm2153_vm3, %v977_v2, -inf  ;;  %v2421_v10 = vrot.slane %v2420_v28, 4 }
 0x14f   :  { %v2473_v0 = vmax.f32 %v2471_v63, %v2472_v12  ;;  %v2480_v4 = vmax.f32 %v2478_v18, %v2479_v14  ;;  %v2414_v25 = vrot.slane %v2413_v48, 4  ;;  %v2408_v52 = vmax.f32 %v2406_v15, %v2407_v42 }
 0x150   :  { %v2467_v31 = vrot.slane %v2466_v23, 1  ;;  %v7798_v39 = vmax.f32 %v2485_v32, %v2486_v57  ;;  %v2427_v50 = vsel %vm2153_vm3, %v978_v38, -inf  ;;  %v2422_v49 = vmax.f32 %v2420_v28, %v2421_v10 }
 0x151   :  { %v2474_v11 = vrot.slane %v2473_v0, 1  ;;  %v2481_v55 = vrot.slane %v2480_v4, 1  ;;  %v2415_v61 = vmax.f32 %v2413_v48, %v2414_v25  ;;  %v2409_v6 = vrot.slane %v2408_v52, 2  ;;  %v7819_v25 = vld [vmem:[%s10457_s2] ss:$0 sm:$0xff] }
 0x152   :  { %v2468_v58 = vmax.f32 %v2466_v23, %v2467_v31  ;;  %v2428_v22 = vrot.slane %v2427_v50, 4  ;;  %v475_v27 = vadd.f32 %v7527_v43, %v7591_v30  ;;  %v2423_v12 = vrot.slane %v2422_v49, 2 }
 0x153   :  { %v2475_v63 = vmax.f32 %v2473_v0, %v2474_v11  ;;  %v2482_v18 = vmax.f32 %v2480_v4, %v2481_v55  ;;  %v2416_v2 = vrot.slane %v2415_v61, 2  ;;  %v7804_v32 = vmax.f32 %v7723_v53, %v2320_v26 }
 0x154   :  { %v2410_v38 = vmax.f32 %v2408_v52, %v2409_v6  ;;  %v2429_v15 = vmax.f32 %v2427_v50, %v2428_v22  ;;  %v7808_v57 = vsel %vm3946_vm4, %v2468_v58, -inf  ;;  %v2424_v42 = vmax.f32 %v2422_v49, %v2423_v12 }
 0x155   :  { %10569 = vst [vmem:[#allocation9_spill] sm:$0xff] %v7808_v57  ;;  %v7811_v28 = vsel %vm3946_vm4, %v2475_v63, -inf  ;;  %v2417_v23 = vmax.f32 %v2415_v61, %v2416_v2  ;;  %v695_v48 = vmax.f32 %v483_v21, 0.0  ;;  %v693_v0 = vmax.f32 %v475_v27, 0.0 }
 0x156   :  { %10570 = vst [vmem:[#allocation10_spill] sm:$0xff] %v7811_v28  ;;  %v2411_v43 = vrot.slane %v2410_v38, 1  ;;  %v2430_v30 = vrot.slane %v2429_v15, 2  ;;  %v7814_v4 = vsel %vm3946_vm4, %v2482_v18, -inf  ;;  %v2425_v26 = vrot.slane %v2424_v42, 1 }
 0x157   :  { %10571 = vst [vmem:[#allocation11_spill] sm:$0xff] %v7814_v4  ;;  %v2418_v53 = vrot.slane %v2417_v23, 1  ;;  %v7823_v10 = vadd.f32 %v7819_v25, %v7594_v33  ;;  %v1047_v50 = vcombine.high %v695_v48, %v695_v48  ;;  %v1054_v21 = vrot.slane %v695_v48, %v7531_v46  ;;  %v7854_v48 = vpop.f32.mrb[24].mxu0 }
 0x158   :  { %v2412_v31 = vmax.f32 %v2410_v38, %v2411_v43  ;;  %v7825_v52 = vmax.f32 %v2429_v15, %v2430_v30  ;;  %v2426_v55 = vmax.f32 %v2424_v42, %v2425_v26  ;;  %v1013_v61 = vcombine.high %v693_v0, %v693_v0 }
 0x159   :  { %v2419_v11 = vmax.f32 %v2417_v23, %v2418_v53  ;;  %v7830_v49 = vadd.f32 %v7819_v25, %v7601_v37  ;;  %v1061_v6 = vrot.slane %v1047_v50, %v7531_v46  ;;  %v1062_v33 = vcombine.high %v1054_v21, %v1054_v21  ;;  %v7857_v50 = vpop.f32.mrb[25].mxu0 }
 0x15a   :  { %v7833_v58 = vsel %vm3946_vm4, %v2412_v31, -inf  ;;  %v1020_v22 = vrot.slane %v693_v0, %v7531_v46  ;;  %v7843_v18 = vsel %vm3946_vm4, %v2426_v55, -inf  ;;  %v2546_v37 = vsel %vm2153_vm3, %v1054_v21, -inf }
 0x15b   :  { %10572 = vst [vmem:[#allocation12_spill] sm:$0xff] %v7833_v58  ;;  %v7840_v63 = vsel %vm3946_vm4, %v2419_v11, -inf  ;;  %10574 = vst [vmem:[#allocation14_spill] sm:$0xff] %v7843_v18  ;;  %v1063_v15 = vcombine.high %v1061_v6, %v1061_v6  ;;  %v2547_v23 = vrot.slane %v2546_v37, 4  ;;  %v2553_v42 = vsel %vm2153_vm3, %v1062_v33, -inf }
 0x15c   :  { %10573 = vst [vmem:[#allocation13_spill] sm:$0xff] %v7840_v63  ;;  %v2560_v43 = vsel %vm2153_vm3, %v1061_v6, -inf  ;;  %v1027_v30 = vrot.slane %v1013_v61, %v7531_v46  ;;  %v2554_v0 = vrot.slane %v2553_v42, 4  ;;  %v1028_v31 = vcombine.high %v1020_v22, %v1020_v22  ;;  %v7861_v61 = vpop.f32.mrb[26].mxu0 }
 0x15d   :  { %v2561_v53 = vrot.slane %v2560_v43, 4  ;;  %v2567_v26 = vsel %vm2153_vm3, %v1063_v15, -inf  ;;  %v2548_v21 = vmax.f32 %v2546_v37, %v2547_v23  ;;  %v2490_v38 = vsel %vm2153_vm3, %v1020_v22, -inf  ;;  %10575 = vst [vmem:[#allocation15_spill] sm:$0xff] %v7861_v61 }
 0x15e   :  { %v2568_v11 = vrot.slane %v2567_v26, 4  ;;  %v1029_v55 = vcombine.high %v1027_v30, %v1027_v30  ;;  %v2555_v12 = vmax.f32 %v2553_v42, %v2554_v0  ;;  %v2491_v27 = vrot.slane %v2490_v38, 4 }
 0x15f   :  { %v2562_v33 = vmax.f32 %v2560_v43, %v2561_v53  ;;  %v2497_v6 = vsel %vm2153_vm3, %v1028_v31, -inf  ;;  %v2549_v40 = vrot.slane %v2548_v21, 2  ;;  %v2504_v15 = vsel %vm2153_vm3, %v1027_v30, -inf }
 0x160   :  { %v2569_v2 = vmax.f32 %v2567_v26, %v2568_v11  ;;  %v2498_v14 = vrot.slane %v2497_v6, 4  ;;  %v2556_v4 = vrot.slane %v2555_v12, 2  ;;  %v2492_v28 = vmax.f32 %v2490_v38, %v2491_v27 }
 0x161   :  { %v2563_v18 = vrot.slane %v2562_v33, 2  ;;  %v2505_v37 = vrot.slane %v2504_v15, 4  ;;  %v2550_v23 = vmax.f32 %v2548_v21, %v2549_v40  ;;  %v2511_v22 = vsel %vm2153_vm3, %v1029_v55, -inf }
 0x162   :  { %v2570_v63 = vrot.slane %v2569_v2, 2  ;;  %v2499_v57 = vmax.f32 %v2497_v6, %v2498_v14  ;;  %v2557_v42 = vmax.f32 %v2555_v12, %v2556_v4  ;;  %v2493_v0 = vrot.slane %v2492_v28, 2 }
 0x163   :  { %v2564_v43 = vmax.f32 %v2562_v33, %v2563_v18  ;;  %v2506_v53 = vmax.f32 %v2504_v15, %v2505_v37  ;;  %v2551_v31 = vrot.slane %v2550_v23, 1  ;;  %v2512_v26 = vrot.slane %v2511_v22, 4 }
 0x164   :  { %v2571_v58 = vmax.f32 %v2569_v2, %v2570_v63  ;;  %v2500_v29 = vrot.slane %v2499_v57, 2  ;;  %v2558_v11 = vrot.slane %v2557_v42, 1  ;;  %v2494_v30 = vmax.f32 %v2492_v28, %v2493_v0 }
 0x165   :  { %v2565_v54 = vrot.slane %v2564_v43, 1  ;;  %v2507_v44 = vrot.slane %v2506_v53, 2  ;;  %v2552_v61 = vmax.f32 %v2550_v23, %v2551_v31  ;;  %v2513_v40 = vmax.f32 %v2511_v22, %v2512_v26  ;;  %v7878_v22 = vpop.f32.mrb[27].mxu0 }
 0x166   :  { %v2572_v27 = vrot.slane %v2571_v58, 1  ;;  %v2501_v38 = vmax.f32 %v2499_v57, %v2500_v29  ;;  %v2559_v21 = vmax.f32 %v2557_v42, %v2558_v11  ;;  %v2495_v6 = vrot.slane %v2494_v30, 1 }
 0x167   :  { %v2566_v14 = vmax.f32 %v2564_v43, %v2565_v54  ;;  %v2508_v55 = vmax.f32 %v2506_v53, %v2507_v44  ;;  %v4020_v18 = vsel %vm3946_vm4, %v2552_v61, -inf  ;;  %v2514_v33 = vrot.slane %v2513_v40, 2 }
 0x168   :  { %v2573_v4 = vmax.f32 %v2571_v58, %v2572_v27  ;;  %v2502_v12 = vrot.slane %v2501_v38, 1  ;;  %v4023_v63 = vsel %vm3946_vm4, %v2559_v21, -inf  ;;  %v2496_v15 = vmax.f32 %v2494_v30, %v2495_v6 }
 0x169   :  { %v4026_v2 = vsel %vm3946_vm4, %v2566_v14, -inf  ;;  %v2509_v28 = vrot.slane %v2508_v55, 1  ;;  %v2515_v57 = vmax.f32 %v2513_v40, %v2514_v33  ;;  %v696_v54 = vmax.f32 %v7823_v10, 0.0 }
 0x16a   :  { %v7869_v37 = vsel %vm3946_vm4, %v2573_v4, -inf  ;;  %v2503_v29 = vmax.f32 %v2501_v38, %v2502_v12  ;;  %v4019_v44 = vsel %vm3946_vm4, %v2496_v15, -inf  ;;  %v694_v58 = vmax.f32 %v7830_v49, 0.0 }
 0x16b   :  { %10576 = vst [vmem:[#allocation16_spill] sm:$0xff] %v7869_v37  ;;  %v2510_v23 = vmax.f32 %v2508_v55, %v2509_v28  ;;  %v7876_v61 = vadd.f32 %v7819_v25, %v7613_v5  ;;  %v2516_v42 = vrot.slane %v2515_v57, 1  ;;  %v4021_v43 = vmax.f32 %v4019_v44, %v4020_v18 }
 0x16c   :  { %v4022_v0 = vsel %vm3946_vm4, %v2503_v29, -inf  ;;  %v1064_v53 = vcombine.high %v696_v54, %v696_v54  ;;  %v1071_v10 = vrot.slane %v696_v54, %v7531_v46  ;;  %v1030_v11 = vcombine.high %v694_v58, %v694_v58 }
 0x16d   :  { %v4024_v31 = vmax.f32 %v4022_v0, %v4023_v63  ;;  %v4025_v26 = vsel %vm3946_vm4, %v2510_v23, -inf  ;;  %v2517_v30 = vmax.f32 %v2515_v57, %v2516_v42  ;;  %v1037_v5 = vrot.slane %v694_v58, %v7531_v46 }
 0x16e   :  { %v4027_v27 = vmax.f32 %v4025_v26, %v4026_v2  ;;  %v1078_v49 = vrot.slane %v1064_v53, %v7531_v46  ;;  %v1079_v40 = vcombine.high %v1071_v10, %v1071_v10  ;;  %v2574_v21 = vsel %vm2153_vm3, %v1071_v10, -inf }
 0x16f   :  { %v4483_v38 = vsel %vm4459_vm5, %v4024_v31, %v4021_v43  ;;  %v1044_v14 = vrot.slane %v1030_v11, %v7531_v46  ;;  %v7889_v6 = vsel %vm3946_vm4, %v2517_v30, -inf  ;;  %v2575_v18 = vrot.slane %v2574_v21, 4 }
 0x170   :  { %10577 = vst [vmem:[#allocation17_spill] sm:$0xff] %v7889_v6  ;;  %v7892_v55 = vsel %vm4461_vm6, %v4027_v27, %v4483_v38  ;;  %v1080_v4 = vcombine.high %v1078_v49, %v1078_v49  ;;  %v2581_v33 = vsel %vm2153_vm3, %v1079_v40, -inf  ;;  %v2588_v63 = vsel %vm2153_vm3, %v1078_v49, -inf }
 0x171   :  { %10578 = vst [vmem:[#allocation18_spill] sm:$0xff] %v7892_v55  ;;  %v1045_v2 = vcombine.high %v1037_v5, %v1037_v5  ;;  %v2576_v15 = vmax.f32 %v2574_v21, %v2575_v18  ;;  %v2582_v28 = vrot.slane %v2581_v33, 4  ;;  %v2589_v29 = vrot.slane %v2588_v63, 4 }
 0x172   :  { %v2595_v57 = vsel %vm2153_vm3, %v1080_v4, -inf  ;;  %v1046_v23 = vcombine.high %v1044_v14, %v1044_v14  ;;  %v2518_v44 = vsel %vm2153_vm3, %v1037_v5, -inf  ;;  %v2532_v10 = vsel %vm2153_vm3, %v1044_v14, -inf }
 0x173   :  { %v2596_v54 = vrot.slane %v2595_v57, 4  ;;  %v2525_v58 = vsel %vm2153_vm3, %v1045_v2, -inf  ;;  %v2577_v42 = vrot.slane %v2576_v15, 2  ;;  %v2583_v43 = vmax.f32 %v2581_v33, %v2582_v28 }
 0x174   :  { %v2590_v0 = vmax.f32 %v2588_v63, %v2589_v29  ;;  %v2519_v53 = vrot.slane %v2518_v44, 4  ;;  %v2526_v26 = vrot.slane %v2525_v58, 4  ;;  %v2539_v11 = vsel %vm2153_vm3, %v1046_v23, -inf }
 0x175   :  { %v2597_v31 = vmax.f32 %v2595_v57, %v2596_v54  ;;  %v2578_v30 = vmax.f32 %v2576_v15, %v2577_v42  ;;  %v2584_v27 = vrot.slane %v2583_v43, 2  ;;  %v2533_v4 = vrot.slane %v2532_v10, 4 }
 0x176   :  { %v2591_v49 = vrot.slane %v2590_v0, 2  ;;  %v2520_v38 = vmax.f32 %v2518_v44, %v2519_v53  ;;  %v2527_v21 = vmax.f32 %v2525_v58, %v2526_v26  ;;  %v2540_v5 = vrot.slane %v2539_v11, 4 }
 0x177   :  { %v2598_v40 = vrot.slane %v2597_v31, 2  ;;  %v2579_v18 = vrot.slane %v2578_v30, 1  ;;  %v2585_v2 = vmax.f32 %v2583_v43, %v2584_v27  ;;  %v2534_v29 = vmax.f32 %v2532_v10, %v2533_v4 }
 0x178   :  { %v2592_v12 = vmax.f32 %v2590_v0, %v2591_v49  ;;  %v2521_v33 = vrot.slane %v2520_v38, 2  ;;  %v2528_v28 = vrot.slane %v2527_v21, 2  ;;  %v2541_v57 = vmax.f32 %v2539_v11, %v2540_v5 }
 0x179   :  { %v7903_v63 = vmax.f32 %v2597_v31, %v2598_v40  ;;  %v2580_v14 = vmax.f32 %v2578_v30, %v2579_v18  ;;  %v2586_v54 = vrot.slane %v2585_v2, 1  ;;  %v10579_v42 = vrot.slane %v7798_v39, 1 }
 0x17a   :  { %v2593_v23 = vrot.slane %v2592_v12, 1  ;;  %v2522_v15 = vmax.f32 %v2520_v38, %v2521_v33  ;;  %v2529_v58 = vmax.f32 %v2527_v21, %v2528_v28  ;;  %v2535_v53 = vrot.slane %v2534_v29, 2 }
 0x17b   :  { %v7908_v44 = vmax.f32 %v7798_v39, %v10579_v42  ;;  %v2542_v26 = vrot.slane %v2541_v57, 2  ;;  %v10580_v43 = vrot.slane %v7825_v52, 1  ;;  %v2587_v31 = vmax.f32 %v2585_v2, %v2586_v54 }
 0x17c   :  { %v2594_v10 = vmax.f32 %v2592_v12, %v2593_v23  ;;  %v2523_v11 = vrot.slane %v2522_v15, 1  ;;  %v2530_v27 = vrot.slane %v2529_v58, 1  ;;  %v2536_v49 = vmax.f32 %v2534_v29, %v2535_v53 }
 0x17d   :  { %v7913_v0 = vmax.f32 %v7825_v52, %v10580_v43  ;;  %v7916_v38 = vmax.f32 %v2541_v57, %v2542_v26  ;;  %v7919_v39 = vsel %vm3946_vm4, %v2580_v14, -inf  ;;  %v7922_v40 = vsel %vm3946_vm4, %v2587_v31, -inf }
 0x17e   :  { %10581 = vst [vmem:[#allocation19_spill] sm:$0xff] %v7919_v39  ;;  %10582 = vst [vmem:[#allocation20_spill] sm:$0xff] %v7922_v40  ;;  %v2524_v21 = vmax.f32 %v2522_v15, %v2523_v11  ;;  %v699_v4 = vmax.f32 %v7876_v61, 0.0  ;;  %v7926_v52 = vsel %vm3946_vm4, %v2594_v10, -inf  ;;  %v2531_v12 = vmax.f32 %v2529_v58, %v2530_v27 }
 0x17f   :  { %10583 = vst [vmem:[#allocation21_spill] sm:$0xff] %v7926_v52  ;;  %v2537_v5 = vrot.slane %v2536_v49, 1  ;;  %v491_v18 = vadd.f32 %v7819_v25, %v7617_v17  ;;  %v502_v29 = vadd.f32 %v7819_v25, %v7634_v56 }
 0x180   :  { %v7931_v2 = vsel %vm3946_vm4, %v2524_v21, -inf  ;;  %v1115_v33 = vcombine.high %v699_v4, %v699_v4  ;;  %v1122_v28 = vrot.slane %v699_v4, %v7531_v46  ;;  %v7940_v54 = vsel %vm3946_vm4, %v2531_v12, -inf }
 0x181   :  { %10584 = vst [vmem:[#allocation22_spill] sm:$0xff] %v7931_v2  ;;  %v2538_v57 = vmax.f32 %v2536_v49, %v2537_v5  ;;  %10585 = vst [vmem:[#allocation23_spill] sm:$0xff] %v7940_v54  ;;  %v697_v53 = vmax.f32 %v491_v18, 0.0  ;;  %v700_v26 = vmax.f32 %v502_v29, 0.0 }
 0x182   :  { %v1129_v23 = vrot.slane %v1115_v33, %v7531_v46  ;;  %v1130_v15 = vcombine.high %v1122_v28, %v1122_v28  ;;  %v2658_v42 = vsel %vm2153_vm3, %v1122_v28, -inf }
 0x183   :  { %v7947_v58 = vsel %vm3946_vm4, %v2538_v57, -inf  ;;  %v2659_v56 = vrot.slane %v2658_v42, 4  ;;  %v1081_v4 = vcombine.high %v697_v53, %v697_v53  ;;  %v1088_v5 = vrot.slane %v697_v53, %v7531_v46 }
 0x184   :  { %10586 = vst [vmem:[#allocation24_spill] sm:$0xff] %v7947_v58  ;;  %v1131_v31 = vcombine.high %v1129_v23, %v1129_v23  ;;  %v2665_v10 = vsel %vm2153_vm3, %v1130_v15, -inf  ;;  %v2672_v11 = vsel %vm2153_vm3, %v1129_v23, -inf  ;;  %v1132_v33 = vcombine.high %v700_v26, %v700_v26 }
 0x185   :  { %v2660_v27 = vmax.f32 %v2658_v42, %v2659_v56  ;;  %v2666_v49 = vrot.slane %v2665_v10, 4  ;;  %v2673_v21 = vrot.slane %v2672_v11, 4  ;;  %v1139_v18 = vrot.slane %v700_v26, %v7531_v46 }
 0x186   :  { %v2679_v12 = vsel %vm2153_vm3, %v1131_v31, -inf  ;;  %v1095_v17 = vrot.slane %v1081_v4, %v7531_v46  ;;  %v1096_v15 = vcombine.high %v1088_v5, %v1088_v5  ;;  %v2602_v23 = vsel %vm2153_vm3, %v1088_v5, -inf }
 0x187   :  { %v2661_v28 = vrot.slane %v2660_v27, 2  ;;  %v2667_v29 = vmax.f32 %v2665_v10, %v2666_v49  ;;  %v2674_v57 = vmax.f32 %v2672_v11, %v2673_v21  ;;  %v2680_v43 = vrot.slane %v2679_v12, 4 }
 0x188   :  { %v1146_v42 = vrot.slane %v1132_v33, %v7531_v46  ;;  %v1097_v30 = vcombine.high %v1095_v17, %v1095_v17  ;;  %v2603_v53 = vrot.slane %v2602_v23, 4  ;;  %v2609_v52 = vsel %vm2153_vm3, %v1096_v15, -inf  ;;  %v7962_v33 = vpop.f32.mrb[28].mxu0 }
 0x189   :  { %v2662_v56 = vmax.f32 %v2660_v27, %v2661_v28  ;;  %v2668_v14 = vrot.slane %v2667_v29, 2  ;;  %v2675_v61 = vrot.slane %v2674_v57, 2  ;;  %v2681_v31 = vmax.f32 %v2679_v12, %v2680_v43 }
 0x18a   :  { %v2616_v26 = vsel %vm2153_vm3, %v1095_v17, -inf  ;;  %v2604_v4 = vmax.f32 %v2602_v23, %v2603_v53  ;;  %v2610_v58 = vrot.slane %v2609_v52, 4  ;;  %v2623_v5 = vsel %vm2153_vm3, %v1097_v30, -inf  ;;  %v7965_v30 = vpop.f32.mrb[29].mxu0 }
 0x18b   :  { %v2663_v10 = vrot.slane %v2662_v56, 1  ;;  %v2669_v11 = vmax.f32 %v2667_v29, %v2668_v14  ;;  %v2676_v49 = vmax.f32 %v2674_v57, %v2675_v61  ;;  %v2682_v21 = vrot.slane %v2681_v31, 2  ;;  %10587 = vst [vmem:[#allocation25_spill] sm:$0xff] %v7965_v30 }
 0x18c   :  { %v2617_v40 = vrot.slane %v2616_v26, 4  ;;  %v2605_v54 = vrot.slane %v2604_v4, 2  ;;  %v2611_v39 = vmax.f32 %v2609_v52, %v2610_v58  ;;  %v2624_v2 = vrot.slane %v2623_v5, 4  ;;  %v7969_v52 = vpop.f32.mrb[30].mxu0 }
 0x18d   :  { %v2664_v27 = vmax.f32 %v2662_v56, %v2663_v10  ;;  %v2670_v28 = vrot.slane %v2669_v11, 1  ;;  %v2677_v43 = vrot.slane %v2676_v49, 1  ;;  %v2683_v12 = vmax.f32 %v2681_v31, %v2682_v21  ;;  %10588 = vst [vmem:[#allocation26_spill] sm:$0xff] %v7969_v52 }
 0x18e   :  { %v2618_v15 = vmax.f32 %v2616_v26, %v2617_v40  ;;  %v2606_v29 = vmax.f32 %v2604_v4, %v2605_v54  ;;  %v2612_v57 = vrot.slane %v2611_v39, 2  ;;  %v2625_v53 = vmax.f32 %v2623_v5, %v2624_v2 }
 0x18f   :  { %v2671_v17 = vmax.f32 %v2669_v11, %v2670_v28  ;;  %v2678_v37 = vmax.f32 %v2676_v49, %v2677_v43  ;;  %v2684_v14 = vrot.slane %v2683_v12, 1  ;;  %v4044_v61 = vsel %vm3946_vm4, %v2664_v27, -inf }
 0x190   :  { %v2619_v23 = vrot.slane %v2618_v15, 2  ;;  %v1147_v10 = vcombine.high %v1139_v18, %v1139_v18  ;;  %v2607_v40 = vrot.slane %v2606_v29, 1  ;;  %v2613_v58 = vmax.f32 %v2611_v39, %v2612_v57 }
 0x191   :  { %v2685_v6 = vmax.f32 %v2683_v12, %v2684_v14  ;;  %v4047_v56 = vsel %vm3946_vm4, %v2671_v17, -inf  ;;  %v4050_v31 = vsel %vm3946_vm4, %v2678_v37, -inf  ;;  %v2626_v11 = vrot.slane %v2625_v53, 2 }
 0x192   :  { %v2620_v26 = vmax.f32 %v2618_v15, %v2619_v23  ;;  %v1148_v54 = vcombine.high %v1146_v42, %v1146_v42  ;;  %v2686_v2 = vsel %vm2153_vm3, %v1139_v18, -inf  ;;  %v2693_v21 = vsel %vm2153_vm3, %v1147_v10, -inf }
 0x193   :  { %v7972_v49 = vsel %vm3946_vm4, %v2685_v6, -inf  ;;  %v2608_v4 = vmax.f32 %v2606_v29, %v2607_v40  ;;  %v2614_v5 = vrot.slane %v2613_v58, 1  ;;  %v2627_v28 = vmax.f32 %v2625_v53, %v2626_v11 }
 0x194   :  { %v2621_v27 = vrot.slane %v2620_v26, 1  ;;  %v2687_v37 = vrot.slane %v2686_v2, 4  ;;  %v2694_v43 = vrot.slane %v2693_v21, 4  ;;  %v2700_v12 = vsel %vm2153_vm3, %v1146_v42, -inf }
 0x195   :  { %v2707_v39 = vsel %vm2153_vm3, %v1148_v54, -inf  ;;  %v2615_v15 = vmax.f32 %v2613_v58, %v2614_v5  ;;  %v2628_v14 = vrot.slane %v2627_v28, 1  ;;  %v4043_v6 = vsel %vm3946_vm4, %v2608_v4, -inf }
 0x196   :  { %v2622_v17 = vmax.f32 %v2620_v26, %v2621_v27  ;;  %v4045_v57 = vmax.f32 %v4043_v6, %v4044_v61  ;;  %v2688_v23 = vmax.f32 %v2686_v2, %v2687_v37  ;;  %v2695_v18 = vmax.f32 %v2693_v21, %v2694_v43 }
 0x197   :  { %v2701_v55 = vrot.slane %v2700_v12, 4  ;;  %v2629_v10 = vmax.f32 %v2627_v28, %v2628_v14  ;;  %v4046_v29 = vsel %vm3946_vm4, %v2615_v15, -inf  ;;  %v2708_v40 = vrot.slane %v2707_v39, 4 }
 0x198   :  { %v4049_v53 = vsel %vm3946_vm4, %v2622_v17, -inf  ;;  %v4048_v11 = vmax.f32 %v4046_v29, %v4047_v56  ;;  %v2689_v42 = vrot.slane %v2688_v23, 2  ;;  %v2696_v30 = vrot.slane %v2695_v18, 2 }
 0x199   :  { %v4051_v52 = vmax.f32 %v4049_v53, %v4050_v31  ;;  %v7982_v58 = vsel %vm3946_vm4, %v2629_v10, -inf  ;;  %v2702_v26 = vmax.f32 %v2700_v12, %v2701_v55  ;;  %v2709_v54 = vmax.f32 %v2707_v39, %v2708_v40 }
 0x19a   :  { %v494_v61 = vadd.f32 %v7819_v25, %v7673_v8  ;;  %v4489_v21 = vsel %vm4459_vm5, %v4048_v11, %v4045_v57  ;;  %v2690_v4 = vmax.f32 %v2688_v23, %v2689_v42  ;;  %v2697_v5 = vmax.f32 %v2695_v18, %v2696_v30 }
 0x19b   :  { %v7990_v56 = vsel %vm4461_vm6, %v4051_v52, %v4489_v21  ;;  %v2703_v31 = vrot.slane %v2702_v26, 2  ;;  %v2710_v27 = vrot.slane %v2709_v54, 2  ;;  %v10589_v55 = vrot.slane %v7636_v59, 1 }
 0x19c   :  { %v698_v28 = vmax.f32 %v494_v61, 0.0  ;;  %v2691_v37 = vrot.slane %v2690_v4, 1  ;;  %v2698_v43 = vrot.slane %v2697_v5, 1  ;;  %v10590_v8 = vrot.slane %v7619_v35, 1 }
 0x19d   :  { %v2209_v12 = vmax.f32 %v7636_v59, %v10589_v55  ;;  %v2704_v15 = vmax.f32 %v2702_v26, %v2703_v31  ;;  %v2711_v17 = vmax.f32 %v2709_v54, %v2710_v27  ;;  %v10591_v18 = vrot.slane %v7903_v63, 1  ;;  %v8025_v55 = vpop.f32.mrb[31].mxu0 }
 0x19e   :  { %v2265_v39 = vmax.f32 %v7619_v35, %v10590_v8  ;;  %v1098_v14 = vcombine.high %v698_v28, %v698_v28  ;;  %v1105_v30 = vrot.slane %v698_v28, %v7531_v46  ;;  %v2692_v52 = vmax.f32 %v2690_v4, %v2691_v37 }
 0x19f   :  { %v2699_v6 = vmax.f32 %v2697_v5, %v2698_v43  ;;  %v3968_v57 = vsel %vm3946_vm4, %v2209_v12, -inf  ;;  %v8004_v10 = vmax.f32 %v7903_v63, %v10591_v18  ;;  %v2705_v59 = vrot.slane %v2704_v15, 1 }
 0x1a0   :  { %v3969_v23 = vsel %vm3946_vm4, %v2265_v39, -inf  ;;  %v1112_v29 = vrot.slane %v1098_v14, %v7531_v46  ;;  %v1113_v35 = vcombine.high %v1105_v30, %v1105_v30  ;;  %v10592_v53 = vrot.slane %v7916_v38, 1 }
 0x1a1   :  { %v2712_v11 = vrot.slane %v2711_v17, 1  ;;  %v2630_v42 = vsel %vm2153_vm3, %v1105_v30, -inf  ;;  %v3970_v26 = vmax.f32 %v3968_v57, %v3969_v23  ;;  %v8014_v54 = vsel %vm3946_vm4, %v2692_v52, -inf }
 0x1a2   :  { %v8010_v40 = vmax.f32 %v7916_v38, %v10592_v53  ;;  %v8017_v61 = vsel %vm3946_vm4, %v2699_v6, -inf  ;;  %v1114_v63 = vcombine.high %v1112_v29, %v1112_v29  ;;  %v2631_v21 = vrot.slane %v2630_v42, 4 }
 0x1a3   :  { %10593 = vst [vmem:[#allocation27_spill] sm:$0xff] %v8017_v61  ;;  %v2637_v4 = vsel %vm2153_vm3, %v1113_v35, -inf  ;;  %v2644_v5 = vsel %vm2153_vm3, %v1112_v29, -inf  ;;  %v3992_v38 = vsel %vm3946_vm4, %v7804_v32, -inf  ;;  %v3993_v31 = vsel %vm3946_vm4, %v7709_v1, -inf }
 0x1a4   :  { %v2706_v27 = vmax.f32 %v2704_v15, %v2705_v59  ;;  %v2632_v28 = vmax.f32 %v2630_v42, %v2631_v21  ;;  %v2638_v37 = vrot.slane %v2637_v4, 4  ;;  %v2645_v43 = vrot.slane %v2644_v5, 4 }
 0x1a5   :  { %v2651_v12 = vsel %vm2153_vm3, %v1114_v63, -inf  ;;  %v3994_v8 = vmax.f32 %v3992_v38, %v3993_v31  ;;  %v10594_v39 = vmax.f32 %v7597_v34, %v7577_v20  ;;  %v8033_v15 = vmax.f32 %v2711_v17, %v2712_v11 }
 0x1a6   :  { %v2633_v32 = vrot.slane %v2632_v28, 2  ;;  %v2639_v30 = vmax.f32 %v2637_v4, %v2638_v37  ;;  %v2646_v52 = vmax.f32 %v2644_v5, %v2645_v43  ;;  %v2652_v1 = vrot.slane %v2651_v12, 4 }
 0x1a7   :  { %v4464_v14 = vsel %vm4463_vm7, %v10594_v39, %v7607_v45  ;;  %v10595_v6 = vmax.f32 %v7645_v7, %v7622_v41  ;;  %v10596_v23 = vmax.f32 %v7734_v13, %v7719_v9  ;;  %v10597_v17 = vmax.f32 %v7660_v19, %v7625_v47 }
 0x1a8   :  { %v2634_v34 = vmax.f32 %v2632_v28, %v2633_v32  ;;  %v2640_v45 = vrot.slane %v2639_v30, 2  ;;  %v2647_v18 = vrot.slane %v2646_v52, 2  ;;  %v2653_v59 = vmax.f32 %v2651_v12, %v2652_v1 }
 0x1a9   :  { %v4466_v57 = vsel %vm4465_vm8, %v10595_v6, %v4464_v14  ;;  %v4476_v20 = vsel %vm4469_vm10, %v10596_v23, %v7744_v24  ;;  %v4610_v7 = vsel %vm4593_vm11, %v3970_v26, 0.0  ;;  %v8053_v35 = vsel %vm4593_vm11, %v3994_v8, 0.0 }
 0x1aa   :  { %v4468_v29 = vsel %vm4467_vm9, %v10597_v17, %v4466_v57  ;;  %v8049_v41 = vsel %vm4593_vm11, 0.0, %v4476_v20  ;;  %v2635_v9 = vrot.slane %v2634_v34, 1  ;;  %v2641_v13 = vmax.f32 %v2639_v30, %v2640_v45 }
 0x1ab   :  { %10598 = vst [vmem:[#allocation28_spill] sm:$0xff] %v8049_v41  ;;  %v2648_v24 = vmax.f32 %v2646_v52, %v2647_v18  ;;  %v2654_v53 = vrot.slane %v2653_v59, 2  ;;  %v8056_v11 = vsel %vm3946_vm4, %v2706_v27, -inf  ;;  %v10600_v47 = vmax.f32 %v7653_v16, %v7630_v51 }
 0x1ac   :  { %10599 = vst [vmem:[#allocation29_spill] sm:$0xff] %v8056_v11  ;;  %v4661_v42 = vrot.slane %v8049_v41, 1  ;;  %v2636_v63 = vmax.f32 %v2634_v34, %v2635_v9  ;;  %v2642_v21 = vrot.slane %v2641_v13, 1  ;;  %v10487_v4 = vmov 0.0  }
 0x1ad   :  { %v4470_v19 = vsel %vm4469_vm10, %v10600_v47, %v4468_v29  ;;  %v2649_v26 = vrot.slane %v2648_v24, 1  ;;  %6865 = vmatprep.subr.bf16.mxu0 %v10487_v4  ;;  %v8064_v5 = vmax.f32 %v2653_v59, %v2654_v53  ;;  %v4659_v31 = vrot.slane %v4610_v7, 1 }
 0x1ae   :  { %v8067_v38 = vsel %vm4593_vm11, 0.0, %v4470_v19  ;;  %v4662_v27 = vrot.slane %v8053_v35, 1  ;;  %v2643_v51 = vmax.f32 %v2641_v13, %v2642_v21  ;;  %v8071_v28 = vsel %vm3946_vm4, %v2636_v63, -inf }
 0x1af   :  { %10601 = vst [vmem:[#allocation30_spill] sm:$0xff] %v8067_v38  ;;  %v2650_v16 = vmax.f32 %v2648_v24, %v2649_v26  ;;  %v8074_v37 = vrot.slane %v10487_v4, 1  ;;  %v4658_v12 = vrot.slane %v8067_v38, 1  ;;  %v515_v39 = vadd.f32 %v7819_v25, %v7750_v36 }
 0x1b0   :  { %v8080_v8 = vsel %vm4655_vm12, %v4661_v42, %v4662_v27  ;;  %v8085_v14 = vsel %vm3946_vm4, %v2643_v51, -inf  ;;  %v4748_v30 = vrot.slane %v4610_v7, 2  ;;  %v507_v52 = vadd.f32 %v7819_v25, %v7755_v3 }
 0x1b1   :  { %10602 = vst [vmem:[#allocation31_spill] sm:$0xff] %v8074_v37  ;;  %v8088_v32 = vsel %vm3946_vm4, %v2650_v16, -inf  ;;  %v8097_v57 = vsel %vm4655_vm12, %v4658_v12, %v4659_v31  ;;  %v703_v36 = vmax.f32 %v515_v39, 0.0  ;;  %v518_v3 = vadd.f32 %v7819_v25, %v7758_v62 }
 0x1b2   :  { %10603 = vst [vmem:[#allocation32_spill] sm:$0xff] %v8088_v32  ;;  %v6925_v20 = vpack.i.bf16 %v8097_v57, %v8074_v37  ;;  %v701_v34 = vmax.f32 %v507_v52, 0.0  ;;  %v8107_v59 = vrot.slane %v10487_v4, 2  ;;  %v4747_v17 = vrot.slane %v8067_v38, 2 }
 0x1b3   :  { %v1183_v45 = vcombine.high %v703_v36, %v703_v36  ;;  %v1190_v18 = vrot.slane %v703_v36, %v7531_v46  ;;  %v8112_v9 = vmax.f32 %v518_v3, 0.0  ;;  %v8116_v13 = vadd.f32 %v7819_v25, %v7796_v60 }
 0x1b4   :  { %10604 = vst [vmem:[#allocation33_spill] sm:$0xff] %v8107_v59  ;;  %6926 = vrot.lane.b32.xlu0 %v6925_v20, %s7312_s16  ;;  %v1149_v29 = vcombine.high %v701_v34, %v701_v34  ;;  %v1156_v7 = vrot.slane %v701_v34, %v7531_v46  ;;  %v8121_v47 = vsel %vm386_vm1, %v4747_v17, %v4748_v30  ;;  %v8130_v20 = vpop.f32.mrb[32].mxu0 }
 0x1b5   :  { %v1197_v62 = vrot.slane %v1183_v45, %v7531_v46  ;;  %v1198_v24 = vcombine.high %v1190_v18, %v1190_v18  ;;  %v2770_v53 = vsel %vm2153_vm3, %v1190_v18, -inf  ;;  %v8132_v17 = vpop.f32.mrb[33].mxu0 }
 0x1b6   :  { %v2771_v19 = vrot.slane %v2770_v53, 4  ;;  %v1163_v42 = vrot.slane %v1149_v29, %v7531_v46  ;;  %v1164_v63 = vcombine.high %v1156_v7, %v1156_v7  ;;  %v2714_v21 = vsel %vm2153_vm3, %v1156_v7, -inf }
 0x1b7   :  { %v1199_v26 = vcombine.high %v1197_v62, %v1197_v62  ;;  %v2777_v31 = vsel %vm2153_vm3, %v1198_v24, -inf  ;;  %v2784_v60 = vsel %vm2153_vm3, %v1197_v62, -inf  ;;  %v2715_v25 = vrot.slane %v2714_v21, 4 }
 0x1b8   :  { %v2772_v27 = vmax.f32 %v2770_v53, %v2771_v19  ;;  %v2778_v51 = vrot.slane %v2777_v31, 4  ;;  %v2785_v16 = vrot.slane %v2784_v60, 4  ;;  %v1165_v12 = vcombine.high %v1163_v42, %v1163_v42  ;;  %v8135_v53 = vpop.f32.mrb[34].mxu0 }
 0x1b9   :  { %v2791_v39 = vsel %vm2153_vm3, %v1199_v26, -inf  ;;  %v2716_v30 = vmax.f32 %v2714_v21, %v2715_v25  ;;  %v2721_v52 = vsel %vm2153_vm3, %v1164_v63, -inf  ;;  %v2728_v36 = vsel %vm2153_vm3, %v1163_v42, -inf }
 0x1ba   :  { %v2773_v34 = vrot.slane %v2772_v27, 2  ;;  %v2779_v3 = vmax.f32 %v2777_v31, %v2778_v51  ;;  %v2786_v45 = vmax.f32 %v2784_v60, %v2785_v16  ;;  %v2792_v18 = vrot.slane %v2791_v39, 4 }
 0x1bb   :  { %v2717_v29 = vrot.slane %v2716_v30, 2  ;;  %v2722_v7 = vrot.slane %v2721_v52, 4  ;;  %v2729_v62 = vrot.slane %v2728_v36, 4  ;;  %v2735_v24 = vsel %vm2153_vm3, %v1165_v12, -inf }
 0x1bc   :  { %v2774_v19 = vmax.f32 %v2772_v27, %v2773_v34  ;;  %v2780_v21 = vrot.slane %v2779_v3, 2  ;;  %v2787_v63 = vrot.slane %v2786_v45, 2  ;;  %v2793_v26 = vmax.f32 %v2791_v39, %v2792_v18 }
 0x1bd   :  { %v2718_v42 = vmax.f32 %v2716_v30, %v2717_v29  ;;  %v2723_v25 = vmax.f32 %v2721_v52, %v2722_v7  ;;  %v2730_v4 = vmax.f32 %v2728_v36, %v2729_v62  ;;  %v2736_v6 = vrot.slane %v2735_v24, 4 }
 0x1be   :  { %v2775_v31 = vrot.slane %v2774_v19, 1  ;;  %v2781_v60 = vmax.f32 %v2779_v3, %v2780_v21  ;;  %v2788_v51 = vmax.f32 %v2786_v45, %v2787_v63  ;;  %v2794_v16 = vrot.slane %v2793_v26, 2 }
 0x1bf   :  { %v2719_v1 = vrot.slane %v2718_v42, 1  ;;  %v2724_v43 = vrot.slane %v2723_v25, 2  ;;  %v2731_v2 = vrot.slane %v2730_v4, 2  ;;  %v2737_v23 = vmax.f32 %v2735_v24, %v2736_v6 }
 0x1c0   :  { %v2776_v37 = vmax.f32 %v2774_v19, %v2775_v31  ;;  %v2782_v12 = vrot.slane %v2781_v60, 1  ;;  %v2789_v11 = vrot.slane %v2788_v51, 1  ;;  %v2795_v32 = vmax.f32 %v2793_v26, %v2794_v16 }
 0x1c1   :  { %v2720_v27 = vmax.f32 %v2718_v42, %v2719_v1  ;;  %v2725_v34 = vmax.f32 %v2723_v25, %v2724_v43  ;;  %v2732_v61 = vmax.f32 %v2730_v4, %v2731_v2  ;;  %v2738_v39 = vrot.slane %v2737_v23, 2  ;;  %v8154_v42 = vpop.f32.mrb[35].mxu0 }
 0x1c2   :  { %v2783_v30 = vmax.f32 %v2781_v60, %v2782_v12  ;;  %v2790_v52 = vmax.f32 %v2788_v51, %v2789_v11  ;;  %v2796_v36 = vrot.slane %v2795_v32, 1  ;;  %v4068_v18 = vsel %vm3946_vm4, %v2776_v37, -inf }
 0x1c3   :  { %v2726_v3 = vrot.slane %v2725_v34, 1  ;;  %v2733_v45 = vrot.slane %v2732_v61, 1  ;;  %v2739_v29 = vmax.f32 %v2737_v23, %v2738_v39  ;;  %v4067_v7 = vsel %vm3946_vm4, %v2720_v27, -inf }
 0x1c4   :  { %v2797_v62 = vmax.f32 %v2795_v32, %v2796_v36  ;;  %v4071_v6 = vsel %vm3946_vm4, %v2783_v30, -inf  ;;  %v4074_v24 = vsel %vm3946_vm4, %v2790_v52, -inf  ;;  %v4069_v19 = vmax.f32 %v4067_v7, %v4068_v18 }
 0x1c5   :  { %v2727_v1 = vmax.f32 %v2725_v34, %v2726_v3  ;;  %v2734_v43 = vmax.f32 %v2732_v61, %v2733_v45  ;;  %v2740_v2 = vrot.slane %v2739_v29, 1  ;;  %v1200_v11 = vcombine.high %v8112_v9, %v8112_v9 }
 0x1c6   :  { %v8144_v4 = vsel %vm3946_vm4, %v2797_v62, -inf  ;;  %v1207_v37 = vrot.slane %v8112_v9, %v7531_v46  ;;  %v6930_v32 = vpack.i.bf16 %v8121_v47, %v8107_v59  ;;  %v702_v23 = vmax.f32 %v8116_v13, 0.0 }
 0x1c7   :  { %v2741_v21 = vmax.f32 %v2739_v29, %v2740_v2  ;;  %v4070_v63 = vsel %vm3946_vm4, %v2727_v1, -inf  ;;  %v4073_v61 = vsel %vm3946_vm4, %v2734_v43, -inf  ;;  %v1214_v26 = vrot.slane %v1200_v11, %v7531_v46 }
 0x1c8   :  { %v4072_v25 = vmax.f32 %v4070_v63, %v4071_v6  ;;  %v4075_v31 = vmax.f32 %v4073_v61, %v4074_v24  ;;  %v1215_v60 = vcombine.high %v1207_v37, %v1207_v37  ;;  %v2798_v51 = vsel %vm2153_vm3, %v1207_v37, -inf  ;;  %6931 = vrot.lane.b32.xlu0 %v6930_v32, %s7313_s17 }
 0x1c9   :  { %v8159_v9 = vsel %vm3946_vm4, %v2741_v21, -inf  ;;  %v1216_v13 = vcombine.high %v1214_v26, %v1214_v26  ;;  %v2799_v16 = vrot.slane %v2798_v51, 4  ;;  %v2812_v12 = vsel %vm2153_vm3, %v1214_v26, -inf }
 0x1ca   :  { %v4495_v34 = vsel %vm4459_vm5, %v4072_v25, %v4069_v19  ;;  %v2805_v39 = vsel %vm2153_vm3, %v1215_v60, -inf  ;;  %v2813_v30 = vrot.slane %v2812_v12, 4  ;;  %v1166_v7 = vcombine.high %v702_v23, %v702_v23 }
 0x1cb   :  { %v8167_v52 = vsel %vm4461_vm6, %v4075_v31, %v4495_v34  ;;  %v2800_v36 = vmax.f32 %v2798_v51, %v2799_v16  ;;  %v2806_v18 = vrot.slane %v2805_v39, 4  ;;  %v2819_v3 = vsel %vm2153_vm3, %v1216_v13, -inf }
 0x1cc   :  { %v2814_v45 = vmax.f32 %v2812_v12, %v2813_v30  ;;  %v2820_v29 = vrot.slane %v2819_v3, 4  ;;  %v1173_v62 = vrot.slane %v702_v23, %v7531_v46  ;;  %v2656_v6 = vrot.slane %v8064_v5, 1 }
 0x1cd   :  { %v2801_v24 = vrot.slane %v2800_v36, 2  ;;  %v2807_v1 = vmax.f32 %v2805_v39, %v2806_v18  ;;  %v6935_v19 = vpack.i.bf16 %v8049_v41, %v8067_v38  ;;  %v1180_v11 = vrot.slane %v1166_v7, %v7531_v46 }
 0x1ce   :  { %v2815_v43 = vrot.slane %v2814_v45, 2  ;;  %v2821_v2 = vmax.f32 %v2819_v3, %v2820_v29  ;;  %v1181_v37 = vcombine.high %v1173_v62, %v1173_v62  ;;  %v2742_v63 = vsel %vm2153_vm3, %v1173_v62, -inf }
 0x1cf   :  { %v2802_v32 = vmax.f32 %v2800_v36, %v2801_v24  ;;  %v2808_v21 = vrot.slane %v2807_v1, 2  ;;  %6936 = vrot.lane.b32.xlu1 %v6935_v19, %s7314_s18  ;;  %v4750_v23 = vrot.slane %v8049_v41, 2  ;;  %v1182_v25 = vcombine.high %v1180_v11, %v1180_v11 }
 0x1d0   :  { %v2816_v61 = vmax.f32 %v2814_v45, %v2815_v43  ;;  %v2822_v26 = vrot.slane %v2821_v2, 2  ;;  %v2743_v31 = vrot.slane %v2742_v63, 4  ;;  %v2749_v13 = vsel %vm2153_vm3, %v1181_v37, -inf }
 0x1d1   :  { %v2803_v60 = vrot.slane %v2802_v32, 1  ;;  %v2809_v51 = vmax.f32 %v2807_v1, %v2808_v21  ;;  %v2756_v16 = vsel %vm2153_vm3, %v1180_v11, -inf  ;;  %v2750_v30 = vrot.slane %v2749_v13, 4 }
 0x1d2   :  { %v2817_v12 = vrot.slane %v2816_v61, 1  ;;  %v8180_v34 = vmax.f32 %v2821_v2, %v2822_v26  ;;  %v2744_v39 = vmax.f32 %v2742_v63, %v2743_v31  ;;  %v2757_v3 = vrot.slane %v2756_v16, 4 }
 0x1d3   :  { %v2804_v36 = vmax.f32 %v2802_v32, %v2803_v60  ;;  %v2810_v18 = vrot.slane %v2809_v51, 1  ;;  %v2763_v29 = vsel %vm2153_vm3, %v1182_v25, -inf  ;;  %v10605_v45 = vpack.i.bf16 %v8080_v8, %v8097_v57 }
 0x1d4   :  { %v8188_v7 = vmax.f32 %v8064_v5, %v2656_v6  ;;  %v2818_v62 = vmax.f32 %v2816_v61, %v2817_v12  ;;  %v2745_v24 = vrot.slane %v2744_v39, 2  ;;  %v2751_v1 = vmax.f32 %v2749_v13, %v2750_v30 }
 0x1d5   :  { %6941 = vrot.lane.b32.xlu1 %v10605_v45, %s7315_s19  ;;  %v2758_v43 = vmax.f32 %v2756_v16, %v2757_v3  ;;  %v2764_v2 = vrot.slane %v2763_v29, 4  ;;  %v4751_v11 = vrot.slane %v8053_v35, 2  ;;  %v2811_v37 = vmax.f32 %v2809_v51, %v2810_v18  ;;  %v8206_v35 = vld [vmem:[%s10457_s2] ss:$0 sm:$0xff] }
 0x1d6   :  { %v8193_v32 = vsel %vm3946_vm4, %v2804_v36, -inf  ;;  %v2746_v21 = vmax.f32 %v2744_v39, %v2745_v24  ;;  %v2752_v63 = vrot.slane %v2751_v1, 2  ;;  %v8196_v57 = vsel %vm3946_vm4, %v2818_v62, -inf }
 0x1d7   :  { %10606 = vst [vmem:[#allocation34_spill] sm:$0xff] %v8193_v32  ;;  %10607 = vst [vmem:[#allocation35_spill] sm:$0xff] %v8196_v57  ;;  %v2759_v5 = vrot.slane %v2758_v43, 2  ;;  %v2765_v6 = vmax.f32 %v2763_v29, %v2764_v2  ;;  %v8199_v61 = vsel %vm386_vm1, %v4750_v23, %v4751_v11  ;;  %v531_v60 = vadd.f32 %v8206_v35, %v7854_v48  ;;  %v10608_v23 = vld [vmem:[#allocation15_spill] sm:$0xff]  ;;  %v8258_v57 = vpop.f32.mrb[36].mxu0 }
 0x1d8   :  { %v2747_v26 = vrot.slane %v2746_v21, 1  ;;  %v2753_v25 = vmax.f32 %v2751_v1, %v2752_v63  ;;  %v6945_v31 = vpack.i.bf16 %v8199_v61, %v8121_v47  ;;  %v523_v16 = vadd.f32 %v8206_v35, %v7857_v50 }
 0x1d9   :  { %v2760_v51 = vmax.f32 %v2758_v43, %v2759_v5  ;;  %v2766_v13 = vrot.slane %v2765_v6, 2  ;;  %v534_v12 = vadd.f32 %v8206_v35, %v10608_v23  ;;  %v8215_v39 = vsel %vm3946_vm4, %v2811_v37, -inf }
 0x1da   :  { %10609 = vst [vmem:[#allocation15_spill] sm:$0xff] %v8215_v39  ;;  %v2748_v47 = vmax.f32 %v2746_v21, %v2747_v26  ;;  %v2754_v30 = vrot.slane %v2753_v25, 1  ;;  %6946 = vrot.lane.b32.xlu0 %v6945_v31, %s7316_s22  ;;  %v707_v36 = vmax.f32 %v531_v60, 0.0  ;;  %v705_v48 = vmax.f32 %v523_v16, 0.0 }
 0x1db   :  { %v2761_v18 = vrot.slane %v2760_v51, 1  ;;  %v8218_v3 = vmax.f32 %v2765_v6, %v2766_v13  ;;  %v8222_v29 = vadd.f32 %v8206_v35, %v7878_v22  ;;  %v8230_v11 = vmax.f32 %v534_v12, 0.0 }
 0x1dc   :  { %v2755_v50 = vmax.f32 %v2753_v25, %v2754_v30  ;;  %v8225_v45 = vsel %vm3946_vm4, %v2748_v47, -inf  ;;  %v1251_v62 = vcombine.high %v707_v36, %v707_v36  ;;  %v1258_v24 = vrot.slane %v707_v36, %v7531_v46 }
 0x1dd   :  { %v2762_v1 = vmax.f32 %v2760_v51, %v2761_v18  ;;  %v1217_v2 = vcombine.high %v705_v48, %v705_v48  ;;  %v1224_v47 = vrot.slane %v705_v48, %v7531_v46  ;;  %v1268_v18 = vcombine.high %v8230_v11, %v8230_v11 }
 0x1de   :  { %v8233_v37 = vsel %vm3946_vm4, %v2755_v50, -inf  ;;  %v1265_v22 = vrot.slane %v1251_v62, %v7531_v46  ;;  %v1266_v21 = vcombine.high %v1258_v24, %v1258_v24  ;;  %v2882_v63 = vsel %vm2153_vm3, %v1258_v24, -inf }
 0x1df   :  { %10610 = vst [vmem:[#allocation36_spill] sm:$0xff] %v8233_v37  ;;  %v8241_v26 = vsel %vm3946_vm4, %v2762_v1, -inf  ;;  %v2883_v25 = vrot.slane %v2882_v63, 4  ;;  %v1231_v36 = vrot.slane %v1217_v2, %v7531_v46  ;;  %v1275_v50 = vrot.slane %v8230_v11, %v7531_v46 }
 0x1e0   :  { %10611 = vst [vmem:[#allocation37_spill] sm:$0xff] %v8241_v26  ;;  %v1267_v60 = vcombine.high %v1265_v22, %v1265_v22  ;;  %v2889_v51 = vsel %vm2153_vm3, %v1266_v21, -inf  ;;  %v2896_v13 = vsel %vm2153_vm3, %v1265_v22, -inf  ;;  %v1232_v22 = vcombine.high %v1224_v47, %v1224_v47 }
 0x1e1   :  { %v2884_v16 = vmax.f32 %v2882_v63, %v2883_v25  ;;  %v2890_v23 = vrot.slane %v2889_v51, 4  ;;  %v2897_v12 = vrot.slane %v2896_v13, 4  ;;  %v1233_v63 = vcombine.high %v1231_v36, %v1231_v36 }
 0x1e2   :  { %v2903_v30 = vsel %vm2153_vm3, %v1267_v60, -inf  ;;  %v2826_v25 = vsel %vm2153_vm3, %v1224_v47, -inf  ;;  %v2840_v48 = vsel %vm2153_vm3, %v1231_v36, -inf  ;;  %v2833_v27 = vsel %vm2153_vm3, %v1232_v22, -inf }
 0x1e3   :  { %v2885_v62 = vrot.slane %v2884_v16, 2  ;;  %v2891_v24 = vmax.f32 %v2889_v51, %v2890_v23  ;;  %v2898_v1 = vmax.f32 %v2896_v13, %v2897_v12  ;;  %v2904_v21 = vrot.slane %v2903_v30, 4 }
 0x1e4   :  { %v2827_v43 = vrot.slane %v2826_v25, 4  ;;  %v2841_v5 = vrot.slane %v2840_v48, 4  ;;  %v2847_v11 = vsel %vm2153_vm3, %v1233_v63, -inf  ;;  %v2834_v59 = vrot.slane %v2833_v27, 4 }
 0x1e5   :  { %v2886_v31 = vmax.f32 %v2884_v16, %v2885_v62  ;;  %v2892_v60 = vrot.slane %v2891_v24, 2  ;;  %v2899_v6 = vrot.slane %v2898_v1, 2  ;;  %v2905_v2 = vmax.f32 %v2903_v30, %v2904_v21 }
 0x1e6   :  { %v2828_v12 = vmax.f32 %v2826_v25, %v2827_v43  ;;  %v2842_v38 = vmax.f32 %v2840_v48, %v2841_v5  ;;  %v2848_v47 = vrot.slane %v2847_v11, 4  ;;  %v2835_v26 = vmax.f32 %v2833_v27, %v2834_v59 }
 0x1e7   :  { %v2887_v19 = vrot.slane %v2886_v31, 1  ;;  %v2893_v51 = vmax.f32 %v2891_v24, %v2892_v60  ;;  %v2900_v13 = vmax.f32 %v2898_v1, %v2899_v6  ;;  %v2906_v23 = vrot.slane %v2905_v2, 2  ;;  %v8264_v60 = vpop.f32.mrb[37].mxu0 }
 0x1e8   :  { %v2829_v21 = vrot.slane %v2828_v12, 2  ;;  %v2843_v22 = vrot.slane %v2842_v38, 2  ;;  %v2849_v39 = vmax.f32 %v2847_v11, %v2848_v47  ;;  %v2836_v43 = vrot.slane %v2835_v26, 2 }
 0x1e9   :  { %v2888_v16 = vmax.f32 %v2886_v31, %v2887_v19  ;;  %v2894_v36 = vrot.slane %v2893_v51, 1  ;;  %v2901_v62 = vrot.slane %v2900_v13, 1  ;;  %v2907_v30 = vmax.f32 %v2905_v2, %v2906_v23 }
 0x1ea   :  { %v2830_v24 = vmax.f32 %v2828_v12, %v2829_v21  ;;  %v2844_v1 = vmax.f32 %v2842_v38, %v2843_v22  ;;  %v2850_v5 = vrot.slane %v2849_v39, 2  ;;  %v1282_v31 = vrot.slane %v1268_v18, %v7531_v46 }
 0x1eb   :  { %v2895_v37 = vmax.f32 %v2893_v51, %v2894_v36  ;;  %v2902_v63 = vmax.f32 %v2900_v13, %v2901_v62  ;;  %v2908_v32 = vrot.slane %v2907_v30, 1  ;;  %v4092_v6 = vsel %vm3946_vm4, %v2888_v16, -inf  ;;  %v8266_v51 = vpop.f32.mrb[38].mxu0 }
 0x1ec   :  { %v2831_v59 = vrot.slane %v2830_v24, 1  ;;  %v2837_v27 = vmax.f32 %v2835_v26, %v2836_v43  ;;  %v2845_v2 = vrot.slane %v2844_v1, 1  ;;  %v2851_v11 = vmax.f32 %v2849_v39, %v2850_v5 }
 0x1ed   :  { %v2909_v25 = vmax.f32 %v2907_v30, %v2908_v32  ;;  %v4095_v48 = vsel %vm3946_vm4, %v2895_v37, -inf  ;;  %v4098_v19 = vsel %vm3946_vm4, %v2902_v63, -inf  ;;  %v1283_v38 = vcombine.high %v1275_v50, %v1275_v50 }
 0x1ee   :  { %v1284_v23 = vcombine.high %v1282_v31, %v1282_v31  ;;  %v2910_v32 = vsel %vm2153_vm3, %v1275_v50, -inf  ;;  %v2832_v37 = vmax.f32 %v2830_v24, %v2831_v59  ;;  %v2838_v12 = vrot.slane %v2837_v27, 1 }
 0x1ef   :  { %v8269_v13 = vsel %vm3946_vm4, %v2909_v25, -inf  ;;  %v2846_v47 = vmax.f32 %v2844_v1, %v2845_v2  ;;  %v2852_v16 = vrot.slane %v2851_v11, 1  ;;  %v2911_v18 = vrot.slane %v2910_v32, 4 }
 0x1f0   :  { %10612 = vst [vmem:[#allocation38_spill] sm:$0xff] %v8269_v13  ;;  %v2917_v36 = vsel %vm2153_vm3, %v1283_v38, -inf  ;;  %v2924_v26 = vsel %vm2153_vm3, %v1282_v31, -inf  ;;  %v2931_v39 = vsel %vm2153_vm3, %v1284_v23, -inf  ;;  %v2839_v62 = vmax.f32 %v2837_v27, %v2838_v12 }
 0x1f1   :  { %v2853_v30 = vmax.f32 %v2851_v11, %v2852_v16  ;;  %v4091_v21 = vsel %vm3946_vm4, %v2832_v37, -inf  ;;  %v4097_v22 = vsel %vm3946_vm4, %v2846_v47, -inf  ;;  %v2912_v50 = vmax.f32 %v2910_v32, %v2911_v18  ;;  %v10615_v32 = vld [vmem:[#allocation7_spill] sm:$0xff]  ;;  %v10616_v37 = vld [vmem:[#allocation6_spill] sm:$0xff] }
 0x1f2   :  { %v4093_v63 = vmax.f32 %v4091_v21, %v4092_v6  ;;  %v4099_v43 = vmax.f32 %v4097_v22, %v4098_v19  ;;  %v2918_v24 = vrot.slane %v2917_v36, 4  ;;  %v4094_v1 = vsel %vm3946_vm4, %v2839_v62, -inf  ;;  %v10614_v19 = vld [vmem:[#allocation8_spill] sm:$0xff] }
 0x1f3   :  { %v8279_v5 = vsel %vm3946_vm4, %v2853_v30, -inf  ;;  %v2925_v25 = vrot.slane %v2924_v26, 4  ;;  %v2932_v59 = vrot.slane %v2931_v39, 4  ;;  %v4096_v31 = vmax.f32 %v4094_v1, %v4095_v48  ;;  %v10618_v48 = vld [vmem:[#allocation12_spill] sm:$0xff]  ;;  %v10619_v30 = vld [vmem:[#allocation9_spill] sm:$0xff] }
 0x1f4   :  { %10613 = vst [vmem:[#allocation39_spill] sm:$0xff] %v8279_v5  ;;  %v2913_v2 = vrot.slane %v2912_v50, 2  ;;  %v2919_v11 = vmax.f32 %v2917_v36, %v2918_v24  ;;  %v706_v6 = vmax.f32 %v8222_v29, 0.0  ;;  %v10617_v12 = vmax.f32 %v10615_v32, %v10616_v37  ;;  %v10625_v37 = vld [vmem:[#allocation14_spill] sm:$0xff] }
 0x1f5   :  { %v2926_v38 = vmax.f32 %v2924_v26, %v2925_v25  ;;  %v2933_v23 = vmax.f32 %v2931_v39, %v2932_v59  ;;  %v4501_v16 = vsel %vm4459_vm5, %v4096_v31, %v4093_v63  ;;  %v10620_v21 = vmax.f32 %v10618_v48, %v10619_v30  ;;  %v10622_v59 = vld [vmem:[#allocation13_spill] sm:$0xff] }
 0x1f6   :  { %v4479_v47 = vsel %vm4463_vm7, %v10617_v12, %v10614_v19  ;;  %v2914_v18 = vmax.f32 %v2912_v50, %v2913_v2  ;;  %v2920_v62 = vrot.slane %v2919_v11, 2  ;;  %v8295_v36 = vsel %vm4461_vm6, %v4099_v43, %v4501_v16  ;;  %v10623_v19 = vld [vmem:[#allocation10_spill] sm:$0xff]  ;;  %v10626_v43 = vld [vmem:[#allocation11_spill] sm:$0xff] }
 0x1f7   :  { %v4480_v22 = vsel %vm4465_vm8, %v10620_v21, %v4479_v47  ;;  %10621 = vst [vmem:[#allocation8_spill] sm:$0xff] %v8295_v36  ;;  %v2927_v26 = vrot.slane %v2926_v38, 2  ;;  %v2934_v29 = vrot.slane %v2933_v23, 2  ;;  %v1234_v39 = vcombine.high %v706_v6, %v706_v6 }
 0x1f8   :  { %v2915_v24 = vrot.slane %v2914_v18, 1  ;;  %v2921_v1 = vmax.f32 %v2919_v11, %v2920_v62  ;;  %v1241_v25 = vrot.slane %v706_v6, %v7531_v46  ;;  %v10624_v63 = vmax.f32 %v10622_v59, %v10623_v19 }
 0x1f9   :  { %v2928_v31 = vmax.f32 %v2926_v38, %v2927_v26  ;;  %v8302_v2 = vmax.f32 %v2933_v23, %v2934_v29  ;;  %v1248_v32 = vrot.slane %v1234_v39, %v7531_v46  ;;  %v10627_v12 = vmax.f32 %v10625_v37, %v10626_v43 }
 0x1fa   :  { %v4481_v50 = vsel %vm4467_vm9, %v10624_v63, %v4480_v22  ;;  %v2916_v16 = vmax.f32 %v2914_v18, %v2915_v24  ;;  %v2922_v48 = vrot.slane %v2921_v1, 1  ;;  %v1249_v11 = vcombine.high %v1241_v25, %v1241_v25 }
 0x1fb   :  { %v4482_v47 = vsel %vm4469_vm10, %v10627_v12, %v4481_v50  ;;  %v2854_v6 = vsel %vm2153_vm3, %v1241_v25, -inf  ;;  %v10628_v62 = vrot.slane %v8180_v34, 1  ;;  %v2929_v38 = vrot.slane %v2928_v31, 1 }
 0x1fc   :  { %v1250_v23 = vcombine.high %v1248_v32, %v1248_v32  ;;  %v2855_v21 = vrot.slane %v2854_v6, 4  ;;  %v10630_v22 = vrot.slane %v8218_v3, 1  ;;  %v2923_v29 = vmax.f32 %v2921_v1, %v2922_v48 }
 0x1fd   :  { %v8313_v30 = vmax.f32 %v8180_v34, %v10628_v62  ;;  %v2861_v18 = vsel %vm2153_vm3, %v1249_v11, -inf  ;;  %v2868_v39 = vsel %vm2153_vm3, %v1248_v32, -inf  ;;  %v8324_v25 = vsel %vm3946_vm4, %v2916_v16, -inf }
 0x1fe   :  { %v8318_v26 = vmax.f32 %v8218_v3, %v10630_v22  ;;  %10632 = vst [vmem:[#allocation12_spill] sm:$0xff] %v8324_v25  ;;  %v2856_v34 = vmax.f32 %v2854_v6, %v2855_v21  ;;  %v2862_v59 = vrot.slane %v2861_v18, 4  ;;  %v2930_v19 = vmax.f32 %v2928_v31, %v2929_v38 }
 0x1ff   :  { %10629 = vst [vmem:[#allocation7_spill] sm:$0xff] %v8313_v30  ;;  %v2869_v63 = vrot.slane %v2868_v39, 4  ;;  %v2875_v50 = vsel %vm2153_vm3, %v1250_v23, -inf  ;;  %v8328_v37 = vsel %vm4593_vm11, 0.0, %v4482_v47  ;;  %v8331_v3 = vsel %vm3946_vm4, %v2923_v29, -inf }
 0x200   :  { %10631 = vst [vmem:[#allocation6_spill] sm:$0xff] %v8318_v26  ;;  %10633 = vst [vmem:[#allocation9_spill] sm:$0xff] %v8328_v37  ;;  %v2857_v1 = vrot.slane %v2856_v34, 2  ;;  %v2863_v43 = vmax.f32 %v2861_v18, %v2862_v59  ;;  %v2876_v32 = vrot.slane %v2875_v50, 4  ;;  %v6950_v16 = vpack.i.bf16 %v8328_v37, %v8049_v41 }
 0x201   :  { %10634 = vst [vmem:[#allocation13_spill] sm:$0xff] %v8331_v3  ;;  %v2870_v12 = vmax.f32 %v2868_v39, %v2869_v63  ;;  %v4016_v48 = vsel %vm3946_vm4, %v7913_v0, -inf  ;;  %v4017_v31 = vsel %vm3946_vm4, %v7908_v44, -inf  ;;  %v4753_v23 = vrot.slane %v8328_v37, 2 }
 0x202   :  { %v2858_v11 = vmax.f32 %v2856_v34, %v2857_v1  ;;  %v2864_v6 = vrot.slane %v2863_v43, 2  ;;  %v2877_v47 = vmax.f32 %v2875_v50, %v2876_v32  ;;  %v4018_v62 = vmax.f32 %v4016_v48, %v4017_v31  ;;  %6951 = vrot.lane.b32.xlu1 %v6950_v16, %s7317_s23  ;;  %v8345_v50 = vpop.f32.mrb[39].mxu0  ;;  %v10635_v48 = vld [vmem:[#allocation25_spill] sm:$0xff] }
 0x203   :  { %v2871_v38 = vrot.slane %v2870_v12, 2  ;;  %v4664_v21 = vrot.slane %v8328_v37, 1  ;;  %v547_v22 = vadd.f32 %v8206_v35, %v7962_v33  ;;  %v539_v31 = vadd.f32 %v8206_v35, %v10635_v48 }
 0x204   :  { %v2859_v29 = vrot.slane %v2858_v11, 1  ;;  %v2865_v0 = vmax.f32 %v2863_v43, %v2864_v6  ;;  %v2878_v18 = vrot.slane %v2877_v47, 2  ;;  %v4612_v44 = vsel %vm4593_vm11, %v4018_v62, 0.0 }
 0x205   :  { %v2872_v39 = vmax.f32 %v2870_v12, %v2871_v38  ;;  %v4665_v34 = vrot.slane %v4612_v44, 1  ;;  %v4754_v59 = vrot.slane %v4612_v44, 2  ;;  %v711_v63 = vmax.f32 %v547_v22, 0.0  ;;  %v10640_v44 = vld [vmem:[#allocation26_spill] sm:$0xff] }
 0x206   :  { %v2860_v1 = vmax.f32 %v2858_v11, %v2859_v29  ;;  %v2866_v32 = vrot.slane %v2865_v0, 1  ;;  %v8347_v16 = vmax.f32 %v2877_v47, %v2878_v18  ;;  %v8358_v6 = vsel %vm3946_vm4, %v2930_v19, -inf }
 0x207   :  { %v2873_v27 = vrot.slane %v2872_v39, 1  ;;  %v8352_v33 = vsel %vm386_vm1, %v4753_v23, %v4754_v59  ;;  %v8355_v43 = vsel %vm4655_vm12, %v4664_v21, %v4665_v34  ;;  %v1319_v12 = vcombine.high %v711_v63, %v711_v63  ;;  %10636 = vst [vmem:[#allocation10_spill] sm:$0xff] %v8358_v6 }
 0x208   :  { %v2867_v62 = vmax.f32 %v2865_v0, %v2866_v32  ;;  %v8361_v11 = vsel %vm3946_vm4, %v2860_v1, -inf  ;;  %v5216_v47 = vpack.c.bf16 %v8352_v33, %v8199_v61  ;;  %v6955_v23 = vpack.i.bf16 %v8355_v43, %v8080_v8 }
 0x209   :  { %10637 = vst [vmem:[#allocation14_spill] sm:$0xff] %v8361_v11  ;;  %v2874_v38 = vmax.f32 %v2872_v39, %v2873_v27  ;;  %v1326_v19 = vrot.slane %v711_v63, %v7531_v46  ;;  %v1333_v0 = vrot.slane %v1319_v12, %v7531_v46  ;;  %v709_v8 = vmax.f32 %v539_v31, 0.0 }
 0x20a   :  { %v8371_v29 = vsel %vm3946_vm4, %v2867_v62, -inf  ;;  %6660 = vmatprep.mubr.msk.bf16.mxu1 %vm3946_vm4, %v5216_v47  ;;  %6956 = vrot.lane.b32.xlu0 %v6955_v23, %s7318_s24  ;;  %v550_v39 = vadd.f32 %v8206_v35, %v10640_v44 }
 0x20b   :  { %10638 = vst [vmem:[#allocation11_spill] sm:$0xff] %v8371_v29  ;;  %v8379_v18 = vsel %vm3946_vm4, %v2874_v38, -inf  ;;  %6961 = vrot.lane.b32.xlu1 %v6955_v23, %s7312_s16  ;;  %v1334_v59 = vcombine.high %v1326_v19, %v1326_v19  ;;  %v1335_v63 = vcombine.high %v1333_v0, %v1333_v0  ;;  %v2994_v1 = vsel %vm2153_vm3, %v1326_v19, -inf }
 0x20c   :  { %10639 = vst [vmem:[#allocation25_spill] sm:$0xff] %v8379_v18  ;;  %v2995_v32 = vrot.slane %v2994_v1, 4  ;;  %v3008_v48 = vsel %vm2153_vm3, %v1333_v0, -inf  ;;  %v1285_v12 = vcombine.high %v709_v8, %v709_v8  ;;  %v1292_v62 = vrot.slane %v709_v8, %v7531_v46 }
 0x20d   :  { %v3001_v47 = vsel %vm2153_vm3, %v1334_v59, -inf  ;;  %v3009_v38 = vrot.slane %v3008_v48, 4  ;;  %v3015_v31 = vsel %vm2153_vm3, %v1335_v63, -inf  ;;  %v712_v23 = vmax.f32 %v550_v39, 0.0  ;;  %v8396_v63 = vpop.f32.mrb[40].mxu0 }
 0x20e   :  { %v2996_v44 = vmax.f32 %v2994_v1, %v2995_v32  ;;  %v3002_v27 = vrot.slane %v3001_v47, 4  ;;  %v3016_v22 = vrot.slane %v3015_v31, 4  ;;  %v1299_v34 = vrot.slane %v1285_v12, %v7531_v46  ;;  %10641 = vst [vmem:[#allocation26_spill] sm:$0xff] %v8396_v63 }
 0x20f   :  { %v3010_v21 = vmax.f32 %v3008_v48, %v3009_v38  ;;  %v1300_v24 = vcombine.high %v1292_v62, %v1292_v62  ;;  %v2938_v19 = vsel %vm2153_vm3, %v1292_v62, -inf  ;;  %v1336_v41 = vcombine.high %v712_v23, %v712_v23  ;;  %v8398_v38 = vpop.f32.mrb[41].mxu0 }
 0x210   :  { %v2997_v0 = vrot.slane %v2996_v44, 2  ;;  %v3003_v6 = vmax.f32 %v3001_v47, %v3002_v27  ;;  %v3017_v18 = vmax.f32 %v3015_v31, %v3016_v22  ;;  %v1301_v8 = vcombine.high %v1299_v34, %v1299_v34  ;;  %10642 = vst [vmem:[#allocation40_spill] sm:$0xff] %v8398_v38  ;;  %v8401_v26 = vpop.f32.mrb[42].mxu0 }
 0x211   :  { %v3011_v3 = vrot.slane %v3010_v21, 2  ;;  %v2939_v59 = vrot.slane %v2938_v19, 4  ;;  %v2945_v29 = vsel %vm2153_vm3, %v1300_v24, -inf  ;;  %v2952_v39 = vsel %vm2153_vm3, %v1299_v34, -inf }
 0x212   :  { %v2998_v1 = vmax.f32 %v2996_v44, %v2997_v0  ;;  %v3004_v32 = vrot.slane %v3003_v6, 2  ;;  %v3018_v12 = vrot.slane %v3017_v18, 2  ;;  %v2946_v48 = vrot.slane %v2945_v29, 4 }
 0x213   :  { %v3012_v62 = vmax.f32 %v3010_v21, %v3011_v3  ;;  %v2940_v25 = vmax.f32 %v2938_v19, %v2939_v59  ;;  %v2953_v11 = vrot.slane %v2952_v39, 4  ;;  %v2959_v22 = vsel %vm2153_vm3, %v1301_v8, -inf }
 0x214   :  { %v2999_v27 = vrot.slane %v2998_v1, 1  ;;  %v3005_v47 = vmax.f32 %v3003_v6, %v3004_v32  ;;  %v3019_v31 = vmax.f32 %v3017_v18, %v3018_v12  ;;  %v2947_v13 = vmax.f32 %v2945_v29, %v2946_v48 }
 0x215   :  { %v3013_v24 = vrot.slane %v3012_v62, 1  ;;  %v2941_v5 = vrot.slane %v2940_v25, 2  ;;  %v2954_v34 = vmax.f32 %v2952_v39, %v2953_v11  ;;  %v2960_v36 = vrot.slane %v2959_v22, 4 }
 0x216   :  { %v3000_v63 = vmax.f32 %v2998_v1, %v2999_v27  ;;  %v3006_v44 = vrot.slane %v3005_v47, 1  ;;  %v3020_v0 = vrot.slane %v3019_v31, 1  ;;  %v2948_v30 = vrot.slane %v2947_v13, 2  ;;  %v8416_v27 = vpop.f32.mrb[43].mxu0 }
 0x217   :  { %v3014_v38 = vmax.f32 %v3012_v62, %v3013_v24  ;;  %v2942_v3 = vmax.f32 %v2940_v25, %v2941_v5  ;;  %v2955_v21 = vrot.slane %v2954_v34, 2  ;;  %v2961_v19 = vmax.f32 %v2959_v22, %v2960_v36 }
 0x218   :  { %v3007_v59 = vmax.f32 %v3005_v47, %v3006_v44  ;;  %v3021_v8 = vmax.f32 %v3019_v31, %v3020_v0  ;;  %v4116_v6 = vsel %vm3946_vm4, %v3000_v63, -inf  ;;  %v2949_v18 = vmax.f32 %v2947_v13, %v2948_v30 }
 0x219   :  { %v8405_v29 = vsel %vm3946_vm4, %v3014_v38, -inf  ;;  %v2943_v11 = vrot.slane %v2942_v3, 1  ;;  %v2956_v39 = vmax.f32 %v2954_v34, %v2955_v21  ;;  %v2962_v1 = vrot.slane %v2961_v19, 2 }
 0x21a   :  { %v4119_v32 = vsel %vm3946_vm4, %v3007_v59, -inf  ;;  %v8409_v12 = vsel %vm3946_vm4, %v3021_v8, -inf  ;;  %v2950_v48 = vrot.slane %v2949_v18, 1  ;;  %v1343_v5 = vrot.slane %v712_v23, %v7531_v46 }
 0x21b   :  { %10643 = vst [vmem:[#allocation41_spill] sm:$0xff] %v8409_v12  ;;  %v2944_v36 = vmax.f32 %v2942_v3, %v2943_v11  ;;  %v2957_v25 = vrot.slane %v2956_v39, 1  ;;  %v2963_v62 = vmax.f32 %v2961_v19, %v2962_v1  ;;  %v1350_v63 = vrot.slane %v1336_v41, %v7531_v46 }
 0x21c   :  { %v2951_v13 = vmax.f32 %v2949_v18, %v2950_v48  ;;  %v1351_v30 = vcombine.high %v1343_v5, %v1343_v5  ;;  %v3022_v38 = vsel %vm2153_vm3, %v1343_v5, -inf  ;;  %v6965_v22 = vpack.i.bf16 %v8352_v33, %v8199_v61 }
 0x21d   :  { %v2958_v47 = vmax.f32 %v2956_v39, %v2957_v25  ;;  %v2964_v31 = vrot.slane %v2963_v62, 1  ;;  %v4115_v24 = vsel %vm3946_vm4, %v2944_v36, -inf  ;;  %v1352_v34 = vcombine.high %v1350_v63, %v1350_v63 }
 0x21e   :  { %v4117_v23 = vmax.f32 %v4115_v24, %v4116_v6  ;;  %v4118_v44 = vsel %vm3946_vm4, %v2951_v13, -inf  ;;  %v3023_v0 = vrot.slane %v3022_v38, 4  ;;  %v3029_v41 = vsel %vm2153_vm3, %v1351_v30, -inf  ;;  %6966 = vrot.lane.b32.xlu0 %v6965_v22, %s7313_s17  ;;  %v10644_v13 = vld [vmem:[#allocation18_spill] sm:$0xff]  ;;  %v10645_v30 = vld [vmem:[#allocation17_spill] sm:$0xff] }
 0x21f   :  { %v2965_v3 = vmax.f32 %v2963_v62, %v2964_v31  ;;  %v4120_v21 = vmax.f32 %v4118_v44, %v4119_v32  ;;  %v8423_v19 = vsel %vm3946_vm4, %v2958_v47, -inf  ;;  %v3030_v61 = vrot.slane %v3029_v41, 4  ;;  %v10648_v44 = vld [vmem:[#allocation22_spill] sm:$0xff] }
 0x220   :  { %v3024_v8 = vmax.f32 %v3022_v38, %v3023_v0  ;;  %v3036_v18 = vsel %vm2153_vm3, %v1350_v63, -inf  ;;  %v3043_v6 = vsel %vm2153_vm3, %v1352_v34, -inf  ;;  %v542_v25 = vadd.f32 %v8206_v35, %v8025_v55  ;;  %v10646_v38 = vld [vmem:[#allocation16_spill] sm:$0xff]  ;;  %v10649_v0 = vld [vmem:[#allocation19_spill] sm:$0xff] }
 0x221   :  { %v8430_v11 = vsel %vm3946_vm4, %v2965_v3, -inf  ;;  %v8433_v39 = vsel %vm4459_vm5, %v4120_v21, %v4117_v23  ;;  %v3031_v1 = vmax.f32 %v3029_v41, %v3030_v61  ;;  %v3037_v32 = vrot.slane %v3036_v18, 4  ;;  %v10651_v61 = vld [vmem:[#allocation23_spill] sm:$0xff] }
 0x222   :  { %v3025_v5 = vrot.slane %v3024_v8, 2  ;;  %v3044_v36 = vrot.slane %v3043_v6, 4  ;;  %v10647_v22 = vmax.f32 %v10645_v30, %v10646_v38  ;;  %v4040_v31 = vsel %vm3946_vm4, %v8010_v40, -inf }
 0x223   :  { %v3032_v62 = vrot.slane %v3031_v1, 2  ;;  %v3038_v63 = vmax.f32 %v3036_v18, %v3037_v32  ;;  %v710_v23 = vmax.f32 %v542_v25, 0.0  ;;  %v10650_v41 = vmax.f32 %v10648_v44, %v10649_v0  ;;  %v10652_v18 = vld [vmem:[#allocation20_spill] sm:$0xff] }
 0x224   :  { %v4485_v47 = vsel %vm4463_vm7, %v10647_v22, %v10644_v13  ;;  %v3026_v24 = vmax.f32 %v3024_v8, %v3025_v5  ;;  %v3045_v34 = vmax.f32 %v3043_v6, %v3044_v36  ;;  %v10653_v32 = vmax.f32 %v10651_v61, %v10652_v18  ;;  %v10654_v25 = vld [vmem:[#allocation24_spill] sm:$0xff]  ;;  %v10655_v22 = vld [vmem:[#allocation21_spill] sm:$0xff] }
 0x225   :  { %v4486_v3 = vsel %vm4465_vm8, %v10650_v41, %v4485_v47  ;;  %v3033_v55 = vmax.f32 %v3031_v1, %v3032_v62  ;;  %v3039_v21 = vrot.slane %v3038_v63, 2  ;;  %v4041_v13 = vsel %vm3946_vm4, %v8004_v10, -inf }
 0x226   :  { %v4487_v30 = vsel %vm4467_vm9, %v10653_v32, %v4486_v3  ;;  %v3027_v38 = vrot.slane %v3026_v24, 1  ;;  %v3046_v40 = vrot.slane %v3045_v34, 2  ;;  %v1302_v8 = vcombine.high %v710_v23, %v710_v23 }
 0x227   :  { %v1309_v6 = vrot.slane %v710_v23, %v7531_v46  ;;  %v3034_v5 = vrot.slane %v3033_v55, 1  ;;  %v3040_v36 = vmax.f32 %v3038_v63, %v3039_v21  ;;  %v10656_v47 = vmax.f32 %v10654_v25, %v10655_v22 }
 0x228   :  { %v4042_v62 = vmax.f32 %v4040_v31, %v4041_v13  ;;  %v3028_v44 = vmax.f32 %v3026_v24, %v3027_v38  ;;  %v3047_v0 = vmax.f32 %v3045_v34, %v3046_v40  ;;  %v1316_v41 = vrot.slane %v1302_v8, %v7531_v46 }
 0x229   :  { %v4488_v1 = vsel %vm4469_vm10, %v10656_v47, %v4487_v30  ;;  %v1317_v3 = vcombine.high %v1309_v6, %v1309_v6  ;;  %v10657_v10 = vrot.slane %v8302_v2, 1  ;;  %v3035_v18 = vmax.f32 %v3033_v55, %v3034_v5 }
 0x22a   :  { %v3041_v23 = vrot.slane %v3040_v36, 1  ;;  %v2966_v63 = vsel %vm2153_vm3, %v1309_v6, -inf  ;;  %v10658_v21 = vrot.slane %v8347_v16, 1  ;;  %v1318_v31 = vcombine.high %v1316_v41, %v1316_v41 }
 0x22b   :  { %v8465_v61 = vmax.f32 %v8302_v2, %v10657_v10  ;;  %v2967_v24 = vrot.slane %v2966_v63, 4  ;;  %v8474_v34 = vsel %vm4593_vm11, 0.0, %v4488_v1  ;;  %v3048_v30 = vrot.slane %v3047_v0, 1 }
 0x22c   :  { %v8471_v32 = vmax.f32 %v8347_v16, %v10658_v21  ;;  %10659 = vst [vmem:[#allocation18_spill] sm:$0xff] %v8474_v34  ;;  %v8477_v13 = vsel %vm3946_vm4, %v3028_v44, -inf  ;;  %v2973_v2 = vsel %vm2153_vm3, %v1317_v3, -inf  ;;  %v2980_v55 = vsel %vm2153_vm3, %v1316_v41, -inf }
 0x22d   :  { %10660 = vst [vmem:[#allocation17_spill] sm:$0xff] %v8477_v13  ;;  %v3042_v38 = vmax.f32 %v3040_v36, %v3041_v23  ;;  %v2968_v40 = vmax.f32 %v2966_v63, %v2967_v24  ;;  %v2974_v8 = vrot.slane %v2973_v2, 4  ;;  %v2981_v6 = vrot.slane %v2980_v55, 4 }
 0x22e   :  { %v8482_v16 = vsel %vm3946_vm4, %v3035_v18, -inf  ;;  %v2987_v5 = vsel %vm2153_vm3, %v1318_v31, -inf  ;;  %v6970_v25 = vpack.i.bf16 %v8474_v34, %v8328_v37  ;;  %v4613_v22 = vsel %vm4593_vm11, %v4042_v62, 0.0 }
 0x22f   :  { %10661 = vst [vmem:[#allocation16_spill] sm:$0xff] %v8482_v16  ;;  %v2969_v47 = vrot.slane %v2968_v40, 2  ;;  %v2975_v1 = vmax.f32 %v2973_v2, %v2974_v8  ;;  %v2982_v44 = vmax.f32 %v2980_v55, %v2981_v6  ;;  %v2988_v3 = vrot.slane %v2987_v5, 4 }
 0x230   :  { %6971 = vrot.lane.b32.xlu1 %v6970_v25, %s7314_s18  ;;  %v4667_v36 = vrot.slane %v8474_v34, 1  ;;  %v4668_v41 = vrot.slane %v4613_v22, 1  ;;  %v4756_v10 = vrot.slane %v8474_v34, 2  ;;  %v4757_v18 = vrot.slane %v4613_v22, 2 }
 0x231   :  { %v2970_v23 = vmax.f32 %v2968_v40, %v2969_v47  ;;  %v2976_v63 = vrot.slane %v2975_v1, 2  ;;  %v2983_v21 = vrot.slane %v2982_v44, 2  ;;  %v2989_v31 = vmax.f32 %v2987_v5, %v2988_v3 }
 0x232   :  { %v8492_v24 = vsel %vm4655_vm12, %v4667_v36, %v4668_v41  ;;  %v8495_v62 = vsel %vm386_vm1, %v4756_v10, %v4757_v18  ;;  %v563_v2 = vadd.f32 %v8206_v35, %v8130_v20  ;;  %v555_v55 = vadd.f32 %v8206_v35, %v8132_v17 }
 0x233   :  { %10662 = vst [vmem:[#allocation22_spill] sm:$0xff] %v8495_v62  ;;  %v2971_v8 = vrot.slane %v2970_v23, 1  ;;  %v2977_v6 = vmax.f32 %v2975_v1, %v2976_v63  ;;  %v2984_v25 = vmax.f32 %v2982_v44, %v2983_v21  ;;  %v2990_v22 = vrot.slane %v2989_v31, 2 }
 0x234   :  { %v6975_v40 = vpack.i.bf16 %v8492_v24, %v8355_v43  ;;  %v6980_v5 = vpack.i.bf16 %v8495_v62, %v8352_v33  ;;  %v715_v47 = vmax.f32 %v563_v2, 0.0  ;;  %v713_v3 = vmax.f32 %v555_v55, 0.0 }
 0x235   :  { %v2972_v36 = vmax.f32 %v2970_v23, %v2971_v8  ;;  %v2978_v41 = vrot.slane %v2977_v6, 1  ;;  %v2985_v10 = vrot.slane %v2984_v25, 1  ;;  %v8505_v18 = vmax.f32 %v2989_v31, %v2990_v22 }
 0x236   :  { %v8507_v20 = vmax.f32 %v3047_v0, %v3048_v30  ;;  %v8510_v17 = vsel %vm3946_vm4, %v3042_v38, -inf  ;;  %6976 = vrot.lane.b32.xlu0 %v6975_v40, %s7315_s19  ;;  %6981 = vrot.lane.b32.xlu1 %v6980_v5, %s7316_s22  ;;  %v1387_v43 = vcombine.high %v715_v47, %v715_v47  ;;  %v1394_v1 = vrot.slane %v715_v47, %v7531_v46 }
 0x237   :  { %v2979_v33 = vmax.f32 %v2977_v6, %v2978_v41  ;;  %v8516_v44 = vsel %vm3946_vm4, %v2972_v36, -inf  ;;  %v1353_v23 = vcombine.high %v713_v3, %v713_v3  ;;  %v8520_v63 = vsel %vm3946_vm4, %v8188_v7, -inf }
 0x238   :  { %10663 = vst [vmem:[#allocation19_spill] sm:$0xff] %v8507_v20  ;;  %10664 = vst [vmem:[#allocation23_spill] sm:$0xff] %v8516_v44  ;;  %v1401_v30 = vrot.slane %v1387_v43, %v7531_v46  ;;  %v1402_v38 = vcombine.high %v1394_v1, %v1394_v1  ;;  %v3106_v21 = vsel %vm2153_vm3, %v1394_v1, -inf  ;;  %v8526_v31 = vmax.f32 %v2984_v25, %v2985_v10 }
 0x239   :  { %v8530_v55 = vsel %vm3946_vm4, %v2979_v33, -inf  ;;  %v3107_v8 = vrot.slane %v3106_v21, 4  ;;  %v1360_v25 = vrot.slane %v713_v3, %v7531_v46  ;;  %v1367_v10 = vrot.slane %v1353_v23, %v7531_v46 }
 0x23a   :  { %10665 = vst [vmem:[#allocation20_spill] sm:$0xff] %v8530_v55  ;;  %v1403_v6 = vcombine.high %v1401_v30, %v1401_v30  ;;  %v3113_v22 = vsel %vm2153_vm3, %v1402_v38, -inf  ;;  %v3120_v40 = vsel %vm2153_vm3, %v1401_v30, -inf  ;;  %v566_v43 = vadd.f32 %v8206_v35, %v8135_v53  ;;  %v8547_v55 = vpop.f32.mrb[44].mxu0 }
 0x23b   :  { %v3108_v5 = vmax.f32 %v3106_v21, %v3107_v8  ;;  %v3114_v47 = vrot.slane %v3113_v22, 4  ;;  %v3121_v36 = vrot.slane %v3120_v40, 4  ;;  %v558_v1 = vadd.f32 %v8206_v35, %v8154_v42 }
 0x23c   :  { %v3127_v41 = vsel %vm2153_vm3, %v1403_v6, -inf  ;;  %v1368_v30 = vcombine.high %v1360_v25, %v1360_v25  ;;  %v1369_v21 = vcombine.high %v1367_v10, %v1367_v10  ;;  %v3050_v8 = vsel %vm2153_vm3, %v1360_v25, -inf }
 0x23d   :  { %v3109_v33 = vrot.slane %v3108_v5, 2  ;;  %v3115_v7 = vmax.f32 %v3113_v22, %v3114_v47  ;;  %v3122_v38 = vmax.f32 %v3120_v40, %v3121_v36  ;;  %v3128_v0 = vrot.slane %v3127_v41, 4 }
 0x23e   :  { %v3064_v3 = vsel %vm2153_vm3, %v1367_v10, -inf  ;;  %v3051_v2 = vrot.slane %v3050_v8, 4  ;;  %v3057_v53 = vsel %vm2153_vm3, %v1368_v30, -inf  ;;  %v3071_v42 = vsel %vm2153_vm3, %v1369_v21, -inf }
 0x23f   :  { %v3110_v48 = vmax.f32 %v3108_v5, %v3109_v33  ;;  %v3116_v6 = vrot.slane %v3115_v7, 2  ;;  %v3123_v59 = vrot.slane %v3122_v38, 2  ;;  %v3129_v23 = vmax.f32 %v3127_v41, %v3128_v0  ;;  %v8549_v41 = vpop.f32.mrb[45].mxu0 }
 0x240   :  { %v3065_v37 = vrot.slane %v3064_v3, 4  ;;  %v3052_v36 = vmax.f32 %v3050_v8, %v3051_v2  ;;  %v3058_v20 = vrot.slane %v3057_v53, 4  ;;  %v3072_v25 = vrot.slane %v3071_v42, 4  ;;  %v8551_v12 = vpop.f32.mrb[46].mxu0 }
 0x241   :  { %v3111_v35 = vrot.slane %v3110_v48, 1  ;;  %v3117_v22 = vmax.f32 %v3115_v7, %v3116_v6  ;;  %v3124_v40 = vmax.f32 %v3122_v38, %v3123_v59  ;;  %v3130_v47 = vrot.slane %v3129_v23, 2 }
 0x242   :  { %v3066_v16 = vmax.f32 %v3064_v3, %v3065_v37  ;;  %v3053_v30 = vrot.slane %v3052_v36, 2  ;;  %v3059_v13 = vmax.f32 %v3057_v53, %v3058_v20  ;;  %v3073_v21 = vmax.f32 %v3071_v42, %v3072_v25 }
 0x243   :  { %v3112_v5 = vmax.f32 %v3110_v48, %v3111_v35  ;;  %v3118_v10 = vrot.slane %v3117_v22, 1  ;;  %v3125_v33 = vrot.slane %v3124_v40, 1  ;;  %v3131_v0 = vmax.f32 %v3129_v23, %v3130_v47 }
 0x244   :  { %v3067_v44 = vrot.slane %v3066_v16, 2  ;;  %v3054_v38 = vmax.f32 %v3052_v36, %v3053_v30  ;;  %v3060_v8 = vrot.slane %v3059_v13, 2  ;;  %v3074_v48 = vrot.slane %v3073_v21, 2 }
 0x245   :  { %v3119_v59 = vmax.f32 %v3117_v22, %v3118_v10  ;;  %v3126_v7 = vmax.f32 %v3124_v40, %v3125_v33  ;;  %v3132_v2 = vrot.slane %v3131_v0, 1  ;;  %v4140_v37 = vsel %vm3946_vm4, %v3112_v5, -inf }
 0x246   :  { %v3068_v3 = vmax.f32 %v3066_v16, %v3067_v44  ;;  %v716_v20 = vmax.f32 %v566_v43, 0.0  ;;  %v3055_v53 = vrot.slane %v3054_v38, 1  ;;  %v3061_v42 = vmax.f32 %v3059_v13, %v3060_v8 }
 0x247   :  { %v3133_v6 = vmax.f32 %v3131_v0, %v3132_v2  ;;  %v4143_v23 = vsel %vm3946_vm4, %v3119_v59, -inf  ;;  %v8556_v35 = vsel %vm3946_vm4, %v3126_v7, -inf  ;;  %v3075_v25 = vmax.f32 %v3073_v21, %v3074_v48 }
 0x248   :  { %10666 = vst [vmem:[#allocation24_spill] sm:$0xff] %v8556_v35  ;;  %v3069_v47 = vrot.slane %v3068_v3, 1  ;;  %v1404_v40 = vcombine.high %v716_v20, %v716_v20  ;;  %v1411_v36 = vrot.slane %v716_v20, %v7531_v46  ;;  %v714_v5 = vmax.f32 %v558_v1, 0.0 }
 0x249   :  { %v8559_v22 = vsel %vm3946_vm4, %v3133_v6, -inf  ;;  %v3056_v16 = vmax.f32 %v3054_v38, %v3055_v53  ;;  %v3062_v44 = vrot.slane %v3061_v42, 1  ;;  %v3076_v33 = vrot.slane %v3075_v25, 1 }
 0x24a   :  { %10667 = vst [vmem:[#allocation21_spill] sm:$0xff] %v8559_v22  ;;  %v3070_v10 = vmax.f32 %v3068_v3, %v3069_v47  ;;  %v1418_v0 = vrot.slane %v1404_v40, %v7531_v46  ;;  %v1419_v30 = vcombine.high %v1411_v36, %v1411_v36  ;;  %v3134_v43 = vsel %vm2153_vm3, %v1411_v36, -inf }
 0x24b   :  { %v1370_v59 = vcombine.high %v714_v5, %v714_v5  ;;  %v3063_v13 = vmax.f32 %v3061_v42, %v3062_v44  ;;  %v3077_v7 = vmax.f32 %v3075_v25, %v3076_v33  ;;  %v4139_v21 = vsel %vm3946_vm4, %v3056_v16, -inf }
 0x24c   :  { %v8566_v2 = vsel %vm3946_vm4, %v3070_v10, -inf  ;;  %v4141_v8 = vmax.f32 %v4139_v21, %v4140_v37  ;;  %v1420_v38 = vcombine.high %v1418_v0, %v1418_v0  ;;  %v3135_v3 = vrot.slane %v3134_v43, 4 }
 0x24d   :  { %10668 = vst [vmem:[#allocation42_spill] sm:$0xff] %v8566_v2  ;;  %v4142_v48 = vsel %vm3946_vm4, %v3063_v13, -inf  ;;  %v8572_v6 = vsel %vm3946_vm4, %v3077_v7, -inf  ;;  %v3141_v20 = vsel %vm2153_vm3, %v1419_v30, -inf  ;;  %v3148_v53 = vsel %vm2153_vm3, %v1418_v0, -inf }
 0x24e   :  { %10669 = vst [vmem:[#allocation43_spill] sm:$0xff] %v8572_v6  ;;  %v4144_v42 = vmax.f32 %v4142_v48, %v4143_v23  ;;  %v3136_v25 = vmax.f32 %v3134_v43, %v3135_v3  ;;  %v3142_v37 = vrot.slane %v3141_v20, 4  ;;  %v3149_v40 = vrot.slane %v3148_v53, 4 }
 0x24f   :  { %v3155_v36 = vsel %vm2153_vm3, %v1420_v38, -inf  ;;  %v1377_v16 = vrot.slane %v714_v5, %v7531_v46  ;;  %v1384_v44 = vrot.slane %v1370_v59, %v7531_v46 }
 0x250   :  { %v8582_v10 = vsel %vm4459_vm5, %v4144_v42, %v4141_v8  ;;  %v3137_v33 = vrot.slane %v3136_v25, 2  ;;  %v3143_v30 = vmax.f32 %v3141_v20, %v3142_v37  ;;  %v3156_v13 = vrot.slane %v3155_v36, 4 }
 0x251   :  { %10670 = vst [vmem:[#allocation44_spill] sm:$0xff] %v8582_v10  ;;  %v3150_v0 = vmax.f32 %v3148_v53, %v3149_v40  ;;  %v1385_v23 = vcombine.high %v1377_v16, %v1377_v16  ;;  %v1386_v7 = vcombine.high %v1384_v44, %v1384_v44  ;;  %v3078_v21 = vsel %vm2153_vm3, %v1377_v16, -inf }
 0x252   :  { %v3138_v43 = vmax.f32 %v3136_v25, %v3137_v33  ;;  %v3144_v3 = vrot.slane %v3143_v30, 2  ;;  %v3157_v48 = vmax.f32 %v3155_v36, %v3156_v13  ;;  %v3079_v47 = vrot.slane %v3078_v21, 4 }
 0x253   :  { %v3151_v38 = vrot.slane %v3150_v0, 2  ;;  %v3085_v5 = vsel %vm2153_vm3, %v1385_v23, -inf  ;;  %v3092_v59 = vsel %vm2153_vm3, %v1384_v44, -inf  ;;  %v3099_v8 = vsel %vm2153_vm3, %v1386_v7, -inf }
 0x254   :  { %v3139_v42 = vrot.slane %v3138_v43, 1  ;;  %v3145_v1 = vmax.f32 %v3143_v30, %v3144_v3  ;;  %v3158_v20 = vrot.slane %v3157_v48, 2  ;;  %v3080_v37 = vmax.f32 %v3078_v21, %v3079_v47 }
 0x255   :  { %v3152_v53 = vmax.f32 %v3150_v0, %v3151_v38  ;;  %v3086_v40 = vrot.slane %v3085_v5, 4  ;;  %v3093_v22 = vrot.slane %v3092_v59, 4  ;;  %v3100_v6 = vrot.slane %v3099_v8, 4 }
 0x256   :  { %v3140_v16 = vmax.f32 %v3138_v43, %v3139_v42  ;;  %v3146_v25 = vrot.slane %v3145_v1, 1  ;;  %v3159_v33 = vmax.f32 %v3157_v48, %v3158_v20  ;;  %v3081_v36 = vrot.slane %v3080_v37, 2 }
 0x257   :  { %v3153_v13 = vrot.slane %v3152_v53, 1  ;;  %v3087_v35 = vmax.f32 %v3085_v5, %v3086_v40  ;;  %v3094_v2 = vmax.f32 %v3092_v59, %v3093_v22  ;;  %v3101_v23 = vmax.f32 %v3099_v8, %v3100_v6 }
 0x258   :  { %v10671_v44 = vrot.slane %v8505_v18, 1  ;;  %v8595_v47 = vsel %vm3946_vm4, %v8526_v31, -inf  ;;  %v3160_v30 = vrot.slane %v3159_v33, 1  ;;  %v3082_v0 = vmax.f32 %v3080_v37, %v3081_v36 }
 0x259   :  { %v3147_v21 = vmax.f32 %v3145_v1, %v3146_v25  ;;  %v3088_v43 = vrot.slane %v3087_v35, 2  ;;  %v3095_v3 = vrot.slane %v3094_v2, 2  ;;  %v3102_v48 = vrot.slane %v3101_v23, 2  ;;  %v10681_v25 = vld [vmem:[#allocation29_spill] sm:$0xff] }
 0x25a   :  { %v8591_v7 = vmax.f32 %v8505_v18, %v10671_v44  ;;  %v3154_v38 = vmax.f32 %v3152_v53, %v3153_v13  ;;  %v8598_v5 = vsel %vm3946_vm4, %v3140_v16, -inf  ;;  %v3083_v22 = vrot.slane %v3082_v0, 1  ;;  %v10680_v16 = vld [vmem:[#allocation32_spill] sm:$0xff] }
 0x25b   :  { %10672 = vst [vmem:[#allocation45_spill] sm:$0xff] %v8598_v5  ;;  %v10673_v18 = vmax.f32 %v7982_v58, %v7972_v49  ;;  %v8605_v59 = vmax.f32 %v3159_v33, %v3160_v30  ;;  %v3089_v31 = vmax.f32 %v3087_v35, %v3088_v43  ;;  %v3096_v8 = vmax.f32 %v3094_v2, %v3095_v3  ;;  %v8618_v49 = vld [vmem:[%s10457_s2] ss:$0 sm:$0xff] }
 0x25c   :  { %v8607_v42 = vmax.f32 %v3101_v23, %v3102_v48  ;;  %v3084_v1 = vmax.f32 %v3082_v0, %v3083_v22  ;;  %v10675_v20 = vmax.f32 %v8071_v28, %v8014_v54  ;;  %v4065_v53 = vsel %vm3946_vm4, %v8033_v15, -inf  ;;  %v10677_v54 = vld [vmem:[#allocation27_spill] sm:$0xff] }
 0x25d   :  { %v4491_v6 = vsel %vm4463_vm7, %v10673_v18, %v7990_v56  ;;  %10674 = vst [vmem:[#allocation46_spill] sm:$0xff] %v8605_v59  ;;  %v579_v58 = vadd.f32 %v8618_v49, %v8258_v57  ;;  %v8623_v56 = vsel %vm3946_vm4, %v3147_v21, -inf  ;;  %v3090_v35 = vrot.slane %v3089_v31, 1 }
 0x25e   :  { %v4492_v37 = vsel %vm4465_vm8, %v10675_v20, %v4491_v6  ;;  %10676 = vst [vmem:[#allocation47_spill] sm:$0xff] %v8623_v56  ;;  %v3097_v2 = vrot.slane %v3096_v8, 1  ;;  %v10678_v28 = vmax.f32 %v8085_v14, %v10677_v54  ;;  %v8630_v15 = vsel %vm3946_vm4, %v3084_v1, -inf }
 0x25f   :  { %10679 = vst [vmem:[#allocation27_spill] sm:$0xff] %v8630_v15  ;;  %v10682_v33 = vmax.f32 %v10680_v16, %v10681_v25  ;;  %v4066_v57 = vmax.f32 %v8520_v63, %v4065_v53  ;;  %v719_v13 = vmax.f32 %v579_v58, 0.0  ;;  %v8638_v23 = vsel %vm3946_vm4, %v3154_v38, -inf  ;;  %v8650_v63 = vpop.f32.mrb[47].mxu0 }
 0x260   :  { %v4493_v40 = vsel %vm4467_vm9, %v10678_v28, %v4492_v37  ;;  %10683 = vst [vmem:[#allocation32_spill] sm:$0xff] %v8638_v23  ;;  %v3091_v44 = vmax.f32 %v3089_v31, %v3090_v35  ;;  %v8652_v48 = vmax.f32 %v3096_v8, %v3097_v2  ;;  %v571_v37 = vadd.f32 %v8618_v49, %v8264_v60 }
 0x261   :  { %v4494_v36 = vsel %vm4469_vm10, %v10682_v33, %v4493_v40  ;;  %v8647_v21 = vsel %vm4593_vm11, %v4066_v57, 0.0  ;;  %v1455_v43 = vcombine.high %v719_v13, %v719_v13  ;;  %v1462_v3 = vrot.slane %v719_v13, %v7531_v46 }
 0x262   :  { %v8644_v0 = vsel %vm4593_vm11, 0.0, %v4494_v36  ;;  %v8655_v38 = vsel %vm3946_vm4, %v3091_v44, -inf  ;;  %v4671_v31 = vrot.slane %v8647_v21, 1  ;;  %v582_v53 = vadd.f32 %v8618_v49, %v8266_v51 }
 0x263   :  { %10684 = vst [vmem:[#allocation29_spill] sm:$0xff] %v8644_v0  ;;  %10685 = vst [vmem:[#allocation48_spill] sm:$0xff] %v8655_v38  ;;  %v6985_v22 = vpack.i.bf16 %v8644_v0, %v8474_v34  ;;  %v4670_v18 = vrot.slane %v8644_v0, 1  ;;  %v1469_v1 = vrot.slane %v1455_v43, %v7531_v46  ;;  %v1470_v20 = vcombine.high %v1462_v3, %v1462_v3 }
 0x264   :  { %v3218_v8 = vsel %vm2153_vm3, %v1462_v3, -inf  ;;  %v717_v51 = vmax.f32 %v571_v37, 0.0  ;;  %v720_v44 = vmax.f32 %v582_v53, 0.0 }
 0x265   :  { %6986 = vrot.lane.b32.xlu0 %v6985_v22, %s7317_s23  ;;  %v8672_v35 = vsel %vm4655_vm12, %v4670_v18, %v4671_v31  ;;  %v1471_v2 = vcombine.high %v1469_v1, %v1469_v1  ;;  %v3219_v54 = vrot.slane %v3218_v8, 4  ;;  %v3225_v28 = vsel %vm2153_vm3, %v1470_v20, -inf }
 0x266   :  { %v6990_v40 = vpack.i.bf16 %v8672_v35, %v8492_v24  ;;  %v3226_v16 = vrot.slane %v3225_v28, 4  ;;  %v3232_v25 = vsel %vm2153_vm3, %v1469_v1, -inf  ;;  %v1421_v24 = vcombine.high %v717_v51, %v717_v51 }
 0x267   :  { %v3220_v33 = vmax.f32 %v3218_v8, %v3219_v54  ;;  %v3233_v60 = vrot.slane %v3232_v25, 4  ;;  %v3239_v36 = vsel %vm2153_vm3, %v1471_v2, -inf  ;;  %v1428_v18 = vrot.slane %v717_v51, %v7531_v46 }
 0x268   :  { %6991 = vrot.lane.b32.xlu1 %v6990_v40, %s7318_s24  ;;  %v3227_v57 = vmax.f32 %v3225_v28, %v3226_v16  ;;  %v3240_v13 = vrot.slane %v3239_v36, 4  ;;  %v1472_v20 = vcombine.high %v720_v44, %v720_v44  ;;  %v1479_v8 = vrot.slane %v720_v44, %v7531_v46 }
 0x269   :  { %6996 = vrot.lane.b32.xlu0 %v6990_v40, %s7312_s16  ;;  %v3221_v3 = vrot.slane %v3220_v33, 2  ;;  %v3234_v22 = vmax.f32 %v3232_v25, %v3233_v60  ;;  %v1435_v54 = vrot.slane %v1421_v24, %v7531_v46  ;;  %v1436_v40 = vcombine.high %v1428_v18, %v1428_v18 }
 0x26a   :  { %v3228_v31 = vrot.slane %v3227_v57, 2  ;;  %v3241_v1 = vmax.f32 %v3239_v36, %v3240_v13  ;;  %v3162_v53 = vsel %vm2153_vm3, %v1428_v18, -inf  ;;  %v1486_v6 = vrot.slane %v1472_v20, %v7531_v46 }
 0x26b   :  { %v3222_v37 = vmax.f32 %v3220_v33, %v3221_v3  ;;  %v3235_v2 = vrot.slane %v3234_v22, 2  ;;  %v1437_v14 = vcombine.high %v1435_v54, %v1435_v54  ;;  %v3163_v51 = vrot.slane %v3162_v53, 4 }
 0x26c   :  { %v3229_v28 = vmax.f32 %v3227_v57, %v3228_v31  ;;  %v3242_v16 = vrot.slane %v3241_v1, 2  ;;  %v3169_v13 = vsel %vm2153_vm3, %v1436_v40, -inf  ;;  %v3176_v33 = vsel %vm2153_vm3, %v1435_v54, -inf  ;;  %v8689_v57 = vpop.f32.mrb[48].mxu0 }
 0x26d   :  { %v3223_v25 = vrot.slane %v3222_v37, 1  ;;  %v3236_v60 = vmax.f32 %v3234_v22, %v3235_v2  ;;  %v3164_v24 = vmax.f32 %v3162_v53, %v3163_v51  ;;  %v3170_v58 = vrot.slane %v3169_v13, 4 }
 0x26e   :  { %v3230_v30 = vrot.slane %v3229_v28, 1  ;;  %v3243_v36 = vmax.f32 %v3241_v1, %v3242_v16  ;;  %v3177_v43 = vrot.slane %v3176_v33, 4  ;;  %v3183_v20 = vsel %vm2153_vm3, %v1437_v14, -inf }
 0x26f   :  { %v3224_v44 = vmax.f32 %v3222_v37, %v3223_v25  ;;  %v3237_v3 = vrot.slane %v3236_v60, 1  ;;  %v3165_v34 = vrot.slane %v3164_v24, 2  ;;  %v3171_v1 = vmax.f32 %v3169_v13, %v3170_v58  ;;  %v8694_v25 = vpop.f32.mrb[49].mxu0 }
 0x270   :  { %v3231_v31 = vmax.f32 %v3229_v28, %v3230_v30  ;;  %v3244_v18 = vrot.slane %v3243_v36, 1  ;;  %v3178_v54 = vmax.f32 %v3176_v33, %v3177_v43  ;;  %v3184_v37 = vrot.slane %v3183_v20, 4  ;;  %v8697_v59 = vpop.f32.mrb[50].mxu0 }
 0x271   :  { %v3238_v22 = vmax.f32 %v3236_v60, %v3237_v3  ;;  %v4164_v2 = vsel %vm3946_vm4, %v3224_v44, -inf  ;;  %v3166_v51 = vmax.f32 %v3164_v24, %v3165_v34  ;;  %v3172_v30 = vrot.slane %v3171_v1, 2  ;;  %10686 = vst [vmem:[#allocation49_spill] sm:$0xff] %v8697_v59 }
 0x272   :  { %v3245_v16 = vmax.f32 %v3243_v36, %v3244_v18  ;;  %v4167_v40 = vsel %vm3946_vm4, %v3231_v31, -inf  ;;  %v1487_v28 = vcombine.high %v1479_v8, %v1479_v8  ;;  %v3179_v60 = vrot.slane %v3178_v54, 2 }
 0x273   :  { %v4170_v53 = vsel %vm3946_vm4, %v3238_v22, -inf  ;;  %v3185_v44 = vmax.f32 %v3183_v20, %v3184_v37  ;;  %v1488_v58 = vcombine.high %v1486_v6, %v1486_v6  ;;  %v3167_v36 = vrot.slane %v3166_v51, 1 }
 0x274   :  { %v8700_v14 = vsel %vm3946_vm4, %v3245_v16, -inf  ;;  %v3173_v13 = vmax.f32 %v3171_v1, %v3172_v30  ;;  %v3246_v43 = vsel %vm2153_vm3, %v1479_v8, -inf  ;;  %v3253_v33 = vsel %vm2153_vm3, %v1487_v28, -inf }
 0x275   :  { %10687 = vst [vmem:[#allocation50_spill] sm:$0xff] %v8700_v14  ;;  %v3180_v3 = vmax.f32 %v3178_v54, %v3179_v60  ;;  %v3186_v31 = vrot.slane %v3185_v44, 2  ;;  %v3247_v18 = vrot.slane %v3246_v43, 4  ;;  %v3254_v34 = vrot.slane %v3253_v33, 4 }
 0x276   :  { %v3168_v24 = vmax.f32 %v3166_v51, %v3167_v36  ;;  %v3174_v22 = vrot.slane %v3173_v13, 1  ;;  %v3260_v56 = vsel %vm2153_vm3, %v1486_v6, -inf  ;;  %v3267_v16 = vsel %vm2153_vm3, %v1488_v58, -inf }
 0x277   :  { %v3181_v38 = vrot.slane %v3180_v3, 1  ;;  %v3187_v5 = vmax.f32 %v3185_v44, %v3186_v31  ;;  %v3248_v20 = vmax.f32 %v3246_v43, %v3247_v18  ;;  %v3255_v37 = vmax.f32 %v3253_v33, %v3254_v34 }
 0x278   :  { %v3175_v15 = vmax.f32 %v3173_v13, %v3174_v22  ;;  %v4163_v1 = vsel %vm3946_vm4, %v3168_v24, -inf  ;;  %v3261_v8 = vrot.slane %v3260_v56, 4  ;;  %v3268_v30 = vrot.slane %v3267_v16, 4 }
 0x279   :  { %v3182_v28 = vmax.f32 %v3180_v3, %v3181_v38  ;;  %v3188_v54 = vrot.slane %v3187_v5, 1  ;;  %v4165_v60 = vmax.f32 %v4163_v1, %v4164_v2  ;;  %v3249_v10 = vrot.slane %v3248_v20, 2 }
 0x27a   :  { %v4166_v51 = vsel %vm3946_vm4, %v3175_v15, -inf  ;;  %v3256_v36 = vrot.slane %v3255_v37, 2  ;;  %v3262_v23 = vmax.f32 %v3260_v56, %v3261_v8  ;;  %v3269_v6 = vmax.f32 %v3267_v16, %v3268_v30 }
 0x27b   :  { %v3189_v59 = vmax.f32 %v3187_v5, %v3188_v54  ;;  %v4168_v58 = vmax.f32 %v4166_v51, %v4167_v40  ;;  %v4169_v44 = vsel %vm3946_vm4, %v3182_v28, -inf  ;;  %v3250_v43 = vmax.f32 %v3248_v20, %v3249_v10  ;;  %v10697_v28 = vld [vmem:[#allocation34_spill] sm:$0xff] }
 0x27c   :  { %v4171_v33 = vmax.f32 %v4169_v44, %v4170_v53  ;;  %v3257_v13 = vmax.f32 %v3255_v37, %v3256_v36  ;;  %v3263_v31 = vrot.slane %v3262_v23, 2  ;;  %v3270_v18 = vrot.slane %v3269_v6, 2  ;;  %v10719_v10 = vld [vmem:[#allocation38_spill] sm:$0xff] }
 0x27d   :  { %v8710_v34 = vsel %vm3946_vm4, %v3189_v59, -inf  ;;  %v4519_v38 = vsel %vm4459_vm5, %v4168_v58, %v4165_v60  ;;  %v3251_v2 = vrot.slane %v3250_v43, 1  ;;  %v10689_v15 = vrot.slane %v8647_v21, 2  ;;  %v10699_v60 = vld [vmem:[#allocation6_spill] sm:$0xff]  ;;  %v10704_v58 = vld [vmem:[#allocation7_spill] sm:$0xff] }
 0x27e   :  { %10688 = vst [vmem:[#allocation51_spill] sm:$0xff] %v8710_v34  ;;  %v10690_v56 = vrot.slane %v8644_v0, 2  ;;  %v8723_v40 = vsel %vm4461_vm6, %v4171_v33, %v4519_v38  ;;  %v3258_v53 = vrot.slane %v3257_v13, 1  ;;  %v3264_v3 = vmax.f32 %v3262_v23, %v3263_v31  ;;  %v10706_v31 = vld [vmem:[#allocation35_spill] sm:$0xff] }
 0x27f   :  { %10692 = vst [vmem:[#allocation53_spill] sm:$0xff] %v8723_v40  ;;  %v3252_v59 = vmax.f32 %v3250_v43, %v3251_v2  ;;  %v8725_v24 = vmax.f32 %v3269_v6, %v3270_v18  ;;  %v574_v21 = vadd.f32 %v8618_v49, %v8345_v50  ;;  %v10693_v16 = vrot.slane %v8607_v42, 1 }
 0x280   :  { %v8718_v5 = vsel %vm386_vm1, %v10690_v56, %v10689_v15  ;;  %v3259_v37 = vmax.f32 %v3257_v13, %v3258_v53  ;;  %v3265_v1 = vrot.slane %v3264_v3, 1  ;;  %v10695_v23 = vmax.f32 %v8159_v9, %v8144_v4  ;;  %v10701_v9 = vld [vmem:[#allocation36_spill] sm:$0xff]  ;;  %v10705_v13 = vld [vmem:[#allocation37_spill] sm:$0xff]  ;;  %v10710_v53 = vld [vmem:[#allocation26_spill] sm:$0xff] }
 0x281   :  { %10691 = vst [vmem:[#allocation52_spill] sm:$0xff] %v8718_v5  ;;  %v7000_v22 = vpack.i.bf16 %v8718_v5, %v8495_v62  ;;  %v8734_v20 = vmax.f32 %v8607_v42, %v10693_v16  ;;  %v8743_v30 = vsel %vm3946_vm4, %v8652_v48, -inf  ;;  %v718_v50 = vmax.f32 %v574_v21, 0.0 }
 0x282   :  { %v4497_v8 = vsel %vm4463_vm7, %v10695_v23, %v8167_v52  ;;  %10696 = vst [vmem:[#allocation55_spill] sm:$0xff] %v8743_v30  ;;  %v10698_v54 = vmax.f32 %v8225_v45, %v10697_v28  ;;  %v4088_v51 = vsel %vm3946_vm4, %v10699_v60, -inf  ;;  %v8754_v4 = vsel %vm3946_vm4, %v3252_v59, -inf  ;;  %v10702_v52 = vld [vmem:[#allocation15_spill] sm:$0xff] }
 0x283   :  { %10694 = vst [vmem:[#allocation54_spill] sm:$0xff] %v8734_v20  ;;  %7001 = vrot.lane.b32.xlu1 %v7000_v22, %s7313_s17  ;;  %10700 = vst [vmem:[#allocation34_spill] sm:$0xff] %v8754_v4  ;;  %v10703_v48 = vmax.f32 %v10701_v9, %v10702_v52  ;;  %v4089_v44 = vsel %vm3946_vm4, %v10704_v58, -inf  ;;  %v3266_v43 = vmax.f32 %v3264_v3, %v3265_v1  ;;  %v8768_v2 = vsel %vm3946_vm4, %v3259_v37, -inf }
 0x284   :  { %v4498_v42 = vsel %vm4465_vm8, %v10698_v54, %v4497_v8  ;;  %v1438_v45 = vcombine.high %v718_v50, %v718_v50  ;;  %v1445_v33 = vrot.slane %v718_v50, %v7531_v46  ;;  %v10707_v18 = vmax.f32 %v10705_v13, %v10706_v31  ;;  %10708 = vst [vmem:[#allocation6_spill] sm:$0xff] %v8768_v2 }
 0x285   :  { %v4499_v6 = vsel %vm4467_vm9, %v10703_v48, %v4498_v42  ;;  %v4090_v56 = vmax.f32 %v4088_v51, %v4089_v44  ;;  %v595_v59 = vadd.f32 %v8618_v49, %v10710_v53  ;;  %v8786_v60 = vsel %vm3946_vm4, %v3266_v43, -inf }
 0x286   :  { %v4500_v38 = vsel %vm4469_vm10, %v10707_v18, %v4499_v6  ;;  %v1452_v3 = vrot.slane %v1438_v45, %v7531_v46  ;;  %v1453_v22 = vcombine.high %v1445_v33, %v1445_v33  ;;  %v3190_v21 = vsel %vm2153_vm3, %v1445_v33, -inf  ;;  %10711 = vst [vmem:[#allocation15_spill] sm:$0xff] %v8786_v60 }
 0x287   :  { %v8771_v15 = vsel %vm4593_vm11, 0.0, %v4500_v38  ;;  %v3191_v1 = vrot.slane %v3190_v21, 4  ;;  %v4615_v23 = vsel %vm4593_vm11, %v4090_v56, 0.0  ;;  %v723_v44 = vmax.f32 %v595_v59, 0.0 }
 0x288   :  { %10709 = vst [vmem:[#allocation36_spill] sm:$0xff] %v8771_v15  ;;  %v7005_v16 = vpack.i.bf16 %v8771_v15, %v8644_v0  ;;  %v4673_v37 = vrot.slane %v8771_v15, 1  ;;  %v4762_v8 = vrot.slane %v8771_v15, 2  ;;  %v1454_v50 = vcombine.high %v1452_v3, %v1452_v3 }
 0x289   :  { %v3197_v28 = vsel %vm2153_vm3, %v1453_v22, -inf  ;;  %v3204_v54 = vsel %vm2153_vm3, %v1452_v3, -inf  ;;  %v4674_v42 = vrot.slane %v4615_v23, 1  ;;  %v3192_v51 = vmax.f32 %v3190_v21, %v3191_v1 }
 0x28a   :  { %7006 = vrot.lane.b32.xlu0 %v7005_v16, %s7314_s18  ;;  %v3198_v9 = vrot.slane %v3197_v28, 4  ;;  %v3205_v52 = vrot.slane %v3204_v54, 4  ;;  %v3211_v48 = vsel %vm2153_vm3, %v1454_v50, -inf  ;;  %v4763_v58 = vrot.slane %v4615_v23, 2 }
 0x28b   :  { %v8790_v6 = vsel %vm4655_vm12, %v4673_v37, %v4674_v42  ;;  %v3193_v45 = vrot.slane %v3192_v51, 2  ;;  %v3212_v31 = vrot.slane %v3211_v48, 4  ;;  %v1523_v38 = vcombine.high %v723_v44, %v723_v44 }
 0x28c   :  { %v3199_v33 = vmax.f32 %v3197_v28, %v3198_v9  ;;  %v3206_v13 = vmax.f32 %v3204_v54, %v3205_v52  ;;  %v7010_v18 = vpack.i.bf16 %v8790_v6, %v8672_v35  ;;  %v8795_v43 = vsel %vm386_vm1, %v4762_v8, %v4763_v58  ;;  %v8803_v28 = vpop.f32.mrb[51].mxu0 }
 0x28d   :  { %10712 = vst [vmem:[#allocation7_spill] sm:$0xff] %v8795_v43  ;;  %v1530_v56 = vrot.slane %v723_v44, %v7531_v46  ;;  %v3194_v53 = vmax.f32 %v3192_v51, %v3193_v45  ;;  %v3213_v21 = vmax.f32 %v3211_v48, %v3212_v31  ;;  %v7015_v59 = vpack.i.bf16 %v8795_v43, %v8718_v5 }
 0x28e   :  { %v3200_v3 = vrot.slane %v3199_v33, 2  ;;  %v3207_v22 = vrot.slane %v3206_v13, 2  ;;  %7011 = vrot.lane.b32.xlu1 %v7010_v18, %s7315_s19  ;;  %v1537_v16 = vrot.slane %v1523_v38, %v7531_v46 }
 0x28f   :  { %v1538_v1 = vcombine.high %v1530_v56, %v1530_v56  ;;  %v3330_v35 = vsel %vm2153_vm3, %v1530_v56, -inf  ;;  %v3195_v23 = vrot.slane %v3194_v53, 1  ;;  %v3214_v50 = vrot.slane %v3213_v21, 2  ;;  %7016 = vrot.lane.b32.xlu0 %v7015_v59, %s7316_s22 }
 0x290   :  { %v3201_v37 = vmax.f32 %v3199_v33, %v3200_v3  ;;  %v3208_v8 = vmax.f32 %v3206_v13, %v3207_v22  ;;  %v1539_v54 = vcombine.high %v1537_v16, %v1537_v16  ;;  %v3331_v42 = vrot.slane %v3330_v35, 4  ;;  %v10714_v3 = vld [vmem:[#allocation40_spill] sm:$0xff] }
 0x291   :  { %v3337_v51 = vsel %vm2153_vm3, %v1538_v1, -inf  ;;  %v3344_v9 = vsel %vm2153_vm3, %v1537_v16, -inf  ;;  %v3196_v52 = vmax.f32 %v3194_v53, %v3195_v23  ;;  %v8808_v44 = vmax.f32 %v3213_v21, %v3214_v50  ;;  %v8818_v1 = vpop.f32.mrb[52].mxu0  ;;  %v10718_v53 = vld [vmem:[#allocation39_spill] sm:$0xff] }
 0x292   :  { %v3202_v48 = vrot.slane %v3201_v37, 1  ;;  %v3209_v58 = vrot.slane %v3208_v8, 1  ;;  %v3332_v45 = vmax.f32 %v3330_v35, %v3331_v42  ;;  %v3338_v31 = vrot.slane %v3337_v51, 4  ;;  %v8827_v50 = vpop.f32.mrb[53].mxu0 }
 0x293   :  { %v3345_v33 = vrot.slane %v3344_v9, 4  ;;  %v3351_v13 = vsel %vm2153_vm3, %v1539_v54, -inf  ;;  %v8812_v56 = vsel %vm3946_vm4, %v3196_v52, -inf  ;;  %v587_v22 = vadd.f32 %v8618_v49, %v10714_v3  ;;  %v10717_v3 = vld [vmem:[#allocation8_spill] sm:$0xff]  ;;  %v8848_v5 = vpop.f32.mrb[54].mxu0 }
 0x294   :  { %v3203_v18 = vmax.f32 %v3201_v37, %v3202_v48  ;;  %v3210_v38 = vmax.f32 %v3208_v8, %v3209_v58  ;;  %10713 = vst [vmem:[#allocation37_spill] sm:$0xff] %v8812_v56  ;;  %v3333_v59 = vrot.slane %v3332_v45, 2  ;;  %v3339_v16 = vmax.f32 %v3337_v51, %v3338_v31  ;;  %v8868_v20 = vpop.f32.mrb[55].mxu0 }
 0x295   :  { %v3346_v21 = vmax.f32 %v3344_v9, %v3345_v33  ;;  %v3352_v8 = vrot.slane %v3351_v13, 4  ;;  %v721_v58 = vmax.f32 %v587_v22, 0.0  ;;  %v598_v31 = vadd.f32 %v8618_v49, %v8401_v26  ;;  %10721 = vst [vmem:[#allocation40_spill] sm:$0xff] %v8868_v20 }
 0x296   :  { %v8822_v23 = vsel %vm3946_vm4, %v3203_v18, -inf  ;;  %v8825_v37 = vsel %vm3946_vm4, %v3210_v38, -inf  ;;  %v3334_v51 = vmax.f32 %v3332_v45, %v3333_v59  ;;  %v3340_v9 = vrot.slane %v3339_v16, 2 }
 0x297   :  { %10715 = vst [vmem:[#allocation35_spill] sm:$0xff] %v8822_v23  ;;  %10716 = vst [vmem:[#allocation26_spill] sm:$0xff] %v8825_v37  ;;  %v3347_v52 = vrot.slane %v3346_v21, 2  ;;  %v3353_v48 = vmax.f32 %v3351_v13, %v3352_v8  ;;  %v590_v38 = vadd.f32 %v8618_v49, %v8416_v27  ;;  %v10720_v54 = vmax.f32 %v10718_v53, %v10719_v10 }
 0x298   :  { %v3335_v33 = vrot.slane %v3334_v51, 1  ;;  %v3341_v18 = vmax.f32 %v3339_v16, %v3340_v9  ;;  %v1489_v42 = vcombine.high %v721_v58, %v721_v58  ;;  %v1496_v13 = vrot.slane %v721_v58, %v7531_v46 }
 0x299   :  { %v8842_v35 = vsel %vm4463_vm7, %v10720_v54, %v10717_v3  ;;  %v3348_v45 = vmax.f32 %v3346_v21, %v3347_v52  ;;  %v3354_v59 = vrot.slane %v3353_v48, 2  ;;  %v724_v26 = vmax.f32 %v598_v31, 0.0 }
 0x29a   :  { %v3336_v22 = vmax.f32 %v3334_v51, %v3335_v33  ;;  %v3342_v8 = vrot.slane %v3341_v18, 1  ;;  %v8845_v36 = vmax.f32 %v590_v38, 0.0  ;;  %v1503_v27 = vrot.slane %v1489_v42, %v7531_v46 }
 0x29b   :  { %v3349_v16 = vrot.slane %v3348_v45, 1  ;;  %v3355_v9 = vmax.f32 %v3353_v48, %v3354_v59  ;;  %v1504_v0 = vcombine.high %v1496_v13, %v1496_v13  ;;  %v3274_v21 = vsel %vm2153_vm3, %v1496_v13, -inf }
 0x29c   :  { %v3343_v10 = vmax.f32 %v3341_v18, %v3342_v8  ;;  %v8851_v53 = vsel %vm3946_vm4, %v3336_v22, -inf  ;;  %v1540_v54 = vcombine.high %v724_v26, %v724_v26  ;;  %v1505_v58 = vcombine.high %v1503_v27, %v1503_v27 }
 0x29d   :  { %v3350_v52 = vmax.f32 %v3348_v45, %v3349_v16  ;;  %v3356_v51 = vrot.slane %v3355_v9, 1  ;;  %v3275_v31 = vrot.slane %v3274_v21, 4  ;;  %v3281_v48 = vsel %vm2153_vm3, %v1504_v0, -inf }
 0x29e   :  { %v8855_v33 = vsel %vm3946_vm4, %v3343_v10, -inf  ;;  %v3288_v42 = vsel %vm2153_vm3, %v1503_v27, -inf  ;;  %v1547_v38 = vrot.slane %v724_v26, %v7531_v46  ;;  %v3282_v13 = vrot.slane %v3281_v48, 4 }
 0x29f   :  { %v3357_v18 = vmax.f32 %v3355_v9, %v3356_v51  ;;  %v8861_v3 = vsel %vm3946_vm4, %v3350_v52, -inf  ;;  %v3276_v59 = vmax.f32 %v3274_v21, %v3275_v31  ;;  %v3289_v22 = vrot.slane %v3288_v42, 4 }
 0x2a0   :  { %v3295_v45 = vsel %vm2153_vm3, %v1505_v58, -inf  ;;  %v1554_v8 = vrot.slane %v1540_v54, %v7531_v46  ;;  %v1555_v16 = vcombine.high %v1547_v38, %v1547_v38  ;;  %v3283_v62 = vmax.f32 %v3281_v48, %v3282_v13 }
 0x2a1   :  { %v8866_v10 = vsel %vm3946_vm4, %v3357_v18, -inf  ;;  %v3277_v0 = vrot.slane %v3276_v59, 2  ;;  %v3296_v27 = vrot.slane %v3295_v45, 4  ;;  %v3290_v26 = vmax.f32 %v3288_v42, %v3289_v22 }
 0x2a2   :  { %v1556_v9 = vcombine.high %v1554_v8, %v1554_v8  ;;  %v3358_v52 = vsel %vm2153_vm3, %v1547_v38, -inf  ;;  %v3365_v21 = vsel %vm2153_vm3, %v1555_v16, -inf  ;;  %v3284_v31 = vrot.slane %v3283_v62, 2 }
 0x2a3   :  { %v3278_v51 = vmax.f32 %v3276_v59, %v3277_v0  ;;  %v3297_v58 = vmax.f32 %v3295_v45, %v3296_v27  ;;  %v3359_v60 = vrot.slane %v3358_v52, 4  ;;  %v3291_v54 = vrot.slane %v3290_v26, 2 }
 0x2a4   :  { %v3366_v37 = vrot.slane %v3365_v21, 4  ;;  %v3372_v18 = vsel %vm2153_vm3, %v1554_v8, -inf  ;;  %v3379_v2 = vsel %vm2153_vm3, %v1556_v9, -inf  ;;  %v3285_v13 = vmax.f32 %v3283_v62, %v3284_v31 }
 0x2a5   :  { %v3279_v48 = vrot.slane %v3278_v51, 1  ;;  %v3298_v23 = vrot.slane %v3297_v58, 2  ;;  %v3360_v4 = vmax.f32 %v3358_v52, %v3359_v60  ;;  %v3292_v42 = vmax.f32 %v3290_v26, %v3291_v54 }
 0x2a6   :  { %v3367_v22 = vmax.f32 %v3365_v21, %v3366_v37  ;;  %v3373_v56 = vrot.slane %v3372_v18, 4  ;;  %v3380_v38 = vrot.slane %v3379_v2, 4  ;;  %v3286_v16 = vrot.slane %v3285_v13, 1 }
 0x2a7   :  { %v3280_v14 = vmax.f32 %v3278_v51, %v3279_v48  ;;  %v3299_v59 = vmax.f32 %v3297_v58, %v3298_v23  ;;  %v3361_v0 = vrot.slane %v3360_v4, 2  ;;  %v3293_v45 = vrot.slane %v3292_v42, 1 }
 0x2a8   :  { %v3368_v27 = vrot.slane %v3367_v22, 2  ;;  %v3374_v34 = vmax.f32 %v3372_v18, %v3373_v56  ;;  %v3381_v40 = vmax.f32 %v3379_v2, %v3380_v38  ;;  %v3287_v30 = vmax.f32 %v3285_v13, %v3286_v16  ;;  %v10724_v16 = vld [vmem:[#allocation14_spill] sm:$0xff] }
 0x2a9   :  { %v3300_v8 = vrot.slane %v3299_v59, 1  ;;  %v4187_v9 = vsel %vm3946_vm4, %v3280_v14, -inf  ;;  %v3362_v20 = vmax.f32 %v3360_v4, %v3361_v0  ;;  %v3294_v62 = vmax.f32 %v3292_v42, %v3293_v45 }
 0x2aa   :  { %v4189_v60 = vmax.f32 %v4187_v9, %v8851_v53  ;;  %v3369_v26 = vmax.f32 %v3367_v22, %v3368_v27  ;;  %v3375_v37 = vrot.slane %v3374_v34, 2  ;;  %v4190_v21 = vsel %vm3946_vm4, %v3287_v30, -inf  ;;  %v10727_v9 = vld [vmem:[#allocation11_spill] sm:$0xff] }
 0x2ab   :  { %v3301_v52 = vmax.f32 %v3299_v59, %v3300_v8  ;;  %v3363_v51 = vrot.slane %v3362_v20, 1  ;;  %v3382_v23 = vrot.slane %v3381_v40, 2  ;;  %v4192_v31 = vmax.f32 %v4190_v21, %v8855_v33  ;;  %v10725_v59 = vld [vmem:[#allocation12_spill] sm:$0xff]  ;;  %v10731_v21 = vld [vmem:[#allocation10_spill] sm:$0xff] }
 0x2ac   :  { %v4193_v56 = vsel %vm3946_vm4, %v3294_v62, -inf  ;;  %v3370_v2 = vrot.slane %v3369_v26, 1  ;;  %v3376_v58 = vmax.f32 %v3374_v34, %v3375_v37  ;;  %v10722_v33 = vrot.slane %v8725_v24, 1  ;;  %v10728_v62 = vld [vmem:[#allocation13_spill] sm:$0xff] }
 0x2ad   :  { %v4195_v54 = vmax.f32 %v4193_v56, %v8861_v3  ;;  %v8881_v14 = vsel %vm3946_vm4, %v3301_v52, -inf  ;;  %v3364_v4 = vmax.f32 %v3362_v20, %v3363_v51  ;;  %v8883_v53 = vmax.f32 %v3381_v40, %v3382_v23  ;;  %v10730_v52 = vld [vmem:[#allocation25_spill] sm:$0xff] }
 0x2ae   :  { %v4525_v30 = vsel %vm4459_vm5, %v4192_v31, %v4189_v60  ;;  %v3371_v48 = vmax.f32 %v3369_v26, %v3370_v2  ;;  %v3377_v13 = vrot.slane %v3376_v58, 1  ;;  %v8891_v42 = vmax.f32 %v8725_v24, %v10722_v33 }
 0x2af   :  { %v10723_v34 = vrot.slane %v8808_v44, 1  ;;  %v8899_v40 = vsel %vm4461_vm6, %v4195_v54, %v4525_v30  ;;  %v1506_v20 = vcombine.high %v8845_v36, %v8845_v36  ;;  %v8905_v38 = vsel %vm3946_vm4, %v3364_v4, -inf }
 0x2b0   :  { %v1513_v24 = vrot.slane %v8845_v36, %v7531_v46  ;;  %v10726_v0 = vmax.f32 %v10724_v16, %v10725_v59  ;;  %v3378_v45 = vmax.f32 %v3376_v58, %v3377_v13  ;;  %v8915_v27 = vsel %vm3946_vm4, %v3371_v48, -inf }
 0x2b1   :  { %v8896_v3 = vmax.f32 %v8808_v44, %v10723_v34  ;;  %v1520_v8 = vrot.slane %v1506_v20, %v7531_v46  ;;  %v10729_v60 = vmax.f32 %v10727_v9, %v10728_v62  ;;  %v10732_v51 = vmax.f32 %v10730_v52, %v10731_v21 }
 0x2b2   :  { %v4504_v44 = vsel %vm4465_vm8, %v10726_v0, %v8842_v35  ;;  %v1521_v37 = vcombine.high %v1513_v24, %v1513_v24  ;;  %v3302_v36 = vsel %vm2153_vm3, %v1513_v24, -inf  ;;  %v4112_v35 = vsel %vm3946_vm4, %v8471_v32, -inf }
 0x2b3   :  { %v4505_v26 = vsel %vm4467_vm9, %v10729_v60, %v4504_v44  ;;  %v1522_v31 = vcombine.high %v1520_v8, %v1520_v8  ;;  %v3303_v56 = vrot.slane %v3302_v36, 4  ;;  %v3316_v2 = vsel %vm2153_vm3, %v1520_v8, -inf }
 0x2b4   :  { %v4506_v23 = vsel %vm4469_vm10, %v10732_v51, %v4505_v26  ;;  %v3309_v54 = vsel %vm2153_vm3, %v1521_v37, -inf  ;;  %v3317_v4 = vrot.slane %v3316_v2, 4  ;;  %v4113_v48 = vsel %vm3946_vm4, %v8465_v61, -inf }
 0x2b5   :  { %v8931_v58 = vsel %vm4593_vm11, 0.0, %v4506_v23  ;;  %v3304_v13 = vmax.f32 %v3302_v36, %v3303_v56  ;;  %v3310_v33 = vrot.slane %v3309_v54, 4  ;;  %v3323_v32 = vsel %vm2153_vm3, %v1522_v31, -inf }
 0x2b6   :  { %10733 = vst [vmem:[#allocation8_spill] sm:$0xff] %v8931_v58  ;;  %v7020_v30 = vpack.i.bf16 %v8931_v58, %v8771_v15  ;;  %v4114_v34 = vmax.f32 %v4112_v35, %v4113_v48  ;;  %v3318_v20 = vmax.f32 %v3316_v2, %v3317_v4  ;;  %v3324_v24 = vrot.slane %v3323_v32, 4 }
 0x2b7   :  { %v4676_v16 = vrot.slane %v8931_v58, 1  ;;  %v611_v59 = vadd.f32 %v8618_v49, %v8547_v55  ;;  %v3305_v0 = vrot.slane %v3304_v13, 2  ;;  %v3311_v44 = vmax.f32 %v3309_v54, %v3310_v33 }
 0x2b8   :  { %7021 = vrot.lane.b32.xlu1 %v7020_v30, %s7317_s23  ;;  %v8944_v8 = vsel %vm4593_vm11, %v4114_v34, 0.0  ;;  %v603_v61 = vadd.f32 %v8618_v49, %v8549_v41  ;;  %v3319_v9 = vrot.slane %v3318_v20, 2  ;;  %v3325_v62 = vmax.f32 %v3323_v32, %v3324_v24 }
 0x2b9   :  { %v4677_v60 = vrot.slane %v8944_v8, 1  ;;  %v727_v26 = vmax.f32 %v611_v59, 0.0  ;;  %v8950_v37 = vsel %vm3946_vm4, %v3378_v45, -inf  ;;  %v3306_v36 = vmax.f32 %v3304_v13, %v3305_v0 }
 0x2ba   :  { %v3312_v52 = vrot.slane %v3311_v44, 2  ;;  %v725_v21 = vmax.f32 %v603_v61, 0.0  ;;  %v3320_v55 = vmax.f32 %v3318_v20, %v3319_v9  ;;  %v3326_v51 = vrot.slane %v3325_v62, 2 }
 0x2bb   :  { %v8953_v23 = vsel %vm4655_vm12, %v4676_v16, %v4677_v60  ;;  %v1591_v35 = vcombine.high %v727_v26, %v727_v26  ;;  %v3307_v31 = vrot.slane %v3306_v36, 1  ;;  %v1598_v45 = vrot.slane %v727_v26, %v7531_v46 }
 0x2bc   :  { %v3313_v56 = vmax.f32 %v3311_v44, %v3312_v52  ;;  %v7025_v41 = vpack.i.bf16 %v8953_v23, %v8790_v6  ;;  %v3321_v2 = vrot.slane %v3320_v55, 1  ;;  %v8957_v54 = vmax.f32 %v3325_v62, %v3326_v51 }
 0x2bd   :  { %v1605_v4 = vrot.slane %v1591_v35, %v7531_v46  ;;  %v3308_v30 = vmax.f32 %v3306_v36, %v3307_v31  ;;  %v1557_v13 = vcombine.high %v725_v21, %v725_v21  ;;  %v614_v33 = vadd.f32 %v8618_v49, %v8551_v12 }
 0x2be   :  { %v3314_v48 = vrot.slane %v3313_v56, 1  ;;  %7026 = vrot.lane.b32.xlu0 %v7025_v41, %s7318_s24  ;;  %7031 = vrot.lane.b32.xlu1 %v7025_v41, %s7312_s16  ;;  %v3322_v32 = vmax.f32 %v3320_v55, %v3321_v2  ;;  %v1606_v34 = vcombine.high %v1598_v45, %v1598_v45  ;;  %v1564_v20 = vrot.slane %v725_v21, %v7531_v46 }
 0x2bf   :  { %v1607_v6 = vcombine.high %v1605_v4, %v1605_v4  ;;  %v8967_v16 = vsel %vm3946_vm4, %v3308_v30, -inf  ;;  %v3442_v59 = vsel %vm2153_vm3, %v1598_v45, -inf  ;;  %v3456_v0 = vsel %vm2153_vm3, %v1605_v4, -inf }
 0x2c0   :  { %v3315_v24 = vmax.f32 %v3313_v56, %v3314_v48  ;;  %v8975_v12 = vsel %vm3946_vm4, %v3322_v32, -inf  ;;  %v3443_v49 = vrot.slane %v3442_v59, 4  ;;  %v3449_v60 = vsel %vm2153_vm3, %v1606_v34, -inf }
 0x2c1   :  { %v3457_v26 = vrot.slane %v3456_v0, 4  ;;  %v3450_v21 = vrot.slane %v3449_v60, 4  ;;  %v3463_v55 = vsel %vm2153_vm3, %v1607_v6, -inf  ;;  %v1571_v31 = vrot.slane %v1557_v13, %v7531_v46 }
 0x2c2   :  { %v8978_v9 = vsel %vm3946_vm4, %v3315_v24, -inf  ;;  %v3444_v52 = vmax.f32 %v3442_v59, %v3443_v49  ;;  %v3464_v35 = vrot.slane %v3463_v55, 4  ;;  %v1572_v56 = vcombine.high %v1564_v20, %v1564_v20 }
 0x2c3   :  { %v3458_v51 = vmax.f32 %v3456_v0, %v3457_v26  ;;  %v3451_v2 = vmax.f32 %v3449_v60, %v3450_v21  ;;  %v3386_v45 = vsel %vm2153_vm3, %v1564_v20, -inf  ;;  %v728_v4 = vmax.f32 %v614_v33, 0.0 }
 0x2c4   :  { %v3445_v41 = vrot.slane %v3444_v52, 2  ;;  %v3465_v48 = vmax.f32 %v3463_v55, %v3464_v35  ;;  %v1573_v32 = vcombine.high %v1571_v31, %v1571_v31  ;;  %v3387_v34 = vrot.slane %v3386_v45, 4 }
 0x2c5   :  { %v3459_v30 = vrot.slane %v3458_v51, 2  ;;  %v3452_v62 = vrot.slane %v3451_v2, 2  ;;  %v3393_v59 = vsel %vm2153_vm3, %v1572_v56, -inf  ;;  %v3400_v6 = vsel %vm2153_vm3, %v1571_v31, -inf }
 0x2c6   :  { %v3446_v24 = vmax.f32 %v3444_v52, %v3445_v41  ;;  %v3466_v49 = vrot.slane %v3465_v48, 2  ;;  %v3388_v26 = vmax.f32 %v3386_v45, %v3387_v34  ;;  %v3394_v13 = vrot.slane %v3393_v59, 4 }
 0x2c7   :  { %v3460_v0 = vmax.f32 %v3458_v51, %v3459_v30  ;;  %v3453_v61 = vmax.f32 %v3451_v2, %v3452_v62  ;;  %v3401_v60 = vrot.slane %v3400_v6, 4  ;;  %v3407_v20 = vsel %vm2153_vm3, %v1573_v32, -inf  ;;  %v8991_v30 = vpop.f32.mrb[56].mxu0 }
 0x2c8   :  { %v3447_v36 = vrot.slane %v3446_v24, 1  ;;  %v3467_v21 = vmax.f32 %v3465_v48, %v3466_v49  ;;  %v3389_v55 = vrot.slane %v3388_v26, 2  ;;  %v3395_v35 = vmax.f32 %v3393_v59, %v3394_v13 }
 0x2c9   :  { %v3461_v33 = vrot.slane %v3460_v0, 1  ;;  %v3454_v52 = vrot.slane %v3453_v61, 1  ;;  %v3402_v41 = vmax.f32 %v3400_v6, %v3401_v60  ;;  %v3408_v44 = vrot.slane %v3407_v20, 4 }
 0x2ca   :  { %v3448_v18 = vmax.f32 %v3446_v24, %v3447_v36  ;;  %v3468_v22 = vrot.slane %v3467_v21, 1  ;;  %v3390_v31 = vmax.f32 %v3388_v26, %v3389_v55  ;;  %v3396_v51 = vrot.slane %v3395_v35, 2 }
 0x2cb   :  { %v3462_v56 = vmax.f32 %v3460_v0, %v3461_v33  ;;  %v3455_v45 = vmax.f32 %v3453_v61, %v3454_v52  ;;  %v3403_v2 = vrot.slane %v3402_v41, 2  ;;  %v3409_v34 = vmax.f32 %v3407_v20, %v3408_v44 }
 0x2cc   :  { %v4212_v62 = vsel %vm3946_vm4, %v3448_v18, -inf  ;;  %v3469_v32 = vmax.f32 %v3467_v21, %v3468_v22  ;;  %v3391_v49 = vrot.slane %v3390_v31, 1  ;;  %v3397_v59 = vmax.f32 %v3395_v35, %v3396_v51 }
 0x2cd   :  { %v4218_v48 = vsel %vm3946_vm4, %v3462_v56, -inf  ;;  %v4215_v36 = vsel %vm3946_vm4, %v3455_v45, -inf  ;;  %v3404_v24 = vmax.f32 %v3402_v41, %v3403_v2  ;;  %v3410_v6 = vrot.slane %v3409_v34, 2 }
 0x2ce   :  { %v1608_v0 = vcombine.high %v728_v4, %v728_v4  ;;  %v8997_v26 = vsel %vm3946_vm4, %v3469_v32, -inf  ;;  %v3392_v13 = vmax.f32 %v3390_v31, %v3391_v49  ;;  %v3398_v60 = vrot.slane %v3397_v59, 1 }
 0x2cf   :  { %v1615_v61 = vrot.slane %v728_v4, %v7531_v46  ;;  %v3405_v18 = vrot.slane %v3404_v24, 1  ;;  %v3411_v33 = vmax.f32 %v3409_v34, %v3410_v6  ;;  %v4765_v44 = vrot.slane %v8931_v58, 2 }
 0x2d0   :  { %v1622_v22 = vrot.slane %v1608_v0, %v7531_v46  ;;  %v3399_v20 = vmax.f32 %v3397_v59, %v3398_v60  ;;  %v4211_v21 = vsel %vm3946_vm4, %v3392_v13, -inf }
 0x2d1   :  { %v1623_v55 = vcombine.high %v1615_v61, %v1615_v61  ;;  %v3470_v35 = vsel %vm2153_vm3, %v1615_v61, -inf  ;;  %v3406_v52 = vmax.f32 %v3404_v24, %v3405_v18  ;;  %v3412_v41 = vrot.slane %v3411_v33, 1 }
 0x2d2   :  { %v4213_v56 = vmax.f32 %v4211_v21, %v4212_v62  ;;  %v1624_v51 = vcombine.high %v1622_v22, %v1622_v22  ;;  %v4214_v31 = vsel %vm3946_vm4, %v3399_v20, -inf  ;;  %v3471_v45 = vrot.slane %v3470_v35, 4 }
 0x2d3   :  { %v3477_v4 = vsel %vm2153_vm3, %v1623_v55, -inf  ;;  %v3484_v2 = vsel %vm2153_vm3, %v1622_v22, -inf  ;;  %v3413_v34 = vmax.f32 %v3411_v33, %v3412_v41  ;;  %v4216_v32 = vmax.f32 %v4214_v31, %v4215_v36 }
 0x2d4   :  { %v4217_v49 = vsel %vm3946_vm4, %v3406_v52, -inf  ;;  %v3478_v59 = vrot.slane %v3477_v4, 4  ;;  %v3472_v0 = vmax.f32 %v3470_v35, %v3471_v45  ;;  %v3485_v13 = vrot.slane %v3484_v2, 4  ;;  %v9024_v52 = vld [vmem:[%s10457_s2] ss:$0 sm:$0xff] }
 0x2d5   :  { %v4219_v6 = vmax.f32 %v4217_v49, %v4218_v48  ;;  %v3491_v24 = vsel %vm2153_vm3, %v1624_v51, -inf  ;;  %v9010_v62 = vsel %vm3946_vm4, %v3413_v34, -inf  ;;  %v4531_v60 = vsel %vm4459_vm5, %v4216_v32, %v4213_v56  ;;  %v9018_v48 = vpop.f32.mrb[57].mxu0 }
 0x2d6   :  { %v3479_v61 = vmax.f32 %v3477_v4, %v3478_v59  ;;  %v3492_v18 = vrot.slane %v3491_v24, 4  ;;  %v3473_v33 = vrot.slane %v3472_v0, 2  ;;  %v3486_v20 = vmax.f32 %v3484_v2, %v3485_v13  ;;  %v9028_v56 = vpop.f32.mrb[58].mxu0 }
 0x2d7   :  { %v9016_v36 = vsel %vm4461_vm6, %v4219_v6, %v4531_v60  ;;  %v4766_v35 = vrot.slane %v8944_v8, 2  ;;  %v606_v41 = vadd.f32 %v9024_v52, %v8650_v63  ;;  %v4135_v45 = vmax.f32 %v8595_v47, %v8510_v17  ;;  %v9037_v2 = vpop.f32.mrb[59].mxu0  ;;  %v10736_v17 = vld [vmem:[#allocation41_spill] sm:$0xff] }
 0x2d8   :  { %v3480_v21 = vrot.slane %v3479_v61, 2  ;;  %v3493_v55 = vmax.f32 %v3491_v24, %v3492_v18  ;;  %v3474_v51 = vmax.f32 %v3472_v0, %v3473_v33  ;;  %v3487_v31 = vrot.slane %v3486_v20, 2  ;;  %v10739_v33 = vld [vmem:[#allocation23_spill] sm:$0xff] }
 0x2d9   :  { %v10734_v4 = vmax.f32 %v8423_v19, %v8405_v29  ;;  %v9040_v49 = vsel %vm386_vm1, %v4765_v44, %v4766_v35  ;;  %v726_v63 = vmax.f32 %v606_v41, 0.0  ;;  %v10737_v47 = vmax.f32 %v8430_v11, %v10736_v17 }
 0x2da   :  { %v3481_v34 = vmax.f32 %v3479_v61, %v3480_v21  ;;  %v3494_v32 = vrot.slane %v3493_v55, 2  ;;  %10735 = vst [vmem:[#allocation39_spill] sm:$0xff] %v9040_v49  ;;  %v3475_v59 = vrot.slane %v3474_v51, 1  ;;  %v3488_v6 = vmax.f32 %v3486_v20, %v3487_v31  ;;  %v10740_v20 = vld [vmem:[#allocation17_spill] sm:$0xff] }
 0x2db   :  { %v4508_v8 = vsel %vm4461_vm6, %v10734_v4, %v8433_v39  ;;  %v7035_v0 = vpack.i.bf16 %v9040_v49, %v8795_v43  ;;  %v1574_v13 = vcombine.high %v726_v63, %v726_v63  ;;  %v1581_v24 = vrot.slane %v726_v63, %v7531_v46 }
 0x2dc   :  { %v4509_v29 = vsel %vm4463_vm7, %v10737_v47, %v4508_v8  ;;  %v3482_v19 = vrot.slane %v3481_v34, 1  ;;  %v3495_v39 = vmax.f32 %v3493_v55, %v3494_v32  ;;  %v10738_v60 = vrot.slane %v8883_v53, 1  ;;  %v10743_v8 = vld [vmem:[#allocation20_spill] sm:$0xff] }
 0x2dd   :  { %v3476_v61 = vmax.f32 %v3474_v51, %v3475_v59  ;;  %v3489_v18 = vrot.slane %v3488_v6, 1  ;;  %7036 = vrot.lane.b32.xlu0 %v7035_v0, %s7313_s17  ;;  %v10741_v21 = vmax.f32 %v10739_v33, %v10740_v20  ;;  %v10742_v35 = vrot.slane %v8957_v54, 1  ;;  %v10744_v32 = vld [vmem:[#allocation16_spill] sm:$0xff] }
 0x2de   :  { %v9052_v44 = vmax.f32 %v8883_v53, %v10738_v60  ;;  %v3496_v41 = vrot.slane %v3495_v39, 1  ;;  %v1588_v31 = vrot.slane %v1574_v13, %v7531_v46  ;;  %v1589_v4 = vcombine.high %v1581_v24, %v1581_v24 }
 0x2df   :  { %v4510_v11 = vsel %vm4465_vm8, %v10741_v21, %v4509_v29  ;;  %v9062_v55 = vmax.f32 %v8957_v54, %v10742_v35  ;;  %v3483_v53 = vmax.f32 %v3481_v34, %v3482_v19  ;;  %v3414_v51 = vsel %vm2153_vm3, %v1581_v24, -inf }
 0x2e0   :  { %v10745_v63 = vmax.f32 %v10743_v8, %v10744_v32  ;;  %v4136_v0 = vsel %vm3946_vm4, %v8591_v7, -inf  ;;  %v3490_v17 = vmax.f32 %v3488_v6, %v3489_v18  ;;  %v9073_v47 = vsel %vm3946_vm4, %v3476_v61, -inf  ;;  %v10748_v61 = vld [vmem:[#allocation19_spill] sm:$0xff] }
 0x2e1   :  { %10746 = vst [vmem:[#allocation38_spill] sm:$0xff] %v9073_v47  ;;  %v1590_v54 = vcombine.high %v1588_v31, %v1588_v31  ;;  %v3415_v29 = vrot.slane %v3414_v51, 4  ;;  %v9075_v60 = vmax.f32 %v3495_v39, %v3496_v41  ;;  %v3421_v34 = vsel %vm2153_vm3, %v1589_v4, -inf }
 0x2e2   :  { %v4511_v59 = vsel %vm4467_vm9, %v10745_v63, %v4510_v11  ;;  %v3428_v19 = vsel %vm2153_vm3, %v1588_v31, -inf  ;;  %v3422_v33 = vrot.slane %v3421_v34, 4  ;;  %v4137_v18 = vsel %vm3946_vm4, %v10748_v61, -inf }
 0x2e3   :  { %10747 = vst [vmem:[#allocation14_spill] sm:$0xff] %v9075_v60  ;;  %v4512_v13 = vsel %vm4469_vm10, %v4135_v45, %v4511_v59  ;;  %v3416_v24 = vmax.f32 %v3414_v51, %v3415_v29  ;;  %v3429_v20 = vrot.slane %v3428_v19, 4  ;;  %v3435_v21 = vsel %vm2153_vm3, %v1590_v54, -inf }
 0x2e4   :  { %v3436_v7 = vrot.slane %v3435_v21, 4  ;;  %v9082_v6 = vsel %vm4593_vm11, 0.0, %v4512_v13  ;;  %v627_v39 = vadd.f32 %v9024_v52, %v8689_v57  ;;  %v3423_v35 = vmax.f32 %v3421_v34, %v3422_v33 }
 0x2e5   :  { %v3417_v11 = vrot.slane %v3416_v24, 2  ;;  %v3430_v41 = vmax.f32 %v3428_v19, %v3429_v20  ;;  %v7040_v45 = vpack.i.bf16 %v9082_v6, %v8931_v58  ;;  %v10749_v4 = vmov 0.0  }
 0x2e6   :  { %v3437_v31 = vmax.f32 %v3435_v21, %v3436_v7  ;;  %v7045_v51 = vpack.i.bf16 %v10749_v4, %v9082_v6  ;;  %v4138_v8 = vmax.f32 %v4136_v0, %v4137_v18  ;;  %v4940_v32 = vrot.slane %v9082_v6, 2 }
 0x2e7   :  { %v3418_v63 = vmax.f32 %v3416_v24, %v3417_v11  ;;  %v3424_v59 = vrot.slane %v3423_v35, 2  ;;  %v3431_v54 = vrot.slane %v3430_v41, 2  ;;  %7041 = vrot.lane.b32.xlu1 %v7040_v45, %s7314_s18  ;;  %v731_v29 = vmax.f32 %v627_v39, 0.0 }
 0x2e8   :  { %v9095_v57 = vsel %vm3946_vm4, %v3483_v53, -inf  ;;  %v3438_v34 = vrot.slane %v3437_v31, 2  ;;  %7046 = vrot.lane.b32.xlu0 %v7045_v51, %s7317_s23  ;;  %v9099_v19 = vsel %vm4593_vm11, %v4138_v8, 0.0  ;;  %v619_v0 = vadd.f32 %v9024_v52, %v8694_v25  ;;  %v10753_v51 = vld [vmem:[#allocation49_spill] sm:$0xff] }
 0x2e9   :  { %10750 = vst [vmem:[#allocation12_spill] sm:$0xff] %v9095_v57  ;;  %v3419_v13 = vrot.slane %v3418_v63, 1  ;;  %v3425_v33 = vmax.f32 %v3423_v35, %v3424_v59  ;;  %v3432_v24 = vmax.f32 %v3430_v41, %v3431_v54  ;;  %v4941_v20 = vrot.slane %v9099_v19, 2 }
 0x2ea   :  { %v9105_v21 = vsel %vm3946_vm4, %v3490_v17, -inf  ;;  %v9107_v7 = vmax.f32 %v3437_v31, %v3438_v34  ;;  %v1659_v53 = vcombine.high %v731_v29, %v731_v29  ;;  %v1666_v61 = vrot.slane %v731_v29, %v7531_v46 }
 0x2eb   :  { %10751 = vst [vmem:[#allocation11_spill] sm:$0xff] %v9105_v21  ;;  %v3420_v18 = vmax.f32 %v3418_v63, %v3419_v13  ;;  %v3426_v39 = vrot.slane %v3425_v33, 1  ;;  %v3433_v11 = vrot.slane %v3432_v24, 1  ;;  %v9111_v45 = vsel %vm386_vm1, %v4940_v32, %v4941_v20 }
 0x2ec   :  { %10752 = vst [vmem:[#allocation13_spill] sm:$0xff] %v9111_v45  ;;  %v7055_v25 = vpack.i.bf16 %v9111_v45, %v9040_v49  ;;  %v1673_v35 = vrot.slane %v1659_v53, %v7531_v46  ;;  %v729_v41 = vmax.f32 %v619_v0, 0.0  ;;  %v630_v17 = vadd.f32 %v9024_v52, %v10753_v51 }
 0x2ed   :  { %v3427_v31 = vmax.f32 %v3425_v33, %v3426_v39  ;;  %v3434_v8 = vmax.f32 %v3432_v24, %v3433_v11  ;;  %v9119_v59 = vsel %vm3946_vm4, %v3420_v18, -inf  ;;  %v1674_v63 = vcombine.high %v1666_v61, %v1666_v61 }
 0x2ee   :  { %10754 = vst [vmem:[#allocation25_spill] sm:$0xff] %v9119_v59  ;;  %7056 = vrot.lane.b32.xlu1 %v7055_v25, %s7316_s22  ;;  %v1675_v29 = vcombine.high %v1673_v35, %v1673_v35  ;;  %v3554_v34 = vsel %vm2153_vm3, %v1666_v61, -inf  ;;  %v3568_v39 = vsel %vm2153_vm3, %v1673_v35, -inf  ;;  %v1625_v51 = vcombine.high %v729_v41, %v729_v41 }
 0x2ef   :  { %v9127_v0 = vsel %vm3946_vm4, %v3427_v31, -inf  ;;  %v9130_v13 = vsel %vm3946_vm4, %v3434_v8, -inf  ;;  %v3555_v33 = vrot.slane %v3554_v34, 4  ;;  %v3561_v24 = vsel %vm2153_vm3, %v1674_v63, -inf }
 0x2f0   :  { %10755 = vst [vmem:[#allocation10_spill] sm:$0xff] %v9127_v0  ;;  %10756 = vst [vmem:[#allocation41_spill] sm:$0xff] %v9130_v13  ;;  %v3562_v18 = vrot.slane %v3561_v24, 4  ;;  %v3569_v61 = vrot.slane %v3568_v39, 4  ;;  %v3575_v25 = vsel %vm2153_vm3, %v1675_v29, -inf  ;;  %v1632_v32 = vrot.slane %v729_v41, %v7531_v46  ;;  %v9146_v13 = vpop.f32.mrb[60].mxu0 }
 0x2f1   :  { %v3556_v11 = vmax.f32 %v3554_v34, %v3555_v33  ;;  %v3576_v8 = vrot.slane %v3575_v25, 4  ;;  %v732_v22 = vmax.f32 %v630_v17, 0.0  ;;  %v1639_v20 = vrot.slane %v1625_v51, %v7531_v46 }
 0x2f2   :  { %v3563_v31 = vmax.f32 %v3561_v24, %v3562_v18  ;;  %v3570_v54 = vmax.f32 %v3568_v39, %v3569_v61  ;;  %v1640_v15 = vcombine.high %v1632_v32, %v1632_v32  ;;  %v3498_v35 = vsel %vm2153_vm3, %v1632_v32, -inf }
 0x2f3   :  { %v3557_v63 = vrot.slane %v3556_v11, 2  ;;  %v3577_v45 = vmax.f32 %v3575_v25, %v3576_v8  ;;  %v1641_v29 = vcombine.high %v1639_v20, %v1639_v20  ;;  %v3499_v58 = vrot.slane %v3498_v35, 4 }
 0x2f4   :  { %v3564_v53 = vrot.slane %v3563_v31, 2  ;;  %v3571_v33 = vrot.slane %v3570_v54, 2  ;;  %v3505_v41 = vsel %vm2153_vm3, %v1640_v15, -inf  ;;  %v3512_v17 = vsel %vm2153_vm3, %v1639_v20, -inf }
 0x2f5   :  { %v3558_v34 = vmax.f32 %v3556_v11, %v3557_v63  ;;  %v3578_v18 = vrot.slane %v3577_v45, 2  ;;  %v3500_v51 = vmax.f32 %v3498_v35, %v3499_v58  ;;  %v3506_v49 = vrot.slane %v3505_v41, 4 }
 0x2f6   :  { %v3565_v24 = vmax.f32 %v3563_v31, %v3564_v53  ;;  %v3572_v61 = vmax.f32 %v3570_v54, %v3571_v33  ;;  %v3513_v25 = vrot.slane %v3512_v17, 4  ;;  %v3519_v8 = vsel %vm2153_vm3, %v1641_v29, -inf }
 0x2f7   :  { %v3559_v39 = vrot.slane %v3558_v34, 1  ;;  %v3579_v43 = vmax.f32 %v3577_v45, %v3578_v18  ;;  %v3501_v63 = vrot.slane %v3500_v51, 2  ;;  %v3507_v21 = vmax.f32 %v3505_v41, %v3506_v49 }
 0x2f8   :  { %v3566_v4 = vrot.slane %v3565_v24, 1  ;;  %v3573_v11 = vrot.slane %v3572_v61, 1  ;;  %v3514_v15 = vmax.f32 %v3512_v17, %v3513_v25  ;;  %v3520_v60 = vrot.slane %v3519_v8, 4 }
 0x2f9   :  { %v3560_v32 = vmax.f32 %v3558_v34, %v3559_v39  ;;  %v3580_v31 = vrot.slane %v3579_v43, 1  ;;  %v3502_v58 = vmax.f32 %v3500_v51, %v3501_v63  ;;  %v3508_v35 = vrot.slane %v3507_v21, 2 }
 0x2fa   :  { %v3567_v53 = vmax.f32 %v3565_v24, %v3566_v4  ;;  %v3574_v20 = vmax.f32 %v3572_v61, %v3573_v11  ;;  %v3515_v18 = vrot.slane %v3514_v15, 2  ;;  %v3521_v29 = vmax.f32 %v3519_v8, %v3520_v60  ;;  %v9157_v11 = vpop.f32.mrb[61].mxu0 }
 0x2fb   :  { %v4236_v54 = vsel %vm3946_vm4, %v3560_v32, -inf  ;;  %v3581_v33 = vmax.f32 %v3579_v43, %v3580_v31  ;;  %v3503_v39 = vrot.slane %v3502_v58, 1  ;;  %v3509_v49 = vmax.f32 %v3507_v21, %v3508_v35 }
 0x2fc   :  { %v4239_v45 = vsel %vm3946_vm4, %v3567_v53, -inf  ;;  %v4242_v34 = vsel %vm3946_vm4, %v3574_v20, -inf  ;;  %v1676_v41 = vcombine.high %v732_v22, %v732_v22  ;;  %v3516_v24 = vmax.f32 %v3514_v15, %v3515_v18  ;;  %v9160_v53 = vpop.f32.mrb[62].mxu0 }
 0x2fd   :  { %v9152_v4 = vsel %vm3946_vm4, %v3581_v33, -inf  ;;  %v3522_v17 = vrot.slane %v3521_v29, 2  ;;  %v1683_v61 = vrot.slane %v732_v22, %v7531_v46  ;;  %v3504_v25 = vmax.f32 %v3502_v58, %v3503_v39 }
 0x2fe   :  { %10757 = vst [vmem:[#allocation23_spill] sm:$0xff] %v9152_v4  ;;  %v3510_v51 = vrot.slane %v3509_v49, 1  ;;  %v1690_v43 = vrot.slane %v1676_v41, %v7531_v46  ;;  %v4887_v32 = vrot.slane %v9099_v19, 1  ;;  %v3517_v60 = vrot.slane %v3516_v24, 1 }
 0x2ff   :  { %v3523_v8 = vmax.f32 %v3521_v29, %v3522_v17  ;;  %v1691_v63 = vcombine.high %v1683_v61, %v1683_v61  ;;  %v3582_v21 = vsel %vm2153_vm3, %v1683_v61, -inf  ;;  %v4235_v15 = vsel %vm3946_vm4, %v3504_v25, -inf }
 0x300   :  { %v3511_v31 = vmax.f32 %v3509_v49, %v3510_v51  ;;  %v1692_v20 = vcombine.high %v1690_v43, %v1690_v43  ;;  %v3583_v22 = vrot.slane %v3582_v21, 4  ;;  %v3518_v58 = vmax.f32 %v3516_v24, %v3517_v60  ;;  %v9168_v60 = vpop.f32.mrb[63].mxu0 }
 0x301   :  { %v3524_v35 = vrot.slane %v3523_v8, 1  ;;  %v4237_v33 = vmax.f32 %v4235_v15, %v4236_v54  ;;  %v3589_v18 = vsel %vm2153_vm3, %v1691_v63, -inf  ;;  %v3596_v29 = vsel %vm2153_vm3, %v1690_v43, -inf }
 0x302   :  { %v4238_v19 = vsel %vm3946_vm4, %v3511_v31, -inf  ;;  %v3584_v39 = vmax.f32 %v3582_v21, %v3583_v22  ;;  %v3590_v41 = vrot.slane %v3589_v18, 4  ;;  %v4241_v57 = vsel %vm3946_vm4, %v3518_v58, -inf }
 0x303   :  { %v3525_v17 = vmax.f32 %v3523_v8, %v3524_v35  ;;  %v4240_v61 = vmax.f32 %v4238_v19, %v4239_v45  ;;  %v3597_v49 = vrot.slane %v3596_v29, 4  ;;  %v4243_v51 = vmax.f32 %v4241_v57, %v4242_v34  ;;  %v10761_v19 = vld [vmem:[#allocation31_spill] sm:$0xff] }
 0x304   :  { %v3585_v25 = vrot.slane %v3584_v39, 2  ;;  %v3591_v0 = vmax.f32 %v3589_v18, %v3590_v41  ;;  %v3603_v24 = vsel %vm2153_vm3, %v1692_v20, -inf  ;;  %v10760_v20 = vrot.slane %v9082_v6, 1 }
 0x305   :  { %v9171_v54 = vsel %vm3946_vm4, %v3525_v17, -inf  ;;  %v4537_v63 = vsel %vm4459_vm5, %v4240_v61, %v4237_v33  ;;  %v3598_v21 = vmax.f32 %v3596_v29, %v3597_v49  ;;  %v3604_v31 = vrot.slane %v3603_v24, 4 }
 0x306   :  { %10758 = vst [vmem:[#allocation17_spill] sm:$0xff] %v9171_v54  ;;  %v9177_v43 = vsel %vm4461_vm6, %v4243_v51, %v4537_v63  ;;  %v3586_v57 = vmax.f32 %v3584_v39, %v3585_v25  ;;  %v3592_v34 = vrot.slane %v3591_v0, 2  ;;  %v4888_v22 = vsel %vm4655_vm12, %v10760_v20, %v4887_v32 }
 0x307   :  { %10759 = vst [vmem:[#allocation20_spill] sm:$0xff] %v9177_v43  ;;  %v3599_v8 = vrot.slane %v3598_v21, 2  ;;  %v3605_v15 = vmax.f32 %v3603_v24, %v3604_v31  ;;  %v622_v58 = vadd.f32 %v9024_v52, %v8803_v28  ;;  %v7050_v18 = vpack.i.bf16 %v4888_v22, %v8953_v23 }
 0x308   :  { %v3587_v35 = vrot.slane %v3586_v57, 1  ;;  %v3593_v33 = vmax.f32 %v3591_v0, %v3592_v34  ;;  %v7060_v41 = vpack.i.bf16 %v10761_v19, %v4888_v22  ;;  %v643_v39 = vadd.f32 %v9024_v52, %v8818_v1 }
 0x309   :  { %v3600_v29 = vmax.f32 %v3598_v21, %v3599_v8  ;;  %v3606_v17 = vrot.slane %v3605_v15, 2  ;;  %v730_v61 = vmax.f32 %v622_v58, 0.0  ;;  %v10762_v49 = vrot.slane %v9107_v7, 1  ;;  %7051 = vrot.lane.b32.xlu0 %v7050_v18, %s7315_s19 }
 0x30a   :  { %v3588_v32 = vmax.f32 %v3586_v57, %v3587_v35  ;;  %v3594_v51 = vrot.slane %v3593_v33, 1  ;;  %7061 = vrot.lane.b32.xlu1 %v7060_v41, %s7318_s24  ;;  %v635_v28 = vadd.f32 %v9024_v52, %v8827_v50  ;;  %v9203_v21 = vadd.f32 %v9024_v52, %v8848_v5 }
 0x30b   :  { %v9191_v6 = vmax.f32 %v9107_v7, %v10762_v49  ;;  %v3601_v23 = vrot.slane %v3600_v29, 1  ;;  %v3607_v0 = vmax.f32 %v3605_v15, %v3606_v17  ;;  %v1642_v25 = vcombine.high %v730_v61, %v730_v61 }
 0x30c   :  { %v1649_v24 = vrot.slane %v730_v61, %v7531_v46  ;;  %v3595_v1 = vmax.f32 %v3593_v33, %v3594_v51  ;;  %v9199_v63 = vsel %vm3946_vm4, %v3588_v32, -inf  ;;  %v735_v7 = vmax.f32 %v643_v39, 0.0 }
 0x30d   :  { %10763 = vst [vmem:[#allocation16_spill] sm:$0xff] %v9191_v6  ;;  %10764 = vst [vmem:[#allocation19_spill] sm:$0xff] %v9199_v63  ;;  %v3608_v31 = vrot.slane %v3607_v0, 1  ;;  %v1656_v57 = vrot.slane %v1642_v25, %v7531_v46  ;;  %v9206_v8 = vmax.f32 %v635_v28, 0.0  ;;  %v3602_v50 = vmax.f32 %v3600_v29, %v3601_v23 }
 0x30e   :  { %v1657_v34 = vcombine.high %v1649_v24, %v1649_v24  ;;  %v3526_v15 = vsel %vm2153_vm3, %v1649_v24, -inf  ;;  %v1727_v20 = vcombine.high %v735_v7, %v735_v7  ;;  %v1734_v22 = vrot.slane %v735_v7, %v7531_v46 }
 0x30f   :  { %v9210_v58 = vmax.f32 %v3607_v0, %v3608_v31  ;;  %v9213_v35 = vsel %vm3946_vm4, %v3595_v1, -inf  ;;  %v1658_v33 = vcombine.high %v1656_v57, %v1656_v57  ;;  %v3527_v5 = vrot.slane %v3526_v15, 4 }
 0x310   :  { %10766 = vst [vmem:[#allocation31_spill] sm:$0xff] %v9213_v35  ;;  %v3533_v18 = vsel %vm2153_vm3, %v1657_v34, -inf  ;;  %v3540_v19 = vsel %vm2153_vm3, %v1656_v57, -inf  ;;  %v1741_v41 = vrot.slane %v1727_v20, %v7531_v46  ;;  %v1742_v17 = vcombine.high %v1734_v22, %v1734_v22 }
 0x311   :  { %10765 = vst [vmem:[#allocation49_spill] sm:$0xff] %v9210_v58  ;;  %v3528_v29 = vmax.f32 %v3526_v15, %v3527_v5  ;;  %v3534_v61 = vrot.slane %v3533_v18, 4  ;;  %v3541_v39 = vrot.slane %v3540_v19, 4  ;;  %v3547_v49 = vsel %vm2153_vm3, %v1658_v33, -inf }
 0x312   :  { %v3548_v32 = vrot.slane %v3547_v49, 4  ;;  %v1743_v51 = vcombine.high %v1741_v41, %v1741_v41  ;;  %v3666_v28 = vsel %vm2153_vm3, %v1734_v22, -inf  ;;  %v3673_v23 = vsel %vm2153_vm3, %v1742_v17, -inf }
 0x313   :  { %v3529_v0 = vrot.slane %v3528_v29, 2  ;;  %v3535_v25 = vmax.f32 %v3533_v18, %v3534_v61  ;;  %v3542_v24 = vmax.f32 %v3540_v19, %v3541_v39  ;;  %v3667_v1 = vrot.slane %v3666_v28, 4 }
 0x314   :  { %v3549_v7 = vmax.f32 %v3547_v49, %v3548_v32  ;;  %v3674_v31 = vrot.slane %v3673_v23, 4  ;;  %v3680_v57 = vsel %vm2153_vm3, %v1741_v41, -inf  ;;  %v3687_v34 = vsel %vm2153_vm3, %v1743_v51, -inf }
 0x315   :  { %v3530_v15 = vmax.f32 %v3528_v29, %v3529_v0  ;;  %v3536_v20 = vrot.slane %v3535_v25, 2  ;;  %v3543_v5 = vrot.slane %v3542_v24, 2  ;;  %v3668_v33 = vmax.f32 %v3666_v28, %v3667_v1 }
 0x316   :  { %v3550_v45 = vrot.slane %v3549_v7, 2  ;;  %v3675_v58 = vmax.f32 %v3673_v23, %v3674_v31  ;;  %v3681_v4 = vrot.slane %v3680_v57, 4  ;;  %v3688_v22 = vrot.slane %v3687_v34, 4 }
 0x317   :  { %v3531_v54 = vrot.slane %v3530_v15, 1  ;;  %v3537_v17 = vmax.f32 %v3535_v25, %v3536_v20  ;;  %v3544_v43 = vmax.f32 %v3542_v24, %v3543_v5  ;;  %v3669_v18 = vrot.slane %v3668_v33, 2 }
 0x318   :  { %v9223_v19 = vmax.f32 %v3549_v7, %v3550_v45  ;;  %v3676_v61 = vrot.slane %v3675_v58, 2  ;;  %v3682_v39 = vmax.f32 %v3680_v57, %v3681_v4  ;;  %v3689_v49 = vmax.f32 %v3687_v34, %v3688_v22 }
 0x319   :  { %v3532_v41 = vmax.f32 %v3530_v15, %v3531_v54  ;;  %v3538_v32 = vrot.slane %v3537_v17, 1  ;;  %v3545_v51 = vrot.slane %v3544_v43, 1  ;;  %v3670_v29 = vmax.f32 %v3668_v33, %v3669_v18 }
 0x31a   :  { %v9226_v0 = vsel %vm3946_vm4, %v3602_v50, -inf  ;;  %v3677_v28 = vmax.f32 %v3675_v58, %v3676_v61  ;;  %v3683_v23 = vrot.slane %v3682_v39, 2  ;;  %v3690_v1 = vrot.slane %v3689_v49, 2 }
 0x31b   :  { %10767 = vst [vmem:[#allocation56_spill] sm:$0xff] %v9226_v0  ;;  %v3539_v31 = vmax.f32 %v3537_v17, %v3538_v32  ;;  %v3546_v6 = vmax.f32 %v3544_v43, %v3545_v51  ;;  %v9229_v25 = vsel %vm3946_vm4, %v3532_v41, -inf  ;;  %v3671_v45 = vrot.slane %v3670_v29, 1 }
 0x31c   :  { %10768 = vst [vmem:[#allocation57_spill] sm:$0xff] %v9229_v25  ;;  %v3678_v54 = vrot.slane %v3677_v28, 1  ;;  %v3684_v7 = vmax.f32 %v3682_v39, %v3683_v23  ;;  %v3691_v34 = vmax.f32 %v3689_v49, %v3690_v1  ;;  %v1693_v17 = vcombine.high %v9206_v8, %v9206_v8  ;;  %v10771_v49 = vld [vmem:[#allocation40_spill] sm:$0xff] }
 0x31d   :  { %v9235_v57 = vsel %vm3946_vm4, %v3539_v31, -inf  ;;  %v9238_v50 = vsel %vm3946_vm4, %v3546_v6, -inf  ;;  %v3672_v58 = vmax.f32 %v3670_v29, %v3671_v45  ;;  %v1700_v6 = vrot.slane %v9206_v8, %v7531_v46 }
 0x31e   :  { %10769 = vst [vmem:[#allocation58_spill] sm:$0xff] %v9235_v57  ;;  %10770 = vst [vmem:[#allocation59_spill] sm:$0xff] %v9238_v50  ;;  %v3679_v20 = vmax.f32 %v3677_v28, %v3678_v54  ;;  %v3685_v5 = vrot.slane %v3684_v7, 1  ;;  %v3692_v33 = vrot.slane %v3691_v34, 1  ;;  %v736_v39 = vmax.f32 %v9203_v21, 0.0 }
 0x31f   :  { %v9245_v22 = vsel %vm3946_vm4, %v3672_v58, -inf  ;;  %v638_v41 = vadd.f32 %v9024_v52, %v10771_v49  ;;  %v1707_v51 = vrot.slane %v1693_v17, %v7531_v46  ;;  %v1708_v29 = vcombine.high %v1700_v6, %v1700_v6 }
 0x320   :  { %v3686_v18 = vmax.f32 %v3684_v7, %v3685_v5  ;;  %v9252_v61 = vsel %vm3946_vm4, %v3679_v20, -inf  ;;  %v3693_v32 = vmax.f32 %v3691_v34, %v3692_v33  ;;  %v3610_v28 = vsel %vm2153_vm3, %v1700_v6, -inf }
 0x321   :  { %v3611_v1 = vrot.slane %v3610_v28, 4  ;;  %v1744_v8 = vcombine.high %v736_v39, %v736_v39  ;;  %v1751_v31 = vrot.slane %v736_v39, %v7531_v46  ;;  %v1709_v21 = vcombine.high %v1707_v51, %v1707_v51 }
 0x322   :  { %v9260_v23 = vsel %vm3946_vm4, %v3686_v18, -inf  ;;  %v9264_v45 = vsel %vm3946_vm4, %v3693_v32, -inf  ;;  %v3617_v54 = vsel %vm2153_vm3, %v1708_v29, -inf  ;;  %v3624_v7 = vsel %vm2153_vm3, %v1707_v51, -inf }
 0x323   :  { %v3612_v58 = vmax.f32 %v3610_v28, %v3611_v1  ;;  %v3618_v34 = vrot.slane %v3617_v54, 4  ;;  %v3625_v20 = vrot.slane %v3624_v7, 4  ;;  %v1758_v5 = vrot.slane %v1744_v8, %v7531_v46 }
 0x324   :  { %v3631_v33 = vsel %vm2153_vm3, %v1709_v21, -inf  ;;  %v1759_v17 = vcombine.high %v1751_v31, %v1751_v31  ;;  %v3694_v6 = vsel %vm2153_vm3, %v1751_v31, -inf  ;;  %v9271_v18 = vmax.f32 %v638_v41, 0.0 }
 0x325   :  { %v3613_v39 = vrot.slane %v3612_v58, 2  ;;  %v3619_v49 = vmax.f32 %v3617_v54, %v3618_v34  ;;  %v3626_v32 = vmax.f32 %v3624_v7, %v3625_v20  ;;  %v3632_v15 = vrot.slane %v3631_v33, 4 }
 0x326   :  { %v1760_v43 = vcombine.high %v1758_v5, %v1758_v5  ;;  %v3695_v29 = vrot.slane %v3694_v6, 4  ;;  %v3701_v51 = vsel %vm2153_vm3, %v1759_v17, -inf  ;;  %v3708_v28 = vsel %vm2153_vm3, %v1758_v5, -inf }
 0x327   :  { %v3614_v1 = vmax.f32 %v3612_v58, %v3613_v39  ;;  %v3620_v4 = vrot.slane %v3619_v49, 2  ;;  %v3627_v8 = vrot.slane %v3626_v32, 2  ;;  %v3633_v24 = vmax.f32 %v3631_v33, %v3632_v15 }
 0x328   :  { %v3696_v21 = vmax.f32 %v3694_v6, %v3695_v29  ;;  %v3702_v0 = vrot.slane %v3701_v51, 4  ;;  %v3709_v50 = vrot.slane %v3708_v28, 4  ;;  %v3715_v41 = vsel %vm2153_vm3, %v1760_v43, -inf }
 0x329   :  { %v3615_v31 = vrot.slane %v3614_v1, 1  ;;  %v3621_v35 = vmax.f32 %v3619_v49, %v3620_v4  ;;  %v3628_v54 = vmax.f32 %v3626_v32, %v3627_v8  ;;  %v3634_v7 = vrot.slane %v3633_v24, 2 }
 0x32a   :  { %v3697_v34 = vrot.slane %v3696_v21, 2  ;;  %v3703_v20 = vmax.f32 %v3701_v51, %v3702_v0  ;;  %v3710_v57 = vmax.f32 %v3708_v28, %v3709_v50  ;;  %v3716_v63 = vrot.slane %v3715_v41, 4 }
 0x32b   :  { %v3616_v17 = vmax.f32 %v3614_v1, %v3615_v31  ;;  %v3622_v25 = vrot.slane %v3621_v35, 1  ;;  %v3629_v5 = vrot.slane %v3628_v54, 1  ;;  %v3635_v58 = vmax.f32 %v3633_v24, %v3634_v7 }
 0x32c   :  { %v3698_v39 = vmax.f32 %v3696_v21, %v3697_v34  ;;  %v3704_v47 = vrot.slane %v3703_v20, 2  ;;  %v3711_v15 = vrot.slane %v3710_v57, 2  ;;  %v3717_v33 = vmax.f32 %v3715_v41, %v3716_v63 }
 0x32d   :  { %v3623_v6 = vmax.f32 %v3621_v35, %v3622_v25  ;;  %v3630_v29 = vmax.f32 %v3628_v54, %v3629_v5  ;;  %v3636_v59 = vrot.slane %v3635_v58, 1  ;;  %v4259_v43 = vsel %vm3946_vm4, %v3616_v17, -inf  ;;  %v10773_v17 = vld [vmem:[#allocation32_spill] sm:$0xff]  ;;  %v10774_v5 = vld [vmem:[#allocation55_spill] sm:$0xff] }
 0x32e   :  { %v4261_v4 = vmax.f32 %v4259_v43, %v9245_v22  ;;  %v3699_v49 = vrot.slane %v3698_v39, 1  ;;  %v3705_v32 = vmax.f32 %v3703_v20, %v3704_v47  ;;  %v3712_v0 = vmax.f32 %v3710_v57, %v3711_v15  ;;  %v10776_v15 = vld [vmem:[#allocation42_spill] sm:$0xff] }
 0x32f   :  { %v3637_v50 = vmax.f32 %v3635_v58, %v3636_v59  ;;  %v4262_v51 = vsel %vm3946_vm4, %v3623_v6, -inf  ;;  %v4265_v28 = vsel %vm3946_vm4, %v3630_v29, -inf  ;;  %v3718_v24 = vrot.slane %v3717_v33, 2 }
 0x330   :  { %v4264_v1 = vmax.f32 %v4262_v51, %v9252_v61  ;;  %v4267_v63 = vmax.f32 %v4265_v28, %v9260_v23  ;;  %v3700_v35 = vmax.f32 %v3698_v39, %v3699_v49  ;;  %v3706_v25 = vrot.slane %v3705_v32, 1  ;;  %v10775_v39 = vld [vmem:[#allocation44_spill] sm:$0xff]  ;;  %v10780_v51 = vld [vmem:[#allocation43_spill] sm:$0xff]  ;;  %v10781_v28 = vld [vmem:[#allocation21_spill] sm:$0xff] }
 0x331   :  { %v9283_v8 = vsel %vm3946_vm4, %v3637_v50, -inf  ;;  %v3713_v21 = vrot.slane %v3712_v0, 1  ;;  %v3719_v22 = vmax.f32 %v3717_v33, %v3718_v24  ;;  %v1710_v47 = vcombine.high %v9271_v18, %v9271_v18  ;;  %v10777_v33 = vld [vmem:[#allocation24_spill] sm:$0xff] }
 0x332   :  { %v10772_v59 = vrot.slane %v9223_v19, 1  ;;  %v4543_v23 = vsel %vm4459_vm5, %v4264_v1, %v4261_v4  ;;  %v3707_v41 = vmax.f32 %v3705_v32, %v3706_v25  ;;  %v9299_v7 = vsel %vm3946_vm4, %v3700_v35, -inf  ;;  %v10783_v25 = vld [vmem:[#allocation27_spill] sm:$0xff] }
 0x333   :  { %v9296_v31 = vsel %vm4461_vm6, %v4267_v63, %v4543_v23  ;;  %v3720_v54 = vrot.slane %v3719_v22, 1  ;;  %v1717_v34 = vrot.slane %v9271_v18, %v7531_v46  ;;  %v3714_v20 = vmax.f32 %v3712_v0, %v3713_v21  ;;  %v10784_v21 = vld [vmem:[#allocation45_spill] sm:$0xff]  ;;  %v10787_v23 = vld [vmem:[#allocation51_spill] sm:$0xff] }
 0x334   :  { %v9290_v57 = vmax.f32 %v9223_v19, %v10772_v59  ;;  %v1724_v19 = vrot.slane %v1710_v47, %v7531_v46  ;;  %v4159_v58 = vmax.f32 %v10774_v5, %v10773_v17  ;;  %v10778_v6 = vmax.f32 %v10776_v15, %v10777_v33  ;;  %v10786_v59 = vld [vmem:[#allocation53_spill] sm:$0xff]  ;;  %v10791_v15 = vld [vmem:[#allocation47_spill] sm:$0xff] }
 0x335   :  { %v9311_v43 = vmax.f32 %v3719_v22, %v3720_v54  ;;  %v9314_v4 = vsel %vm3946_vm4, %v3707_v41, -inf  ;;  %v1725_v49 = vcombine.high %v1717_v34, %v1717_v34  ;;  %v3638_v18 = vsel %vm2153_vm3, %v1717_v34, -inf  ;;  %v10788_v41 = vld [vmem:[#allocation50_spill] sm:$0xff] }
 0x336   :  { %v4514_v29 = vsel %vm4461_vm6, %v10778_v6, %v10775_v39  ;;  %v1726_v32 = vcombine.high %v1724_v19, %v1724_v19  ;;  %v3639_v0 = vrot.slane %v3638_v18, 4  ;;  %v3652_v50 = vsel %vm2153_vm3, %v1724_v19, -inf  ;;  %v10790_v39 = vld [vmem:[#allocation48_spill] sm:$0xff] }
 0x337   :  { %10779 = vst [vmem:[#allocation40_spill] sm:$0xff] %v9311_v43  ;;  %v10782_v24 = vmax.f32 %v10780_v51, %v10781_v28  ;;  %v3645_v63 = vsel %vm2153_vm3, %v1725_v49, -inf  ;;  %v3653_v35 = vrot.slane %v3652_v50, 4  ;;  %v10785_v22 = vmax.f32 %v10783_v25, %v10784_v21  ;;  %v10793_v28 = vld [vmem:[#allocation37_spill] sm:$0xff] }
 0x338   :  { %v10789_v54 = vmax.f32 %v10787_v23, %v10788_v41  ;;  %v3640_v19 = vmax.f32 %v3638_v18, %v3639_v0  ;;  %v3646_v17 = vrot.slane %v3645_v63, 4  ;;  %v3659_v5 = vsel %vm2153_vm3, %v1726_v32, -inf  ;;  %v10796_v18 = vld [vmem:[#allocation35_spill] sm:$0xff]  ;;  %v10797_v0 = vld [vmem:[#allocation6_spill] sm:$0xff] }
 0x339   :  { %v4515_v1 = vsel %vm4463_vm7, %v10782_v24, %v4514_v29  ;;  %v10792_v33 = vmax.f32 %v10790_v39, %v10791_v15  ;;  %v3654_v29 = vmax.f32 %v3652_v50, %v3653_v35  ;;  %v3660_v49 = vrot.slane %v3659_v5, 4  ;;  %v10794_v24 = vld [vmem:[#allocation34_spill] sm:$0xff]  ;;  %v10801_v41 = vld [vmem:[#allocation15_spill] sm:$0xff] }
 0x33a   :  { %v4516_v47 = vsel %vm4465_vm8, %v10785_v22, %v4515_v1  ;;  %v4521_v34 = vsel %vm4463_vm7, %v10789_v54, %v10786_v59  ;;  %v10795_v1 = vmax.f32 %v10793_v28, %v10794_v24  ;;  %v3641_v21 = vrot.slane %v3640_v19, 2  ;;  %v10800_v35 = vld [vmem:[#allocation26_spill] sm:$0xff] }
 0x33b   :  { %v4517_v6 = vsel %vm4467_vm9, %v10792_v33, %v4516_v47  ;;  %v3647_v22 = vmax.f32 %v3645_v63, %v3646_v17  ;;  %v10798_v59 = vmax.f32 %v10796_v18, %v10797_v0  ;;  %v3655_v47 = vrot.slane %v3654_v29, 2  ;;  %v10803_v39 = vld [vmem:[#allocation54_spill] sm:$0xff] }
 0x33c   :  { %v4518_v51 = vsel %vm4469_vm10, %v4159_v58, %v4517_v6  ;;  %v4522_v25 = vsel %vm4465_vm8, %v10795_v1, %v4521_v34  ;;  %v3661_v50 = vmax.f32 %v3659_v5, %v3660_v49  ;;  %v10802_v58 = vmax.f32 %v10800_v35, %v10801_v41  ;;  %v10805_v33 = vld [vmem:[#allocation46_spill] sm:$0xff] }
 0x33d   :  { %v4523_v32 = vsel %vm4467_vm9, %v10798_v59, %v4522_v25  ;;  %v9347_v23 = vsel %vm4593_vm11, 0.0, %v4518_v51  ;;  %v4160_v34 = vsel %vm3946_vm4, %v10803_v39, -inf  ;;  %v3642_v15 = vmax.f32 %v3640_v19, %v3641_v21 }
 0x33e   :  { %10799 = vst [vmem:[#allocation32_spill] sm:$0xff] %v9347_v23  ;;  %v4524_v54 = vsel %vm4469_vm10, %v10802_v58, %v4523_v32  ;;  %v3648_v63 = vrot.slane %v3647_v22, 2  ;;  %v4161_v6 = vsel %vm3946_vm4, %v10805_v33, -inf  ;;  %v3656_v51 = vmax.f32 %v3654_v29, %v3655_v47 }
 0x33f   :  { %v9356_v17 = vsel %vm4593_vm11, 0.0, %v4524_v54  ;;  %v3662_v28 = vrot.slane %v3661_v50, 2  ;;  %v4162_v49 = vmax.f32 %v4160_v34, %v4161_v6  ;;  %v3643_v24 = vrot.slane %v3642_v15, 1 }
 0x340   :  { %10804 = vst [vmem:[#allocation55_spill] sm:$0xff] %v9356_v17  ;;  %v7065_v5 = vpack.i.bf16 %v9356_v17, %v9347_v23  ;;  %v3649_v1 = vmax.f32 %v3647_v22, %v3648_v63  ;;  %v4184_v25 = vsel %vm3946_vm4, %v8896_v3, -inf  ;;  %v4185_v19 = vsel %vm3946_vm4, %v8891_v42, -inf }
 0x341   :  { %v3657_v21 = vrot.slane %v3656_v51, 1  ;;  %v3663_v18 = vmax.f32 %v3661_v50, %v3662_v28  ;;  %v4186_v0 = vmax.f32 %v4184_v25, %v4185_v19  ;;  %v4618_v29 = vsel %vm4593_vm11, %v4162_v49, 0.0 }
 0x342   :  { %7066 = vrot.lane.b32.xlu0 %v7065_v5, %s7314_s18  ;;  %v9369_v59 = vsel %vm3946_vm4, %v3714_v20, -inf  ;;  %v3644_v32 = vmax.f32 %v3642_v15, %v3643_v24  ;;  %v3650_v47 = vrot.slane %v3649_v1, 1  ;;  %v4768_v22 = vrot.slane %v9347_v23, 2 }
 0x343   :  { %10806 = vst [vmem:[#allocation44_spill] sm:$0xff] %v9369_v59  ;;  %v3658_v35 = vmax.f32 %v3656_v51, %v3657_v21  ;;  %v4619_v3 = vsel %vm4593_vm11, %v4186_v0, 0.0  ;;  %v4769_v41 = vrot.slane %v4618_v29, 2  ;;  %v4771_v42 = vrot.slane %v9356_v17, 2 }
 0x344   :  { %v3651_v58 = vmax.f32 %v3649_v1, %v3650_v47  ;;  %v3664_v50 = vrot.slane %v3663_v18, 1  ;;  %v9375_v54 = vsel %vm3946_vm4, %v3644_v32, -inf  ;;  %v4772_v39 = vrot.slane %v4619_v3, 2 }
 0x345   :  { %v9380_v34 = vsel %vm3946_vm4, %v3658_v35, -inf  ;;  %v4770_v15 = vsel %vm386_vm1, %v4768_v22, %v4769_v41  ;;  %v4679_v63 = vrot.slane %v9347_v23, 1  ;;  %v4680_v28 = vrot.slane %v4618_v29, 1 }
 0x346   :  { %10807 = vst [vmem:[#allocation42_spill] sm:$0xff] %v9380_v34  ;;  %v9385_v33 = vsel %vm3946_vm4, %v3651_v58, -inf  ;;  %v9390_v51 = vsel %vm386_vm1, %v4771_v42, %v4772_v39  ;;  %v4682_v24 = vrot.slane %v9356_v17, 1  ;;  %v4683_v1 = vrot.slane %v4619_v3, 1 }
 0x347   :  { %10808 = vst [vmem:[#allocation24_spill] sm:$0xff] %v9390_v51  ;;  %v7075_v49 = vpack.i.bf16 %v9390_v51, %v4770_v15  ;;  %v9396_v25 = vmax.f32 %v3663_v18, %v3664_v50  ;;  %v659_v19 = vadd.f32 %v9024_v52, %v8991_v30  ;;  %v651_v21 = vadd.f32 %v9024_v52, %v9018_v48 }
 0x348   :  { %v662_v0 = vadd.f32 %v9024_v52, %v9028_v56  ;;  %v4681_v29 = vsel %vm4655_vm12, %v4679_v63, %v4680_v28  ;;  %v9407_v32 = vsel %vm4655_vm12, %v4682_v24, %v4683_v1  ;;  %v654_v18 = vadd.f32 %v9024_v52, %v9037_v2 }
 0x349   :  { %7076 = vrot.lane.b32.xlu1 %v7075_v49, %s7313_s17  ;;  %v10809_v30 = vmax.f32 %v8881_v14, %v8866_v10  ;;  %v7070_v48 = vpack.i.bf16 %v9407_v32, %v4681_v29  ;;  %v739_v22 = vmax.f32 %v659_v19, 0.0  ;;  %v737_v56 = vmax.f32 %v651_v21, 0.0 }
 0x34a   :  { %v740_v35 = vmax.f32 %v662_v0, 0.0  ;;  %v9417_v3 = vmax.f32 %v654_v18, 0.0  ;;  %v10810_v41 = vmax.f32 %v8967_v16, %v8905_v38 }
 0x34b   :  { %v4527_v47 = vsel %vm4463_vm7, %v10809_v30, %v8899_v40  ;;  %7071 = vrot.lane.b32.xlu0 %v7070_v48, %s7312_s16  ;;  %v1795_v52 = vcombine.high %v739_v22, %v739_v22  ;;  %v1802_v10 = vrot.slane %v739_v22, %v7531_v46  ;;  %v1761_v14 = vcombine.high %v737_v56, %v737_v56 }
 0x34c   :  { %v9423_v42 = vsel %vm4465_vm8, %v10810_v41, %v4527_v47  ;;  %v1768_v40 = vrot.slane %v737_v56, %v7531_v46  ;;  %v1812_v2 = vcombine.high %v740_v35, %v740_v35  ;;  %v9429_v58 = vrot.slane %v740_v35, %v7531_v46 }
 0x34d   :  { %7081 = vrot.lane.b32.xlu1 %v7070_v48, %s7315_s19  ;;  %v9436_v16 = vrot.slane %v9417_v3, %v7531_v46  ;;  %v1809_v50 = vrot.slane %v1795_v52, %v7531_v46  ;;  %v1810_v39 = vcombine.high %v1802_v10, %v1802_v10  ;;  %v3778_v15 = vsel %vm2153_vm3, %v1802_v10, -inf }
 0x34e   :  { %v1775_v63 = vrot.slane %v1761_v14, %v7531_v46  ;;  %v3779_v28 = vrot.slane %v3778_v15, 4  ;;  %v1776_v24 = vcombine.high %v1768_v40, %v1768_v40  ;;  %v3722_v1 = vsel %vm2153_vm3, %v1768_v40, -inf }
 0x34f   :  { %v9443_v19 = vrot.slane %v1812_v2, %v7531_v46  ;;  %v1811_v21 = vcombine.high %v1809_v50, %v1809_v50  ;;  %v3785_v0 = vsel %vm2153_vm3, %v1810_v39, -inf  ;;  %v3792_v29 = vsel %vm2153_vm3, %v1809_v50, -inf  ;;  %7086 = vrot.lane.b32.xlu0 %v7075_v49, %s7316_s22 }
 0x350   :  { %v1777_v18 = vcombine.high %v1775_v63, %v1775_v63  ;;  %v3780_v30 = vmax.f32 %v3778_v15, %v3779_v28  ;;  %v3786_v47 = vrot.slane %v3785_v0, 4  ;;  %v3793_v48 = vrot.slane %v3792_v29, 4 }
 0x351   :  { %v3723_v22 = vrot.slane %v3722_v1, 4  ;;  %v3799_v56 = vsel %vm2153_vm3, %v1811_v21, -inf  ;;  %v3729_v35 = vsel %vm2153_vm3, %v1776_v24, -inf  ;;  %v3736_v41 = vsel %vm2153_vm3, %v1775_v63, -inf }
 0x352   :  { %v3743_v52 = vsel %vm2153_vm3, %v1777_v18, -inf  ;;  %v3781_v10 = vrot.slane %v3780_v30, 2  ;;  %v3787_v14 = vmax.f32 %v3785_v0, %v3786_v47  ;;  %v3794_v40 = vmax.f32 %v3792_v29, %v3793_v48 }
 0x353   :  { %v3800_v2 = vrot.slane %v3799_v56, 4  ;;  %v3724_v50 = vmax.f32 %v3722_v1, %v3723_v22  ;;  %v3730_v39 = vrot.slane %v3729_v35, 4  ;;  %v3737_v6 = vrot.slane %v3736_v41, 4 }
 0x354   :  { %v3744_v49 = vrot.slane %v3743_v52, 4  ;;  %v3782_v15 = vmax.f32 %v3780_v30, %v3781_v10  ;;  %v3788_v28 = vrot.slane %v3787_v14, 2  ;;  %v3795_v5 = vrot.slane %v3794_v40, 2 }
 0x355   :  { %v3801_v20 = vmax.f32 %v3799_v56, %v3800_v2  ;;  %v3725_v61 = vrot.slane %v3724_v50, 2  ;;  %v3731_v21 = vmax.f32 %v3729_v35, %v3730_v39  ;;  %v3738_v38 = vmax.f32 %v3736_v41, %v3737_v6 }
 0x356   :  { %v3745_v24 = vmax.f32 %v3743_v52, %v3744_v49  ;;  %v3783_v51 = vrot.slane %v3782_v15, 1  ;;  %v3789_v63 = vmax.f32 %v3787_v14, %v3788_v28  ;;  %v3796_v23 = vmax.f32 %v3794_v40, %v3795_v5 }
 0x357   :  { %v3802_v18 = vrot.slane %v3801_v20, 2  ;;  %v3726_v59 = vmax.f32 %v3724_v50, %v3725_v61  ;;  %v3732_v0 = vrot.slane %v3731_v21, 2  ;;  %v3739_v29 = vrot.slane %v3738_v38, 2 }
 0x358   :  { %v3746_v47 = vrot.slane %v3745_v24, 2  ;;  %v3784_v1 = vmax.f32 %v3782_v15, %v3783_v51  ;;  %v3790_v48 = vrot.slane %v3789_v63, 1  ;;  %v3797_v22 = vrot.slane %v3796_v23, 1 }
 0x359   :  { %v3803_v34 = vmax.f32 %v3801_v20, %v3802_v18  ;;  %v3727_v30 = vrot.slane %v3726_v59, 1  ;;  %v3733_v10 = vmax.f32 %v3731_v21, %v3732_v0  ;;  %v3740_v43 = vmax.f32 %v3738_v38, %v3739_v29  ;;  %v10820_v29 = vld [vmem:[#allocation16_spill] sm:$0xff] }
 0x35a   :  { %v3747_v56 = vmax.f32 %v3745_v24, %v3746_v47  ;;  %v3791_v2 = vmax.f32 %v3789_v63, %v3790_v48  ;;  %v3798_v35 = vmax.f32 %v3796_v23, %v3797_v22  ;;  %v4284_v41 = vsel %vm3946_vm4, %v3784_v1, -inf }
 0x35b   :  { %v3804_v6 = vrot.slane %v3803_v34, 1  ;;  %v3728_v52 = vmax.f32 %v3726_v59, %v3727_v30  ;;  %v3734_v5 = vrot.slane %v3733_v10, 1  ;;  %v3741_v14 = vrot.slane %v3740_v43, 1 }
 0x35c   :  { %v3748_v61 = vrot.slane %v3747_v56, 1  ;;  %v4287_v50 = vsel %vm3946_vm4, %v3791_v2, -inf  ;;  %v4290_v51 = vsel %vm3946_vm4, %v3798_v35, -inf  ;;  %v1827_v20 = vcombine.high %v9429_v58, %v9429_v58 }
 0x35d   :  { %v3805_v40 = vmax.f32 %v3803_v34, %v3804_v6  ;;  %v3735_v39 = vmax.f32 %v3733_v10, %v3734_v5  ;;  %v3742_v38 = vmax.f32 %v3740_v43, %v3741_v14  ;;  %v4283_v23 = vsel %vm3946_vm4, %v3728_v52, -inf }
 0x35e   :  { %v3749_v49 = vmax.f32 %v3747_v56, %v3748_v61  ;;  %v4285_v59 = vmax.f32 %v4283_v23, %v4284_v41  ;;  %v1828_v28 = vcombine.high %v9443_v19, %v9443_v19  ;;  %v3806_v34 = vsel %vm2153_vm3, %v9429_v58, -inf }
 0x35f   :  { %v9459_v15 = vsel %vm3946_vm4, %v3805_v40, -inf  ;;  %v4286_v21 = vsel %vm3946_vm4, %v3735_v39, -inf  ;;  %v4289_v24 = vsel %vm3946_vm4, %v3742_v38, -inf  ;;  %v3807_v43 = vrot.slane %v3806_v34, 4 }
 0x360   :  { %v9468_v63 = vsel %vm3946_vm4, %v3749_v49, -inf  ;;  %v4288_v18 = vmax.f32 %v4286_v21, %v4287_v50  ;;  %v4291_v0 = vmax.f32 %v4289_v24, %v4290_v51  ;;  %v3813_v47 = vsel %vm2153_vm3, %v1827_v20, -inf }
 0x361   :  { %v3808_v1 = vmax.f32 %v3806_v34, %v3807_v43  ;;  %v3814_v48 = vrot.slane %v3813_v47, 4  ;;  %v3820_v58 = vsel %vm2153_vm3, %v9443_v19, -inf  ;;  %v3827_v22 = vsel %vm2153_vm3, %v1828_v28, -inf }
 0x362   :  { %v4549_v30 = vsel %vm4459_vm5, %v4288_v18, %v4285_v59  ;;  %v3821_v10 = vrot.slane %v3820_v58, 4  ;;  %v3828_v56 = vrot.slane %v3827_v22, 4  ;;  %v10811_v2 = vcombine.high %v9417_v3, %v9417_v3 }
 0x363   :  { %v9482_v6 = vsel %vm4461_vm6, %v4291_v0, %v4549_v30  ;;  %v3809_v41 = vrot.slane %v3808_v1, 2  ;;  %v3815_v52 = vmax.f32 %v3813_v47, %v3814_v48  ;;  %v1793_v5 = vcombine.high %v9436_v16, %v9436_v16 }
 0x364   :  { %v1792_v35 = vrot.slane %v10811_v2, %v7531_v46  ;;  %v3822_v19 = vmax.f32 %v3820_v58, %v3821_v10  ;;  %v3829_v14 = vmax.f32 %v3827_v22, %v3828_v56  ;;  %v3750_v40 = vsel %vm2153_vm3, %v9436_v16, -inf }
 0x365   :  { %v3810_v50 = vmax.f32 %v3808_v1, %v3809_v41  ;;  %v3816_v51 = vrot.slane %v3815_v52, 2  ;;  %v3751_v20 = vrot.slane %v3750_v40, 4  ;;  %v3757_v3 = vsel %vm2153_vm3, %v1793_v5, -inf }
 0x366   :  { %v1794_v61 = vcombine.high %v1792_v35, %v1792_v35  ;;  %v3823_v39 = vrot.slane %v3822_v19, 2  ;;  %v3830_v38 = vrot.slane %v3829_v14, 2  ;;  %v3758_v49 = vrot.slane %v3757_v3, 4 }
 0x367   :  { %v3764_v23 = vsel %vm2153_vm3, %v1792_v35, -inf  ;;  %v3811_v59 = vrot.slane %v3810_v50, 1  ;;  %v3817_v28 = vmax.f32 %v3815_v52, %v3816_v51  ;;  %v3752_v34 = vmax.f32 %v3750_v40, %v3751_v20 }
 0x368   :  { %v3765_v21 = vrot.slane %v3764_v23, 4  ;;  %v3824_v24 = vmax.f32 %v3822_v19, %v3823_v39  ;;  %v3831_v43 = vmax.f32 %v3829_v14, %v3830_v38  ;;  %v3759_v18 = vmax.f32 %v3757_v3, %v3758_v49 }
 0x369   :  { %v3771_v0 = vsel %vm2153_vm3, %v1794_v61, -inf  ;;  %v3812_v16 = vmax.f32 %v3810_v50, %v3811_v59  ;;  %v3818_v47 = vrot.slane %v3817_v28, 1  ;;  %v3753_v1 = vrot.slane %v3752_v34, 2 }
 0x36a   :  { %v3766_v48 = vmax.f32 %v3764_v23, %v3765_v21  ;;  %v3825_v58 = vrot.slane %v3824_v24, 1  ;;  %v3760_v22 = vrot.slane %v3759_v18, 2  ;;  %v3772_v30 = vrot.slane %v3771_v0, 4 }
 0x36b   :  { %v4208_v10 = vsel %vm3946_vm4, %v9062_v55, -inf  ;;  %v3819_v56 = vmax.f32 %v3817_v28, %v3818_v47  ;;  %v3832_v2 = vrot.slane %v3831_v43, 1  ;;  %v3754_v35 = vmax.f32 %v3752_v34, %v3753_v1 }
 0x36c   :  { %v3767_v41 = vrot.slane %v3766_v48, 2  ;;  %v3826_v52 = vmax.f32 %v3824_v24, %v3825_v58  ;;  %v9494_v5 = vsel %vm3946_vm4, %v3812_v16, -inf  ;;  %v3761_v19 = vmax.f32 %v3759_v18, %v3760_v22  ;;  %v7308_v18 = vld [vmem:[%s10457_s2] ss:$0 sm:$0xff] }
 0x36d   :  { %v3773_v14 = vmax.f32 %v3771_v0, %v3772_v30  ;;  %v9497_v61 = vsel %vm3946_vm4, %v3819_v56, -inf  ;;  %v3755_v40 = vrot.slane %v3754_v35, 1  ;;  %v10812_v51 = vmax.f32 %v8978_v9, %v8915_v27 }
 0x36e   :  { %v3768_v50 = vmax.f32 %v3766_v48, %v3767_v41  ;;  %v9505_v20 = vsel %vm3946_vm4, %v3826_v52, -inf  ;;  %v3762_v3 = vrot.slane %v3761_v19, 1  ;;  %v10813_v38 = vmax.f32 %v8975_v12, %v8950_v37 }
 0x36f   :  { %v4529_v55 = vsel %vm4467_vm9, %v10812_v51, %v9423_v42  ;;  %v3774_v39 = vrot.slane %v3773_v14, 2  ;;  %v3756_v23 = vmax.f32 %v3754_v35, %v3755_v40  ;;  %v4209_v27 = vsel %vm3946_vm4, %v9052_v44, -inf }
 0x370   :  { %v4530_v49 = vsel %vm4469_vm10, %v10813_v38, %v4529_v55  ;;  %v3769_v59 = vrot.slane %v3768_v50, 1  ;;  %v3763_v9 = vmax.f32 %v3761_v19, %v3762_v3  ;;  %v4210_v21 = vmax.f32 %v4208_v10, %v4209_v27 }
 0x371   :  { %v9512_v28 = vsel %vm4593_vm11, 0.0, %v4530_v49  ;;  %v9516_v42 = vmax.f32 %v3773_v14, %v3774_v39  ;;  %v9521_v37 = vsel %vm3946_vm4, %v3756_v23, -inf  ;;  %v675_v0 = vadd.f32 %v7308_v18, %v9146_v13 }
 0x372   :  { %v7090_v34 = vpack.i.bf16 %v9512_v28, %v9356_v17  ;;  %v3770_v24 = vmax.f32 %v3768_v50, %v3769_v59  ;;  %v4685_v12 = vrot.slane %v9512_v28, 1  ;;  %v9528_v44 = vmax.f32 %v3831_v43, %v3832_v2 }
 0x373   :  { %v9533_v47 = vsel %vm3946_vm4, %v3763_v9, -inf  ;;  %v9537_v1 = vsel %vm4593_vm11, %v4210_v21, 0.0  ;;  %v743_v43 = vmax.f32 %v675_v0, 0.0  ;;  %v3776_v22 = vrot.slane %v9516_v42, 1 }
 0x374   :  { %7091 = vrot.lane.b32.xlu1 %v7090_v34, %s7317_s23  ;;  %v9542_v58 = vsel %vm3946_vm4, %v3770_v24, -inf  ;;  %v4686_v13 = vrot.slane %v9537_v1, 1  ;;  %v667_v10 = vadd.f32 %v7308_v18, %v9157_v11  ;;  %v678_v56 = vadd.f32 %v7308_v18, %v9160_v53 }
 0x375   :  { %v1863_v35 = vcombine.high %v743_v43, %v743_v43  ;;  %v1870_v41 = vrot.slane %v743_v43, %v7531_v46  ;;  %v670_v52 = vadd.f32 %v7308_v18, %v9168_v60  ;;  %v10814_v50 = vmax.f32 %v9010_v62, %v8997_v26 }
 0x376   :  { %v9551_v2 = vsel %vm4655_vm12, %v4685_v12, %v4686_v13  ;;  %v741_v14 = vmax.f32 %v667_v10, 0.0  ;;  %v744_v40 = vmax.f32 %v678_v56, 0.0 }
 0x377   :  { %v7095_v19 = vpack.i.bf16 %v9551_v2, %v9407_v32  ;;  %v9562_v11 = vsel %vm4463_vm7, %v10814_v50, %v9016_v36  ;;  %v1877_v53 = vrot.slane %v1863_v35, %v7531_v46  ;;  %v1878_v51 = vcombine.high %v1870_v41, %v1870_v41 }
 0x378   :  { %v3890_v55 = vsel %vm2153_vm3, %v1870_v41, -inf  ;;  %v9566_v3 = vmax.f32 %v670_v52, 0.0  ;;  %v1829_v32 = vcombine.high %v741_v14, %v741_v14  ;;  %v1836_v39 = vrot.slane %v741_v14, %v7531_v46 }
 0x379   :  { %7096 = vrot.lane.b32.xlu0 %v7095_v19, %s7318_s24  ;;  %v3891_v60 = vrot.slane %v3890_v55, 4  ;;  %v1880_v38 = vcombine.high %v744_v40, %v744_v40  ;;  %v1879_v49 = vcombine.high %v1877_v53, %v1877_v53  ;;  %v3897_v26 = vsel %vm2153_vm3, %v1878_v51, -inf }
 0x37a   :  { %v3904_v62 = vsel %vm2153_vm3, %v1877_v53, -inf  ;;  %v1887_v36 = vrot.slane %v744_v40, %v7531_v46  ;;  %v3898_v59 = vrot.slane %v3897_v26, 4  ;;  %v1843_v9 = vrot.slane %v1829_v32, %v7531_v46 }
 0x37b   :  { %v3892_v23 = vmax.f32 %v3890_v55, %v3891_v60  ;;  %v3905_v27 = vrot.slane %v3904_v62, 4  ;;  %v3911_v34 = vsel %vm2153_vm3, %v1879_v49, -inf  ;;  %v1844_v21 = vcombine.high %v1836_v39, %v1836_v39 }
 0x37c   :  { %v3834_v24 = vsel %vm2153_vm3, %v1836_v39, -inf  ;;  %v9577_v12 = vrot.slane %v1880_v38, %v7531_v46  ;;  %v3899_v0 = vmax.f32 %v3897_v26, %v3898_v59  ;;  %v3912_v43 = vrot.slane %v3911_v34, 4 }
 0x37d   :  { %v3893_v18 = vrot.slane %v3892_v23, 2  ;;  %v3906_v13 = vmax.f32 %v3904_v62, %v3905_v27  ;;  %v1845_v10 = vcombine.high %v1843_v9, %v1843_v9  ;;  %v3835_v56 = vrot.slane %v3834_v24, 4 }
 0x37e   :  { %v3841_v35 = vsel %vm2153_vm3, %v1844_v21, -inf  ;;  %v3848_v41 = vsel %vm2153_vm3, %v1843_v9, -inf  ;;  %v3900_v19 = vrot.slane %v3899_v0, 2  ;;  %v3913_v40 = vmax.f32 %v3911_v34, %v3912_v43 }
 0x37f   :  { %v3894_v52 = vmax.f32 %v3892_v23, %v3893_v18  ;;  %v3907_v14 = vrot.slane %v3906_v13, 2  ;;  %v3836_v50 = vmax.f32 %v3834_v24, %v3835_v56  ;;  %v3842_v53 = vrot.slane %v3841_v35, 4  ;;  %v9582_v18 = vpop.permute.xlu0 %6926 }
 0x380   :  { %v3849_v51 = vrot.slane %v3848_v41, 4  ;;  %v3855_v55 = vsel %vm2153_vm3, %v1845_v10, -inf  ;;  %v3901_v32 = vmax.f32 %v3899_v0, %v3900_v19  ;;  %v3914_v38 = vrot.slane %v3913_v40, 2 }
 0x381   :  { %v3895_v60 = vrot.slane %v3894_v52, 1  ;;  %v3908_v39 = vmax.f32 %v3906_v13, %v3907_v14  ;;  %v3837_v49 = vrot.slane %v3836_v50, 2  ;;  %v3843_v26 = vmax.f32 %v3841_v35, %v3842_v53 }
 0x382   :  { %v3850_v62 = vmax.f32 %v3848_v41, %v3849_v51  ;;  %v3856_v59 = vrot.slane %v3855_v55, 4  ;;  %v3902_v21 = vrot.slane %v3901_v32, 1  ;;  %v3915_v23 = vmax.f32 %v3913_v40, %v3914_v38 }
 0x383   :  { %v3896_v27 = vmax.f32 %v3894_v52, %v3895_v60  ;;  %v3909_v9 = vrot.slane %v3908_v39, 1  ;;  %v3838_v34 = vmax.f32 %v3836_v50, %v3837_v49  ;;  %v3844_v24 = vrot.slane %v3843_v26, 2  ;;  %v9596_v49 = vpop.permute.xlu0 %6931 }
 0x384   :  { %v3851_v43 = vrot.slane %v3850_v62, 2  ;;  %v3857_v56 = vmax.f32 %v3855_v55, %v3856_v59  ;;  %v3903_v30 = vmax.f32 %v3901_v32, %v3902_v21  ;;  %v3916_v48 = vrot.slane %v3915_v23, 1 }
 0x385   :  { %v3910_v10 = vmax.f32 %v3908_v39, %v3909_v9  ;;  %v4308_v0 = vsel %vm3946_vm4, %v3896_v27, -inf  ;;  %v3839_v13 = vrot.slane %v3838_v34, 1  ;;  %v3845_v19 = vmax.f32 %v3843_v26, %v3844_v24 }
 0x386   :  { %v3852_v35 = vmax.f32 %v3850_v62, %v3851_v43  ;;  %v3858_v41 = vrot.slane %v3857_v56, 2  ;;  %v3917_v14 = vmax.f32 %v3915_v23, %v3916_v48  ;;  %v4311_v52 = vsel %vm3946_vm4, %v3903_v30, -inf  ;;  %v9598_v30 = vpop.permute.xlu1 %6936 }
 0x387   :  { %v9587_v40 = vsel %vm3946_vm4, %v3910_v10, -inf  ;;  %v1895_v53 = vcombine.high %v1887_v36, %v1887_v36  ;;  %v3840_v50 = vmax.f32 %v3838_v34, %v3839_v13  ;;  %v3846_v51 = vrot.slane %v3845_v19, 1 }
 0x388   :  { %v3853_v60 = vrot.slane %v3852_v35, 1  ;;  %v3859_v55 = vmax.f32 %v3857_v56, %v3858_v41  ;;  %v9590_v32 = vsel %vm3946_vm4, %v3917_v14, -inf  ;;  %v1896_v39 = vcombine.high %v9577_v12, %v9577_v12 }
 0x389   :  { %v3918_v38 = vsel %vm2153_vm3, %v1887_v36, -inf  ;;  %v3925_v48 = vsel %vm2153_vm3, %v1895_v53, -inf  ;;  %v3847_v26 = vmax.f32 %v3845_v19, %v3846_v51  ;;  %v4307_v27 = vsel %vm3946_vm4, %v3840_v50, -inf }
 0x38a   :  { %v3854_v62 = vmax.f32 %v3852_v35, %v3853_v60  ;;  %v3860_v59 = vrot.slane %v3859_v55, 1  ;;  %v4309_v21 = vmax.f32 %v4307_v27, %v4308_v0  ;;  %v3919_v9 = vrot.slane %v3918_v38, 4  ;;  %v9620_v60 = vpop.permute.xlu0 %6946 }
 0x38b   :  { %v3926_v23 = vrot.slane %v3925_v48, 4  ;;  %v3932_v34 = vsel %vm2153_vm3, %v9577_v12, -inf  ;;  %v4310_v36 = vsel %vm3946_vm4, %v3847_v26, -inf  ;;  %v3939_v14 = vsel %vm2153_vm3, %v1896_v39, -inf }
 0x38c   :  { %v3861_v24 = vmax.f32 %v3859_v55, %v3860_v59  ;;  %v9605_v43 = vsel %vm3946_vm4, %v3854_v62, -inf  ;;  %v3933_v56 = vrot.slane %v3932_v34, 4  ;;  %v4312_v10 = vmax.f32 %v4310_v36, %v4311_v52  ;;  %v9622_v55 = vpop.permute.xlu1 %6941 }
 0x38d   :  { %v3920_v19 = vmax.f32 %v3918_v38, %v3919_v9  ;;  %v3927_v35 = vmax.f32 %v3925_v48, %v3926_v23  ;;  %v1846_v12 = vcombine.high %v9566_v3, %v9566_v3  ;;  %v3940_v48 = vrot.slane %v3939_v14, 4  ;;  %v10816_v9 = vld [vmem:[#allocation38_spill] sm:$0xff] }
 0x38e   :  { %v9610_v0 = vsel %vm3946_vm4, %v3861_v24, -inf  ;;  %v3934_v41 = vmax.f32 %v3932_v34, %v3933_v56  ;;  %v9618_v50 = vsel %vm4459_vm5, %v4312_v10, %v4309_v21  ;;  %v1853_v39 = vrot.slane %v9566_v3, %v7531_v46  ;;  %v10815_v21 = vld [vmem:[#allocation25_spill] sm:$0xff] }
 0x38f   :  { %v3921_v52 = vrot.slane %v3920_v19, 2  ;;  %v3928_v51 = vrot.slane %v3927_v35, 2  ;;  %v1860_v26 = vrot.slane %v1846_v12, %v7531_v46  ;;  %v9630_v62 = vmax.f32 %v9516_v42, %v3776_v22  ;;  %v9639_v42 = vpop.permute.xlu0 %6956 }
 0x390   :  { %v3935_v38 = vrot.slane %v3934_v41, 2  ;;  %v10817_v23 = vmax.f32 %v10815_v21, %v10816_v9  ;;  %v3941_v36 = vmax.f32 %v3939_v14, %v3940_v48  ;;  %v1861_v56 = vcombine.high %v1853_v39, %v1853_v39  ;;  %10818 = vst [vmem:[#allocation43_spill] sm:$0xff] %v9639_v42  ;;  %v9642_v14 = vpop.permute.xlu1 %6951 }
 0x391   :  { %v3922_v59 = vmax.f32 %v3920_v19, %v3921_v52  ;;  %v3929_v27 = vmax.f32 %v3927_v35, %v3928_v51  ;;  %v1862_v10 = vcombine.high %v1860_v26, %v1860_v26  ;;  %v3862_v12 = vsel %vm2153_vm3, %v1853_v39, -inf  ;;  %10819 = vst [vmem:[#allocation21_spill] sm:$0xff] %v9642_v14 }
 0x392   :  { %v4534_v34 = vsel %vm4465_vm8, %v10817_v23, %v9562_v11  ;;  %v3936_v24 = vmax.f32 %v3934_v41, %v3935_v38  ;;  %v3876_v13 = vsel %vm2153_vm3, %v1860_v26, -inf  ;;  %v3942_v19 = vrot.slane %v3941_v36, 2 }
 0x393   :  { %v3923_v3 = vrot.slane %v3922_v59, 1  ;;  %v3930_v53 = vrot.slane %v3929_v27, 1  ;;  %v3863_v35 = vrot.slane %v3862_v12, 4  ;;  %v3869_v52 = vsel %vm2153_vm3, %v1861_v56, -inf }
 0x394   :  { %v3937_v22 = vrot.slane %v3936_v24, 1  ;;  %v3870_v11 = vrot.slane %v3869_v52, 4  ;;  %v3877_v41 = vrot.slane %v3876_v13, 4  ;;  %v3943_v48 = vmax.f32 %v3941_v36, %v3942_v19  ;;  %v10821_v36 = vld [vmem:[#allocation10_spill] sm:$0xff] }
 0x395   :  { %v3924_v51 = vmax.f32 %v3922_v59, %v3923_v3  ;;  %v3931_v21 = vmax.f32 %v3929_v27, %v3930_v53  ;;  %v3864_v9 = vmax.f32 %v3862_v12, %v3863_v35  ;;  %v3883_v39 = vsel %vm2153_vm3, %v1862_v10, -inf  ;;  %v10822_v12 = vld [vmem:[#allocation12_spill] sm:$0xff]  ;;  %v10824_v19 = vld [vmem:[#allocation14_spill] sm:$0xff] }
 0x396   :  { %v3938_v38 = vmax.f32 %v3936_v24, %v3937_v22  ;;  %v3871_v23 = vmax.f32 %v3869_v52, %v3870_v11  ;;  %v3878_v16 = vmax.f32 %v3876_v13, %v3877_v41  ;;  %v4232_v46 = vsel %vm3946_vm4, %v10820_v29, -inf  ;;  %v9659_v13 = vpop.permute.xlu0 %6966  ;;  %v10826_v11 = vld [vmem:[#allocation11_spill] sm:$0xff] }
 0x397   :  { %v9646_v26 = vsel %vm3946_vm4, %v3924_v51, -inf  ;;  %v3944_v56 = vrot.slane %v3943_v48, 1  ;;  %v9651_v53 = vsel %vm3946_vm4, %v3931_v21, -inf  ;;  %v3865_v59 = vrot.slane %v3864_v9, 2  ;;  %v10825_v21 = vld [vmem:[#allocation41_spill] sm:$0xff] }
 0x398   :  { %v3884_v27 = vrot.slane %v3883_v39, 4  ;;  %v3872_v3 = vrot.slane %v3871_v23, 2  ;;  %v3879_v24 = vrot.slane %v3878_v16, 2  ;;  %v10823_v22 = vmax.f32 %v10821_v36, %v10822_v12  ;;  %v9671_v12 = vpop.permute.xlu1 %6961 }
 0x399   :  { %v4233_v35 = vsel %vm3946_vm4, %v10824_v19, -inf  ;;  %v9662_v29 = vsel %vm3946_vm4, %v3938_v38, -inf  ;;  %v3866_v52 = vmax.f32 %v3864_v9, %v3865_v59  ;;  %v10827_v41 = vmax.f32 %v10825_v21, %v10826_v11 }
 0x39a   :  { %v4535_v10 = vsel %vm4467_vm9, %v10823_v22, %v4534_v34  ;;  %v3885_v51 = vmax.f32 %v3883_v39, %v3884_v27  ;;  %v3873_v42 = vmax.f32 %v3871_v23, %v3872_v3  ;;  %v3880_v14 = vmax.f32 %v3878_v16, %v3879_v24  ;;  %v9685_v11 = vpop.permute.xlu0 %6976 }
 0x39b   :  { %v4536_v17 = vsel %vm4469_vm10, %v10827_v41, %v4535_v10  ;;  %v4234_v34 = vmax.f32 %v4232_v46, %v4233_v35  ;;  %v3867_v22 = vrot.slane %v3866_v52, 1  ;;  %v4774_v9 = vrot.slane %v9512_v28, 2 }
 0x39c   :  { %v9669_v36 = vsel %vm4593_vm11, 0.0, %v4536_v17  ;;  %v3886_v19 = vrot.slane %v3885_v51, 2  ;;  %v3874_v39 = vrot.slane %v3873_v42, 1  ;;  %v3881_v59 = vrot.slane %v3880_v14, 1 }
 0x39d   :  { %v7100_v38 = vpack.i.bf16 %v9669_v36, %v9512_v28  ;;  %v4621_v27 = vsel %vm4593_vm11, %v4234_v34, 0.0  ;;  %v4775_v23 = vrot.slane %v9537_v1, 2  ;;  %v3868_v16 = vmax.f32 %v3866_v52, %v3867_v22  ;;  %v10835_v22 = vld [vmem:[#allocation49_spill] sm:$0xff] }
 0x39e   :  { %v9678_v3 = vmax.f32 %v3885_v51, %v3886_v19  ;;  %v4777_v46 = vrot.slane %v9669_v36, 2  ;;  %v4778_v17 = vrot.slane %v4621_v27, 2  ;;  %v9682_v24 = vmax.f32 %v3943_v48, %v3944_v56  ;;  %v9704_v56 = vpop.permute.xlu1 %6971 }
 0x39f   :  { %7101 = vrot.lane.b32.xlu1 %v7100_v38, %s7314_s18  ;;  %v3875_v10 = vmax.f32 %v3873_v42, %v3874_v39  ;;  %v3882_v35 = vmax.f32 %v3880_v14, %v3881_v59  ;;  %v4688_v21 = vrot.slane %v9669_v36, 1  ;;  %v9688_v41 = vsel %vm3946_vm4, %v3868_v16, -inf  ;;  %v10828_v59 = vld [vmem:[#allocation20_spill] sm:$0xff] }
 0x3a0   :  { %v9691_v1 = vsel %vm386_vm1, %v4774_v9, %v4775_v23  ;;  %v9694_v52 = vsel %vm386_vm1, %v4777_v46, %v4778_v17  ;;  %v4689_v51 = vrot.slane %v4621_v27, 1  ;;  %v7219_v9 = vld [vmem:[%s10458_s3] sm:$0xff]   ;;  %v10829_v27 = vld [vmem:[#allocation17_spill] sm:$0xff]  ;;  %v10830_v23 = vld [vmem:[#allocation23_spill] sm:$0xff]  ;;  %v4256_v17 = vsel %vm3946_vm4, %v9290_v57, -inf }
 0x3a1   :  { %v9700_v14 = vsel %vm3946_vm4, %v3875_v10, -inf  ;;  %v7110_v48 = vpack.i.bf16 %v9694_v52, %v9691_v1  ;;  %v9709_v19 = vsel %vm3946_vm4, %v3882_v35, -inf  ;;  %v10831_v16 = vmax.f32 %v10829_v27, %v10830_v23  ;;  %v10832_v10 = vld [vmem:[#allocation57_spill] sm:$0xff]  ;;  %v10833_v35 = vld [vmem:[#allocation19_spill] sm:$0xff] }
 0x3a2   :  { %v4690_v38 = vsel %vm4655_vm12, %v4688_v21, %v4689_v51  ;;  %v10834_v21 = vmax.f32 %v10832_v10, %v10833_v35  ;;  %v4257_v42 = vsel %vm3946_vm4, %v10835_v22, -inf  ;;  %v10838_v27 = vld [vmem:[#allocation31_spill] sm:$0xff]  ;;  %v7319_v10 = vmov 0   ;;  %v10842_v35 = vld [vmem:[#allocation56_spill] sm:$0xff] }
 0x3a3   :  { %7111 = vrot.lane.b32.xlu0 %v7110_v48, %s7313_s17  ;;  %v7105_v39 = vpack.i.bf16 %v4690_v38, %v9551_v2  ;;  %v4539_v46 = vsel %vm4463_vm7, %v10831_v16, %v10828_v59  ;;  %v10836_v2 = vmax.f32 %v9283_v8, %v9264_v45  ;;  %v10837_v59 = vld [vmem:[#allocation58_spill] sm:$0xff]  ;;  %v4258_v16 = vmax.f32 %v4256_v17, %v4257_v42  ;;  %v9747_v8 = vpop.permute.xlu0 %6986 }
 0x3a4   :  { %v4540_v51 = vsel %vm4465_vm8, %v10834_v21, %v4539_v46  ;;  %v10839_v23 = vmax.f32 %v10837_v59, %v10838_v27  ;;  %5334 = vmatprep.subr.bf16.mxu1 %v7319_v10  ;;  %v10840_v22 = vmax.f32 %v9375_v54, %v9299_v7  ;;  %v4280_v45 = vsel %vm3946_vm4, %v9396_v25, -inf  ;;  %v7220_v54 = vld [vmem:[%s10458_s3 + $0x8] sm:$0xff]   ;;  %v10848_v59 = vld [vmem:[#allocation44_spill] sm:$0xff] }
 0x3a5   :  { %v4545_v34 = vsel %vm4463_vm7, %v10836_v2, %v9296_v31  ;;  %7106 = vrot.lane.b32.xlu1 %v7105_v39, %s7312_s16  ;;  %v10841_v31 = vld [vmem:[#allocation59_spill] sm:$0xff]  ;;  %5335 = vmatpush1.bf16.msra.mxu1 %v7219_v9  ;;  %v10844_v42 = vmax.f32 %v9385_v33, %v9314_v4  ;;  %v10846_v25 = vmax.f32 %v9468_v63, %v9459_v15  ;;  %v4622_v4 = vsel %vm4593_vm11, %v4258_v16, 0.0  ;;  %v10847_v33 = vld [vmem:[#allocation42_spill] sm:$0xff] }
 0x3a6   :  { %v4541_v57 = vsel %vm4467_vm9, %v10839_v23, %v4540_v51  ;;  %v4546_v46 = vsel %vm4465_vm8, %v10840_v22, %v4545_v34  ;;  %v10843_v21 = vmax.f32 %v10841_v31, %v10842_v35  ;;  %v10845_v51 = vld [vmem:[#allocation40_spill] sm:$0xff]  ;;  %v10849_v27 = vmax.f32 %v10847_v33, %v10848_v59  ;;  %5336 = vmatprep.subr.bf16.mxu1 %v7319_v10  ;;  %v9777_v22 = vpop.permute.xlu1 %6981 }
 0x3a7   :  { %v4547_v17 = vsel %vm4467_vm9, %v10844_v42, %v4546_v46  ;;  %v4281_v7 = vsel %vm3946_vm4, %v10845_v51, -inf  ;;  %v4551_v34 = vsel %vm4463_vm7, %v10846_v25, %v9482_v6  ;;  %7116 = vrot.lane.b32.xlu0 %v7105_v39, %s7315_s19  ;;  %v4692_v6 = vrot.slane %v4622_v4, 1  ;;  %v9807_v33 = vpop.permute.xlu0 %6996 }
 0x3a8   :  { %v4542_v2 = vsel %vm4469_vm10, %v10843_v21, %v4541_v57  ;;  %v4548_v23 = vsel %vm4469_vm10, %v10849_v27, %v4547_v17  ;;  %v4282_v57 = vmax.f32 %v4280_v45, %v4281_v7  ;;  %v4781_v31 = vrot.slane %v4622_v4, 2 }
 0x3a9   :  { %v9769_v9 = vsel %vm4593_vm11, 0.0, %v4542_v2  ;;  %v9783_v39 = vsel %vm4593_vm11, 0.0, %v4548_v23  ;;  %7121 = vrot.lane.b32.xlu1 %v7110_v48, %s7316_s22  ;;  %5337 = vmatpush1.bf16.msra.mxu1 %v7220_v54  ;;  %v7221_v48 = vld [vmem:[%s10458_s3 + $0x10] sm:$0xff]   ;;  %v10850_v25 = vmax.f32 %v9521_v37, %v9494_v5  ;;  %v4304_v23 = vsel %vm3946_vm4, %v9630_v62, -inf }
 0x3aa   :  { %v7125_v15 = vpack.i.bf16 %v9769_v9, %v9669_v36  ;;  %v4691_v63 = vrot.slane %v9769_v9, 1  ;;  %v7135_v16 = vpack.i.bf16 %v9783_v39, %v9769_v9  ;;  %v4623_v46 = vsel %vm4593_vm11, %v4282_v57, 0.0  ;;  %5338 = vmatprep.subr.bf16.mxu1 %v7319_v10  ;;  %v9805_v4 = vpop.permute.xlu1 %6991 }
 0x3ab   :  { %v4780_v45 = vrot.slane %v9769_v9, 2  ;;  %v4783_v21 = vrot.slane %v9783_v39, 2  ;;  %v4784_v2 = vrot.slane %v4623_v46, 2  ;;  %v4694_v42 = vrot.slane %v9783_v39, 1 }
 0x3ac   :  { %v4693_v35 = vsel %vm4655_vm12, %v4691_v63, %v4692_v6  ;;  %7126 = vrot.lane.b32.xlu0 %v7125_v15, %s7317_s23  ;;  %v4695_v7 = vrot.slane %v4623_v46, 1  ;;  %v4552_v54 = vsel %vm4465_vm8, %v10850_v25, %v4551_v34  ;;  %v4305_v5 = vsel %vm3946_vm4, %v9528_v44, -inf  ;;  %v7222_v44 = vld [vmem:[%s10458_s3 + $0x18] sm:$0xff]  }
 0x3ad   :  { %v7130_v17 = vpack.i.bf16 %v4693_v35, %v4690_v38  ;;  %v9798_v51 = vsel %vm386_vm1, %v4780_v45, %v4781_v31  ;;  %v9810_v59 = vsel %vm386_vm1, %v4783_v21, %v4784_v2  ;;  %v10851_v38 = vmax.f32 %v9533_v47, %v9497_v61  ;;  %5339 = vmatpush1.bf16.msra.mxu1 %v7221_v48  ;;  %v10854_v21 = vld [vmem:[#allocation30_spill] sm:$0xff] }
 0x3ae   :  { %v7145_v37 = vpack.i.bf16 %v9810_v59, %v9798_v51  ;;  %v9824_v34 = vsel %vm4655_vm12, %v4694_v42, %v4695_v7  ;;  %v10852_v57 = vmax.f32 %v9542_v58, %v9505_v20  ;;  %v4306_v15 = vmax.f32 %v4304_v23, %v4305_v5  ;;  %5340 = vmatprep.subr.bf16.mxu1 %v7319_v10  ;;  %v9852_v48 = vpop.permute.xlu1 %7001 }
 0x3af   :  { %v4553_v27 = vsel %vm4467_vm9, %v10851_v38, %v4552_v54  ;;  %7131 = vrot.lane.b32.xlu1 %v7130_v17, %s7318_s24  ;;  %v7140_v47 = vpack.i.bf16 %v9824_v34, %v4693_v35  ;;  %v10853_v63 = vrot.slane %v9678_v3, 1  ;;  %v6929_v58 = vunpack.i.h.bf16 %v9582_v18  ;;  %v9854_v17 = vpop.permute.xlu0 %7006 }
 0x3b0   :  { %v4554_v61 = vsel %vm4469_vm10, %v10852_v57, %v4553_v27  ;;  %7136 = vrot.lane.b32.xlu0 %v7135_v16, %s7314_s18  ;;  %v6928_v46 = vunpack.i.l.bf16 %v9582_v18  ;;  %v4624_v45 = vsel %vm4593_vm11, %v4306_v15, 0.0  ;;  %v6934_v35 = vunpack.i.h.bf16 %v9596_v49  ;;  %v7223_v18 = vld [vmem:[%s10458_s3 + $0x20] sm:$0xff]  }
 0x3b1   :  { %v9832_v62 = vsel %vm4593_vm11, 0.0, %v4554_v61  ;;  %v3889_v6 = vmax.f32 %v9678_v3, %v10853_v63  ;;  %v4698_v3 = vrot.slane %v4624_v45, 1  ;;  %v5100_v16 = vsel %vm3946_vm4, %v10854_v21, %v6929_v58  ;;  %5341 = vmatpush1.bf16.msra.mxu1 %v7222_v44 }
 0x3b2   :  { %v4697_v20 = vrot.slane %v9832_v62, 1  ;;  %v4786_v31 = vrot.slane %v9832_v62, 2  ;;  %v5099_v2 = vsel %vm3946_vm4, 0.0, %v6928_v46  ;;  %v4787_v42 = vrot.slane %v4624_v45, 2  ;;  %5342 = vmatprep.subr.bf16.mxu1 %v7319_v10  ;;  %v9910_v58 = vpop.permute.xlu1 %7011 }
 0x3b3   :  { %7146 = vrot.lane.b32.xlu1 %v7145_v37, %s7313_s17  ;;  %v6933_v7 = vunpack.i.l.bf16 %v9596_v49  ;;  %v5116_v25 = vsel %vm5114_vm13, %v5100_v16, %v6934_v35  ;;  %v6939_v54 = vunpack.i.h.bf16 %v9598_v30  ;;  %v6938_v23 = vunpack.i.l.bf16 %v9598_v30  ;;  %v9912_v46 = vpop.permute.xlu0 %7016 }
 0x3b4   :  { %7141 = vrot.lane.b32.xlu0 %v7140_v47, %s7312_s16  ;;  %v9864_v38 = vsel %vm4655_vm12, %v4697_v20, %v4698_v3  ;;  %v9868_v27 = vsel %vm386_vm1, %v4786_v31, %v4787_v42  ;;  %v4327_v49 = vmax.f32 %v9709_v19, %v9662_v29  ;;  %v7160_v5 = vpack.i.bf16 %v9832_v62, %v9783_v39 }
 0x3b5   :  { %v7165_v57 = vpack.i.bf16 %v9864_v38, %v9824_v34  ;;  %v5228_v61 = vpack.c.bf16 %v9868_v27, %v9810_v59  ;;  %v9880_v44 = vsel %vm5114_vm13, %v5099_v2, %v6933_v7  ;;  %v5132_v15 = vsel %vm5130_vm14, %v5116_v25, %v6939_v54  ;;  %5343 = vmatpush1.bf16.msra.mxu1 %v7223_v18 }
 0x3b6   :  { %v10855_v30 = vmax.f32 %v9605_v43, %v9587_v40  ;;  %v4328_v19 = vsel %vm3946_vm4, %v3889_v6, -inf  ;;  %v4329_v34 = vsel %vm3946_vm4, %v9682_v24, -inf  ;;  %v5131_v63 = vsel %vm5130_vm14, %v9880_v44, %v6938_v23  ;;  %v7224_v40 = vld [vmem:[%s10458_s3 + $0x28] sm:$0xff]   ;;  %5344 = vmatprep.subr.bf16.mxu1 %v7319_v10 }
 0x3b7   :  { %7151 = vrot.lane.b32.xlu1 %v7140_v47, %s7315_s19  ;;  %v10856_v47 = vmax.f32 %v9610_v0, %v9590_v32  ;;  %v4330_v43 = vmax.f32 %v4328_v19, %v4329_v34  ;;  %v10857_v24 = vmax.f32 %v9688_v41, %v9646_v26  ;;  %v6944_v32 = vunpack.i.h.bf16 %v9622_v55  ;;  %v9937_v25 = vpop.permute.xlu0 %7026  ;;  %v9954_v34 = vpop.permute.xlu1 %7021 }
 0x3b8   :  { %v4556_v29 = vsel %vm4461_vm6, %v10855_v30, %v9618_v50  ;;  %v6949_v50 = vunpack.i.h.bf16 %v9620_v60  ;;  %7156 = vrot.lane.b32.xlu0 %v7145_v37, %s7316_s22  ;;  %v6943_v0 = vunpack.i.l.bf16 %v9622_v55  ;;  %v10858_v45 = vmax.f32 %v9700_v14, %v9651_v53  ;;  %v7225_v14 = vld [vmem:[%s10458_s3 + $0x30] sm:$0xff]  }
 0x3b9   :  { %v4557_v20 = vsel %vm4463_vm7, %v10856_v47, %v4556_v29  ;;  %v4625_v31 = vsel %vm4593_vm11, %v4330_v43, 0.0  ;;  %v6948_v26 = vunpack.i.l.bf16 %v9620_v60  ;;  %v5149_v35 = vsel %vm5147_vm15, %v5132_v15, %v6944_v32  ;;  %5345 = vmatpush1.bf16.msra.mxu1 %v7224_v40  ;;  %v10859_v60 = vld [vmem:[#allocation21_spill] sm:$0xff]  ;;  %v7226_v40 = vld [vmem:[%s10458_s3 + $0x38] sm:$0xff]  }
 0x3ba   :  { %v4558_v6 = vsel %vm4465_vm8, %v10857_v24, %v4557_v20  ;;  %v5148_v55 = vsel %vm5147_vm15, %v5131_v63, %v6943_v0  ;;  %v4890_v53 = vrot.slane %v4625_v31, 1  ;;  %v6954_v21 = vunpack.i.h.bf16 %v10859_v60  ;;  %5346 = vmatprep.subr.bf16.mxu1 %v7319_v10  ;;  %v10862_v0 = vld [vmem:[#allocation28_spill] sm:$0xff] }
 0x3bb   :  { %v4559_v37 = vsel %vm4467_vm9, %v10858_v45, %v4558_v6  ;;  %7161 = vrot.lane.b32.xlu1 %v7160_v5, %s7317_s23  ;;  %v6953_v16 = vunpack.i.l.bf16 %v10859_v60  ;;  %v4944_v18 = vrot.slane %v4625_v31, 2  ;;  %v5165_v7 = vsel %vm5164_vm0, %v5148_v55, %v6948_v26  ;;  %v10860_v5 = vld [vmem:[#allocation43_spill] sm:$0xff]  ;;  %v10864_v31 = vld [vmem:[#allocation52_spill] sm:$0xff] }
 0x3bc   :  { %v4560_v41 = vsel %vm4469_vm10, %v4327_v49, %v4559_v37  ;;  %7166 = vrot.lane.b32.xlu0 %v7165_v57, %s7318_s24  ;;  %v5166_v23 = vsel %vm5164_vm0, %v5149_v35, %v6949_v50  ;;  %v6959_v57 = vunpack.i.h.bf16 %v10860_v5  ;;  %v6958_v29 = vunpack.i.l.bf16 %v10860_v5  ;;  %v10861_v50 = vld [vmem:[#allocation9_spill] sm:$0xff] }
 0x3bd   :  { %v9925_v3 = vsel %vm4593_vm11, 0.0, %v4560_v41  ;;  %v5182_v49 = vsel %vm5181_vm2, %v5165_v7, %v6953_v16  ;;  %v6964_v19 = vunpack.i.h.bf16 %v9671_v12  ;;  %5347 = vmatpush1.bf16.msra.mxu1 %v7225_v14  ;;  %v5183_v20 = vsel %vm5181_vm2, %v5166_v23, %v6954_v21 }
 0x3be   :  { %v4889_v2 = vrot.slane %v9925_v3, 1  ;;  %v4943_v42 = vrot.slane %v9925_v3, 2  ;;  %v7170_v54 = vpack.i.bf16 %v9925_v3, %v9832_v62  ;;  %v6963_v43 = vunpack.i.l.bf16 %v9671_v12  ;;  %5348 = vmatprep.subr.bf16.mxu1 %v7319_v10  ;;  %v10863_v12 = vld [vmem:[#allocation22_spill] sm:$0xff] }
 0x3bf   :  { %4728 = vrot.lane.b32.xlu1 %v9864_v38, %s7312_s16  ;;  %v6969_v24 = vunpack.i.h.bf16 %v9659_v13  ;;  %v6968_v6 = vunpack.i.l.bf16 %v9659_v13  ;;  %v6974_v32 = vunpack.i.h.bf16 %v9704_v56  ;;  %v6973_v37 = vunpack.i.l.bf16 %v9704_v56  ;;  %v7227_v56 = vld [vmem:[%s10458_s3 + $0x40] sm:$0xff]  }
 0x3c0   :  { %v9947_v15 = vsel %vm4655_vm12, %v4889_v2, %v4890_v53  ;;  %v9950_v30 = vsel %vm386_vm1, %v4943_v42, %v4944_v18  ;;  %4817 = vrot.lane.b32.xlu0 %v9868_v27, %s7313_s17  ;;  %v5101_v45 = vsel %vm3946_vm4, %v10862_v0, %v6963_v43  ;;  %vm5198_vm1 = vcmask 916480   ;;  %v9983_v53 = vpop.permute.xlu0 %7036 }
 0x3c1   :  { %v7175_v63 = vpack.i.bf16 %v9947_v15, %v9864_v38  ;;  %v7180_v47 = vpack.i.bf16 %v9950_v30, %v9868_v27  ;;  %v5102_v38 = vsel %vm3946_vm4, %v10861_v50, %v6964_v19  ;;  %v5218_v26 = vpack.c.bf16 %v10864_v31, %v10863_v12  ;;  %5349 = vmatpush1.bf16.msra.mxu1 %v7226_v40  ;;  %v10866_v50 = vld [vmem:[#allocation18_spill] sm:$0xff] }
 0x3c2   :  { %v5118_v41 = vsel %vm5114_vm13, %v5102_v38, %v6969_v24  ;;  %v5117_v55 = vsel %vm5114_vm13, %v5101_v45, %v6968_v6  ;;  %v5199_v35 = vsel %vm5198_vm1, %v5182_v49, %v6958_v29  ;;  %v5200_v13 = vsel %vm5198_vm1, %v5183_v20, %v6959_v57  ;;  %5350 = vmatprep.subr.bf16.mxu1 %v7319_v10 }
 0x3c3   :  { %7171 = vrot.lane.b32.xlu1 %v7170_v54, %s7314_s18  ;;  %v5133_v14 = vsel %vm5130_vm14, %v5117_v55, %v6973_v37  ;;  %v5134_v60 = vsel %vm5130_vm14, %v5118_v41, %v6974_v32  ;;  %v5215_v21 = vpack.c.bf16 %v5200_v13, %v5199_v35  ;;  %v6979_v16 = vunpack.i.h.bf16 %v9685_v11  ;;  %v7032_v54 = vpop.permute.xlu1 %7031  ;;  %v10867_v55 = vld [vmem:[#allocation7_spill] sm:$0xff] }
 0x3c4   :  { %7176 = vrot.lane.b32.xlu0 %v7175_v63, %s7315_s19  ;;  %v6978_v2 = vunpack.i.l.bf16 %v9685_v11  ;;  %v6984_v42 = vunpack.i.h.bf16 %v9777_v22  ;;  %v6983_v18 = vunpack.i.l.bf16 %v9777_v22  ;;  %v6989_v7 = vunpack.i.h.bf16 %v9747_v8  ;;  %v10018_v24 = vpop.permute.xlu0 %7046  ;;  %v10868_v35 = vld [vmem:[#allocation39_spill] sm:$0xff] }
 0x3c5   :  { %v5151_v23 = vsel %vm5147_vm15, %v5134_v60, %v6979_v16  ;;  %v6988_v49 = vunpack.i.l.bf16 %v9747_v8  ;;  %v6994_v5 = vunpack.i.h.bf16 %v9805_v4  ;;  %v6993_v57 = vunpack.i.l.bf16 %v9805_v4  ;;  %5351 = vmatpush1.bf16.msra.mxu1 %v7227_v56 }
 0x3c6   :  { %v5150_v29 = vsel %vm5147_vm15, %v5133_v14, %v6978_v2  ;;  %v5168_v11 = vsel %vm5164_vm0, %v5151_v23, %v6984_v42  ;;  %v6999_v19 = vunpack.i.h.bf16 %v9807_v33  ;;  %v6998_v22 = vunpack.i.l.bf16 %v9807_v33 }
 0x3c7   :  { %7181 = vrot.lane.b32.xlu1 %v7180_v47, %s7316_s22  ;;  %v5167_v63 = vsel %vm5164_vm0, %v5150_v29, %v6983_v18  ;;  %v5185_v20 = vsel %vm5181_vm2, %v5168_v11, %v6989_v7  ;;  %v7004_v8 = vunpack.i.h.bf16 %v9852_v48  ;;  %v7003_v40 = vunpack.i.l.bf16 %v9852_v48  ;;  %v10865_v47 = vld [vmem:[#allocation29_spill] sm:$0xff]  ;;  %v7042_v37 = vpop.permute.xlu1 %7041 }
 0x3c8   :  { %5022 = vrot.lane.b32.xlu0 %v9925_v3, %s7317_s23  ;;  %v5184_v4 = vsel %vm5181_vm2, %v5167_v63, %v6988_v49  ;;  %v5104_v43 = vsel %vm3946_vm4, %v10865_v47, %v6999_v19  ;;  %v5103_v33 = vsel %vm3946_vm4, %v10866_v50, %v6998_v22  ;;  %v7009_v38 = vunpack.i.h.bf16 %v9854_v17  ;;  %5367 = vmatmul.mubr.bf16.vlgmr.msra.gmra.mrb[0].mxu1 %v5215_v21  ;;  %v7052_v2 = vpop.permute.xlu0 %7051  ;;  %v10869_v49 = vld [vmem:[#allocation8_spill] sm:$0xff] }
 0x3c9   :  { %v5119_v6 = vsel %vm5114_vm13, %v5103_v33, %v7003_v40  ;;  %v5120_v32 = vsel %vm5114_vm13, %v5104_v43, %v7004_v8  ;;  %v7008_v48 = vunpack.i.l.bf16 %v9854_v17  ;;  %v5201_v3 = vsel %vm5198_vm1, %v5184_v4, %v6993_v57  ;;  %6661 = vmatprep.mubr.msk.bf16.mxu1 %vm3946_vm4, %v5218_v26 }
 0x3ca   :  { %v5202_v0 = vsel %vm5198_vm1, %v5185_v20, %v6994_v5  ;;  %v7014_v45 = vunpack.i.h.bf16 %v9910_v58  ;;  %v7013_v12 = vunpack.i.l.bf16 %v9910_v58  ;;  %v5136_v41 = vsel %vm5130_vm14, %v5120_v32, %v7009_v38  ;;  %v10870_v5 = vld [vmem:[#allocation36_spill] sm:$0xff] }
 0x3cb   :  { %5067 = vrot.lane.b32.xlu1 %v9947_v15, %s7318_s24  ;;  %v5135_v31 = vsel %vm5130_vm14, %v5119_v6, %v7008_v48  ;;  %v5217_v17 = vpack.c.bf16 %v5202_v0, %v5201_v3  ;;  %v5220_v13 = vpack.c.bf16 %v10868_v35, %v10867_v55  ;;  %v7019_v56 = vunpack.i.h.bf16 %v9912_v46  ;;  %v10871_v55 = vld [vmem:[#allocation13_spill] sm:$0xff] }
 0x3cc   :  { %v5153_v15 = vsel %vm5147_vm15, %v5136_v41, %v7014_v45  ;;  %v7018_v14 = vunpack.i.l.bf16 %v9912_v46  ;;  %v7024_v60 = vunpack.i.h.bf16 %v9954_v34  ;;  %v5152_v26 = vsel %vm5147_vm15, %v5135_v31, %v7013_v12  ;;  %v7067_v20 = vpop.permute.xlu0 %7066  ;;  %v10872_v35 = vld [vmem:[#allocation33_spill] sm:$0xff] }
 0x3cd   :  { %v7023_v58 = vunpack.i.l.bf16 %v9954_v34  ;;  %v7034_v21 = vunpack.i.h.bf16 %v7032_v54  ;;  %v7033_v16 = vunpack.i.l.bf16 %v7032_v54  ;;  %v7029_v42 = vunpack.i.h.bf16 %v9937_v25  ;;  %v7057_v34 = vpop.permute.xlu1 %7056 }
 0x3ce   :  { %v7028_v18 = vunpack.i.l.bf16 %v9937_v25  ;;  %v7039_v7 = vunpack.i.h.bf16 %v9983_v53  ;;  %v7038_v23 = vunpack.i.l.bf16 %v9983_v53  ;;  %v7044_v29 = vunpack.i.h.bf16 %v7042_v37 }
 0x3cf   :  { %v5106_v46 = vsel %vm3946_vm4, %v10869_v49, %v7034_v21  ;;  %v5105_v57 = vsel %vm3946_vm4, %v10870_v5, %v7033_v16  ;;  %v7043_v11 = vunpack.i.l.bf16 %v7042_v37  ;;  %v5169_v54 = vsel %vm5164_vm0, %v5152_v26, %v7018_v14 }
 0x3d0   :  { %v5170_v19 = vsel %vm5164_vm0, %v5153_v15, %v7019_v56  ;;  %v5122_v22 = vsel %vm5114_vm13, %v5106_v46, %v7039_v7  ;;  %v5121_v25 = vsel %vm5114_vm13, %v5105_v57, %v7038_v23  ;;  %5375 = vmatmul.mubr.bf16.gmra.mrb[4].mxu1 %v5217_v17  ;;  %v5186_v53 = vsel %vm5181_vm2, %v5169_v54, %v7023_v58  ;;  %v7072_v17 = vpop.permute.xlu0 %7071  ;;  %v10874_v23 = vld [vmem:[#allocation24_spill] sm:$0xff] }
 0x3d1   :  { %v5187_v63 = vsel %vm5181_vm2, %v5170_v19, %v7024_v60  ;;  %6662 = vmatprep.mubr.msk.bf16.mxu1 %vm3946_vm4, %v5220_v13  ;;  %v5203_v8 = vsel %vm5198_vm1, %v5186_v53, %v7028_v18  ;;  %v7054_v4 = vunpack.i.h.bf16 %v7052_v2  ;;  %v7053_v47 = vunpack.i.l.bf16 %v7052_v2  ;;  %v10065_v12 = vpop.permute.xlu1 %7061  ;;  %v10873_v2 = vld [vmem:[#allocation32_spill] sm:$0xff] }
 0x3d2   :  { %v5204_v40 = vsel %vm5198_vm1, %v5187_v63, %v7029_v42  ;;  %v5137_v43 = vsel %vm5130_vm14, %v5121_v25, %v7043_v11  ;;  %v5138_v50 = vsel %vm5130_vm14, %v5122_v22, %v7044_v29  ;;  %v7059_v33 = vunpack.i.h.bf16 %v7057_v34 }
 0x3d3   :  { %v7058_v38 = vunpack.i.l.bf16 %v7057_v34  ;;  %v7049_v6 = vunpack.i.h.bf16 %v10018_v24  ;;  %v5154_v32 = vsel %vm5147_vm15, %v5137_v43, %v7053_v47  ;;  %v5155_v48 = vsel %vm5147_vm15, %v5138_v50, %v7054_v4 }
 0x3d4   :  { %v5219_v3 = vpack.c.bf16 %v5204_v40, %v5203_v8  ;;  %v7048_v0 = vunpack.i.l.bf16 %v10018_v24  ;;  %v5172_v37 = vsel %vm5164_vm0, %v5155_v48, %v7059_v33  ;;  %v5222_v13 = vpack.c.bf16 %v10872_v35, %v10871_v55  ;;  %v7087_v34 = vpop.permute.xlu0 %7086  ;;  %v7230_v24 = vld [vmem:[%s10459_s6 + $0x4] ss:$8 sps:$4 sm:$0xff]  }
 0x3d5   :  { %v5171_v45 = vsel %vm5164_vm0, %v5154_v32, %v7058_v38  ;;  %v5189_v41 = vsel %vm5181_vm2, %v5172_v37, %v7049_v6  ;;  %v7064_v15 = vunpack.i.h.bf16 %v10065_v12  ;;  %v7063_v56 = vunpack.i.l.bf16 %v10065_v12  ;;  %v7077_v14 = vpop.permute.xlu1 %7076  ;;  %5539 = vmatprep.subr.bf16.mxu1 %v7230_v24  ;;  %v7233_v12 = vld [vmem:[%s10459_s6 + $0x14] ss:$8 sps:$4 sm:$0xff]  }
 0x3d6   :  { %v5188_v31 = vsel %vm5181_vm2, %v5171_v45, %v7048_v0  ;;  %v7073_v58 = vunpack.i.l.bf16 %v7072_v17  ;;  %v5226_v21 = vpack.c.bf16 %v9798_v51, %v9694_v52  ;;  %v7078_v18 = vunpack.i.l.bf16 %v7077_v14  ;;  %v10875_v0 = vld [vmem:[#allocation55_spill] sm:$0xff] }
 0x3d7   :  { %v5205_v60 = vsel %vm5198_vm1, %v5188_v31, %v7063_v56  ;;  %v5206_v26 = vsel %vm5198_vm1, %v5189_v41, %v7064_v15  ;;  %v5224_v49 = vpack.c.bf16 %v9691_v1, %v10874_v23  ;;  %v7069_v5 = vunpack.i.h.bf16 %v7067_v20 }
 0x3d8   :  { %5383 = vmatmul.mubr.bf16.gmra.mrb[8].mxu1 %v5219_v3  ;;  %v5221_v16 = vpack.c.bf16 %v5206_v26, %v5205_v60  ;;  %v5107_v42 = vsel %vm3946_vm4, %v10873_v2, %v7073_v58  ;;  %v7068_v57 = vunpack.i.l.bf16 %v7067_v20  ;;  %v7089_v19 = vunpack.i.h.bf16 %v7087_v34 }
 0x3d9   :  { %6663 = vmatprep.mubr.msk.bf16.mxu1 %vm3946_vm4, %v5222_v13  ;;  %v7082_v7 = vpop.permute.xlu1 %7081  ;;  %v5123_v46 = vsel %vm5114_vm13, %v5107_v42, %v7078_v18  ;;  %v7088_v22 = vunpack.i.l.bf16 %v7087_v34  ;;  %v7074_v48 = vunpack.i.h.bf16 %v7072_v17  ;;  %v7079_v37 = vunpack.i.h.bf16 %v7077_v14 }
 0x3da   :  { %v7084_v29 = vunpack.i.h.bf16 %v7082_v7  ;;  %v7083_v11 = vunpack.i.l.bf16 %v7082_v7  ;;  %v5140_v52 = vsel %vm5130_vm14, %v5123_v46, %v7069_v5  ;;  %v5139_v54 = vsel %vm5130_vm14, %v9880_v44, %v7068_v57 }
 0x3db   :  { %v5108_v45 = vsel %vm3946_vm4, %v10875_v0, %v7074_v48  ;;  %vm7320_vm3 = vmmov 0   ;;  %vm5640_vm5 = vcmask 1042432   ;;  %vm5513_vm6 = vcmask 1041409  }
 0x3dc   :  { %v5156_v1 = vsel %vm5147_vm15, %v5139_v54, %v7083_v11  ;;  %v5157_v25 = vsel %vm5147_vm15, %v5140_v52, %v7084_v29  ;;  %v5124_v13 = vsel %vm5114_vm13, %v5108_v45, %v7079_v37  ;;  %vm5635_vm7 = vcmask 39936  }
 0x3dd   :  { %v5173_v20 = vsel %vm5164_vm0, %v5156_v1, %v7088_v22  ;;  %v5174_v8 = vsel %vm5164_vm0, %v5157_v25, %v7089_v19  ;;  %vm5838_vm8 = vcmask 254976  }
 0x3e0   :  { %5391 = vmatmul.mubr.bf16.gmra.mrb[12].mxu1 %v5221_v16 }
 0x3e1   :  { %6664 = vmatprep.mubr.msk.bf16.mxu1 %vm3946_vm4, %v5224_v49 }
 0x3e6   :  { %v7092_v51 = vpop.permute.xlu1 %7091 }
 0x3e7   :  { %v7094_v53 = vunpack.i.h.bf16 %v7092_v51  ;;  %v7093_v63 = vunpack.i.l.bf16 %v7092_v51 }
 0x3e9   :  { %v5190_v40 = vsel %vm5181_vm2, %v5173_v20, %v7093_v63  ;;  %v5191_v4 = vsel %vm5181_vm2, %v5174_v8, %v7094_v53 }
 0x3eb   :  { %v7097_v47 = vpop.permute.xlu0 %7096 }
 0x3ec   :  { %v7099_v43 = vunpack.i.h.bf16 %v7097_v47  ;;  %v7098_v50 = vunpack.i.l.bf16 %v7097_v47 }
 0x3ee   :  { %v5207_v44 = vsel %vm5198_vm1, %v5190_v40, %v7098_v50  ;;  %v5208_v33 = vsel %vm5198_vm1, %v5191_v4, %v7099_v43 }
 0x3ef   :  { %v5223_v38 = vpack.c.bf16 %v5208_v33, %v5207_v44 }
 0x3f1   :  { %5399 = vmatmul.mubr.bf16.gmra.mrb[16].mxu1 %v5223_v38 }
 0x3f2   :  { %6665 = vmatprep.mubr.msk.bf16.mxu1 %vm3946_vm4, %v5226_v21 }
 0x411   :  { %v7102_v32 = vpop.permute.xlu1 %7101 }
 0x412   :  { %v7103_v31 = vunpack.i.l.bf16 %v7102_v32  ;;  %v7104_v26 = vunpack.i.h.bf16 %v7102_v32 }
 0x414   :  { %v5141_v17 = vsel %vm5130_vm14, %v5124_v13, %v7103_v31 }
 0x415   :  { %v7112_v3 = vpop.permute.xlu0 %7111 }
 0x416   :  { %v7113_v56 = vunpack.i.l.bf16 %v7112_v3  ;;  %v7114_v8 = vunpack.i.h.bf16 %v7112_v3 }
 0x417   :  { %v7107_v41 = vpop.permute.xlu1 %7106 }
 0x418   :  { %v7108_v55 = vunpack.i.l.bf16 %v7107_v41  ;;  %v7109_v29 = vunpack.i.h.bf16 %v7107_v41 }
 0x419   :  { %v7117_v60 = vpop.permute.xlu0 %7116 }
 0x41a   :  { %v5109_v58 = vsel %vm3946_vm4, %v9512_v28, %v7108_v55  ;;  %v7119_v16 = vunpack.i.h.bf16 %v7117_v60  ;;  %v7118_v21 = vunpack.i.l.bf16 %v7117_v60  ;;  %v5110_v20 = vsel %vm3946_vm4, %v9669_v36, %v7109_v29 }
 0x41b   :  { %v5125_v2 = vsel %vm5114_vm13, %v5109_v58, %v7113_v56  ;;  %v7122_v42 = vpop.permute.xlu1 %7121  ;;  %v5126_v43 = vsel %vm5114_vm13, %v5110_v20, %v7114_v8 }
 0x41c   :  { %v5142_v14 = vsel %vm5130_vm14, %v5125_v2, %v7104_v26  ;;  %v5158_v18 = vsel %vm5147_vm15, %v5141_v17, %v7118_v21  ;;  %v7124_v7 = vunpack.i.h.bf16 %v7122_v42  ;;  %v7123_v23 = vunpack.i.l.bf16 %v7122_v42 }
 0x41d   :  { %v5159_v49 = vsel %vm5147_vm15, %v5142_v14, %v7119_v16 }
 0x41e   :  { %v7127_v46 = vpop.permute.xlu0 %7126  ;;  %v5175_v28 = vsel %vm5164_vm0, %v5158_v18, %v7123_v23  ;;  %v5176_v11 = vsel %vm5164_vm0, %v5159_v49, %v7124_v7  ;;  %v5230_v7 = vpack.c.bf16 %v10872_v35, %v9950_v30 }
 0x41f   :  { %v7129_v5 = vunpack.i.h.bf16 %v7127_v46  ;;  %v7128_v57 = vunpack.i.l.bf16 %v7127_v46 }
 0x421   :  { %v7132_v34 = vpop.permute.xlu1 %7131  ;;  %v5192_v52 = vsel %vm5181_vm2, %v5175_v28, %v7128_v57  ;;  %v5193_v51 = vsel %vm5181_vm2, %v5176_v11, %v7129_v5 }
 0x422   :  { %v7134_v54 = vunpack.i.h.bf16 %v7132_v34  ;;  %v7133_v19 = vunpack.i.l.bf16 %v7132_v34  ;;  %v7137_v22 = vpop.permute.xlu0 %7136 }
 0x423   :  { %v7138_v40 = vunpack.i.l.bf16 %v7137_v22  ;;  %v7139_v33 = vunpack.i.h.bf16 %v7137_v22 }
 0x424   :  { %v5209_v1 = vsel %vm5198_vm1, %v5192_v52, %v7133_v19  ;;  %v5210_v25 = vsel %vm5198_vm1, %v5193_v51, %v7134_v54 }
 0x425   :  { %v5225_v53 = vpack.c.bf16 %v5210_v25, %v5209_v1  ;;  %v7147_v63 = vpop.permute.xlu1 %7146  ;;  %v5143_v48 = vsel %vm5130_vm14, %v5126_v43, %v7138_v40  ;;  %v7228_v43 = vld [vmem:[%s10459_s6] ss:$8 sps:$4 sm:$0xff]  }
 0x426   :  { %v7142_v4 = vpop.permute.xlu0 %7141  ;;  %v7148_v50 = vunpack.i.l.bf16 %v7147_v63  ;;  %v7149_v46 = vunpack.i.h.bf16 %v7147_v63  ;;  %5540 = vmatpush1.bf16.msra.mxu1 %v7228_v43 }
 0x427   :  { %5407 = vmatmul.mubr.bf16.gmra.mrb[20].mxu1 %v5225_v53  ;;  %v7143_v47 = vunpack.i.l.bf16 %v7142_v4  ;;  %v7144_v13 = vunpack.i.h.bf16 %v7142_v4  ;;  %5541 = vmatprep.subr.bf16.mxu1 %v7233_v12 }
 0x428   :  { %6666 = vmatprep.mubr.msk.bf16.mxu1 %vm3946_vm4, %v5228_v61 }
 0x429   :  { %v7152_v44 = vpop.permute.xlu1 %7151  ;;  %v5111_v38 = vsel %vm3946_vm4, %v9769_v9, %v7143_v47  ;;  %v5112_v23 = vsel %vm3946_vm4, %v9783_v39, %v7144_v13 }
 0x42a   :  { %v7154_v32 = vunpack.i.h.bf16 %v7152_v44  ;;  %v7153_v36 = vunpack.i.l.bf16 %v7152_v44  ;;  %v5127_v3 = vsel %vm5114_vm13, %v5111_v38, %v7148_v50  ;;  %v7157_v0 = vpop.permute.xlu0 %7156  ;;  %v5128_v11 = vsel %vm5114_vm13, %v5112_v23, %v7149_v46 }
 0x42b   :  { %v5144_v59 = vsel %vm5130_vm14, %v5127_v3, %v7139_v33  ;;  %v7159_v61 = vunpack.i.h.bf16 %v7157_v0  ;;  %v7158_v45 = vunpack.i.l.bf16 %v7157_v0 }
 0x42c   :  { %v5160_v27 = vsel %vm5147_vm15, %v5143_v48, %v7153_v36  ;;  %v5161_v37 = vsel %vm5147_vm15, %v5144_v59, %v7154_v32 }
 0x42d   :  { %v7162_v31 = vpop.permute.xlu1 %7161  ;;  %v5177_v9 = vsel %vm5164_vm0, %v5160_v27, %v7158_v45  ;;  %v5178_v56 = vsel %vm5164_vm0, %v5161_v37, %v7159_v61 }
 0x42e   :  { %v7164_v41 = vunpack.i.h.bf16 %v7162_v31  ;;  %v7163_v55 = vunpack.i.l.bf16 %v7162_v31  ;;  %v7167_v60 = vpop.permute.xlu0 %7166 }
 0x42f   :  { %v7169_v16 = vunpack.i.h.bf16 %v7167_v60  ;;  %v7168_v21 = vunpack.i.l.bf16 %v7167_v60 }
 0x430   :  { %v5194_v26 = vsel %vm5181_vm2, %v5177_v9, %v7163_v55  ;;  %v5195_v58 = vsel %vm5181_vm2, %v5178_v56, %v7164_v41 }
 0x431   :  { %v4729_v17 = vpop.permute.xlu1 %4728  ;;  %v5211_v2 = vsel %vm5198_vm1, %v5194_v26, %v7168_v21  ;;  %v5212_v42 = vsel %vm5198_vm1, %v5195_v58, %v7169_v16 }
 0x432   :  { %v4818_v14 = vpop.permute.xlu0 %4817  ;;  %v5227_v18 = vpack.c.bf16 %v5212_v42, %v5211_v2  ;;  %v5113_v49 = vsel %vm3946_vm4, %v9832_v62, %v4729_v17 }
 0x433   :  { %v5129_v28 = vsel %vm5114_vm13, %v5113_v49, %v4818_v14 }
 0x434   :  { %5415 = vmatmul.mubr.bf16.gmra.mrb[24].mxu1 %v5227_v18 }
 0x435   :  { %v7172_v5 = vpop.permute.xlu1 %7171  ;;  %6667 = vmatprep.mubr.msk.bf16.mxu1 %vm3946_vm4, %v5230_v7  ;;  %vm5639_vm4 = vcmask 1041408  }
 0x436   :  { %v7174_v57 = vunpack.i.h.bf16 %v7172_v5  ;;  %v7173_v29 = vunpack.i.l.bf16 %v7172_v5  ;;  %v7177_v34 = vpop.permute.xlu0 %7176 }
 0x437   :  { %v7179_v39 = vunpack.i.h.bf16 %v7177_v34  ;;  %v7178_v52 = vunpack.i.l.bf16 %v7177_v34 }
 0x438   :  { %v5145_v30 = vsel %vm5130_vm14, %v5128_v11, %v7173_v29  ;;  %v5146_v35 = vsel %vm5130_vm14, %v5129_v28, %v7174_v57 }
 0x439   :  { %v7182_v51 = vpop.permute.xlu1 %7181  ;;  %v5163_v19 = vsel %vm5147_vm15, %v5146_v35, %v7179_v39  ;;  %v5162_v22 = vsel %vm5147_vm15, %v5145_v30, %v7178_v52 }
 0x43a   :  { %v7184_v62 = vunpack.i.h.bf16 %v7182_v51  ;;  %v7183_v54 = vunpack.i.l.bf16 %v7182_v51  ;;  %v5023_v25 = vpop.permute.xlu0 %5022 }
 0x43c   :  { %v5180_v1 = vsel %vm5164_vm0, %v5163_v19, %v7184_v62  ;;  %v5179_v53 = vsel %vm5164_vm0, %v5162_v22, %v7183_v54 }
 0x43d   :  { %v5196_v63 = vsel %vm5181_vm2, %v5179_v53, %v5023_v25  ;;  %v5068_v20 = vpop.permute.xlu1 %5067  ;;  %v5197_v8 = vsel %vm5181_vm2, %v5180_v1, %v7049_v6  ;;  %v7231_v6 = vld [vmem:[%s10459_s6 + $0x10] ss:$8 sps:$4 sm:$0xff]  }
 0x43e   :  { %v5213_v40 = vsel %vm5198_vm1, %v5196_v63, %v5068_v20  ;;  %v5214_v4 = vsel %vm5198_vm1, %v5197_v8, %v7064_v15  ;;  %5542 = vmatpush1.bf16.msra.mxu1 %v7231_v6  ;;  %v10176_v15 = vld [vmem:[%s10460_s4] ss:$0 sm:$0xff] }
 0x43f   :  { %v5229_v47 = vpack.c.bf16 %v5214_v4, %v5213_v40 }
 0x441   :  { %5423 = vmatmul.mubr.bf16.gmra.mrb[28].mxu1 %v5229_v47 }
 0x442   :  { %5571 = vmatprep.mubr.bf16.mxu1 %v7319_v10  ;;  %v10876_v10 = vmov 0.0  }
 0x443   :  { %6835 = vmatprep.subr.bf16.mxu1 %v10876_v10  ;;  %6869 = vmatprep.mubr.msk.bf16.mxu0 %vm7320_vm3, %v10876_v10 }
 0x49b   :  { %v5368_v50 = vpop.f32.mrb[0].mxu1 }
 0x49c   :  { %v5369_v44 = vadd.f32 %v10176_v15, %v5368_v50  ;;  %v5370_v33 = vpop.f32.mrb[1].mxu1 }
 0x49d   :  { %v5371_v38 = vpop.f32.mrb[2].mxu1 }
 0x49e   :  { %v5431_v32 = vmax.f32 %v5369_v44, 0.0  ;;  %v5372_v36 = vadd.f32 %v10176_v15, %v5371_v38  ;;  %v5373_v48 = vpop.f32.mrb[3].mxu1 }
 0x4a0   :  { %v5432_v3 = vmax.f32 %v5372_v36, 0.0  ;;  %v5447_v0 = vsel %vm5114_vm13, %v5431_v32, 0.0 }
 0x4a2   :  { %v5448_v59 = vsel %vm5114_vm13, %v5432_v3, 0.0 }
 0x4a3   :  { %v5449_v27 = vadd.f32 %v5448_v59, %v5447_v0  ;;  %v5376_v61 = vpop.f32.mrb[4].mxu1 }
 0x4a4   :  { %v5377_v45 = vadd.f32 %v10176_v15, %v5376_v61  ;;  %v5378_v37 = vpop.f32.mrb[5].mxu1 }
 0x4a5   :  { %v5379_v31 = vpop.f32.mrb[6].mxu1 }
 0x4a6   :  { %v5433_v41 = vmax.f32 %v5377_v45, 0.0  ;;  %v5380_v55 = vadd.f32 %v10176_v15, %v5379_v31  ;;  %v5381_v13 = vpop.f32.mrb[7].mxu1 }
 0x4a8   :  { %v5450_v9 = vsel %vm5114_vm13, %v5433_v41, 0.0  ;;  %v5434_v56 = vmax.f32 %v5380_v55, 0.0 }
 0x4a9   :  { %v5451_v60 = vadd.f32 %v5450_v9, %v5449_v27 }
 0x4aa   :  { %v5452_v26 = vsel %vm5114_vm13, %v5434_v56, 0.0 }
 0x4ab   :  { %v5453_v58 = vadd.f32 %v5452_v26, %v5451_v60  ;;  %v5384_v16 = vpop.f32.mrb[8].mxu1 }
 0x4ac   :  { %v5385_v21 = vadd.f32 %v10176_v15, %v5384_v16  ;;  %v5386_v17 = vpop.f32.mrb[9].mxu1 }
 0x4ad   :  { %v5387_v2 = vpop.f32.mrb[10].mxu1 }
 0x4ae   :  { %v5435_v42 = vmax.f32 %v5385_v21, 0.0  ;;  %v5388_v14 = vadd.f32 %v10176_v15, %v5387_v2  ;;  %v5389_v18 = vpop.f32.mrb[11].mxu1 }
 0x4b0   :  { %v5454_v7 = vsel %vm5114_vm13, %v5435_v42, 0.0  ;;  %v5436_v23 = vmax.f32 %v5388_v14, 0.0 }
 0x4b1   :  { %v5455_v49 = vadd.f32 %v5454_v7, %v5453_v58 }
 0x4b2   :  { %v5456_v46 = vsel %vm5114_vm13, %v5436_v23, 0.0 }
 0x4b3   :  { %v5457_v5 = vadd.f32 %v5456_v46, %v5455_v49  ;;  %v5392_v57 = vpop.f32.mrb[12].mxu1 }
 0x4b4   :  { %v5393_v29 = vadd.f32 %v10176_v15, %v5392_v57  ;;  %v5394_v28 = vpop.f32.mrb[13].mxu1 }
 0x4b5   :  { %v5395_v11 = vpop.f32.mrb[14].mxu1 }
 0x4b6   :  { %v5437_v34 = vmax.f32 %v5393_v29, 0.0  ;;  %v5396_v30 = vadd.f32 %v10176_v15, %v5395_v11  ;;  %v5397_v35 = vpop.f32.mrb[15].mxu1 }
 0x4b8   :  { %v5458_v39 = vsel %vm5114_vm13, %v5437_v34, 0.0  ;;  %v5438_v52 = vmax.f32 %v5396_v30, 0.0 }
 0x4b9   :  { %v5459_v51 = vadd.f32 %v5458_v39, %v5457_v5 }
 0x4ba   :  { %v5460_v62 = vsel %vm5114_vm13, %v5438_v52, 0.0 }
 0x4bb   :  { %v5461_v54 = vadd.f32 %v5460_v62, %v5459_v51  ;;  %v5582_v51 = vld [vmem:[%s10461_s5 + $0x2] sm:$0x3]  ;;  %v5583_v62 = vld [vmem:[%s10461_s5 + $0x4] sm:$0x3] }
 0x4bd   :  { %v5462_v13 = vrot.slane %v5461_v54, 4 }
 0x4bf   :  { %v5463_v26 = vadd.f32 %v5462_v13, %v5461_v54  ;;  %v5584_v54 = vld [vmem:[%s10461_s5 + $0x6] sm:$0x3] }
 0x4c1   :  { %v5464_v17 = vrot.slane %v5463_v26, 2 }
 0x4c3   :  { %v5465_v49 = vadd.f32 %v5464_v17, %v5463_v26 }
 0x4c4   :  { %v5400_v19 = vpop.f32.mrb[16].mxu1 }
 0x4c5   :  { %v5401_v22 = vadd.f32 %v10176_v15, %v5400_v19  ;;  %v5402_v1 = vpop.f32.mrb[17].mxu1  ;;  %v5466_v29 = vrot.slane %v5465_v49, 1  ;;  %v5585_v19 = vld [vmem:[%s10461_s5 + $0x8] sm:$0x3] }
 0x4c6   :  { %v5403_v25 = vpop.f32.mrb[18].mxu1  ;;  %v5586_v1 = vld [vmem:[%s10461_s5 + $0xa] sm:$0x3] }
 0x4c7   :  { %v5439_v53 = vmax.f32 %v5401_v22, 0.0  ;;  %v5404_v63 = vadd.f32 %v10176_v15, %v5403_v25  ;;  %v5405_v20 = vpop.f32.mrb[19].mxu1  ;;  %v5467_v34 = vadd.f32 %v5466_v29, %v5465_v49  ;;  %v5587_v25 = vld [vmem:[%s10461_s5 + $0xc] sm:$0x3] }
 0x4c9   :  { %v5440_v8 = vmax.f32 %v5404_v63, 0.0  ;;  %v5468_v40 = vsel %vm5114_vm13, %v5439_v53, 0.0  ;;  %v5489_v39 = vmul.f32 0.015625, %v5467_v34  ;;  %v5588_v53 = vld [vmem:[%s10461_s5 + $0xe] sm:$0x3]  ;;  %v10877_v63 = vmov 65535  }
 0x4ca   :  { %v5641_v20 = vsel %vm5639_vm4, 4294967295, %v10877_v63 }
 0x4cb   :  { %v5469_v4 = vsel %vm5114_vm13, %v5440_v8, 0.0  ;;  %v5491_v8 = vpack.c.bf16 %v5489_v39, %v5489_v39 }
 0x4cc   :  { %v5470_v47 = vadd.f32 %v5469_v4, %v5468_v40 }
 0x4fa   :  { %v5408_v43 = vpop.f32.mrb[20].mxu1 }
 0x4fb   :  { %v5409_v24 = vadd.f32 %v10176_v15, %v5408_v43  ;;  %v5410_v6 = vpop.f32.mrb[21].mxu1  ;;  %v5614_v43 = vcombine.low %v5585_v19, %v5586_v1 }
 0x4fc   :  { %v5411_v12 = vpop.f32.mrb[22].mxu1 }
 0x4fd   :  { %v5441_v50 = vmax.f32 %v5409_v24, 0.0  ;;  %v5412_v44 = vadd.f32 %v10176_v15, %v5411_v12  ;;  %v5413_v33 = vpop.f32.mrb[23].mxu1  ;;  %v5615_v24 = vcombine.low %v5587_v25, %v5588_v53  ;;  %v5634_v12 = vld [vmem:[%s10462_s8] sm:$0x7] }
 0x4ff   :  { %v5471_v38 = vsel %vm5114_vm13, %v5441_v50, 0.0  ;;  %v5442_v32 = vmax.f32 %v5412_v44, 0.0  ;;  %v5642_v50 = vsel %vm5640_vm5, %v5641_v20, 0  ;;  %v5511_v44 = vunpack.c.l.b16 %v5491_v8 }
 0x500   :  { %v5472_v36 = vadd.f32 %v5471_v38, %v5470_v47  ;;  %v5598_v47 = vcombine.low %v5583_v62, %v5584_v54  ;;  %v10878_v38 = vld [vmem:[#allocation5_spill] sm:$0xff] }
 0x501   :  { %v5473_v48 = vsel %vm5114_vm13, %v5442_v32, 0.0 }
 0x502   :  { %v5474_v3 = vadd.f32 %v5473_v48, %v5472_v36  ;;  %v5612_v36 = vrot.slane %v5598_v47, %v10878_v38  ;;  %v5622_v48 = vrot.slane %v5614_v43, %v10878_v38 }
 0x507   :  { %v5416_v0 = vpop.f32.mrb[24].mxu1 }
 0x508   :  { %v5417_v59 = vadd.f32 %v10176_v15, %v5416_v0  ;;  %v5418_v27 = vpop.f32.mrb[25].mxu1 }
 0x509   :  { %v5419_v61 = vpop.f32.mrb[26].mxu1 }
 0x50a   :  { %v5443_v45 = vmax.f32 %v5417_v59, 0.0  ;;  %v5420_v37 = vadd.f32 %v10176_v15, %v5419_v61  ;;  %v5421_v31 = vpop.f32.mrb[27].mxu1  ;;  %v5644_v59 = vand.u32 %v5642_v50, %v5634_v12 }
 0x50b   :  { %v10253_v31 = vld [vmem:[%s10463_s9] sm:$0xff]  }
 0x50c   :  { %v5475_v41 = vsel %vm5114_vm13, %v5443_v45, 0.0  ;;  %v5444_v55 = vmax.f32 %v5420_v37, 0.0  ;;  %6866 = vmatpush3.bf16.msra.mxu0 %v10253_v31 }
 0x50d   :  { %v5476_v9 = vadd.f32 %v5475_v41, %v5474_v3  ;;  %v5629_v3 = vrot.slane %v5615_v24, %v10878_v38  ;;  %v10259_v41 = vld [vmem:[%s10463_s9 + $0x8] sm:$0xff]   ;;  %6867 = vmatprep.subr.bf16.mxu0 %v10876_v10 }
 0x50e   :  { %v5477_v56 = vsel %vm5114_vm13, %v5444_v55, 0.0  ;;  %v10879_v55 = vld [vmem:[#allocation4_spill] sm:$0xff] }
 0x50f   :  { %v5478_v60 = vadd.f32 %v5477_v56, %v5476_v9  ;;  %v5630_v45 = vcombine.low %v5622_v48, %v5629_v3  ;;  %v5501_v13 = vsub.s32 0, %v10879_v55  ;;  %v5497_v9 = vld [vmem:[%s10464_s7] sm:$0x3]  ;;  %v5505_v56 = vsub.s32 1, %v10879_v55 }
 0x510   :  { %6868 = vmatpush3.bf16.msra.mxu0 %v10259_v41 }
 0x511   :  { %6881 = vmatprep.subr.bf16.mxu0 %v10876_v10  ;;  %v5506_v26 = vrot.slane %v5497_v9, %v5505_v56 }
 0x514   :  { %v5424_v58 = vpop.f32.mrb[28].mxu1 }
 0x515   :  { %v5425_v16 = vadd.f32 %v10176_v15, %v5424_v58  ;;  %v5426_v21 = vpop.f32.mrb[29].mxu1 }
 0x516   :  { %v5427_v2 = vpop.f32.mrb[30].mxu1 }
 0x517   :  { %v5445_v42 = vmax.f32 %v5425_v16, 0.0  ;;  %v5428_v14 = vadd.f32 %v10176_v15, %v5427_v2  ;;  %v5429_v18 = vpop.f32.mrb[31].mxu1  ;;  %v5581_v15 = vld [vmem:[%s10461_s5] sm:$0x3] }
 0x518   :  { %v5597_v4 = vcombine.low %v5581_v15, %v5582_v51 }
 0x519   :  { %v5479_v7 = vsel %vm5114_vm13, %v5445_v42, 0.0  ;;  %v5446_v23 = vmax.f32 %v5428_v14, 0.0 }
 0x51a   :  { %v5480_v46 = vadd.f32 %v5479_v7, %v5478_v60  ;;  %v5605_v32 = vrot.slane %v5597_v4, %v10878_v38  ;;  %v5502_v60 = vrot.slane %v5497_v9, %v5501_v13 }
 0x51b   :  { %v5481_v5 = vsel %vm5114_vm13, %v5446_v23, 0.0 }
 0x51c   :  { %v5482_v57 = vadd.f32 %v5481_v5, %v5480_v46  ;;  %v5613_v61 = vcombine.low %v5605_v32, %v5612_v36 }
 0x51e   :  { %v5483_v28 = vrot.slane %v5482_v57, 4  ;;  %v5633_v37 = vpack.c.bf16 %v5630_v45, %v5613_v61 }
 0x520   :  { %v5484_v11 = vadd.f32 %v5483_v28, %v5482_v57 }
 0x522   :  { %v5485_v30 = vrot.slane %v5484_v11, 2 }
 0x524   :  { %v5486_v35 = vadd.f32 %v5485_v30, %v5484_v11 }
 0x526   :  { %v5487_v52 = vrot.slane %v5486_v35, 1 }
 0x528   :  { %v5488_v22 = vadd.f32 %v5487_v52, %v5486_v35 }
 0x52a   :  { %v5490_v40 = vmul.f32 0.015625, %v5488_v22 }
 0x52c   :  { %v5492_v6 = vpack.c.bf16 %v5490_v40, %v5490_v40 }
 0x52e   :  { %v5512_v33 = vunpack.c.l.b16 %v5492_v6 }
 0x530   :  { %v5514_v0 = vsel %vm5513_vm6, %v5512_v33, %v5511_v44 }
 0x531   :  { %v5515_v27 = vpack.c.b16 %v5514_v0, %v5514_v0 }
 0x533   :  { %6672 = vmatmul.mubr.msk.bf16.vlgmr.msra.gmra.mrb[32].mxu1 %vm5114_vm13, %v5515_v27 }
 0x534   :  { %6836 = vmatpush3.bf16.msra.mxu1 %v5644_v59  ;;  %6837 = vmatprep.mubr.msk.bf16.mxu1 %vm7320_vm3, %v10876_v10 }
 0x535   :  { %6841 = vmatprep.subr.bf16.mxu1 %v10876_v10 }
 0x53b   :  { %6838 = vmatmul.mubr.msk.bf16.vlgmr.msra.gmra.mrb[36].mxu1 %vm5635_vm7, %v5633_v37 }
 0x53c   :  { %6845 = vmatprep.mubr.msk.bf16.mxu1 %vm7320_vm3, %v10876_v10  ;;  %6842 = vmatpush3.bf16.msra.mxu1 %v10253_v31 }
 0x53d   :  { %6843 = vmatprep.subr.bf16.mxu1 %v10876_v10 }
 0x540   :  { %6844 = vmatpush3.bf16.msra.mxu1 %v10259_v41 }
 0x541   :  { %6849 = vmatprep.subr.bf16.mxu1 %v10876_v10 }
 0x606   :  { %v5573_v58 = vpop.f32.mrb[32].mxu1 }
 0x607   :  { %v5574_v16 = vadd.f32 %v5573_v58, %v5502_v60  ;;  %v5575_v21 = vpop.f32.mrb[33].mxu1 }
 0x608   :  { %v5576_v17 = vadd.f32 %v5575_v21, %v5506_v26  ;;  %v5577_v2 = vpop.f32.mrb[34].mxu1 }
 0x609   :  { %7238 = vtanh.f32 %v5574_v16  ;;  %v5578_v42 = vpop.f32.mrb[35].mxu1  ;;  %5746 = vrot.lane.b32.xlu0 %v5574_v16, %s7315_s19 }
 0x60a   :  { %5748 = vrot.lane.b32.xlu1 %v5576_v17, %s7315_s19 }
 0x60e   :  { %v5680_v14 = vpop.f32.mrb[36].mxu1 }
 0x60f   :  { %v5689_v18 = vcombine.high %v5680_v14, %v5680_v14  ;;  %v5696_v7 = vrot.slane %v5680_v14, %v10878_v38  ;;  %6674 = vst.sshfl [vmem:[#allocation2] sm:$0x3 pattern:$0x76325410] %v5680_v14  ;;  %v6839_v23 = vpop.f32.mrb[37].mxu1 }
 0x610   :  { %v5683_v49 = vpop.f32.mrb[38].mxu1 }
 0x611   :  { %v5703_v46 = vrot.slane %v5689_v18, %v10878_v38  ;;  %v5704_v5 = vcombine.high %v5696_v7, %v5696_v7  ;;  %6675 = vst.sshfl [vmem:[#allocation2 + $0x4] sm:$0x3 pattern:$0x76325410] %v5689_v18  ;;  %v5706_v57 = vcombine.high %v5683_v49, %v5683_v49  ;;  %v5713_v29 = vrot.slane %v5683_v49, %v10878_v38  ;;  %v6840_v28 = vpop.f32.mrb[39].mxu1 }
 0x612   :  { %6676 = vst.sshfl [vmem:[#allocation2 + $0x8] sm:$0x3 pattern:$0x76325410] %v5683_v49 }
 0x613   :  { %v7239_v11 = vpop.eup %7238  ;;  %v5705_v34 = vcombine.high %v5703_v46, %v5703_v46  ;;  %5732 = vst [vmem:[#allocation2 + $0x2] sm:$0x3] %v5704_v5  ;;  %v5720_v30 = vrot.slane %v5706_v57, %v10878_v38  ;;  %v5721_v35 = vcombine.high %v5713_v29, %v5713_v29  ;;  %6677 = vst.sshfl [vmem:[#allocation2 + $0xc] sm:$0x3 pattern:$0x76325410] %v5706_v57 }
 0x614   :  { %v5753_v39 = vpack.c.bf16 %v7239_v11, %v7239_v11 }
 0x615   :  { %5734 = vst [vmem:[#allocation2 + $0x6] sm:$0x3] %v5705_v34  ;;  %v5722_v52 = vcombine.high %v5720_v30, %v5720_v30  ;;  %5736 = vst [vmem:[#allocation2 + $0xa] sm:$0x3] %v5721_v35 }
 0x616   :  { %6846 = vmatmul.mubr.msk.bf16.vlgmr.msra.gmra.mrb[40].mxu1 %vm5114_vm13, %v5753_v39  ;;  %v5743_v54 = vld [vmem:[#allocation2] sm:$0x3] }
 0x617   :  { %5738 = vst [vmem:[#allocation2 + $0xe] sm:$0x3] %v5722_v52  ;;  %6850 = vmatpush3.bf16.msra.mxu1 %v10253_v31  ;;  %6853 = vmatprep.mubr.msk.bf16.mxu1 %vm7320_vm3, %v10876_v10 }
 0x618   :  { %6851 = vmatprep.subr.bf16.mxu1 %v10876_v10  ;;  %v5922_v23 = vld [vmem:[#allocation2 + $0x4] sm:$0x3] }
 0x61a   :  { %v5841_v3 = vld [vmem:[#allocation2 + $0x2] sm:$0x3] }
 0x61b   :  { %6852 = vmatpush3.bf16.msra.mxu1 %v10259_v41 }
 0x61c   :  { %6857 = vmatprep.subr.bf16.mxu1 %v10876_v10 }
 0x67b   :  { %v5747_v15 = vpop.permute.xlu0 %5746 }
 0x67c   :  { %v5749_v51 = vpop.permute.xlu1 %5748 }
 0x67d   :  { %v10287_v62 = vsel %vm5147_vm15, %v5747_v15, %v5749_v51 }
 0x67e   :  { %v5752_v19 = vadd.f32 %v10287_v62, %v5743_v54  ;;  %v5842_v0 = vadd.f32 %v5841_v3, %v10287_v62  ;;  %v5923_v49 = vadd.f32 %v5922_v23, %v10287_v62 }
 0x6e9   :  { %v5803_v22 = vpop.f32.mrb[40].mxu1 }
 0x6ea   :  { %v5809_v1 = vadd.f32 %v5803_v22, %v5752_v19  ;;  %v6847_v25 = vpop.f32.mrb[41].mxu1 }
 0x6eb   :  { %v5806_v53 = vpop.f32.mrb[42].mxu1 }
 0x6ec   :  { %7240 = vtanh.f32 %v5809_v1  ;;  %v6848_v63 = vpop.f32.mrb[43].mxu1  ;;  %v6681_v8 = vmul.f32 -1.442695, %v5809_v1 }
 0x6ee   :  { %7242 = vpow2.f32 %v6681_v8 }
 0x6f6   :  { %v7241_v20 = vpop.eup %7240 }
 0x6f7   :  { %5819 = vrot.lane.b32.xlu0 %v7241_v20, %s7315_s19  ;;  %v6003_v20 = vld [vmem:[#allocation2 + $0x6] sm:$0x3] }
 0x6f8   :  { %v7243_v40 = vpop.eup %7242  ;;  %v6004_v8 = vadd.f32 %v6003_v20, %v10287_v62 }
 0x6f9   :  { %v5813_v4 = vadd.f32 1.0, %v7243_v40 }
 0x6fb   :  { %7244 = vrcp.f32 %v5813_v4 }
 0x705   :  { %v7245_v47 = vpop.eup %7244 }
 0x706   :  { %v5817_v6 = vmul.f32 %v7245_v47, %v7239_v11 }
 0x769   :  { %v5820_v43 = vpop.permute.xlu0 %5819 }
 0x76a   :  { %v5822_v24 = vmul.f32 %v7245_v47, %v5820_v43 }
 0x76c   :  { %5824 = vrot.lane.b32.xlu1 %v5822_v24, %s7313_s17 }
 0x7de   :  { %v5825_v12 = vpop.permute.xlu1 %5824 }
 0x7df   :  { %v5827_v50 = vadd.f32 %v5825_v12, %v5817_v6 }
 0x7e1   :  { %7246 = vtanh.f32 %v5827_v50 }
 0x7eb   :  { %v7247_v44 = vpop.eup %7246 }
 0x7ec   :  { %5830 = vrot.lane.b32.xlu0 %v7247_v44, %s7315_s19 }
 0x85e   :  { %v5831_v33 = vpop.permute.xlu0 %5830 }
 0x85f   :  { %v10293_v32 = vmul.f32 %v7245_v47, %v5831_v33 }
 0x861   :  { %v5843_v36 = vpack.c.bf16 %v10293_v32, %v10293_v32 }
 0x863   :  { %5845 = vrot.lane.b32.xlu1 %v5843_v36, %s7313_s17 }
 0x8d5   :  { %v5846_v48 = vpop.permute.xlu1 %5845 }
 0x8d6   :  { %6854 = vmatmul.mubr.msk.bf16.vlgmr.msra.gmra.mrb[44].mxu1 %vm5114_vm13, %v5846_v48 }
 0x8d7   :  { %6858 = vmatpush3.bf16.msra.mxu1 %v10253_v31  ;;  %6861 = vmatprep.mubr.msk.bf16.mxu1 %vm7320_vm3, %v10876_v10 }
 0x8d8   :  { %6859 = vmatprep.subr.bf16.mxu1 %v10876_v10 }
 0x8db   :  { %6860 = vmatpush3.bf16.msra.mxu1 %v10259_v41 }
 0x8dc   :  { %6873 = vmatprep.subr.bf16.mxu1 %v10876_v10 }
 0x9a9   :  { %v5884_v59 = vpop.f32.mrb[44].mxu1 }
 0x9aa   :  { %v5890_v27 = vadd.f32 %v5884_v59, %v5842_v0  ;;  %v6855_v61 = vpop.f32.mrb[45].mxu1 }
 0x9ab   :  { %v5887_v45 = vpop.f32.mrb[46].mxu1 }
 0x9ac   :  { %7248 = vtanh.f32 %v5890_v27  ;;  %v6856_v37 = vpop.f32.mrb[47].mxu1  ;;  %v6683_v13 = vmul.f32 -1.442695, %v5890_v27 }
 0x9ae   :  { %7250 = vpow2.f32 %v6683_v13  ;;  %v6084_v13 = vld [vmem:[#allocation2 + $0x8] sm:$0x3] }
 0x9b6   :  { %v7249_v55 = vpop.eup %7248 }
 0x9b7   :  { %5900 = vrot.lane.b32.xlu0 %v7249_v55, %s7315_s19 }
 0x9b8   :  { %v7251_v9 = vpop.eup %7250 }
 0x9b9   :  { %v5894_v56 = vadd.f32 1.0, %v7251_v9  ;;  %v6085_v9 = vadd.f32 %v6084_v13, %v10287_v62 }
 0x9bb   :  { %7252 = vrcp.f32 %v5894_v56 }
 0x9c5   :  { %v7253_v60 = vpop.eup %7252 }
 0x9c6   :  { %v5898_v16 = vmul.f32 %v7253_v60, %v5827_v50 }
 0xa29   :  { %v5901_v26 = vpop.permute.xlu0 %5900 }
 0xa2a   :  { %v5903_v58 = vmul.f32 %v7253_v60, %v5901_v26 }
 0xa2c   :  { %5905 = vrot.lane.b32.xlu1 %v5903_v58, %s7313_s17 }
 0xa9e   :  { %v5906_v21 = vpop.permute.xlu1 %5905 }
 0xa9f   :  { %v5908_v17 = vadd.f32 %v5906_v21, %v5898_v16 }
 0xaa1   :  { %7254 = vtanh.f32 %v5908_v17 }
 0xaab   :  { %v7255_v2 = vpop.eup %7254 }
 0xaac   :  { %5911 = vrot.lane.b32.xlu0 %v7255_v2, %s7315_s19 }
 0xb1e   :  { %v5912_v42 = vpop.permute.xlu0 %5911 }
 0xb1f   :  { %v10309_v14 = vmul.f32 %v7253_v60, %v5912_v42 }
 0xb21   :  { %v5924_v18 = vpack.c.bf16 %v10309_v14, %v10309_v14 }
 0xb23   :  { %5926 = vrot.lane.b32.xlu1 %v5924_v18, %s7313_s17 }
 0xb95   :  { %v5927_v7 = vpop.permute.xlu1 %5926 }
 0xb96   :  { %6862 = vmatmul.mubr.msk.bf16.vlgmr.msra.gmra.mrb[48].mxu1 %vm5114_vm13, %v5927_v7 }
 0xb97   :  { %6874 = vmatpush3.bf16.msra.mxu1 %v10253_v31  ;;  %6877 = vmatprep.mubr.msk.bf16.mxu1 %vm7320_vm3, %v10876_v10 }
 0xb98   :  { %6875 = vmatprep.subr.bf16.mxu1 %v10876_v10 }
 0xb9b   :  { %6876 = vmatpush3.bf16.msra.mxu1 %v10259_v41 }
 0xb9c   :  { %6889 = vmatprep.subr.bf16.mxu1 %v10876_v10 }
 0xc69   :  { %v5965_v46 = vpop.f32.mrb[48].mxu1 }
 0xc6a   :  { %v5971_v5 = vadd.f32 %v5965_v46, %v5923_v49  ;;  %v6863_v57 = vpop.f32.mrb[49].mxu1 }
 0xc6b   :  { %v5968_v29 = vpop.f32.mrb[50].mxu1 }
 0xc6c   :  { %7256 = vtanh.f32 %v5971_v5  ;;  %v6864_v28 = vpop.f32.mrb[51].mxu1  ;;  %v6685_v34 = vmul.f32 -1.442695, %v5971_v5 }
 0xc6e   :  { %7258 = vpow2.f32 %v6685_v34 }
 0xc76   :  { %v7257_v11 = vpop.eup %7256 }
 0xc77   :  { %5981 = vrot.lane.b32.xlu0 %v7257_v11, %s7315_s19 }
 0xc78   :  { %v7259_v30 = vpop.eup %7258 }
 0xc79   :  { %v5975_v35 = vadd.f32 1.0, %v7259_v30  ;;  %v6165_v30 = vld [vmem:[#allocation2 + $0xa] sm:$0x3] }
 0xc7b   :  { %7260 = vrcp.f32 %v5975_v35  ;;  %v6166_v35 = vadd.f32 %v6165_v30, %v10287_v62 }
 0xc85   :  { %v7261_v39 = vpop.eup %7260 }
 0xc86   :  { %v5979_v51 = vmul.f32 %v7261_v39, %v5908_v17 }
 0xce9   :  { %v5982_v52 = vpop.permute.xlu0 %5981 }
 0xcea   :  { %v5984_v15 = vmul.f32 %v7261_v39, %v5982_v52 }
 0xcec   :  { %5986 = vrot.lane.b32.xlu1 %v5984_v15, %s7313_s17 }
 0xd5e   :  { %v5987_v54 = vpop.permute.xlu1 %5986 }
 0xd5f   :  { %v5989_v19 = vadd.f32 %v5987_v54, %v5979_v51 }
 0xd61   :  { %7262 = vtanh.f32 %v5989_v19 }
 0xd6b   :  { %v7263_v22 = vpop.eup %7262 }
 0xd6c   :  { %5992 = vrot.lane.b32.xlu0 %v7263_v22, %s7315_s19 }
 0xdde   :  { %v5993_v1 = vpop.permute.xlu0 %5992 }
 0xddf   :  { %v10325_v25 = vmul.f32 %v7261_v39, %v5993_v1 }
 0xde1   :  { %v6005_v53 = vpack.c.bf16 %v10325_v25, %v10325_v25 }
 0xde3   :  { %6007 = vrot.lane.b32.xlu1 %v6005_v53, %s7313_s17 }
 0xe55   :  { %v6008_v63 = vpop.permute.xlu1 %6007 }
 0xe56   :  { %6870 = vmatmul.mubr.msk.bf16.vlgmr.msra.gmra.mrb[64].mxu0 %vm5114_vm13, %v6008_v63 }
 0xe57   :  { %6882 = vmatpush3.bf16.msra.mxu0 %v10253_v31  ;;  %6885 = vmatprep.mubr.msk.bf16.mxu0 %vm7320_vm3, %v10876_v10 }
 0xe58   :  { %6883 = vmatprep.subr.bf16.mxu0 %v10876_v10 }
 0xe5b   :  { %6884 = vmatpush3.bf16.msra.mxu0 %v10259_v41 }
 0xe5c   :  { %6897 = vmatprep.subr.bf16.mxu0 %v10876_v10 }
 0xf29   :  { %v6046_v40 = vpop.f32.mrb[64].mxu0 }
 0xf2a   :  { %v6052_v4 = vadd.f32 %v6046_v40, %v6004_v8  ;;  %v6871_v47 = vpop.f32.mrb[65].mxu0 }
 0xf2b   :  { %v6049_v43 = vpop.f32.mrb[66].mxu0 }
 0xf2c   :  { %7264 = vtanh.f32 %v6052_v4  ;;  %v6872_v24 = vpop.f32.mrb[67].mxu0  ;;  %v6687_v12 = vmul.f32 -1.442695, %v6052_v4 }
 0xf2e   :  { %7266 = vpow2.f32 %v6687_v12  ;;  %v6246_v12 = vld [vmem:[#allocation2 + $0xc] sm:$0x3] }
 0xf36   :  { %v7265_v6 = vpop.eup %7264 }
 0xf37   :  { %6062 = vrot.lane.b32.xlu0 %v7265_v6, %s7315_s19 }
 0xf38   :  { %v7267_v50 = vpop.eup %7266 }
 0xf39   :  { %v6056_v44 = vadd.f32 1.0, %v7267_v50  ;;  %v6247_v50 = vadd.f32 %v6246_v12, %v10287_v62 }
 0xf3b   :  { %7268 = vrcp.f32 %v6056_v44 }
 0xf45   :  { %v7269_v33 = vpop.eup %7268 }
 0xf46   :  { %v6060_v3 = vmul.f32 %v7269_v33, %v5989_v19 }
 0xfa9   :  { %v6063_v36 = vpop.permute.xlu0 %6062 }
 0xfaa   :  { %v6065_v48 = vmul.f32 %v7269_v33, %v6063_v36 }
 0xfac   :  { %6067 = vrot.lane.b32.xlu1 %v6065_v48, %s7313_s17 }
0x101e   :  { %v6068_v0 = vpop.permute.xlu1 %6067 }
0x101f   :  { %v6070_v59 = vadd.f32 %v6068_v0, %v6060_v3 }
0x1021   :  { %7270 = vtanh.f32 %v6070_v59 }
0x102b   :  { %v7271_v27 = vpop.eup %7270 }
0x102c   :  { %6073 = vrot.lane.b32.xlu0 %v7271_v27, %s7315_s19 }
0x109e   :  { %v6074_v61 = vpop.permute.xlu0 %6073 }
0x109f   :  { %v10341_v45 = vmul.f32 %v7269_v33, %v6074_v61 }
0x10a1   :  { %v6086_v37 = vpack.c.bf16 %v10341_v45, %v10341_v45 }
0x10a3   :  { %6088 = vrot.lane.b32.xlu1 %v6086_v37, %s7313_s17 }
0x1115   :  { %v6089_v55 = vpop.permute.xlu1 %6088 }
0x1116   :  { %6878 = vmatmul.mubr.msk.bf16.vlgmr.msra.gmra.mrb[52].mxu1 %vm5114_vm13, %v6089_v55 }
0x1117   :  { %6890 = vmatpush3.bf16.msra.mxu1 %v10253_v31  ;;  %6893 = vmatprep.mubr.msk.bf16.mxu1 %vm7320_vm3, %v10876_v10 }
0x1118   :  { %6891 = vmatprep.subr.bf16.mxu1 %v10876_v10 }
0x111b   :  { %6892 = vmatpush3.bf16.msra.mxu1 %v10259_v41 }
0x111c   :  { %6905 = vmatprep.subr.bf16.mxu1 %v10876_v10 }
0x11e9   :  { %v6127_v56 = vpop.f32.mrb[52].mxu1 }
0x11ea   :  { %v6133_v60 = vadd.f32 %v6127_v56, %v6085_v9  ;;  %v6879_v26 = vpop.f32.mrb[53].mxu1 }
0x11eb   :  { %v6130_v58 = vpop.f32.mrb[54].mxu1 }
0x11ec   :  { %7272 = vtanh.f32 %v6133_v60  ;;  %v6880_v16 = vpop.f32.mrb[55].mxu1  ;;  %v6689_v17 = vmul.f32 -1.442695, %v6133_v60 }
0x11ee   :  { %7274 = vpow2.f32 %v6689_v17 }
0x11f6   :  { %v7273_v21 = vpop.eup %7272 }
0x11f7   :  { %6143 = vrot.lane.b32.xlu0 %v7273_v21, %s7315_s19 }
0x11f8   :  { %v7275_v2 = vpop.eup %7274 }
0x11f9   :  { %v6137_v42 = vadd.f32 1.0, %v7275_v2  ;;  %v6327_v2 = vld [vmem:[#allocation2 + $0xe] sm:$0x3] }
0x11fb   :  { %7276 = vrcp.f32 %v6137_v42  ;;  %v6328_v42 = vadd.f32 %v6327_v2, %v10287_v62 }
0x1205   :  { %v7277_v18 = vpop.eup %7276 }
0x1206   :  { %v6141_v49 = vmul.f32 %v7277_v18, %v6070_v59 }
0x1269   :  { %v6144_v7 = vpop.permute.xlu0 %6143 }
0x126a   :  { %v6146_v23 = vmul.f32 %v7277_v18, %v6144_v7 }
0x126c   :  { %6148 = vrot.lane.b32.xlu1 %v6146_v23, %s7313_s17 }
0x12de   :  { %v6149_v46 = vpop.permute.xlu1 %6148 }
0x12df   :  { %v6151_v5 = vadd.f32 %v6149_v46, %v6141_v49 }
0x12e1   :  { %7278 = vtanh.f32 %v6151_v5 }
0x12eb   :  { %v7279_v57 = vpop.eup %7278 }
0x12ec   :  { %6154 = vrot.lane.b32.xlu0 %v7279_v57, %s7315_s19 }
0x135e   :  { %v6155_v29 = vpop.permute.xlu0 %6154 }
0x135f   :  { %v10357_v28 = vmul.f32 %v7277_v18, %v6155_v29 }
0x1361   :  { %v6167_v11 = vpack.c.bf16 %v10357_v28, %v10357_v28 }
0x1363   :  { %6169 = vrot.lane.b32.xlu1 %v6167_v11, %s7313_s17 }
0x13d5   :  { %v6170_v34 = vpop.permute.xlu1 %6169 }
0x13d6   :  { %6886 = vmatmul.mubr.msk.bf16.vlgmr.msra.gmra.mrb[68].mxu0 %vm5114_vm13, %v6170_v34 }
0x13d7   :  { %6898 = vmatpush3.bf16.msra.mxu0 %v10253_v31  ;;  %6901 = vmatprep.mubr.msk.bf16.mxu0 %vm7320_vm3, %v10876_v10 }
0x13d8   :  { %6899 = vmatprep.subr.bf16.mxu0 %v10876_v10 }
0x13db   :  { %6900 = vmatpush3.bf16.msra.mxu0 %v10259_v41 }
0x14a9   :  { %v6208_v39 = vpop.f32.mrb[68].mxu0 }
0x14aa   :  { %v6214_v52 = vadd.f32 %v6208_v39, %v6166_v35  ;;  %v6887_v15 = vpop.f32.mrb[69].mxu0 }
0x14ab   :  { %v6211_v51 = vpop.f32.mrb[70].mxu0 }
0x14ac   :  { %7280 = vtanh.f32 %v6214_v52  ;;  %v6888_v54 = vpop.f32.mrb[71].mxu0  ;;  %v6691_v31 = vmul.f32 -1.442695, %v6214_v52 }
0x14ae   :  { %7282 = vpow2.f32 %v6691_v31 }
0x14b6   :  { %v7281_v19 = vpop.eup %7280 }
0x14b7   :  { %6224 = vrot.lane.b32.xlu0 %v7281_v19, %s7315_s19  ;;  %v7237_v19 = vld [vmem:[%s10465_s10 + $0x8] sm:$0xff]  }
0x14b8   :  { %v7283_v22 = vpop.eup %7282 }
0x14b9   :  { %v6218_v1 = vadd.f32 1.0, %v7283_v22 }
0x14bb   :  { %7284 = vrcp.f32 %v6218_v1 }
0x14c5   :  { %v7285_v53 = vpop.eup %7284 }
0x14c6   :  { %v6222_v20 = vmul.f32 %v7285_v53, %v6151_v5 }
0x1529   :  { %v6225_v63 = vpop.permute.xlu0 %6224 }
0x152a   :  { %v6227_v41 = vmul.f32 %v7285_v53, %v6225_v63 }
0x152c   :  { %6229 = vrot.lane.b32.xlu1 %v6227_v41, %s7313_s17 }
0x159e   :  { %v6230_v8 = vpop.permute.xlu1 %6229 }
0x159f   :  { %v6232_v40 = vadd.f32 %v6230_v8, %v6222_v20 }
0x15a1   :  { %7286 = vtanh.f32 %v6232_v40 }
0x15ab   :  { %v7287_v4 = vpop.eup %7286 }
0x15ac   :  { %6235 = vrot.lane.b32.xlu0 %v7287_v4, %s7315_s19 }
0x161e   :  { %v6236_v47 = vpop.permute.xlu0 %6235 }
0x161f   :  { %v10372_v43 = vmul.f32 %v7285_v53, %v6236_v47 }
0x1621   :  { %v6248_v24 = vpack.c.bf16 %v10372_v43, %v10372_v43 }
0x1623   :  { %6250 = vrot.lane.b32.xlu1 %v6248_v24, %s7313_s17 }
0x1695   :  { %v6251_v6 = vpop.permute.xlu1 %6250 }
0x1696   :  { %6894 = vmatmul.mubr.msk.bf16.vlgmr.msra.gmra.mrb[56].mxu1 %vm5114_vm13, %v6251_v6 }
0x1697   :  { %6909 = vmatprep.mubr.msk.bf16.mxu1 %vm7320_vm3, %v10876_v10 }
0x1769   :  { %v6289_v44 = vpop.f32.mrb[56].mxu1 }
0x176a   :  { %v6295_v33 = vadd.f32 %v6289_v44, %v6247_v50  ;;  %v6895_v36 = vpop.f32.mrb[57].mxu1 }
0x176b   :  { %v6292_v48 = vpop.f32.mrb[58].mxu1 }
0x176c   :  { %7288 = vtanh.f32 %v6295_v33  ;;  %v6896_v3 = vpop.f32.mrb[59].mxu1  ;;  %v6693_v59 = vmul.f32 -1.442695, %v6295_v33 }
0x176e   :  { %7290 = vpow2.f32 %v6693_v59  ;;  %v6696_v59 = vld [vmem:[%s10466_s11] ss:$0 sm:$0xff] }
0x1776   :  { %v7289_v0 = vpop.eup %7288 }
0x1777   :  { %6305 = vrot.lane.b32.xlu0 %v7289_v0, %s7315_s19 }
0x1778   :  { %v7291_v27 = vpop.eup %7290 }
0x1779   :  { %v6299_v61 = vadd.f32 1.0, %v7291_v27 }
0x177b   :  { %7292 = vrcp.f32 %v6299_v61 }
0x1785   :  { %v7293_v37 = vpop.eup %7292 }
0x1786   :  { %v6303_v9 = vmul.f32 %v7293_v37, %v6232_v40 }
0x17e9   :  { %v6306_v55 = vpop.permute.xlu0 %6305 }
0x17ea   :  { %v6308_v13 = vmul.f32 %v7293_v37, %v6306_v55 }
0x17ec   :  { %6310 = vrot.lane.b32.xlu1 %v6308_v13, %s7313_s17 }
0x185e   :  { %v6311_v56 = vpop.permute.xlu1 %6310 }
0x185f   :  { %v6313_v60 = vadd.f32 %v6311_v56, %v6303_v9 }
0x1861   :  { %7294 = vtanh.f32 %v6313_v60 }
0x186b   :  { %v7295_v26 = vpop.eup %7294 }
0x186c   :  { %6316 = vrot.lane.b32.xlu0 %v7295_v26, %s7315_s19 }
0x18de   :  { %v6317_v58 = vpop.permute.xlu0 %6316 }
0x18df   :  { %v6319_v16 = vmul.f32 %v7293_v37, %v6317_v58 }
0x18e1   :  { %v6329_v21 = vpack.c.bf16 %v6319_v16, %v6319_v16 }
0x18e3   :  { %6331 = vrot.lane.b32.xlu1 %v6329_v21, %s7313_s17 }
0x1955   :  { %v6332_v17 = vpop.permute.xlu1 %6331 }
0x1956   :  { %6902 = vmatmul.mubr.msk.bf16.vlgmr.msra.gmra.mrb[72].mxu0 %vm5114_vm13, %v6332_v17 }
0x1a29   :  { %v6370_v18 = vpop.f32.mrb[72].mxu0 }
0x1a2a   :  { %v6376_v7 = vadd.f32 %v6370_v18, %v6328_v42  ;;  %v6903_v23 = vpop.f32.mrb[73].mxu0 }
0x1a2b   :  { %v6373_v49 = vpop.f32.mrb[74].mxu0 }
0x1a2c   :  { %7296 = vtanh.f32 %v6376_v7  ;;  %v6904_v46 = vpop.f32.mrb[75].mxu0  ;;  %v6695_v57 = vmul.f32 -1.442695, %v6376_v7 }
0x1a2e   :  { %7298 = vpow2.f32 %v6695_v57 }
0x1a36   :  { %v7297_v5 = vpop.eup %7296 }
0x1a37   :  { %6386 = vrot.lane.b32.xlu0 %v7297_v5, %s7315_s19 }
0x1a38   :  { %v7299_v29 = vpop.eup %7298 }
0x1a39   :  { %v6380_v11 = vadd.f32 1.0, %v7299_v29 }
0x1a3b   :  { %7300 = vrcp.f32 %v6380_v11 }
0x1a45   :  { %v7301_v34 = vpop.eup %7300 }
0x1a46   :  { %v6384_v62 = vmul.f32 %v7301_v34, %v6313_v60 }
0x1aa9   :  { %v6387_v30 = vpop.permute.xlu0 %6386 }
0x1aaa   :  { %v6389_v35 = vmul.f32 %v7301_v34, %v6387_v30 }
0x1aac   :  { %6391 = vrot.lane.b32.xlu1 %v6389_v35, %s7313_s17 }
0x1ab0   :  { %5835 = vrot.lane.b32.xlu1 %v10293_v32, %s7313_s17 }
0x1ab4   :  { %5997 = vrot.lane.b32.xlu1 %v10325_v25, %s7313_s17 }
0x1ab8   :  { %6159 = vrot.lane.b32.xlu1 %v10357_v28, %s7313_s17  ;;  %v7236_v28 = vld [vmem:[%s10465_s10] sm:$0xff]  }
0x1ab9   :  { %6906 = vmatpush3.bf16.msra.mxu1 %v7236_v28 }
0x1aba   :  { %6907 = vmatprep.subr.bf16.mxu1 %v10876_v10 }
0x1abc   :  { %6321 = vrot.lane.b32.xlu1 %v6319_v16, %s7313_s17 }
0x1abd   :  { %6908 = vmatpush3.bf16.msra.mxu1 %v7237_v19 }
0x1b1e   :  { %v6392_v39 = vpop.permute.xlu1 %6391 }
0x1b1f   :  { %v6394_v52 = vadd.f32 %v6392_v39, %v6384_v62 }
0x1b21   :  { %7302 = vtanh.f32 %v6394_v52 }
0x1b22   :  { %v5836_v15 = vpop.permute.xlu1 %5835 }
0x1b23   :  { %5839 = vst.msk [vmem:[#allocation3] sm:$0x3] %vm5838_vm8, %v5836_v15 }
0x1b26   :  { %v5998_v51 = vpop.permute.xlu1 %5997 }
0x1b27   :  { %6001 = vst.msk [vmem:[#allocation3 + $0x4] sm:$0x3] %vm5838_vm8, %v5998_v51 }
0x1b2a   :  { %v6160_v32 = vpop.permute.xlu1 %6159  ;;  %v6407_v40 = vld [vmem:[#allocation3] sm:$0x3] }
0x1b2b   :  { %v7303_v54 = vpop.eup %7302  ;;  %6163 = vst.msk [vmem:[#allocation3 + $0x8] sm:$0x3] %vm5838_vm8, %v6160_v32 }
0x1b2c   :  { %6397 = vrot.lane.b32.xlu0 %v7303_v54, %s7315_s19 }
0x1b2e   :  { %v6322_v25 = vpop.permute.xlu1 %6321  ;;  %v6409_v10 = vld [vmem:[#allocation3 + $0x4] sm:$0x3] }
0x1b2f   :  { %6325 = vst.msk [vmem:[#allocation3 + $0xc] sm:$0x3] %vm5838_vm8, %v6322_v25 }
0x1b30   :  { %5916 = vrot.lane.b32.xlu0 %v10309_v14, %s7313_s17 }
0x1b32   :  { %v6411_v4 = vld [vmem:[#allocation3 + $0x8] sm:$0x3] }
0x1b34   :  { %6078 = vrot.lane.b32.xlu0 %v10341_v45, %s7313_s17 }
0x1b36   :  { %v6413_v24 = vld [vmem:[#allocation3 + $0xc] sm:$0x3] }
0x1b38   :  { %6240 = vrot.lane.b32.xlu0 %v10372_v43, %s7313_s17 }
0x1b9e   :  { %v6398_v31 = vpop.permute.xlu0 %6397 }
0x1b9f   :  { %v6400_v14 = vmul.f32 %v7301_v34, %v6398_v31 }
0x1ba1   :  { %6402 = vrot.lane.b32.xlu0 %v6400_v14, %s7313_s17 }
0x1ba2   :  { %v5917_v45 = vpop.permute.xlu0 %5916 }
0x1ba3   :  { %5920 = vst.msk [vmem:[#allocation3 + $0x2] sm:$0x3] %vm5838_vm8, %v5917_v45 }
0x1ba6   :  { %v6079_v22 = vpop.permute.xlu0 %6078 }
0x1ba7   :  { %6082 = vst.msk [vmem:[#allocation3 + $0x6] sm:$0x3] %vm5838_vm8, %v6079_v22 }
0x1baa   :  { %v6241_v1 = vpop.permute.xlu0 %6240  ;;  %v6408_v41 = vld [vmem:[#allocation3 + $0x2] sm:$0x3] }
0x1bab   :  { %6244 = vst.msk [vmem:[#allocation3 + $0xa] sm:$0x3] %vm5838_vm8, %v6241_v1  ;;  %v6423_v47 = vcombine.low %v6407_v40, %v6408_v41 }
0x1bad   :  { %v6431_v44 = vrot.slane %v6423_v47, %v10878_v38 }
0x1bae   :  { %v6410_v63 = vld [vmem:[#allocation3 + $0x6] sm:$0x3] }
0x1baf   :  { %v6424_v8 = vcombine.low %v6409_v10, %v6410_v63 }
0x1bb1   :  { %v6438_v12 = vrot.slane %v6424_v8, %v10878_v38 }
0x1bb2   :  { %v6412_v20 = vld [vmem:[#allocation3 + $0xa] sm:$0x3] }
0x1bb3   :  { %v6440_v43 = vcombine.low %v6411_v4, %v6412_v20  ;;  %v6439_v48 = vcombine.low %v6431_v44, %v6438_v12 }
0x1bb5   :  { %v6448_v33 = vrot.slane %v6440_v43, %v10878_v38 }
0x1c13   :  { %v6403_v53 = vpop.permute.xlu0 %6402 }
0x1c14   :  { %6406 = vst.msk [vmem:[#allocation3 + $0xe] sm:$0x3] %vm5838_vm8, %v6403_v53 }
0x1c1b   :  { %v6414_v6 = vld [vmem:[#allocation3 + $0xe] sm:$0x3] }
0x1c1c   :  { %v6441_v50 = vcombine.low %v6413_v24, %v6414_v6 }
0x1c1e   :  { %v6455_v36 = vrot.slane %v6441_v50, %v10878_v38 }
0x1c20   :  { %v6456_v3 = vcombine.low %v6448_v33, %v6455_v36 }
0x1c22   :  { %v6459_v0 = vpack.c.bf16 %v6456_v3, %v6439_v48 }
0x1c24   :  { %6910 = vmatmul.mubr.msk.bf16.vlgmr.msra.gmra.mrb[60].mxu1 %vm5114_vm13, %v6459_v0 }
0x1cf7   :  { %v6520_v27 = vpop.f32.mrb[60].mxu1 }
0x1cf8   :  { %v6521_v61 = vadd.f32 %v6696_v59, %v6520_v27  ;;  %v6911_v37 = vpop.f32.mrb[61].mxu1 }
0x1cf9   :  { %v6523_v55 = vpop.f32.mrb[62].mxu1 }
0x1cfa   :  { %v6529_v13 = vcombine.high %v6521_v61, %v6521_v61  ;;  %v6536_v9 = vrot.slane %v6521_v61, %v10878_v38  ;;  %6700 = vst.sshfl [vmem:[%s10467_s12] sm:$0x3 pattern:$0x76325410] %v6521_v61  ;;  %v6524_v56 = vadd.f32 %v6696_v59, %v6523_v55  ;;  %v6912_v60 = vpop.f32.mrb[63].mxu1 }
0x1cfc   :  { %v6543_v26 = vrot.slane %v6529_v13, %v10878_v38  ;;  %v6544_v58 = vcombine.high %v6536_v9, %v6536_v9  ;;  %6701 = vst.sshfl [vmem:[%s10467_s12 + $0x4] sm:$0x3 pattern:$0x76325410] %v6529_v13  ;;  %v6546_v16 = vcombine.high %v6524_v56, %v6524_v56  ;;  %v6553_v21 = vrot.slane %v6524_v56, %v10878_v38 }
0x1cfd   :  { %6702 = vst.sshfl [vmem:[%s10467_s12 + $0x8] sm:$0x3 pattern:$0x76325410] %v6524_v56 }
0x1cfe   :  { %v6545_v17 = vcombine.high %v6543_v26, %v6543_v26  ;;  %6572 = vst [vmem:[%s10467_s12 + $0x2] sm:$0x3] %v6544_v58  ;;  %v6560_v2 = vrot.slane %v6546_v16, %v10878_v38  ;;  %v6561_v42 = vcombine.high %v6553_v21, %v6553_v21  ;;  %6703 = vst.sshfl [vmem:[%s10467_s12 + $0xc] sm:$0x3 pattern:$0x76325410] %v6546_v16 }
0x1d00   :  { %6574 = vst [vmem:[%s10467_s12 + $0x6] sm:$0x3] %v6545_v17  ;;  %v6562_v18 = vcombine.high %v6560_v2, %v6560_v2  ;;  %6576 = vst [vmem:[%s10467_s12 + $0xa] sm:$0x3] %v6561_v42 }
0x1d02   :  { %6578 = vst [vmem:[%s10467_s12 + $0xe] sm:$0x3] %v6562_v18 }

</bundles_post_ra>
